<compile_context>
chip_gen: v6e
topology: v6e:2x2x1
jax: 0.10.0
libtpu: 0.0.40
codegen_flags: <defaults>
</compile_context>

<pallas_src>
from functools import partial

import jax
import jax.numpy as jnp
import numpy as np
from jax.experimental import pallas as pl
from jax.experimental.pallas import tpu as pltpu


# ----------------------------------------------------------------------------
# Tiled matmul with fused bias (+ optional ReLU): out = act(A @ B + bias)
# ----------------------------------------------------------------------------

def _round_up(x, m):
    return ((x + m - 1) // m) * m


def _pick_tile(padded_dim, candidates=(512, 256, 128)):
    for c in candidates:
        if padded_dim % c == 0:
            return c
    return padded_dim


def _matmul_kernel(a_ref, b_ref, bias_ref, o_ref, acc_ref, *, relu):
    """Grid = (M/tm, N/tn, K/tk); K (reduction) is the last, 'arbitrary' axis."""

    @pl.when(pl.program_id(2) == 0)
    def _init():
        acc_ref[...] = jnp.zeros_like(acc_ref)

    acc_ref[...] += jnp.dot(a_ref[...], b_ref[...],
                            preferred_element_type=jnp.float32)

    @pl.when(pl.program_id(2) == pl.num_programs(2) - 1)
    def _epilogue():
        out = acc_ref[...] + bias_ref[...]          # (tm, tn) + (1, tn)
        if relu:
            out = jnp.maximum(out, 0.0)
        o_ref[...] = out.astype(o_ref.dtype)


def matmul_bias_act(a, b, bias, *, relu, out_dtype=jnp.bfloat16):
    """act(a @ b + bias) with bf16 operands on the MXU and an f32 accumulator.

    a: (M, K), b: (K, N), bias: (N,).  Returns (M, N) in `out_dtype`.
    """
    m, k = a.shape
    k2, n = b.shape
    assert k == k2, (a.shape, b.shape)

    kp = _round_up(k, 128)
    np_pad = _round_up(n, 128)
    tk = _pick_tile(kp)
    tn = _pick_tile(np_pad)
    if m >= 512:
        tm = 256
    elif m >= 128:
        tm = 128
    else:
        tm = _round_up(m, 8)
    mp = _round_up(m, tm)

    a_p = jnp.pad(a.astype(jnp.bfloat16), ((0, mp - m), (0, kp - k)))
    b_p = jnp.pad(b.astype(jnp.bfloat16), ((0, kp - k), (0, np_pad - n)))
    bias_p = jnp.pad(bias.astype(jnp.float32), (0, np_pad - n)).reshape(1, np_pad)

    grid = (mp // tm, np_pad // tn, kp // tk)

    out = pl.pallas_call(
        partial(_matmul_kernel, relu=relu),
        out_shape=jax.ShapeDtypeStruct((mp, np_pad), out_dtype),
        grid=grid,
        in_specs=[
            pl.BlockSpec((tm, tk), lambda i, j, kk: (i, kk)),
            pl.BlockSpec((tk, tn), lambda i, j, kk: (kk, j)),
            pl.BlockSpec((1, tn), lambda i, j, kk: (0, j)),
        ],
        out_specs=pl.BlockSpec((tm, tn), lambda i, j, kk: (i, j)),
        scratch_shapes=[pltpu.VMEM((tm, tn), jnp.float32)],
        compiler_params=pltpu.CompilerParams(
            dimension_semantics=("parallel", "parallel", "arbitrary")),
    )(a_p, b_p, bias_p)

    return out[:m, :n]


# ----------------------------------------------------------------------------
# MaxPool2d(kernel=3, stride=2), floor mode, NHWC layout
# ----------------------------------------------------------------------------

def _pool3s2_major_kernel(x_ref, o_ref):
    """Max-pool (k=3, s=2) along axis 1 of a (1, H, W, C) block.

    Axis 1 is a *major* axis, so the stride-2 decimation is expressed with
    layout-free reshapes / static slices (no strided or masked vector loads);
    the 3-tap max itself is pure VPU work on lane-contiguous channels.
    """
    ho = o_ref.shape[1]
    x = x_ref[...]
    _, h, w, c = x.shape
    x3 = x.reshape(h, w, c)
    pair = x3[0:2 * ho].reshape(ho, 2, w, c)          # rows 2i and 2i+1
    shifted = x3[1:2 * ho + 1].reshape(ho, 2, w, c)   # rows 2i+1 and 2i+2
    out = jnp.maximum(jnp.maximum(pair[:, 0], pair[:, 1]), shifted[:, 1])
    o_ref[...] = out.reshape(1, ho, w, c)


def _pool3s2_axis1(x):
    n, h, w, c = x.shape
    ho = (h - 3) // 2 + 1
    return pl.pallas_call(
        _pool3s2_major_kernel,
        out_shape=jax.ShapeDtypeStruct((n, ho, w, c), x.dtype),
        grid=(n,),
        in_specs=[pl.BlockSpec((1, h, w, c), lambda i: (i, 0, 0, 0))],
        out_specs=pl.BlockSpec((1, ho, w, c), lambda i: (i, 0, 0, 0)),
        compiler_params=pltpu.CompilerParams(
            dimension_semantics=("parallel",)),
    )(x)


def maxpool_3x3_s2(x_nhwc):
    """PyTorch MaxPool2d(3, stride=2) (floor mode) on an NHWC tensor."""
    x = _pool3s2_axis1(x_nhwc)          # pool along H -> (N, Ho, W, C)
    x = jnp.swapaxes(x, 1, 2)           # (N, W, Ho, C)
    x = _pool3s2_axis1(x)               # pool along W -> (N, Wo, Ho, C)
    return jnp.swapaxes(x, 1, 2)        # (N, Ho, Wo, C)


# ----------------------------------------------------------------------------
# Conv2d = bf16 im2col + MXU matmul with fused bias + ReLU
# ----------------------------------------------------------------------------

def _im2col_nhwc(x, kh, kw, stride, pad):
    """x: (N, H, W, C) -> (N*Ho*Wo, kh*kw*C) patch matrix (same dtype as x)."""
    n, h, w, c = x.shape
    ho = (h + 2 * pad - kh) // stride + 1
    wo = (w + 2 * pad - kw) // stride + 1
    xp = jnp.pad(x, ((0, 0), (pad, pad), (pad, pad), (0, 0)))
    taps = []
    for i in range(kh):
        for j in range(kw):
            taps.append(jax.lax.slice(
                xp,
                (0, i, j, 0),
                (n, i + (ho - 1) * stride + 1, j + (wo - 1) * stride + 1, c),
                (1, stride, stride, 1)))
    patches = jnp.stack(taps, axis=3)                 # (N, Ho, Wo, kh*kw, C)
    return patches.reshape(n * ho * wo, kh * kw * c), (n, ho, wo)


def conv2d_bias_relu(x_nhwc, w_hwio, b, *, stride, pad):
    # TODO(synk): generate im2col rows inside the matmul kernel (index_map +
    #             pl.ds on the spatial window) to avoid materialising the
    #             patch matrix even in bf16.
    kh, kw, cin, cout = w_hwio.shape
    cols, (n, ho, wo) = _im2col_nhwc(
        x_nhwc.astype(jnp.bfloat16), kh, kw, stride, pad)
    wmat = w_hwio.reshape(kh * kw * cin, cout)        # matches (i, j, c) order
    out = matmul_bias_act(cols, wmat, b, relu=True, out_dtype=jnp.bfloat16)
    return out.reshape(n, ho, wo, cout)


# ----------------------------------------------------------------------------
# AlexNet forward
# ----------------------------------------------------------------------------

def alexnet_forward(x_nchw, params):
    # NCHW float32 (PyTorch interface) -> NHWC bf16 internal layout.
    x = jnp.transpose(x_nchw, (0, 2, 3, 1)).astype(jnp.bfloat16)

    # features
    x = conv2d_bias_relu(x, params["w1"], params["b1"], stride=4, pad=2)  # 55x55x64
    x = maxpool_3x3_s2(x)                                                 # 27x27x64
    x = conv2d_bias_relu(x, params["w2"], params["b2"], stride=1, pad=2)  # 27x27x192
    x = maxpool_3x3_s2(x)                                                 # 13x13x192
    x = conv2d_bias_relu(x, params["w3"], params["b3"], stride=1, pad=1)  # 13x13x384
    x = conv2d_bias_relu(x, params["w4"], params["b4"], stride=1, pad=1)  # 13x13x256
    x = conv2d_bias_relu(x, params["w5"], params["b5"], stride=1, pad=1)  # 13x13x256
    x = maxpool_3x3_s2(x)                                                 # 6x6x256

    # TODO(synk): matplotlib/PIL feature-map visualisation (plt.imshow loop)
    #             from the original forward() is intentionally omitted.

    # flatten in PyTorch's NCHW order: x.view(N, 256*6*6)
    n = x.shape[0]
    x = jnp.transpose(x, (0, 3, 1, 2)).reshape(n, 256 * 6 * 6)

    # classifier (Dropout -> identity in eval mode)
    x = matmul_bias_act(x, params["fc1_w"], params["fc1_b"],
                        relu=True, out_dtype=jnp.bfloat16)
    x = matmul_bias_act(x, params["fc2_w"], params["fc2_b"],
                        relu=True, out_dtype=jnp.bfloat16)
    x = matmul_bias_act(x, params["fc3_w"], params["fc3_b"],
                        relu=False, out_dtype=jnp.float32)
    return x


def init_params(key, num_classes=22):
    ks = jax.random.split(key, 8)

    def conv_w(k, kh, kw, cin, cout):
        scale = np.sqrt(2.0 / (kh * kw * cin)).astype(np.float32)
        return jax.random.normal(k, (kh, kw, cin, cout), jnp.float32) * scale

    def fc_w(k, fin, fout):
        scale = np.sqrt(2.0 / fin).astype(np.float32)
        return jax.random.normal(k, (fin, fout), jnp.float32) * scale

    return {
        "w1": conv_w(ks[0], 11, 11, 1, 64),   "b1": jnp.zeros((64,), jnp.float32),
        "w2": conv_w(ks[1], 5, 5, 64, 192),   "b2": jnp.zeros((192,), jnp.float32),
        "w3": conv_w(ks[2], 3, 3, 192, 384),  "b3": jnp.zeros((384,), jnp.float32),
        "w4": conv_w(ks[3], 3, 3, 384, 256),  "b4": jnp.zeros((256,), jnp.float32),
        "w5": conv_w(ks[4], 3, 3, 256, 256),  "b5": jnp.zeros((256,), jnp.float32),
        "fc1_w": fc_w(ks[5], 256 * 6 * 6, 4096),
        "fc1_b": jnp.zeros((4096,), jnp.float32),
        "fc2_w": fc_w(ks[6], 4096, 4096),
        "fc2_b": jnp.zeros((4096,), jnp.float32),
        "fc3_w": fc_w(ks[7], 4096, num_classes),
        "fc3_b": jnp.zeros((num_classes,), jnp.float32),
    }


if __name__ == "__main__":
    key = jax.random.PRNGKey(0)
    kx, kp = jax.random.split(key)

    # The classifier hard-codes 256*6*6 inputs, which requires 224x224 images
    # (1 input channel per the original module).  Batch kept small.
    x = jax.random.normal(kx, (2, 1, 224, 224), jnp.float32)
    params = init_params(kp, num_classes=22)

    fwd = jax.jit(alexnet_forward)
    out = jax.block_until_ready(fwd(x, params))

    assert out.shape == (2, 22), out.shape
    assert bool(jnp.all(jnp.isfinite(out))), "non-finite output"
    print("KERNEL_OK")
</pallas_src>

<mosaic_0001>
module attributes {stable_mosaic.version = 11 : i64} {
  func.func @_matmul_kernel(%arg0: i32, %arg1: i32, %arg2: i32, %arg3: memref<256x128xbf16, #tpu.memory_space<vmem>>, %arg4: memref<128x128xbf16, #tpu.memory_space<vmem>>, %arg5: memref<1x128xf32, #tpu.memory_space<vmem>>, %arg6: memref<256x128xbf16, #tpu.memory_space<vmem>>, %arg7: memref<256x128xf32, #tpu.memory_space<vmem>>) attributes {dimension_semantics = [#tpu.dimension_semantics<parallel>, #tpu.dimension_semantics<parallel>, #tpu.dimension_semantics<arbitrary>], iteration_bounds = array<i64: 24, 1, 1>, scalar_prefetch = 0 : i64, scratch_operands = 1 : i64, tpu.core_type = #tpu.core_type<tc>, window_params = [{transform_indices = @transform_0, window_bounds = array<i64: 256, 128>}, {transform_indices = @transform_1, window_bounds = array<i64: 128, 128>}, {transform_indices = @transform_2, window_bounds = array<i64: 1, 128>}, {transform_indices = @transform_3, window_bounds = array<i64: 256, 128>}]} {
    %c0_i32 = arith.constant 0 : i32
    %0 = arith.cmpi eq, %arg2, %c0_i32 : i32
    %1 = arith.extui %0 : i1 to i32
    %c0_i32_0 = arith.constant 0 : i32
    %2 = arith.cmpi ne, %1, %c0_i32_0 : i32
    scf.if %2 {
      %cst_10 = arith.constant 0.000000e+00 : f32
      %12 = vector.broadcast %cst_10 : f32 to vector<256x128xf32>
      %c0_11 = arith.constant 0 : index
      %c0_12 = arith.constant 0 : index
      %13 = vector.load %arg7[%c0_11, %c0_12] : memref<256x128xf32, #tpu.memory_space<vmem>>, vector<256x128xf32>
      tpu.vector_store %arg7[%c0_11, %c0_12], %12 {strides = array<i32>} : memref<256x128xf32, #tpu.memory_space<vmem>>, vector<256x128xf32>,
    } else {
    }
    %c0 = arith.constant 0 : index
    %c0_1 = arith.constant 0 : index
    %3 = vector.load %arg7[%c0, %c0_1] : memref<256x128xf32, #tpu.memory_space<vmem>>, vector<256x128xf32>
    %c0_2 = arith.constant 0 : index
    %c0_3 = arith.constant 0 : index
    %4 = vector.load %arg3[%c0_2, %c0_3] : memref<256x128xbf16, #tpu.memory_space<vmem>>, vector<256x128xbf16>
    %c0_4 = arith.constant 0 : index
    %c0_5 = arith.constant 0 : index
    %5 = vector.load %arg4[%c0_4, %c0_5] : memref<128x128xbf16, #tpu.memory_space<vmem>>, vector<128x128xbf16>
    %cst = arith.constant dense<0.000000e+00> : vector<256x128xf32>
    %6 = tpu.matmul %4, %5, %cst {dimension_numbers = #tpu.dot_dimension_numbers<[1], [0], [0], [1], [0, 0, 1, 1], [], []>} : vector<256x128xbf16>, vector<128x128xbf16>, vector<256x128xf32> -> vector<256x128xf32>
    %7 = arith.addf %3, %6 : vector<256x128xf32>
    %c0_6 = arith.constant 0 : index
    %c0_7 = arith.constant 0 : index
    %8 = vector.load %arg7[%c0_6, %c0_7] : memref<256x128xf32, #tpu.memory_space<vmem>>, vector<256x128xf32>
    tpu.vector_store %arg7[%c0_6, %c0_7], %7 {strides = array<i32>} : memref<256x128xf32, #tpu.memory_space<vmem>>, vector<256x128xf32>,
    %c0_i32_8 = arith.constant 0 : i32
    %9 = arith.cmpi eq, %arg2, %c0_i32_8 : i32
    %10 = arith.extui %9 : i1 to i32
    %c0_i32_9 = arith.constant 0 : i32
    %11 = arith.cmpi ne, %10, %c0_i32_9 : i32
    scf.if %11 {
      %c0_10 = arith.constant 0 : index
      %c0_11 = arith.constant 0 : index
      %12 = vector.load %arg7[%c0_10, %c0_11] : memref<256x128xf32, #tpu.memory_space<vmem>>, vector<256x128xf32>
      %c0_12 = arith.constant 0 : index
      %c0_13 = arith.constant 0 : index
      %13 = vector.load %arg5[%c0_12, %c0_13] : memref<1x128xf32, #tpu.memory_space<vmem>>, vector<1x128xf32>
      %14 = vector.broadcast %13 : vector<1x128xf32> to vector<256x128xf32>
      %15 = arith.addf %12, %14 : vector<256x128xf32>
      %cst_14 = arith.constant 0.000000e+00 : f32
      %16 = vector.broadcast %cst_14 : f32 to vector<256x128xf32>
      %17 = arith.maximumf %15, %16 : vector<256x128xf32>
      %18 = arith.truncf %17 : vector<256x128xf32> to vector<256x128xbf16>
      %c0_15 = arith.constant 0 : index
      %c0_16 = arith.constant 0 : index
      %19 = vector.load %arg6[%c0_15, %c0_16] : memref<256x128xbf16, #tpu.memory_space<vmem>>, vector<256x128xbf16>
      tpu.vector_store %arg6[%c0_15, %c0_16], %18 {strides = array<i32>} : memref<256x128xbf16, #tpu.memory_space<vmem>>, vector<256x128xbf16>,
    } else {
    }
    return
  }
  func.func @transform_0(%arg0: i32, %arg1: i32, %arg2: i32) -> (i32, i32) {
    %c0_i32 = arith.constant 0 : i32
    return %arg0, %arg2 : i32, i32
  }
  func.func @transform_1(%arg0: i32, %arg1: i32, %arg2: i32) -> (i32, i32) {
    %c0_i32 = arith.constant 0 : i32
    return %arg2, %arg1 : i32, i32
  }
  func.func @transform_2(%arg0: i32, %arg1: i32, %arg2: i32) -> (i32, i32) {
    %c0_i32 = arith.constant 0 : i32
    %c0_i32_0 = arith.constant 0 : i32
    return %c0_i32, %arg1 : i32, i32
  }
  func.func @transform_3(%arg0: i32, %arg1: i32, %arg2: i32) -> (i32, i32) {
    %c0_i32 = arith.constant 0 : i32
    return %arg0, %arg1 : i32, i32
  }
}

module attributes {stable_mosaic.version = 11 : i64} {
  func.func @_pool3s2_major_kernel(%arg0: i32, %arg1: memref<1x55x55x64xbf16, #tpu.memory_space<vmem>>, %arg2: memref<1x27x55x64xbf16, #tpu.memory_space<vmem>>) attributes {dimension_semantics = [#tpu.dimension_semantics<parallel>], iteration_bounds = array<i64: 2>, scalar_prefetch = 0 : i64, scratch_operands = 0 : i64, tpu.core_type = #tpu.core_type<tc>, window_params = [{transform_indices = @transform_0, window_bounds = array<i64: 1, 55, 55, 64>}, {transform_indices = @transform_1, window_bounds = array<i64: 1, 27, 55, 64>}]} {
    %c0 = arith.constant 0 : index
    %c0_0 = arith.constant 0 : index
    %c0_1 = arith.constant 0 : index
    %c0_2 = arith.constant 0 : index
    %0 = vector.load %arg1[%c0, %c0_0, %c0_1, %c0_2] : memref<1x55x55x64xbf16, #tpu.memory_space<vmem>>, vector<1x55x55x64xbf16>
    %1 = vector.shape_cast %0 : vector<1x55x55x64xbf16> to vector<55x55x64xbf16>
    %2 = vector.extract_strided_slice %1 {offsets = [0, 0, 0], sizes = [54, 55, 64], strides = [1, 1, 1]} : vector<55x55x64xbf16> to vector<54x55x64xbf16>
    %3 = vector.shape_cast %2 : vector<54x55x64xbf16> to vector<27x2x55x64xbf16>
    %4 = vector.extract_strided_slice %1 {offsets = [1, 0, 0], sizes = [54, 55, 64], strides = [1, 1, 1]} : vector<55x55x64xbf16> to vector<54x55x64xbf16>
    %5 = vector.shape_cast %4 : vector<54x55x64xbf16> to vector<27x2x55x64xbf16>
    %6 = vector.extract_strided_slice %3 {offsets = [0, 0, 0, 0], sizes = [27, 1, 55, 64], strides = [1, 1, 1, 1]} : vector<27x2x55x64xbf16> to vector<27x1x55x64xbf16>
    %7 = vector.shape_cast %6 : vector<27x1x55x64xbf16> to vector<27x55x64xbf16>
    %8 = vector.extract_strided_slice %3 {offsets = [0, 1, 0, 0], sizes = [27, 1, 55, 64], strides = [1, 1, 1, 1]} : vector<27x2x55x64xbf16> to vector<27x1x55x64xbf16>
    %9 = vector.shape_cast %8 : vector<27x1x55x64xbf16> to vector<27x55x64xbf16>
    %10 = arith.maximumf %7, %9 : vector<27x55x64xbf16>
    %11 = vector.extract_strided_slice %5 {offsets = [0, 1, 0, 0], sizes = [27, 1, 55, 64], strides = [1, 1, 1, 1]} : vector<27x2x55x64xbf16> to vector<27x1x55x64xbf16>
    %12 = vector.shape_cast %11 : vector<27x1x55x64xbf16> to vector<27x55x64xbf16>
    %13 = arith.maximumf %10, %12 : vector<27x55x64xbf16>
    %14 = vector.shape_cast %13 : vector<27x55x64xbf16> to vector<1x27x55x64xbf16>
    %c0_3 = arith.constant 0 : index
    %c0_4 = arith.constant 0 : index
    %c0_5 = arith.constant 0 : index
    %c0_6 = arith.constant 0 : index
    %15 = vector.load %arg2[%c0_3, %c0_4, %c0_5, %c0_6] : memref<1x27x55x64xbf16, #tpu.memory_space<vmem>>, vector<1x27x55x64xbf16>
    tpu.vector_store %arg2[%c0_3, %c0_4, %c0_5, %c0_6], %14 {strides = array<i32>} : memref<1x27x55x64xbf16, #tpu.memory_space<vmem>>, vector<1x27x55x64xbf16>,
    return
  }
  func.func @transform_0(%arg0: i32) -> (i32, i32, i32, i32) {
    %c0_i32 = arith.constant 0 : i32
    %c0_i32_0 = arith.constant 0 : i32
    %c0_i32_1 = arith.constant 0 : i32
    %c0_i32_2 = arith.constant 0 : i32
    return %arg0, %c0_i32, %c0_i32_0, %c0_i32_1 : i32, i32, i32, i32
  }
  func.func @transform_1(%arg0: i32) -> (i32, i32, i32, i32) {
    %c0_i32 = arith.constant 0 : i32
    %c0_i32_0 = arith.constant 0 : i32
    %c0_i32_1 = arith.constant 0 : i32
    %c0_i32_2 = arith.constant 0 : i32
    return %arg0, %c0_i32, %c0_i32_0, %c0_i32_1 : i32, i32, i32, i32
  }
}

module attributes {stable_mosaic.version = 11 : i64} {
  func.func @_pool3s2_major_kernel(%arg0: i32, %arg1: memref<1x55x27x64xbf16, #tpu.memory_space<vmem>>, %arg2: memref<1x27x27x64xbf16, #tpu.memory_space<vmem>>) attributes {dimension_semantics = [#tpu.dimension_semantics<parallel>], iteration_bounds = array<i64: 2>, scalar_prefetch = 0 : i64, scratch_operands = 0 : i64, tpu.core_type = #tpu.core_type<tc>, window_params = [{transform_indices = @transform_0, window_bounds = array<i64: 1, 55, 27, 64>}, {transform_indices = @transform_1, window_bounds = array<i64: 1, 27, 27, 64>}]} {
    %c0 = arith.constant 0 : index
    %c0_0 = arith.constant 0 : index
    %c0_1 = arith.constant 0 : index
    %c0_2 = arith.constant 0 : index
    %0 = vector.load %arg1[%c0, %c0_0, %c0_1, %c0_2] : memref<1x55x27x64xbf16, #tpu.memory_space<vmem>>, vector<1x55x27x64xbf16>
    %1 = vector.shape_cast %0 : vector<1x55x27x64xbf16> to vector<55x27x64xbf16>
    %2 = vector.extract_strided_slice %1 {offsets = [0, 0, 0], sizes = [54, 27, 64], strides = [1, 1, 1]} : vector<55x27x64xbf16> to vector<54x27x64xbf16>
    %3 = vector.shape_cast %2 : vector<54x27x64xbf16> to vector<27x2x27x64xbf16>
    %4 = vector.extract_strided_slice %1 {offsets = [1, 0, 0], sizes = [54, 27, 64], strides = [1, 1, 1]} : vector<55x27x64xbf16> to vector<54x27x64xbf16>
    %5 = vector.shape_cast %4 : vector<54x27x64xbf16> to vector<27x2x27x64xbf16>
    %6 = vector.extract_strided_slice %3 {offsets = [0, 0, 0, 0], sizes = [27, 1, 27, 64], strides = [1, 1, 1, 1]} : vector<27x2x27x64xbf16> to vector<27x1x27x64xbf16>
    %7 = vector.shape_cast %6 : vector<27x1x27x64xbf16> to vector<27x27x64xbf16>
    %8 = vector.extract_strided_slice %3 {offsets = [0, 1, 0, 0], sizes = [27, 1, 27, 64], strides = [1, 1, 1, 1]} : vector<27x2x27x64xbf16> to vector<27x1x27x64xbf16>
    %9 = vector.shape_cast %8 : vector<27x1x27x64xbf16> to vector<27x27x64xbf16>
    %10 = arith.maximumf %7, %9 : vector<27x27x64xbf16>
    %11 = vector.extract_strided_slice %5 {offsets = [0, 1, 0, 0], sizes = [27, 1, 27, 64], strides = [1, 1, 1, 1]} : vector<27x2x27x64xbf16> to vector<27x1x27x64xbf16>
    %12 = vector.shape_cast %11 : vector<27x1x27x64xbf16> to vector<27x27x64xbf16>
    %13 = arith.maximumf %10, %12 : vector<27x27x64xbf16>
    %14 = vector.shape_cast %13 : vector<27x27x64xbf16> to vector<1x27x27x64xbf16>
    %c0_3 = arith.constant 0 : index
    %c0_4 = arith.constant 0 : index
    %c0_5 = arith.constant 0 : index
    %c0_6 = arith.constant 0 : index
    %15 = vector.load %arg2[%c0_3, %c0_4, %c0_5, %c0_6] : memref<1x27x27x64xbf16, #tpu.memory_space<vmem>>, vector<1x27x27x64xbf16>
    tpu.vector_store %arg2[%c0_3, %c0_4, %c0_5, %c0_6], %14 {strides = array<i32>} : memref<1x27x27x64xbf16, #tpu.memory_space<vmem>>, vector<1x27x27x64xbf16>,
    return
  }
  func.func @transform_0(%arg0: i32) -> (i32, i32, i32, i32) {
    %c0_i32 = arith.constant 0 : i32
    %c0_i32_0 = arith.constant 0 : i32
    %c0_i32_1 = arith.constant 0 : i32
    %c0_i32_2 = arith.constant 0 : i32
    return %arg0, %c0_i32, %c0_i32_0, %c0_i32_1 : i32, i32, i32, i32
  }
  func.func @transform_1(%arg0: i32) -> (i32, i32, i32, i32) {
    %c0_i32 = arith.constant 0 : i32
    %c0_i32_0 = arith.constant 0 : i32
    %c0_i32_1 = arith.constant 0 : i32
    %c0_i32_2 = arith.constant 0 : i32
    return %arg0, %c0_i32, %c0_i32_0, %c0_i32_1 : i32, i32, i32, i32
  }
}

module attributes {stable_mosaic.version = 11 : i64} {
  func.func @_matmul_kernel(%arg0: i32, %arg1: i32, %arg2: i32, %arg3: memref<256x128xbf16, #tpu.memory_space<vmem>>, %arg4: memref<128x256xbf16, #tpu.memory_space<vmem>>, %arg5: memref<1x256xf32, #tpu.memory_space<vmem>>, %arg6: memref<256x256xbf16, #tpu.memory_space<vmem>>, %arg7: memref<256x256xf32, #tpu.memory_space<vmem>>) attributes {dimension_semantics = [#tpu.dimension_semantics<parallel>, #tpu.dimension_semantics<parallel>, #tpu.dimension_semantics<arbitrary>], iteration_bounds = array<i64: 6, 1, 13>, scalar_prefetch = 0 : i64, scratch_operands = 1 : i64, tpu.core_type = #tpu.core_type<tc>, window_params = [{transform_indices = @transform_0, window_bounds = array<i64: 256, 128>}, {transform_indices = @transform_1, window_bounds = array<i64: 128, 256>}, {transform_indices = @transform_2, window_bounds = array<i64: 1, 256>}, {transform_indices = @transform_3, window_bounds = array<i64: 256, 256>}]} {
    %c0_i32 = arith.constant 0 : i32
    %0 = arith.cmpi eq, %arg2, %c0_i32 : i32
    %1 = arith.extui %0 : i1 to i32
    %c0_i32_0 = arith.constant 0 : i32
    %2 = arith.cmpi ne, %1, %c0_i32_0 : i32
    scf.if %2 {
      %cst_9 = arith.constant 0.000000e+00 : f32
      %12 = vector.broadcast %cst_9 : f32 to vector<256x256xf32>
      %c0_10 = arith.constant 0 : index
      %c0_11 = arith.constant 0 : index
      %13 = vector.load %arg7[%c0_10, %c0_11] : memref<256x256xf32, #tpu.memory_space<vmem>>, vector<256x256xf32>
      tpu.vector_store %arg7[%c0_10, %c0_11], %12 {strides = array<i32>} : memref<256x256xf32, #tpu.memory_space<vmem>>, vector<256x256xf32>,
    } else {
    }
    %c0 = arith.constant 0 : index
    %c0_1 = arith.constant 0 : index
    %3 = vector.load %arg7[%c0, %c0_1] : memref<256x256xf32, #tpu.memory_space<vmem>>, vector<256x256xf32>
    %c0_2 = arith.constant 0 : index
    %c0_3 = arith.constant 0 : index
    %4 = vector.load %arg3[%c0_2, %c0_3] : memref<256x128xbf16, #tpu.memory_space<vmem>>, vector<256x128xbf16>
    %c0_4 = arith.constant 0 : index
    %c0_5 = arith.constant 0 : index
    %5 = vector.load %arg4[%c0_4, %c0_5] : memref<128x256xbf16, #tpu.memory_space<vmem>>, vector<128x256xbf16>
    %cst = arith.constant dense<0.000000e+00> : vector<256x256xf32>
    %6 = tpu.matmul %4, %5, %cst {dimension_numbers = #tpu.dot_dimension_numbers<[1], [0], [0], [1], [0, 0, 1, 1], [], []>} : vector<256x128xbf16>, vector<128x256xbf16>, vector<256x256xf32> -> vector<256x256xf32>
    %7 = arith.addf %3, %6 : vector<256x256xf32>
    %c0_6 = arith.constant 0 : index
    %c0_7 = arith.constant 0 : index
    %8 = vector.load %arg7[%c0_6, %c0_7] : memref<256x256xf32, #tpu.memory_space<vmem>>, vector<256x256xf32>
    tpu.vector_store %arg7[%c0_6, %c0_7], %7 {strides = array<i32>} : memref<256x256xf32, #tpu.memory_space<vmem>>, vector<256x256xf32>,
    %c12_i32 = arith.constant 12 : i32
    %9 = arith.cmpi eq, %arg2, %c12_i32 : i32
    %10 = arith.extui %9 : i1 to i32
    %c0_i32_8 = arith.constant 0 : i32
    %11 = arith.cmpi ne, %10, %c0_i32_8 : i32
    scf.if %11 {
      %c0_9 = arith.constant 0 : index
      %c0_10 = arith.constant 0 : index
      %12 = vector.load %arg7[%c0_9, %c0_10] : memref<256x256xf32, #tpu.memory_space<vmem>>, vector<256x256xf32>
      %c0_11 = arith.constant 0 : index
      %c0_12 = arith.constant 0 : index
      %13 = vector.load %arg5[%c0_11, %c0_12] : memref<1x256xf32, #tpu.memory_space<vmem>>, vector<1x256xf32>
      %14 = vector.broadcast %13 : vector<1x256xf32> to vector<256x256xf32>
      %15 = arith.addf %12, %14 : vector<256x256xf32>
      %cst_13 = arith.constant 0.000000e+00 : f32
      %16 = vector.broadcast %cst_13 : f32 to vector<256x256xf32>
      %17 = arith.maximumf %15, %16 : vector<256x256xf32>
      %18 = arith.truncf %17 : vector<256x256xf32> to vector<256x256xbf16>
      %c0_14 = arith.constant 0 : index
      %c0_15 = arith.constant 0 : index
      %19 = vector.load %arg6[%c0_14, %c0_15] : memref<256x256xbf16, #tpu.memory_space<vmem>>, vector<256x256xbf16>
      tpu.vector_store %arg6[%c0_14, %c0_15], %18 {strides = array<i32>} : memref<256x256xbf16, #tpu.memory_space<vmem>>, vector<256x256xbf16>,
    } else {
    }
    return
  }
  func.func @transform_0(%arg0: i32, %arg1: i32, %arg2: i32) -> (i32, i32) {
    %c0_i32 = arith.constant 0 : i32
    return %arg0, %arg2 : i32, i32
  }
  func.func @transform_1(%arg0: i32, %arg1: i32, %arg2: i32) -> (i32, i32) {
    %c0_i32 = arith.constant 0 : i32
    return %arg2, %arg1 : i32, i32
  }
  func.func @transform_2(%arg0: i32, %arg1: i32, %arg2: i32) -> (i32, i32) {
    %c0_i32 = arith.constant 0 : i32
    %c0_i32_0 = arith.constant 0 : i32
    return %c0_i32, %arg1 : i32, i32
  }
  func.func @transform_3(%arg0: i32, %arg1: i32, %arg2: i32) -> (i32, i32) {
    %c0_i32 = arith.constant 0 : i32
    return %arg0, %arg1 : i32, i32
  }
}

module attributes {stable_mosaic.version = 11 : i64} {
  func.func @_pool3s2_major_kernel(%arg0: i32, %arg1: memref<1x27x27x192xbf16, #tpu.memory_space<vmem>>, %arg2: memref<1x13x27x192xbf16, #tpu.memory_space<vmem>>) attributes {dimension_semantics = [#tpu.dimension_semantics<parallel>], iteration_bounds = array<i64: 2>, scalar_prefetch = 0 : i64, scratch_operands = 0 : i64, tpu.core_type = #tpu.core_type<tc>, window_params = [{transform_indices = @transform_0, window_bounds = array<i64: 1, 27, 27, 192>}, {transform_indices = @transform_1, window_bounds = array<i64: 1, 13, 27, 192>}]} {
    %c0 = arith.constant 0 : index
    %c0_0 = arith.constant 0 : index
    %c0_1 = arith.constant 0 : index
    %c0_2 = arith.constant 0 : index
    %0 = vector.load %arg1[%c0, %c0_0, %c0_1, %c0_2] : memref<1x27x27x192xbf16, #tpu.memory_space<vmem>>, vector<1x27x27x192xbf16>
    %1 = vector.shape_cast %0 : vector<1x27x27x192xbf16> to vector<27x27x192xbf16>
    %2 = vector.extract_strided_slice %1 {offsets = [0, 0, 0], sizes = [26, 27, 192], strides = [1, 1, 1]} : vector<27x27x192xbf16> to vector<26x27x192xbf16>
    %3 = vector.shape_cast %2 : vector<26x27x192xbf16> to vector<13x2x27x192xbf16>
    %4 = vector.extract_strided_slice %1 {offsets = [1, 0, 0], sizes = [26, 27, 192], strides = [1, 1, 1]} : vector<27x27x192xbf16> to vector<26x27x192xbf16>
    %5 = vector.shape_cast %4 : vector<26x27x192xbf16> to vector<13x2x27x192xbf16>
    %6 = vector.extract_strided_slice %3 {offsets = [0, 0, 0, 0], sizes = [13, 1, 27, 192], strides = [1, 1, 1, 1]} : vector<13x2x27x192xbf16> to vector<13x1x27x192xbf16>
    %7 = vector.shape_cast %6 : vector<13x1x27x192xbf16> to vector<13x27x192xbf16>
    %8 = vector.extract_strided_slice %3 {offsets = [0, 1, 0, 0], sizes = [13, 1, 27, 192], strides = [1, 1, 1, 1]} : vector<13x2x27x192xbf16> to vector<13x1x27x192xbf16>
    %9 = vector.shape_cast %8 : vector<13x1x27x192xbf16> to vector<13x27x192xbf16>
    %10 = arith.maximumf %7, %9 : vector<13x27x192xbf16>
    %11 = vector.extract_strided_slice %5 {offsets = [0, 1, 0, 0], sizes = [13, 1, 27, 192], strides = [1, 1, 1, 1]} : vector<13x2x27x192xbf16> to vector<13x1x27x192xbf16>
    %12 = vector.shape_cast %11 : vector<13x1x27x192xbf16> to vector<13x27x192xbf16>
    %13 = arith.maximumf %10, %12 : vector<13x27x192xbf16>
    %14 = vector.shape_cast %13 : vector<13x27x192xbf16> to vector<1x13x27x192xbf16>
    %c0_3 = arith.constant 0 : index
    %c0_4 = arith.constant 0 : index
    %c0_5 = arith.constant 0 : index
    %c0_6 = arith.constant 0 : index
    %15 = vector.load %arg2[%c0_3, %c0_4, %c0_5, %c0_6] : memref<1x13x27x192xbf16, #tpu.memory_space<vmem>>, vector<1x13x27x192xbf16>
    tpu.vector_store %arg2[%c0_3, %c0_4, %c0_5, %c0_6], %14 {strides = array<i32>} : memref<1x13x27x192xbf16, #tpu.memory_space<vmem>>, vector<1x13x27x192xbf16>,
    return
  }
  func.func @transform_0(%arg0: i32) -> (i32, i32, i32, i32) {
    %c0_i32 = arith.constant 0 : i32
    %c0_i32_0 = arith.constant 0 : i32
    %c0_i32_1 = arith.constant 0 : i32
    %c0_i32_2 = arith.constant 0 : i32
    return %arg0, %c0_i32, %c0_i32_0, %c0_i32_1 : i32, i32, i32, i32
  }
  func.func @transform_1(%arg0: i32) -> (i32, i32, i32, i32) {
    %c0_i32 = arith.constant 0 : i32
    %c0_i32_0 = arith.constant 0 : i32
    %c0_i32_1 = arith.constant 0 : i32
    %c0_i32_2 = arith.constant 0 : i32
    return %arg0, %c0_i32, %c0_i32_0, %c0_i32_1 : i32, i32, i32, i32
  }
}

module attributes {stable_mosaic.version = 11 : i64} {
  func.func @_pool3s2_major_kernel(%arg0: i32, %arg1: memref<1x27x13x192xbf16, #tpu.memory_space<vmem>>, %arg2: memref<1x13x13x192xbf16, #tpu.memory_space<vmem>>) attributes {dimension_semantics = [#tpu.dimension_semantics<parallel>], iteration_bounds = array<i64: 2>, scalar_prefetch = 0 : i64, scratch_operands = 0 : i64, tpu.core_type = #tpu.core_type<tc>, window_params = [{transform_indices = @transform_0, window_bounds = array<i64: 1, 27, 13, 192>}, {transform_indices = @transform_1, window_bounds = array<i64: 1, 13, 13, 192>}]} {
    %c0 = arith.constant 0 : index
    %c0_0 = arith.constant 0 : index
    %c0_1 = arith.constant 0 : index
    %c0_2 = arith.constant 0 : index
    %0 = vector.load %arg1[%c0, %c0_0, %c0_1, %c0_2] : memref<1x27x13x192xbf16, #tpu.memory_space<vmem>>, vector<1x27x13x192xbf16>
    %1 = vector.shape_cast %0 : vector<1x27x13x192xbf16> to vector<27x13x192xbf16>
    %2 = vector.extract_strided_slice %1 {offsets = [0, 0, 0], sizes = [26, 13, 192], strides = [1, 1, 1]} : vector<27x13x192xbf16> to vector<26x13x192xbf16>
    %3 = vector.shape_cast %2 : vector<26x13x192xbf16> to vector<13x2x13x192xbf16>
    %4 = vector.extract_strided_slice %1 {offsets = [1, 0, 0], sizes = [26, 13, 192], strides = [1, 1, 1]} : vector<27x13x192xbf16> to vector<26x13x192xbf16>
    %5 = vector.shape_cast %4 : vector<26x13x192xbf16> to vector<13x2x13x192xbf16>
    %6 = vector.extract_strided_slice %3 {offsets = [0, 0, 0, 0], sizes = [13, 1, 13, 192], strides = [1, 1, 1, 1]} : vector<13x2x13x192xbf16> to vector<13x1x13x192xbf16>
    %7 = vector.shape_cast %6 : vector<13x1x13x192xbf16> to vector<13x13x192xbf16>
    %8 = vector.extract_strided_slice %3 {offsets = [0, 1, 0, 0], sizes = [13, 1, 13, 192], strides = [1, 1, 1, 1]} : vector<13x2x13x192xbf16> to vector<13x1x13x192xbf16>
    %9 = vector.shape_cast %8 : vector<13x1x13x192xbf16> to vector<13x13x192xbf16>
    %10 = arith.maximumf %7, %9 : vector<13x13x192xbf16>
    %11 = vector.extract_strided_slice %5 {offsets = [0, 1, 0, 0], sizes = [13, 1, 13, 192], strides = [1, 1, 1, 1]} : vector<13x2x13x192xbf16> to vector<13x1x13x192xbf16>
    %12 = vector.shape_cast %11 : vector<13x1x13x192xbf16> to vector<13x13x192xbf16>
    %13 = arith.maximumf %10, %12 : vector<13x13x192xbf16>
    %14 = vector.shape_cast %13 : vector<13x13x192xbf16> to vector<1x13x13x192xbf16>
    %c0_3 = arith.constant 0 : index
    %c0_4 = arith.constant 0 : index
    %c0_5 = arith.constant 0 : index
    %c0_6 = arith.constant 0 : index
    %15 = vector.load %arg2[%c0_3, %c0_4, %c0_5, %c0_6] : memref<1x13x13x192xbf16, #tpu.memory_space<vmem>>, vector<1x13x13x192xbf16>
    tpu.vector_store %arg2[%c0_3, %c0_4, %c0_5, %c0_6], %14 {strides = array<i32>} : memref<1x13x13x192xbf16, #tpu.memory_space<vmem>>, vector<1x13x13x192xbf16>,
    return
  }
  func.func @transform_0(%arg0: i32) -> (i32, i32, i32, i32) {
    %c0_i32 = arith.constant 0 : i32
    %c0_i32_0 = arith.constant 0 : i32
    %c0_i32_1 = arith.constant 0 : i32
    %c0_i32_2 = arith.constant 0 : i32
    return %arg0, %c0_i32, %c0_i32_0, %c0_i32_1 : i32, i32, i32, i32
  }
  func.func @transform_1(%arg0: i32) -> (i32, i32, i32, i32) {
    %c0_i32 = arith.constant 0 : i32
    %c0_i32_0 = arith.constant 0 : i32
    %c0_i32_1 = arith.constant 0 : i32
    %c0_i32_2 = arith.constant 0 : i32
    return %arg0, %c0_i32, %c0_i32_0, %c0_i32_1 : i32, i32, i32, i32
  }
}

module attributes {stable_mosaic.version = 11 : i64} {
  func.func @_matmul_kernel(%arg0: i32, %arg1: i32, %arg2: i32, %arg3: memref<128x256xbf16, #tpu.memory_space<vmem>>, %arg4: memref<256x128xbf16, #tpu.memory_space<vmem>>, %arg5: memref<1x128xf32, #tpu.memory_space<vmem>>, %arg6: memref<128x128xbf16, #tpu.memory_space<vmem>>, %arg7: memref<128x128xf32, #tpu.memory_space<vmem>>) attributes {dimension_semantics = [#tpu.dimension_semantics<parallel>, #tpu.dimension_semantics<parallel>, #tpu.dimension_semantics<arbitrary>], iteration_bounds = array<i64: 3, 3, 7>, scalar_prefetch = 0 : i64, scratch_operands = 1 : i64, tpu.core_type = #tpu.core_type<tc>, window_params = [{transform_indices = @transform_0, window_bounds = array<i64: 128, 256>}, {transform_indices = @transform_1, window_bounds = array<i64: 256, 128>}, {transform_indices = @transform_2, window_bounds = array<i64: 1, 128>}, {transform_indices = @transform_3, window_bounds = array<i64: 128, 128>}]} {
    %c0_i32 = arith.constant 0 : i32
    %0 = arith.cmpi eq, %arg2, %c0_i32 : i32
    %1 = arith.extui %0 : i1 to i32
    %c0_i32_0 = arith.constant 0 : i32
    %2 = arith.cmpi ne, %1, %c0_i32_0 : i32
    scf.if %2 {
      %cst_9 = arith.constant 0.000000e+00 : f32
      %12 = vector.broadcast %cst_9 : f32 to vector<128x128xf32>
      %c0_10 = arith.constant 0 : index
      %c0_11 = arith.constant 0 : index
      %13 = vector.load %arg7[%c0_10, %c0_11] : memref<128x128xf32, #tpu.memory_space<vmem>>, vector<128x128xf32>
      tpu.vector_store %arg7[%c0_10, %c0_11], %12 {strides = array<i32>} : memref<128x128xf32, #tpu.memory_space<vmem>>, vector<128x128xf32>,
    } else {
    }
    %c0 = arith.constant 0 : index
    %c0_1 = arith.constant 0 : index
    %3 = vector.load %arg7[%c0, %c0_1] : memref<128x128xf32, #tpu.memory_space<vmem>>, vector<128x128xf32>
    %c0_2 = arith.constant 0 : index
    %c0_3 = arith.constant 0 : index
    %4 = vector.load %arg3[%c0_2, %c0_3] : memref<128x256xbf16, #tpu.memory_space<vmem>>, vector<128x256xbf16>
    %c0_4 = arith.constant 0 : index
    %c0_5 = arith.constant 0 : index
    %5 = vector.load %arg4[%c0_4, %c0_5] : memref<256x128xbf16, #tpu.memory_space<vmem>>, vector<256x128xbf16>
    %cst = arith.constant dense<0.000000e+00> : vector<128x128xf32>
    %6 = tpu.matmul %4, %5, %cst {dimension_numbers = #tpu.dot_dimension_numbers<[1], [0], [0], [1], [0, 0, 1, 1], [], []>} : vector<128x256xbf16>, vector<256x128xbf16>, vector<128x128xf32> -> vector<128x128xf32>
    %7 = arith.addf %3, %6 : vector<128x128xf32>
    %c0_6 = arith.constant 0 : index
    %c0_7 = arith.constant 0 : index
    %8 = vector.load %arg7[%c0_6, %c0_7] : memref<128x128xf32, #tpu.memory_space<vmem>>, vector<128x128xf32>
    tpu.vector_store %arg7[%c0_6, %c0_7], %7 {strides = array<i32>} : memref<128x128xf32, #tpu.memory_space<vmem>>, vector<128x128xf32>,
    %c6_i32 = arith.constant 6 : i32
    %9 = arith.cmpi eq, %arg2, %c6_i32 : i32
    %10 = arith.extui %9 : i1 to i32
    %c0_i32_8 = arith.constant 0 : i32
    %11 = arith.cmpi ne, %10, %c0_i32_8 : i32
    scf.if %11 {
      %c0_9 = arith.constant 0 : index
      %c0_10 = arith.constant 0 : index
      %12 = vector.load %arg7[%c0_9, %c0_10] : memref<128x128xf32, #tpu.memory_space<vmem>>, vector<128x128xf32>
      %c0_11 = arith.constant 0 : index
      %c0_12 = arith.constant 0 : index
      %13 = vector.load %arg5[%c0_11, %c0_12] : memref<1x128xf32, #tpu.memory_space<vmem>>, vector<1x128xf32>
      %14 = vector.broadcast %13 : vector<1x128xf32> to vector<128x128xf32>
      %15 = arith.addf %12, %14 : vector<128x128xf32>
      %cst_13 = arith.constant 0.000000e+00 : f32
      %16 = vector.broadcast %cst_13 : f32 to vector<128x128xf32>
      %17 = arith.maximumf %15, %16 : vector<128x128xf32>
      %18 = arith.truncf %17 : vector<128x128xf32> to vector<128x128xbf16>
      %c0_14 = arith.constant 0 : index
      %c0_15 = arith.constant 0 : index
      %19 = vector.load %arg6[%c0_14, %c0_15] : memref<128x128xbf16, #tpu.memory_space<vmem>>, vector<128x128xbf16>
      tpu.vector_store %arg6[%c0_14, %c0_15], %18 {strides = array<i32>} : memref<128x128xbf16, #tpu.memory_space<vmem>>, vector<128x128xbf16>,
    } else {
    }
    return
  }
  func.func @transform_0(%arg0: i32, %arg1: i32, %arg2: i32) -> (i32, i32) {
    %c0_i32 = arith.constant 0 : i32
    return %arg0, %arg2 : i32, i32
  }
  func.func @transform_1(%arg0: i32, %arg1: i32, %arg2: i32) -> (i32, i32) {
    %c0_i32 = arith.constant 0 : i32
    return %arg2, %arg1 : i32, i32
  }
  func.func @transform_2(%arg0: i32, %arg1: i32, %arg2: i32) -> (i32, i32) {
    %c0_i32 = arith.constant 0 : i32
    %c0_i32_0 = arith.constant 0 : i32
    return %c0_i32, %arg1 : i32, i32
  }
  func.func @transform_3(%arg0: i32, %arg1: i32, %arg2: i32) -> (i32, i32) {
    %c0_i32 = arith.constant 0 : i32
    return %arg0, %arg1 : i32, i32
  }
}

module attributes {stable_mosaic.version = 11 : i64} {
  func.func @_matmul_kernel(%arg0: i32, %arg1: i32, %arg2: i32, %arg3: memref<128x128xbf16, #tpu.memory_space<vmem>>, %arg4: memref<128x256xbf16, #tpu.memory_space<vmem>>, %arg5: memref<1x256xf32, #tpu.memory_space<vmem>>, %arg6: memref<128x256xbf16, #tpu.memory_space<vmem>>, %arg7: memref<128x256xf32, #tpu.memory_space<vmem>>) attributes {dimension_semantics = [#tpu.dimension_semantics<parallel>, #tpu.dimension_semantics<parallel>, #tpu.dimension_semantics<arbitrary>], iteration_bounds = array<i64: 3, 1, 27>, scalar_prefetch = 0 : i64, scratch_operands = 1 : i64, tpu.core_type = #tpu.core_type<tc>, window_params = [{transform_indices = @transform_0, window_bounds = array<i64: 128, 128>}, {transform_indices = @transform_1, window_bounds = array<i64: 128, 256>}, {transform_indices = @transform_2, window_bounds = array<i64: 1, 256>}, {transform_indices = @transform_3, window_bounds = array<i64: 128, 256>}]} {
    %c0_i32 = arith.constant 0 : i32
    %0 = arith.cmpi eq, %arg2, %c0_i32 : i32
    %1 = arith.extui %0 : i1 to i32
    %c0_i32_0 = arith.constant 0 : i32
    %2 = arith.cmpi ne, %1, %c0_i32_0 : i32
    scf.if %2 {
      %cst_9 = arith.constant 0.000000e+00 : f32
      %12 = vector.broadcast %cst_9 : f32 to vector<128x256xf32>
      %c0_10 = arith.constant 0 : index
      %c0_11 = arith.constant 0 : index
      %13 = vector.load %arg7[%c0_10, %c0_11] : memref<128x256xf32, #tpu.memory_space<vmem>>, vector<128x256xf32>
      tpu.vector_store %arg7[%c0_10, %c0_11], %12 {strides = array<i32>} : memref<128x256xf32, #tpu.memory_space<vmem>>, vector<128x256xf32>,
    } else {
    }
    %c0 = arith.constant 0 : index
    %c0_1 = arith.constant 0 : index
    %3 = vector.load %arg7[%c0, %c0_1] : memref<128x256xf32, #tpu.memory_space<vmem>>, vector<128x256xf32>
    %c0_2 = arith.constant 0 : index
    %c0_3 = arith.constant 0 : index
    %4 = vector.load %arg3[%c0_2, %c0_3] : memref<128x128xbf16, #tpu.memory_space<vmem>>, vector<128x128xbf16>
    %c0_4 = arith.constant 0 : index
    %c0_5 = arith.constant 0 : index
    %5 = vector.load %arg4[%c0_4, %c0_5] : memref<128x256xbf16, #tpu.memory_space<vmem>>, vector<128x256xbf16>
    %cst = arith.constant dense<0.000000e+00> : vector<128x256xf32>
    %6 = tpu.matmul %4, %5, %cst {dimension_numbers = #tpu.dot_dimension_numbers<[1], [0], [0], [1], [0, 0, 1, 1], [], []>} : vector<128x128xbf16>, vector<128x256xbf16>, vector<128x256xf32> -> vector<128x256xf32>
    %7 = arith.addf %3, %6 : vector<128x256xf32>
    %c0_6 = arith.constant 0 : index
    %c0_7 = arith.constant 0 : index
    %8 = vector.load %arg7[%c0_6, %c0_7] : memref<128x256xf32, #tpu.memory_space<vmem>>, vector<128x256xf32>
    tpu.vector_store %arg7[%c0_6, %c0_7], %7 {strides = array<i32>} : memref<128x256xf32, #tpu.memory_space<vmem>>, vector<128x256xf32>,
    %c26_i32 = arith.constant 26 : i32
    %9 = arith.cmpi eq, %arg2, %c26_i32 : i32
    %10 = arith.extui %9 : i1 to i32
    %c0_i32_8 = arith.constant 0 : i32
    %11 = arith.cmpi ne, %10, %c0_i32_8 : i32
    scf.if %11 {
      %c0_9 = arith.constant 0 : index
      %c0_10 = arith.constant 0 : index
      %12 = vector.load %arg7[%c0_9, %c0_10] : memref<128x256xf32, #tpu.memory_space<vmem>>, vector<128x256xf32>
      %c0_11 = arith.constant 0 : index
      %c0_12 = arith.constant 0 : index
      %13 = vector.load %arg5[%c0_11, %c0_12] : memref<1x256xf32, #tpu.memory_space<vmem>>, vector<1x256xf32>
      %14 = vector.broadcast %13 : vector<1x256xf32> to vector<128x256xf32>
      %15 = arith.addf %12, %14 : vector<128x256xf32>
      %cst_13 = arith.constant 0.000000e+00 : f32
      %16 = vector.broadcast %cst_13 : f32 to vector<128x256xf32>
      %17 = arith.maximumf %15, %16 : vector<128x256xf32>
      %18 = arith.truncf %17 : vector<128x256xf32> to vector<128x256xbf16>
      %c0_14 = arith.constant 0 : index
      %c0_15 = arith.constant 0 : index
      %19 = vector.load %arg6[%c0_14, %c0_15] : memref<128x256xbf16, #tpu.memory_space<vmem>>, vector<128x256xbf16>
      tpu.vector_store %arg6[%c0_14, %c0_15], %18 {strides = array<i32>} : memref<128x256xbf16, #tpu.memory_space<vmem>>, vector<128x256xbf16>,
    } else {
    }
    return
  }
  func.func @transform_0(%arg0: i32, %arg1: i32, %arg2: i32) -> (i32, i32) {
    %c0_i32 = arith.constant 0 : i32
    return %arg0, %arg2 : i32, i32
  }
  func.func @transform_1(%arg0: i32, %arg1: i32, %arg2: i32) -> (i32, i32) {
    %c0_i32 = arith.constant 0 : i32
    return %arg2, %arg1 : i32, i32
  }
  func.func @transform_2(%arg0: i32, %arg1: i32, %arg2: i32) -> (i32, i32) {
    %c0_i32 = arith.constant 0 : i32
    %c0_i32_0 = arith.constant 0 : i32
    return %c0_i32, %arg1 : i32, i32
  }
  func.func @transform_3(%arg0: i32, %arg1: i32, %arg2: i32) -> (i32, i32) {
    %c0_i32 = arith.constant 0 : i32
    return %arg0, %arg1 : i32, i32
  }
}

module attributes {stable_mosaic.version = 11 : i64} {
  func.func @_matmul_kernel(%arg0: i32, %arg1: i32, %arg2: i32, %arg3: memref<128x256xbf16, #tpu.memory_space<vmem>>, %arg4: memref<256x256xbf16, #tpu.memory_space<vmem>>, %arg5: memref<1x256xf32, #tpu.memory_space<vmem>>, %arg6: memref<128x256xbf16, #tpu.memory_space<vmem>>, %arg7: memref<128x256xf32, #tpu.memory_space<vmem>>) attributes {dimension_semantics = [#tpu.dimension_semantics<parallel>, #tpu.dimension_semantics<parallel>, #tpu.dimension_semantics<arbitrary>], iteration_bounds = array<i64: 3, 1, 9>, scalar_prefetch = 0 : i64, scratch_operands = 1 : i64, tpu.core_type = #tpu.core_type<tc>, window_params = [{transform_indices = @transform_0, window_bounds = array<i64: 128, 256>}, {transform_indices = @transform_1, window_bounds = array<i64: 256, 256>}, {transform_indices = @transform_2, window_bounds = array<i64: 1, 256>}, {transform_indices = @transform_3, window_bounds = array<i64: 128, 256>}]} {
    %c0_i32 = arith.constant 0 : i32
    %0 = arith.cmpi eq, %arg2, %c0_i32 : i32
    %1 = arith.extui %0 : i1 to i32
    %c0_i32_0 = arith.constant 0 : i32
    %2 = arith.cmpi ne, %1, %c0_i32_0 : i32
    scf.if %2 {
      %cst_9 = arith.constant 0.000000e+00 : f32
      %12 = vector.broadcast %cst_9 : f32 to vector<128x256xf32>
      %c0_10 = arith.constant 0 : index
      %c0_11 = arith.constant 0 : index
      %13 = vector.load %arg7[%c0_10, %c0_11] : memref<128x256xf32, #tpu.memory_space<vmem>>, vector<128x256xf32>
      tpu.vector_store %arg7[%c0_10, %c0_11], %12 {strides = array<i32>} : memref<128x256xf32, #tpu.memory_space<vmem>>, vector<128x256xf32>,
    } else {
    }
    %c0 = arith.constant 0 : index
    %c0_1 = arith.constant 0 : index
    %3 = vector.load %arg7[%c0, %c0_1] : memref<128x256xf32, #tpu.memory_space<vmem>>, vector<128x256xf32>
    %c0_2 = arith.constant 0 : index
    %c0_3 = arith.constant 0 : index
    %4 = vector.load %arg3[%c0_2, %c0_3] : memref<128x256xbf16, #tpu.memory_space<vmem>>, vector<128x256xbf16>
    %c0_4 = arith.constant 0 : index
    %c0_5 = arith.constant 0 : index
    %5 = vector.load %arg4[%c0_4, %c0_5] : memref<256x256xbf16, #tpu.memory_space<vmem>>, vector<256x256xbf16>
    %cst = arith.constant dense<0.000000e+00> : vector<128x256xf32>
    %6 = tpu.matmul %4, %5, %cst {dimension_numbers = #tpu.dot_dimension_numbers<[1], [0], [0], [1], [0, 0, 1, 1], [], []>} : vector<128x256xbf16>, vector<256x256xbf16>, vector<128x256xf32> -> vector<128x256xf32>
    %7 = arith.addf %3, %6 : vector<128x256xf32>
    %c0_6 = arith.constant 0 : index
    %c0_7 = arith.constant 0 : index
    %8 = vector.load %arg7[%c0_6, %c0_7] : memref<128x256xf32, #tpu.memory_space<vmem>>, vector<128x256xf32>
    tpu.vector_store %arg7[%c0_6, %c0_7], %7 {strides = array<i32>} : memref<128x256xf32, #tpu.memory_space<vmem>>, vector<128x256xf32>,
    %c8_i32 = arith.constant 8 : i32
    %9 = arith.cmpi eq, %arg2, %c8_i32 : i32
    %10 = arith.extui %9 : i1 to i32
    %c0_i32_8 = arith.constant 0 : i32
    %11 = arith.cmpi ne, %10, %c0_i32_8 : i32
    scf.if %11 {
      %c0_9 = arith.constant 0 : index
      %c0_10 = arith.constant 0 : index
      %12 = vector.load %arg7[%c0_9, %c0_10] : memref<128x256xf32, #tpu.memory_space<vmem>>, vector<128x256xf32>
      %c0_11 = arith.constant 0 : index
      %c0_12 = arith.constant 0 : index
      %13 = vector.load %arg5[%c0_11, %c0_12] : memref<1x256xf32, #tpu.memory_space<vmem>>, vector<1x256xf32>
      %14 = vector.broadcast %13 : vector<1x256xf32> to vector<128x256xf32>
      %15 = arith.addf %12, %14 : vector<128x256xf32>
      %cst_13 = arith.constant 0.000000e+00 : f32
      %16 = vector.broadcast %cst_13 : f32 to vector<128x256xf32>
      %17 = arith.maximumf %15, %16 : vector<128x256xf32>
      %18 = arith.truncf %17 : vector<128x256xf32> to vector<128x256xbf16>
      %c0_14 = arith.constant 0 : index
      %c0_15 = arith.constant 0 : index
      %19 = vector.load %arg6[%c0_14, %c0_15] : memref<128x256xbf16, #tpu.memory_space<vmem>>, vector<128x256xbf16>
      tpu.vector_store %arg6[%c0_14, %c0_15], %18 {strides = array<i32>} : memref<128x256xbf16, #tpu.memory_space<vmem>>, vector<128x256xbf16>,
    } else {
    }
    return
  }
  func.func @transform_0(%arg0: i32, %arg1: i32, %arg2: i32) -> (i32, i32) {
    %c0_i32 = arith.constant 0 : i32
    return %arg0, %arg2 : i32, i32
  }
  func.func @transform_1(%arg0: i32, %arg1: i32, %arg2: i32) -> (i32, i32) {
    %c0_i32 = arith.constant 0 : i32
    return %arg2, %arg1 : i32, i32
  }
  func.func @transform_2(%arg0: i32, %arg1: i32, %arg2: i32) -> (i32, i32) {
    %c0_i32 = arith.constant 0 : i32
    %c0_i32_0 = arith.constant 0 : i32
    return %c0_i32, %arg1 : i32, i32
  }
  func.func @transform_3(%arg0: i32, %arg1: i32, %arg2: i32) -> (i32, i32) {
    %c0_i32 = arith.constant 0 : i32
    return %arg0, %arg1 : i32, i32
  }
}

module attributes {stable_mosaic.version = 11 : i64} {
  func.func @_pool3s2_major_kernel(%arg0: i32, %arg1: memref<1x13x13x256xbf16, #tpu.memory_space<vmem>>, %arg2: memref<1x6x13x256xbf16, #tpu.memory_space<vmem>>) attributes {dimension_semantics = [#tpu.dimension_semantics<parallel>], iteration_bounds = array<i64: 2>, scalar_prefetch = 0 : i64, scratch_operands = 0 : i64, tpu.core_type = #tpu.core_type<tc>, window_params = [{transform_indices = @transform_0, window_bounds = array<i64: 1, 13, 13, 256>}, {transform_indices = @transform_1, window_bounds = array<i64: 1, 6, 13, 256>}]} {
    %c0 = arith.constant 0 : index
    %c0_0 = arith.constant 0 : index
    %c0_1 = arith.constant 0 : index
    %c0_2 = arith.constant 0 : index
    %0 = vector.load %arg1[%c0, %c0_0, %c0_1, %c0_2] : memref<1x13x13x256xbf16, #tpu.memory_space<vmem>>, vector<1x13x13x256xbf16>
    %1 = vector.shape_cast %0 : vector<1x13x13x256xbf16> to vector<13x13x256xbf16>
    %2 = vector.extract_strided_slice %1 {offsets = [0, 0, 0], sizes = [12, 13, 256], strides = [1, 1, 1]} : vector<13x13x256xbf16> to vector<12x13x256xbf16>
    %3 = vector.shape_cast %2 : vector<12x13x256xbf16> to vector<6x2x13x256xbf16>
    %4 = vector.extract_strided_slice %1 {offsets = [1, 0, 0], sizes = [12, 13, 256], strides = [1, 1, 1]} : vector<13x13x256xbf16> to vector<12x13x256xbf16>
    %5 = vector.shape_cast %4 : vector<12x13x256xbf16> to vector<6x2x13x256xbf16>
    %6 = vector.extract_strided_slice %3 {offsets = [0, 0, 0, 0], sizes = [6, 1, 13, 256], strides = [1, 1, 1, 1]} : vector<6x2x13x256xbf16> to vector<6x1x13x256xbf16>
    %7 = vector.shape_cast %6 : vector<6x1x13x256xbf16> to vector<6x13x256xbf16>
    %8 = vector.extract_strided_slice %3 {offsets = [0, 1, 0, 0], sizes = [6, 1, 13, 256], strides = [1, 1, 1, 1]} : vector<6x2x13x256xbf16> to vector<6x1x13x256xbf16>
    %9 = vector.shape_cast %8 : vector<6x1x13x256xbf16> to vector<6x13x256xbf16>
    %10 = arith.maximumf %7, %9 : vector<6x13x256xbf16>
    %11 = vector.extract_strided_slice %5 {offsets = [0, 1, 0, 0], sizes = [6, 1, 13, 256], strides = [1, 1, 1, 1]} : vector<6x2x13x256xbf16> to vector<6x1x13x256xbf16>
    %12 = vector.shape_cast %11 : vector<6x1x13x256xbf16> to vector<6x13x256xbf16>
    %13 = arith.maximumf %10, %12 : vector<6x13x256xbf16>
    %14 = vector.shape_cast %13 : vector<6x13x256xbf16> to vector<1x6x13x256xbf16>
    %c0_3 = arith.constant 0 : index
    %c0_4 = arith.constant 0 : index
    %c0_5 = arith.constant 0 : index
    %c0_6 = arith.constant 0 : index
    %15 = vector.load %arg2[%c0_3, %c0_4, %c0_5, %c0_6] : memref<1x6x13x256xbf16, #tpu.memory_space<vmem>>, vector<1x6x13x256xbf16>
    tpu.vector_store %arg2[%c0_3, %c0_4, %c0_5, %c0_6], %14 {strides = array<i32>} : memref<1x6x13x256xbf16, #tpu.memory_space<vmem>>, vector<1x6x13x256xbf16>,
    return
  }
  func.func @transform_0(%arg0: i32) -> (i32, i32, i32, i32) {
    %c0_i32 = arith.constant 0 : i32
    %c0_i32_0 = arith.constant 0 : i32
    %c0_i32_1 = arith.constant 0 : i32
    %c0_i32_2 = arith.constant 0 : i32
    return %arg0, %c0_i32, %c0_i32_0, %c0_i32_1 : i32, i32, i32, i32
  }
  func.func @transform_1(%arg0: i32) -> (i32, i32, i32, i32) {
    %c0_i32 = arith.constant 0 : i32
    %c0_i32_0 = arith.constant 0 : i32
    %c0_i32_1 = arith.constant 0 : i32
    %c0_i32_2 = arith.constant 0 : i32
    return %arg0, %c0_i32, %c0_i32_0, %c0_i32_1 : i32, i32, i32, i32
  }
}

module attributes {stable_mosaic.version = 11 : i64} {
  func.func @_pool3s2_major_kernel(%arg0: i32, %arg1: memref<1x13x6x256xbf16, #tpu.memory_space<vmem>>, %arg2: memref<1x6x6x256xbf16, #tpu.memory_space<vmem>>) attributes {dimension_semantics = [#tpu.dimension_semantics<parallel>], iteration_bounds = array<i64: 2>, scalar_prefetch = 0 : i64, scratch_operands = 0 : i64, tpu.core_type = #tpu.core_type<tc>, window_params = [{transform_indices = @transform_0, window_bounds = array<i64: 1, 13, 6, 256>}, {transform_indices = @transform_1, window_bounds = array<i64: 1, 6, 6, 256>}]} {
    %c0 = arith.constant 0 : index
    %c0_0 = arith.constant 0 : index
    %c0_1 = arith.constant 0 : index
    %c0_2 = arith.constant 0 : index
    %0 = vector.load %arg1[%c0, %c0_0, %c0_1, %c0_2] : memref<1x13x6x256xbf16, #tpu.memory_space<vmem>>, vector<1x13x6x256xbf16>
    %1 = vector.shape_cast %0 : vector<1x13x6x256xbf16> to vector<13x6x256xbf16>
    %2 = vector.extract_strided_slice %1 {offsets = [0, 0, 0], sizes = [12, 6, 256], strides = [1, 1, 1]} : vector<13x6x256xbf16> to vector<12x6x256xbf16>
    %3 = vector.shape_cast %2 : vector<12x6x256xbf16> to vector<6x2x6x256xbf16>
    %4 = vector.extract_strided_slice %1 {offsets = [1, 0, 0], sizes = [12, 6, 256], strides = [1, 1, 1]} : vector<13x6x256xbf16> to vector<12x6x256xbf16>
    %5 = vector.shape_cast %4 : vector<12x6x256xbf16> to vector<6x2x6x256xbf16>
    %6 = vector.extract_strided_slice %3 {offsets = [0, 0, 0, 0], sizes = [6, 1, 6, 256], strides = [1, 1, 1, 1]} : vector<6x2x6x256xbf16> to vector<6x1x6x256xbf16>
    %7 = vector.shape_cast %6 : vector<6x1x6x256xbf16> to vector<6x6x256xbf16>
    %8 = vector.extract_strided_slice %3 {offsets = [0, 1, 0, 0], sizes = [6, 1, 6, 256], strides = [1, 1, 1, 1]} : vector<6x2x6x256xbf16> to vector<6x1x6x256xbf16>
    %9 = vector.shape_cast %8 : vector<6x1x6x256xbf16> to vector<6x6x256xbf16>
    %10 = arith.maximumf %7, %9 : vector<6x6x256xbf16>
    %11 = vector.extract_strided_slice %5 {offsets = [0, 1, 0, 0], sizes = [6, 1, 6, 256], strides = [1, 1, 1, 1]} : vector<6x2x6x256xbf16> to vector<6x1x6x256xbf16>
    %12 = vector.shape_cast %11 : vector<6x1x6x256xbf16> to vector<6x6x256xbf16>
    %13 = arith.maximumf %10, %12 : vector<6x6x256xbf16>
    %14 = vector.shape_cast %13 : vector<6x6x256xbf16> to vector<1x6x6x256xbf16>
    %c0_3 = arith.constant 0 : index
    %c0_4 = arith.constant 0 : index
    %c0_5 = arith.constant 0 : index
    %c0_6 = arith.constant 0 : index
    %15 = vector.load %arg2[%c0_3, %c0_4, %c0_5, %c0_6] : memref<1x6x6x256xbf16, #tpu.memory_space<vmem>>, vector<1x6x6x256xbf16>
    tpu.vector_store %arg2[%c0_3, %c0_4, %c0_5, %c0_6], %14 {strides = array<i32>} : memref<1x6x6x256xbf16, #tpu.memory_space<vmem>>, vector<1x6x6x256xbf16>,
    return
  }
  func.func @transform_0(%arg0: i32) -> (i32, i32, i32, i32) {
    %c0_i32 = arith.constant 0 : i32
    %c0_i32_0 = arith.constant 0 : i32
    %c0_i32_1 = arith.constant 0 : i32
    %c0_i32_2 = arith.constant 0 : i32
    return %arg0, %c0_i32, %c0_i32_0, %c0_i32_1 : i32, i32, i32, i32
  }
  func.func @transform_1(%arg0: i32) -> (i32, i32, i32, i32) {
    %c0_i32 = arith.constant 0 : i32
    %c0_i32_0 = arith.constant 0 : i32
    %c0_i32_1 = arith.constant 0 : i32
    %c0_i32_2 = arith.constant 0 : i32
    return %arg0, %c0_i32, %c0_i32_0, %c0_i32_1 : i32, i32, i32, i32
  }
}

module attributes {stable_mosaic.version = 11 : i64} {
  func.func @_matmul_kernel(%arg0: i32, %arg1: i32, %arg2: i32, %arg3: memref<8x512xbf16, #tpu.memory_space<vmem>>, %arg4: memref<512x512xbf16, #tpu.memory_space<vmem>>, %arg5: memref<1x512xf32, #tpu.memory_space<vmem>>, %arg6: memref<8x512xbf16, #tpu.memory_space<vmem>>, %arg7: memref<8x512xf32, #tpu.memory_space<vmem>>) attributes {dimension_semantics = [#tpu.dimension_semantics<parallel>, #tpu.dimension_semantics<parallel>, #tpu.dimension_semantics<arbitrary>], iteration_bounds = array<i64: 1, 8, 18>, scalar_prefetch = 0 : i64, scratch_operands = 1 : i64, tpu.core_type = #tpu.core_type<tc>, window_params = [{transform_indices = @transform_0, window_bounds = array<i64: 8, 512>}, {transform_indices = @transform_1, window_bounds = array<i64: 512, 512>}, {transform_indices = @transform_2, window_bounds = array<i64: 1, 512>}, {transform_indices = @transform_3, window_bounds = array<i64: 8, 512>}]} {
    %c0_i32 = arith.constant 0 : i32
    %0 = arith.cmpi eq, %arg2, %c0_i32 : i32
    %1 = arith.extui %0 : i1 to i32
    %c0_i32_0 = arith.constant 0 : i32
    %2 = arith.cmpi ne, %1, %c0_i32_0 : i32
    scf.if %2 {
      %cst_9 = arith.constant 0.000000e+00 : f32
      %12 = vector.broadcast %cst_9 : f32 to vector<8x512xf32>
      %c0_10 = arith.constant 0 : index
      %c0_11 = arith.constant 0 : index
      %13 = vector.load %arg7[%c0_10, %c0_11] : memref<8x512xf32, #tpu.memory_space<vmem>>, vector<8x512xf32>
      tpu.vector_store %arg7[%c0_10, %c0_11], %12 {strides = array<i32>} : memref<8x512xf32, #tpu.memory_space<vmem>>, vector<8x512xf32>,
    } else {
    }
    %c0 = arith.constant 0 : index
    %c0_1 = arith.constant 0 : index
    %3 = vector.load %arg7[%c0, %c0_1] : memref<8x512xf32, #tpu.memory_space<vmem>>, vector<8x512xf32>
    %c0_2 = arith.constant 0 : index
    %c0_3 = arith.constant 0 : index
    %4 = vector.load %arg3[%c0_2, %c0_3] : memref<8x512xbf16, #tpu.memory_space<vmem>>, vector<8x512xbf16>
    %c0_4 = arith.constant 0 : index
    %c0_5 = arith.constant 0 : index
    %5 = vector.load %arg4[%c0_4, %c0_5] : memref<512x512xbf16, #tpu.memory_space<vmem>>, vector<512x512xbf16>
    %cst = arith.constant dense<0.000000e+00> : vector<8x512xf32>
    %6 = tpu.matmul %4, %5, %cst {dimension_numbers = #tpu.dot_dimension_numbers<[1], [0], [0], [1], [0, 0, 1, 1], [], []>} : vector<8x512xbf16>, vector<512x512xbf16>, vector<8x512xf32> -> vector<8x512xf32>
    %7 = arith.addf %3, %6 : vector<8x512xf32>
    %c0_6 = arith.constant 0 : index
    %c0_7 = arith.constant 0 : index
    %8 = vector.load %arg7[%c0_6, %c0_7] : memref<8x512xf32, #tpu.memory_space<vmem>>, vector<8x512xf32>
    tpu.vector_store %arg7[%c0_6, %c0_7], %7 {strides = array<i32>} : memref<8x512xf32, #tpu.memory_space<vmem>>, vector<8x512xf32>,
    %c17_i32 = arith.constant 17 : i32
    %9 = arith.cmpi eq, %arg2, %c17_i32 : i32
    %10 = arith.extui %9 : i1 to i32
    %c0_i32_8 = arith.constant 0 : i32
    %11 = arith.cmpi ne, %10, %c0_i32_8 : i32
    scf.if %11 {
      %c0_9 = arith.constant 0 : index
      %c0_10 = arith.constant 0 : index
      %12 = vector.load %arg7[%c0_9, %c0_10] : memref<8x512xf32, #tpu.memory_space<vmem>>, vector<8x512xf32>
      %c0_11 = arith.constant 0 : index
      %c0_12 = arith.constant 0 : index
      %13 = vector.load %arg5[%c0_11, %c0_12] : memref<1x512xf32, #tpu.memory_space<vmem>>, vector<1x512xf32>
      %14 = vector.broadcast %13 : vector<1x512xf32> to vector<8x512xf32>
      %15 = arith.addf %12, %14 : vector<8x512xf32>
      %cst_13 = arith.constant 0.000000e+00 : f32
      %16 = vector.broadcast %cst_13 : f32 to vector<8x512xf32>
      %17 = arith.maximumf %15, %16 : vector<8x512xf32>
      %18 = arith.truncf %17 : vector<8x512xf32> to vector<8x512xbf16>
      %c0_14 = arith.constant 0 : index
      %c0_15 = arith.constant 0 : index
      %19 = vector.load %arg6[%c0_14, %c0_15] : memref<8x512xbf16, #tpu.memory_space<vmem>>, vector<8x512xbf16>
      tpu.vector_store %arg6[%c0_14, %c0_15], %18 {strides = array<i32>} : memref<8x512xbf16, #tpu.memory_space<vmem>>, vector<8x512xbf16>,
    } else {
    }
    return
  }
  func.func @transform_0(%arg0: i32, %arg1: i32, %arg2: i32) -> (i32, i32) {
    %c0_i32 = arith.constant 0 : i32
    return %arg0, %arg2 : i32, i32
  }
  func.func @transform_1(%arg0: i32, %arg1: i32, %arg2: i32) -> (i32, i32) {
    %c0_i32 = arith.constant 0 : i32
    return %arg2, %arg1 : i32, i32
  }
  func.func @transform_2(%arg0: i32, %arg1: i32, %arg2: i32) -> (i32, i32) {
    %c0_i32 = arith.constant 0 : i32
    %c0_i32_0 = arith.constant 0 : i32
    return %c0_i32, %arg1 : i32, i32
  }
  func.func @transform_3(%arg0: i32, %arg1: i32, %arg2: i32) -> (i32, i32) {
    %c0_i32 = arith.constant 0 : i32
    return %arg0, %arg1 : i32, i32
  }
}

module attributes {stable_mosaic.version = 11 : i64} {
  func.func @_matmul_kernel(%arg0: i32, %arg1: i32, %arg2: i32, %arg3: memref<8x512xbf16, #tpu.memory_space<vmem>>, %arg4: memref<512x512xbf16, #tpu.memory_space<vmem>>, %arg5: memref<1x512xf32, #tpu.memory_space<vmem>>, %arg6: memref<8x512xbf16, #tpu.memory_space<vmem>>, %arg7: memref<8x512xf32, #tpu.memory_space<vmem>>) attributes {dimension_semantics = [#tpu.dimension_semantics<parallel>, #tpu.dimension_semantics<parallel>, #tpu.dimension_semantics<arbitrary>], iteration_bounds = array<i64: 1, 8, 8>, scalar_prefetch = 0 : i64, scratch_operands = 1 : i64, tpu.core_type = #tpu.core_type<tc>, window_params = [{transform_indices = @transform_0, window_bounds = array<i64: 8, 512>}, {transform_indices = @transform_1, window_bounds = array<i64: 512, 512>}, {transform_indices = @transform_2, window_bounds = array<i64: 1, 512>}, {transform_indices = @transform_3, window_bounds = array<i64: 8, 512>}]} {
    %c0_i32 = arith.constant 0 : i32
    %0 = arith.cmpi eq, %arg2, %c0_i32 : i32
    %1 = arith.extui %0 : i1 to i32
    %c0_i32_0 = arith.constant 0 : i32
    %2 = arith.cmpi ne, %1, %c0_i32_0 : i32
    scf.if %2 {
      %cst_9 = arith.constant 0.000000e+00 : f32
      %12 = vector.broadcast %cst_9 : f32 to vector<8x512xf32>
      %c0_10 = arith.constant 0 : index
      %c0_11 = arith.constant 0 : index
      %13 = vector.load %arg7[%c0_10, %c0_11] : memref<8x512xf32, #tpu.memory_space<vmem>>, vector<8x512xf32>
      tpu.vector_store %arg7[%c0_10, %c0_11], %12 {strides = array<i32>} : memref<8x512xf32, #tpu.memory_space<vmem>>, vector<8x512xf32>,
    } else {
    }
    %c0 = arith.constant 0 : index
    %c0_1 = arith.constant 0 : index
    %3 = vector.load %arg7[%c0, %c0_1] : memref<8x512xf32, #tpu.memory_space<vmem>>, vector<8x512xf32>
    %c0_2 = arith.constant 0 : index
    %c0_3 = arith.constant 0 : index
    %4 = vector.load %arg3[%c0_2, %c0_3] : memref<8x512xbf16, #tpu.memory_space<vmem>>, vector<8x512xbf16>
    %c0_4 = arith.constant 0 : index
    %c0_5 = arith.constant 0 : index
    %5 = vector.load %arg4[%c0_4, %c0_5] : memref<512x512xbf16, #tpu.memory_space<vmem>>, vector<512x512xbf16>
    %cst = arith.constant dense<0.000000e+00> : vector<8x512xf32>
    %6 = tpu.matmul %4, %5, %cst {dimension_numbers = #tpu.dot_dimension_numbers<[1], [0], [0], [1], [0, 0, 1, 1], [], []>} : vector<8x512xbf16>, vector<512x512xbf16>, vector<8x512xf32> -> vector<8x512xf32>
    %7 = arith.addf %3, %6 : vector<8x512xf32>
    %c0_6 = arith.constant 0 : index
    %c0_7 = arith.constant 0 : index
    %8 = vector.load %arg7[%c0_6, %c0_7] : memref<8x512xf32, #tpu.memory_space<vmem>>, vector<8x512xf32>
    tpu.vector_store %arg7[%c0_6, %c0_7], %7 {strides = array<i32>} : memref<8x512xf32, #tpu.memory_space<vmem>>, vector<8x512xf32>,
    %c7_i32 = arith.constant 7 : i32
    %9 = arith.cmpi eq, %arg2, %c7_i32 : i32
    %10 = arith.extui %9 : i1 to i32
    %c0_i32_8 = arith.constant 0 : i32
    %11 = arith.cmpi ne, %10, %c0_i32_8 : i32
    scf.if %11 {
      %c0_9 = arith.constant 0 : index
      %c0_10 = arith.constant 0 : index
      %12 = vector.load %arg7[%c0_9, %c0_10] : memref<8x512xf32, #tpu.memory_space<vmem>>, vector<8x512xf32>
      %c0_11 = arith.constant 0 : index
      %c0_12 = arith.constant 0 : index
      %13 = vector.load %arg5[%c0_11, %c0_12] : memref<1x512xf32, #tpu.memory_space<vmem>>, vector<1x512xf32>
      %14 = vector.broadcast %13 : vector<1x512xf32> to vector<8x512xf32>
      %15 = arith.addf %12, %14 : vector<8x512xf32>
      %cst_13 = arith.constant 0.000000e+00 : f32
      %16 = vector.broadcast %cst_13 : f32 to vector<8x512xf32>
      %17 = arith.maximumf %15, %16 : vector<8x512xf32>
      %18 = arith.truncf %17 : vector<8x512xf32> to vector<8x512xbf16>
      %c0_14 = arith.constant 0 : index
      %c0_15 = arith.constant 0 : index
      %19 = vector.load %arg6[%c0_14, %c0_15] : memref<8x512xbf16, #tpu.memory_space<vmem>>, vector<8x512xbf16>
      tpu.vector_store %arg6[%c0_14, %c0_15], %18 {strides = array<i32>} : memref<8x512xbf16, #tpu.memory_space<vmem>>, vector<8x512xbf16>,
    } else {
    }
    return
  }
  func.func @transform_0(%arg0: i32, %arg1: i32, %arg2: i32) -> (i32, i32) {
    %c0_i32 = arith.constant 0 : i32
    return %arg0, %arg2 : i32, i32
  }
  func.func @transform_1(%arg0: i32, %arg1: i32, %arg2: i32) -> (i32, i32) {
    %c0_i32 = arith.constant 0 : i32
    return %arg2, %arg1 : i32, i32
  }
  func.func @transform_2(%arg0: i32, %arg1: i32, %arg2: i32) -> (i32, i32) {
    %c0_i32 = arith.constant 0 : i32
    %c0_i32_0 = arith.constant 0 : i32
    return %c0_i32, %arg1 : i32, i32
  }
  func.func @transform_3(%arg0: i32, %arg1: i32, %arg2: i32) -> (i32, i32) {
    %c0_i32 = arith.constant 0 : i32
    return %arg0, %arg1 : i32, i32
  }
}

module attributes {stable_mosaic.version = 11 : i64} {
  func.func @_matmul_kernel(%arg0: i32, %arg1: i32, %arg2: i32, %arg3: memref<8x512xbf16, #tpu.memory_space<vmem>>, %arg4: memref<512x128xbf16, #tpu.memory_space<vmem>>, %arg5: memref<1x128xf32, #tpu.memory_space<vmem>>, %arg6: memref<8x128xf32, #tpu.memory_space<vmem>>, %arg7: memref<8x128xf32, #tpu.memory_space<vmem>>) attributes {dimension_semantics = [#tpu.dimension_semantics<parallel>, #tpu.dimension_semantics<parallel>, #tpu.dimension_semantics<arbitrary>], iteration_bounds = array<i64: 1, 1, 8>, scalar_prefetch = 0 : i64, scratch_operands = 1 : i64, tpu.core_type = #tpu.core_type<tc>, window_params = [{transform_indices = @transform_0, window_bounds = array<i64: 8, 512>}, {transform_indices = @transform_1, window_bounds = array<i64: 512, 128>}, {transform_indices = @transform_2, window_bounds = array<i64: 1, 128>}, {transform_indices = @transform_3, window_bounds = array<i64: 8, 128>}]} {
    %c0_i32 = arith.constant 0 : i32
    %0 = arith.cmpi eq, %arg2, %c0_i32 : i32
    %1 = arith.extui %0 : i1 to i32
    %c0_i32_0 = arith.constant 0 : i32
    %2 = arith.cmpi ne, %1, %c0_i32_0 : i32
    scf.if %2 {
      %cst_9 = arith.constant 0.000000e+00 : f32
      %12 = vector.broadcast %cst_9 : f32 to vector<8x128xf32>
      %c0_10 = arith.constant 0 : index
      %c0_11 = arith.constant 0 : index
      %13 = vector.load %arg7[%c0_10, %c0_11] : memref<8x128xf32, #tpu.memory_space<vmem>>, vector<8x128xf32>
      tpu.vector_store %arg7[%c0_10, %c0_11], %12 {strides = array<i32>} : memref<8x128xf32, #tpu.memory_space<vmem>>, vector<8x128xf32>,
    } else {
    }
    %c0 = arith.constant 0 : index
    %c0_1 = arith.constant 0 : index
    %3 = vector.load %arg7[%c0, %c0_1] : memref<8x128xf32, #tpu.memory_space<vmem>>, vector<8x128xf32>
    %c0_2 = arith.constant 0 : index
    %c0_3 = arith.constant 0 : index
    %4 = vector.load %arg3[%c0_2, %c0_3] : memref<8x512xbf16, #tpu.memory_space<vmem>>, vector<8x512xbf16>
    %c0_4 = arith.constant 0 : index
    %c0_5 = arith.constant 0 : index
    %5 = vector.load %arg4[%c0_4, %c0_5] : memref<512x128xbf16, #tpu.memory_space<vmem>>, vector<512x128xbf16>
    %cst = arith.constant dense<0.000000e+00> : vector<8x128xf32>
    %6 = tpu.matmul %4, %5, %cst {dimension_numbers = #tpu.dot_dimension_numbers<[1], [0], [0], [1], [0, 0, 1, 1], [], []>} : vector<8x512xbf16>, vector<512x128xbf16>, vector<8x128xf32> -> vector<8x128xf32>
    %7 = arith.addf %3, %6 : vector<8x128xf32>
    %c0_6 = arith.constant 0 : index
    %c0_7 = arith.constant 0 : index
    %8 = vector.load %arg7[%c0_6, %c0_7] : memref<8x128xf32, #tpu.memory_space<vmem>>, vector<8x128xf32>
    tpu.vector_store %arg7[%c0_6, %c0_7], %7 {strides = array<i32>} : memref<8x128xf32, #tpu.memory_space<vmem>>, vector<8x128xf32>,
    %c7_i32 = arith.constant 7 : i32
    %9 = arith.cmpi eq, %arg2, %c7_i32 : i32
    %10 = arith.extui %9 : i1 to i32
    %c0_i32_8 = arith.constant 0 : i32
    %11 = arith.cmpi ne, %10, %c0_i32_8 : i32
    scf.if %11 {
      %c0_9 = arith.constant 0 : index
      %c0_10 = arith.constant 0 : index
      %12 = vector.load %arg7[%c0_9, %c0_10] : memref<8x128xf32, #tpu.memory_space<vmem>>, vector<8x128xf32>
      %c0_11 = arith.constant 0 : index
      %c0_12 = arith.constant 0 : index
      %13 = vector.load %arg5[%c0_11, %c0_12] : memref<1x128xf32, #tpu.memory_space<vmem>>, vector<1x128xf32>
      %14 = vector.broadcast %13 : vector<1x128xf32> to vector<8x128xf32>
      %15 = arith.addf %12, %14 : vector<8x128xf32>
      %c0_13 = arith.constant 0 : index
      %c0_14 = arith.constant 0 : index
      %16 = vector.load %arg6[%c0_13, %c0_14] : memref<8x128xf32, #tpu.memory_space<vmem>>, vector<8x128xf32>
      tpu.vector_store %arg6[%c0_13, %c0_14], %15 {strides = array<i32>} : memref<8x128xf32, #tpu.memory_space<vmem>>, vector<8x128xf32>,
    } else {
    }
    return
  }
  func.func @transform_0(%arg0: i32, %arg1: i32, %arg2: i32) -> (i32, i32) {
    %c0_i32 = arith.constant 0 : i32
    return %arg0, %arg2 : i32, i32
  }
  func.func @transform_1(%arg0: i32, %arg1: i32, %arg2: i32) -> (i32, i32) {
    %c0_i32 = arith.constant 0 : i32
    return %arg2, %arg1 : i32, i32
  }
  func.func @transform_2(%arg0: i32, %arg1: i32, %arg2: i32) -> (i32, i32) {
    %c0_i32 = arith.constant 0 : i32
    %c0_i32_0 = arith.constant 0 : i32
    return %c0_i32, %arg1 : i32, i32
  }
  func.func @transform_3(%arg0: i32, %arg1: i32, %arg2: i32) -> (i32, i32) {
    %c0_i32 = arith.constant 0 : i32
    return %arg0, %arg1 : i32, i32
  }
}

</mosaic_0001>

<bundles_post_ra>
// kernel: alexnet_forward.14
= control target key start
LH: loop header
LB: loop body
LE: loop exit
PB: predicated region body
PF: predicated region fallthrough
CT: control target
= control target key end

     0   :  { %s1499_s12 = smov 0   ;;  %s1501_s13 = smov 0   ;;  %s1636_s0 = inlined_call_operand.vmem [shape: bf16[6144,128], index: 0, kind: input, shape index: {}]   ;;  %s1637_s1 = inlined_call_operand.vmem [shape: bf16[128,128], index: 1, kind: input, shape index: {}]   ;;  %s1638_s2 = inlined_call_operand.vmem [shape: f32[1,128], index: 2, kind: input, shape index: {}]   ;;  %s1639_s3 = inlined_call_operand.vmem [shape: bf16[6144,128], index: 3, kind: output, shape index: {}]  }
   0x1   :  { %s1503_s14 = smov 0  }
   0x2 LB: > { %s32_s15 = sadd.s32 1, %s1473_s13  ;;  %p1128_p0 = scmp.ge.s32.totalorder %s1477_s14, 1  ;;  %s1477_s14 = sphi %s1503_s14, %s13_s14   ;;  %s1473_s13 = sphi %s1501_s13, %s1641_s13   ;;  %s1469_s12 = sphi %s1499_s12, %s1640_s12  }
   0x3   : > { %p34_p1 = scmp.ge.s32.totalorder %s32_s15, 24  ;;  %p188_p2 = scmp.lt.s32.totalorder %s1477_s14, 25 }
   0x5   : > { %s1643_s15 = smov (%p34_p1, %s32_s15), 0  ;;  %p189_p3 = pnand %p1128_p0, %p188_p2 }
   0x6   : > { %s1129_s18 = sshll.u32 (!%p189_p3), %s1469_s12, 5 }
   0x7   : > { %192 = sbr.rel (%p189_p3) target bundleno = 275 (0x113), region = 32  ;;  %p230_p4 = scmp.lt.s32.totalorder (!%p189_p3), %s1129_s18, 767 }
   0xc   : > { %v1431_v0 = vld [vmem:[%s1637_s1 + $0x38] sm:$0xff]   ;;  %v1432_v1 = vld [vmem:[%s1637_s1 + $0x30] sm:$0xff]   ;;  %s1645_s18 = smov (!%p230_p4, %s1129_s18), 767  ;;  %v1433_v2 = vld [vmem:[%s1637_s1 + $0x28] sm:$0xff]  }
   0xd   : > { %1343 = vmatprep.subr.bf16.mxu0 %v1431_v0  ;;  %1391 = vmatprep.subr.bf16.mxu1 %v1431_v0  ;;  %s1130_s23 = sshll.u32 %s1645_s18, 2  ;;  %v1434_v3 = vld [vmem:[%s1637_s1 + $0x20] sm:$0xff]   ;;  %v1435_v6 = vld [vmem:[%s1637_s1 + $0x18] sm:$0xff]   ;;  %v1436_v7 = vld [vmem:[%s1637_s1 + $0x10] sm:$0xff]  }
   0xe   : > { %1344 = vmatpush3.bf16.msra.mxu0 %v1431_v0  ;;  %1399 = vmatpush3.bf16.msra.mxu1 %v1431_v0  ;;  %s1534_s26 = scalar_lea.vmem %s1636_s0, %s1130_s23  ;;  %v1437_v8 = vld [vmem:[%s1637_s1 + $0x8] sm:$0xff]   ;;  %v1438_v9 = vld [vmem:[%s1637_s1] sm:$0xff]   ;;  %s1585_s17 = scalar_lea.vmem %s1639_s3, %s1130_s23 }
   0xf   : > { %1345 = vmatprep.subr.bf16.mxu0 %v1432_v1  ;;  %1392 = vmatprep.subr.bf16.mxu1 %v1432_v1  ;;  %v1439_v4 = vld [vmem:[%s1534_s26] sm:$0xff]   ;;  %v1441_v10 = vld [vmem:[%s1534_s26 + $0x8] sm:$0xff]   ;;  %v1443_v12 = vld [vmem:[%s1534_s26 + $0x10] sm:$0xff]  }
  0x10   : > { %v1440_v5 = vld [vmem:[%s1534_s26 + $0x40] sm:$0xff]   ;;  %1359 = vmatprep.mubr.bf16.mxu0 %v1439_v4  ;;  %v1442_v11 = vld [vmem:[%s1534_s26 + $0x48] sm:$0xff]   ;;  %v1444_v13 = vld [vmem:[%s1534_s26 + $0x50] sm:$0xff]  }
  0x11   : > { %1375 = vmatprep.mubr.bf16.mxu1 %v1440_v5  ;;  %v1445_v14 = vld [vmem:[%s1534_s26 + $0x18] sm:$0xff]   ;;  %v1447_v16 = vld [vmem:[%s1534_s26 + $0x20] sm:$0xff]   ;;  %v1449_v18 = vld [vmem:[%s1534_s26 + $0x28] sm:$0xff]  }
  0x12   : > { %1346 = vmatpush3.bf16.msra.mxu0 %v1432_v1  ;;  %1400 = vmatpush3.bf16.msra.mxu1 %v1432_v1  ;;  %v1446_v15 = vld [vmem:[%s1534_s26 + $0x58] sm:$0xff]   ;;  %v1448_v17 = vld [vmem:[%s1534_s26 + $0x60] sm:$0xff]   ;;  %v1450_v19 = vld [vmem:[%s1534_s26 + $0x68] sm:$0xff]  }
  0x13   : > { %1347 = vmatprep.subr.bf16.mxu0 %v1433_v2  ;;  %1393 = vmatprep.subr.bf16.mxu1 %v1433_v2  ;;  %v1451_v20 = vld [vmem:[%s1534_s26 + $0x30] sm:$0xff]   ;;  %v1453_v22 = vld [vmem:[%s1534_s26 + $0x38] sm:$0xff]   ;;  %v1570_v24 = vld [vmem:[%s1638_s2] ss:$0 sm:$0xff] }
  0x14   : > { %v1452_v21 = vld [vmem:[%s1534_s26 + $0x70] sm:$0xff]   ;;  %v1454_v23 = vld [vmem:[%s1534_s26 + $0x78] sm:$0xff]  }
  0x16   : > { %1348 = vmatpush3.bf16.msra.mxu0 %v1433_v2  ;;  %1401 = vmatpush3.bf16.msra.mxu1 %v1433_v2 }
  0x17   : > { %1349 = vmatprep.subr.bf16.mxu0 %v1434_v3  ;;  %1394 = vmatprep.subr.bf16.mxu1 %v1434_v3 }
  0x1a   : > { %1350 = vmatpush3.bf16.msra.mxu0 %v1434_v3  ;;  %1402 = vmatpush3.bf16.msra.mxu1 %v1434_v3 }
  0x1b   : > { %1351 = vmatprep.subr.bf16.mxu0 %v1435_v6  ;;  %1395 = vmatprep.subr.bf16.mxu1 %v1435_v6 }
  0x1e   : > { %1352 = vmatpush3.bf16.msra.mxu0 %v1435_v6  ;;  %1403 = vmatpush3.bf16.msra.mxu1 %v1435_v6 }
  0x1f   : > { %1353 = vmatprep.subr.bf16.mxu0 %v1436_v7  ;;  %1396 = vmatprep.subr.bf16.mxu1 %v1436_v7 }
  0x22   : > { %1354 = vmatpush3.bf16.msra.mxu0 %v1436_v7  ;;  %1404 = vmatpush3.bf16.msra.mxu1 %v1436_v7 }
  0x23   : > { %1355 = vmatprep.subr.bf16.mxu0 %v1437_v8  ;;  %1397 = vmatprep.subr.bf16.mxu1 %v1437_v8 }
  0x26   : > { %1356 = vmatpush3.bf16.msra.mxu0 %v1437_v8  ;;  %1405 = vmatpush3.bf16.msra.mxu1 %v1437_v8 }
  0x27   : > { %1357 = vmatprep.subr.bf16.mxu0 %v1438_v9  ;;  %1398 = vmatprep.subr.bf16.mxu1 %v1438_v9 }
  0x2a   : > { %1358 = vmatpush3.bf16.msra.mxu0 %v1438_v9  ;;  %1406 = vmatpush3.bf16.msra.mxu1 %v1438_v9 }
  0x2d   : > { %1360 = vmatmul.mubr.bf16.vlgmr.msra.gmra.mxu0 %v1441_v10  ;;  %1376 = vmatmul.mubr.bf16.vlgmr.msra.gmra.mxu1 %v1442_v11 }
  0x2e   : > { %1363 = vmatprep.mubr.bf16.mxu0 %v1443_v12  ;;  %1379 = vmatprep.mubr.bf16.mxu1 %v1444_v13 }
  0x35   : > { %1364 = vmatmul.mubr.bf16.gmra.mxu0 %v1445_v14  ;;  %1380 = vmatmul.mubr.bf16.gmra.mxu1 %v1446_v15 }
  0x36   : > { %1367 = vmatprep.mubr.bf16.mxu0 %v1447_v16  ;;  %1383 = vmatprep.mubr.bf16.mxu1 %v1448_v17 }
  0x3d   : > { %1368 = vmatmul.mubr.bf16.gmra.mxu0 %v1449_v18  ;;  %1384 = vmatmul.mubr.bf16.gmra.mxu1 %v1450_v19 }
  0x3e   : > { %1371 = vmatprep.mubr.bf16.mxu0 %v1451_v20  ;;  %1387 = vmatprep.mubr.bf16.mxu1 %v1452_v21 }
  0x45   : > { %1372 = vmatmul.mubr.bf16.gmra.mxu0 %v1453_v22  ;;  %1388 = vmatmul.mubr.bf16.gmra.mxu1 %v1454_v23 }
  0xed   : > { %v1361_v25 = vpop.f32.mrf.mxu0  ;;  %v1377_v26 = vpop.f32.mrf.mxu1 }
  0xee   : > { %v789_v27 = vadd.f32 %v1361_v25, %v1570_v24  ;;  %v805_v28 = vadd.f32 %v1377_v26, %v1570_v24 }
  0xef   : > { %v554_v29 = vpop.f32.mrf.mxu0  ;;  %v618_v30 = vpop.f32.mrf.mxu1 }
  0xf0   : > { %v787_v31 = vadd.f32 %v1570_v24, %v554_v29  ;;  %v803_v32 = vadd.f32 %v1570_v24, %v618_v30  ;;  %v821_v37 = vmax.f32 %v789_v27, 0.0  ;;  %v837_v38 = vmax.f32 %v805_v28, 0.0 }
  0xf1   : > { %v1362_v33 = vpop.f32.mrf.mxu0  ;;  %v1378_v34 = vpop.f32.mrf.mxu1 }
  0xf2   : > { %v790_v35 = vadd.f32 %v1362_v33, %v1570_v24  ;;  %v806_v36 = vadd.f32 %v1378_v34, %v1570_v24  ;;  %v819_v45 = vmax.f32 %v787_v31, 0.0  ;;  %v835_v46 = vmax.f32 %v803_v32, 0.0 }
  0xf3   : > { %v557_v39 = vpop.f32.mrf.mxu0  ;;  %v621_v40 = vpop.f32.mrf.mxu1 }
  0xf4   : > { %v822_v41 = vmax.f32 %v790_v35, 0.0  ;;  %v838_v42 = vmax.f32 %v806_v36, 0.0  ;;  %v788_v43 = vadd.f32 %v1570_v24, %v557_v39  ;;  %v804_v44 = vadd.f32 %v1570_v24, %v621_v40 }
  0xf5   : > { %v1365_v47 = vpop.f32.mrf.mxu0  ;;  %v1381_v48 = vpop.f32.mrf.mxu1 }
  0xf6   : > { %v1232_v49 = vpack.c.bf16 %v822_v41, %v821_v37  ;;  %v1272_v50 = vpack.c.bf16 %v838_v42, %v837_v38  ;;  %v820_v51 = vmax.f32 %v788_v43, 0.0  ;;  %v836_v52 = vmax.f32 %v804_v44, 0.0 }
  0xf7   : > { %v793_v53 = vadd.f32 %v1365_v47, %v1570_v24  ;;  %v809_v54 = vadd.f32 %v1381_v48, %v1570_v24  ;;  %v570_v55 = vpop.f32.mrf.mxu0  ;;  %v634_v56 = vpop.f32.mrf.mxu1 }
  0xf8   : > { %1304 = vst [vmem:[%s1585_s17 + $0x8] sm:$0xff] %v1232_v49   ;;  %1312 = vst [vmem:[%s1585_s17 + $0x48] sm:$0xff] %v1272_v50   ;;  %v1227_v57 = vpack.c.bf16 %v820_v51, %v819_v45  ;;  %v1267_v58 = vpack.c.bf16 %v836_v52, %v835_v46  ;;  %v791_v59 = vadd.f32 %v1570_v24, %v570_v55 }
  0xf9   : > { %v807_v60 = vadd.f32 %v1570_v24, %v634_v56  ;;  %v1366_v61 = vpop.f32.mrf.mxu0  ;;  %v1382_v62 = vpop.f32.mrf.mxu1  ;;  %v825_v1 = vmax.f32 %v793_v53, 0.0  ;;  %v841_v2 = vmax.f32 %v809_v54, 0.0 }
  0xfa   : > { %1228 = vst [vmem:[%s1585_s17] sm:$0xff] %v1227_v57   ;;  %1311 = vst [vmem:[%s1585_s17 + $0x40] sm:$0xff] %v1267_v58   ;;  %v794_v63 = vadd.f32 %v1366_v61, %v1570_v24  ;;  %v810_v0 = vadd.f32 %v1382_v62, %v1570_v24  ;;  %v823_v9 = vmax.f32 %v791_v59, 0.0 }
  0xfb   : > { %v573_v3 = vpop.f32.mrf.mxu0  ;;  %v637_v4 = vpop.f32.mrf.mxu1  ;;  %v839_v10 = vmax.f32 %v807_v60, 0.0 }
  0xfc   : > { %v826_v5 = vmax.f32 %v794_v63, 0.0  ;;  %v842_v6 = vmax.f32 %v810_v0, 0.0  ;;  %v792_v7 = vadd.f32 %v1570_v24, %v573_v3  ;;  %v808_v8 = vadd.f32 %v1570_v24, %v637_v4 }
  0xfd   : > { %v1369_v11 = vpop.f32.mrf.mxu0  ;;  %v1385_v12 = vpop.f32.mrf.mxu1 }
  0xfe   : > { %v1242_v13 = vpack.c.bf16 %v826_v5, %v825_v1  ;;  %v1282_v14 = vpack.c.bf16 %v842_v6, %v841_v2  ;;  %v824_v15 = vmax.f32 %v792_v7, 0.0  ;;  %v840_v16 = vmax.f32 %v808_v8, 0.0 }
  0xff   : > { %v797_v17 = vadd.f32 %v1369_v11, %v1570_v24  ;;  %v813_v18 = vadd.f32 %v1385_v12, %v1570_v24  ;;  %v586_v19 = vpop.f32.mrf.mxu0  ;;  %v650_v20 = vpop.f32.mrf.mxu1 }
 0x100   : > { %1306 = vst [vmem:[%s1585_s17 + $0x18] sm:$0xff] %v1242_v13   ;;  %1314 = vst [vmem:[%s1585_s17 + $0x58] sm:$0xff] %v1282_v14   ;;  %v1237_v21 = vpack.c.bf16 %v824_v15, %v823_v9  ;;  %v1277_v22 = vpack.c.bf16 %v840_v16, %v839_v10  ;;  %v795_v23 = vadd.f32 %v1570_v24, %v586_v19 }
 0x101   : > { %v811_v25 = vadd.f32 %v1570_v24, %v650_v20  ;;  %v1370_v26 = vpop.f32.mrf.mxu0  ;;  %v1386_v27 = vpop.f32.mrf.mxu1  ;;  %v829_v30 = vmax.f32 %v797_v17, 0.0  ;;  %v845_v31 = vmax.f32 %v813_v18, 0.0 }
 0x102   : > { %1305 = vst [vmem:[%s1585_s17 + $0x10] sm:$0xff] %v1237_v21   ;;  %1313 = vst [vmem:[%s1585_s17 + $0x50] sm:$0xff] %v1277_v22   ;;  %v798_v28 = vadd.f32 %v1370_v26, %v1570_v24  ;;  %v814_v29 = vadd.f32 %v1386_v27, %v1570_v24  ;;  %v827_v38 = vmax.f32 %v795_v23, 0.0 }
 0x103   : > { %v589_v32 = vpop.f32.mrf.mxu0  ;;  %v653_v33 = vpop.f32.mrf.mxu1  ;;  %v843_v39 = vmax.f32 %v811_v25, 0.0 }
 0x104   : > { %v830_v34 = vmax.f32 %v798_v28, 0.0  ;;  %v846_v35 = vmax.f32 %v814_v29, 0.0  ;;  %v796_v36 = vadd.f32 %v1570_v24, %v589_v32  ;;  %v812_v37 = vadd.f32 %v1570_v24, %v653_v33 }
 0x105   : > { %v1373_v40 = vpop.f32.mrf.mxu0  ;;  %v1389_v41 = vpop.f32.mrf.mxu1 }
 0x106   : > { %v1252_v42 = vpack.c.bf16 %v830_v34, %v829_v30  ;;  %v1292_v43 = vpack.c.bf16 %v846_v35, %v845_v31  ;;  %v828_v44 = vmax.f32 %v796_v36, 0.0  ;;  %v844_v45 = vmax.f32 %v812_v37, 0.0 }
 0x107   : > { %v801_v46 = vadd.f32 %v1373_v40, %v1570_v24  ;;  %v817_v47 = vadd.f32 %v1389_v41, %v1570_v24  ;;  %v602_v48 = vpop.f32.mrf.mxu0  ;;  %v666_v49 = vpop.f32.mrf.mxu1 }
 0x108   : > { %1308 = vst [vmem:[%s1585_s17 + $0x28] sm:$0xff] %v1252_v42   ;;  %1316 = vst [vmem:[%s1585_s17 + $0x68] sm:$0xff] %v1292_v43   ;;  %v1247_v50 = vpack.c.bf16 %v828_v44, %v827_v38  ;;  %v1287_v51 = vpack.c.bf16 %v844_v45, %v843_v39  ;;  %v799_v52 = vadd.f32 %v1570_v24, %v602_v48 }
 0x109   : > { %v815_v53 = vadd.f32 %v1570_v24, %v666_v49  ;;  %v1374_v54 = vpop.f32.mrf.mxu0  ;;  %v1390_v55 = vpop.f32.mrf.mxu1  ;;  %v833_v58 = vmax.f32 %v801_v46, 0.0  ;;  %v849_v59 = vmax.f32 %v817_v47, 0.0 }
 0x10a   : > { %1307 = vst [vmem:[%s1585_s17 + $0x20] sm:$0xff] %v1247_v50   ;;  %1315 = vst [vmem:[%s1585_s17 + $0x60] sm:$0xff] %v1287_v51   ;;  %v802_v56 = vadd.f32 %v1374_v54, %v1570_v24  ;;  %v818_v57 = vadd.f32 %v1390_v55, %v1570_v24  ;;  %v831_v2 = vmax.f32 %v799_v52, 0.0 }
 0x10b   : > { %v605_v60 = vpop.f32.mrf.mxu0  ;;  %v669_v61 = vpop.f32.mrf.mxu1  ;;  %v847_v3 = vmax.f32 %v815_v53, 0.0 }
 0x10c   : > { %v834_v62 = vmax.f32 %v802_v56, 0.0  ;;  %v850_v63 = vmax.f32 %v818_v57, 0.0  ;;  %v800_v0 = vadd.f32 %v1570_v24, %v605_v60  ;;  %v816_v1 = vadd.f32 %v1570_v24, %v669_v61 }
 0x10e   : > { %v1262_v4 = vpack.c.bf16 %v834_v62, %v833_v58  ;;  %v1302_v5 = vpack.c.bf16 %v850_v63, %v849_v59  ;;  %v832_v6 = vmax.f32 %v800_v0, 0.0  ;;  %v848_v7 = vmax.f32 %v816_v1, 0.0 }
 0x110   : > { %1310 = vst [vmem:[%s1585_s17 + $0x38] sm:$0xff] %v1262_v4   ;;  %1318 = vst [vmem:[%s1585_s17 + $0x78] sm:$0xff] %v1302_v5   ;;  %v1257_v8 = vpack.c.bf16 %v832_v6, %v831_v2  ;;  %v1297_v9 = vpack.c.bf16 %v848_v7, %v847_v3 }
 0x112   : > { %1309 = vst [vmem:[%s1585_s17 + $0x30] sm:$0xff] %v1257_v8   ;;  %1317 = vst [vmem:[%s1585_s17 + $0x70] sm:$0xff] %v1297_v9  }
 0x113 PF: > { %s13_s14 = sadd.s32 1, %s1477_s14   ;;  %s1640_s12 = smov %s1473_s13 }
 0x114   : > { %p10_p5 = scmp.ge.s32.totalorder %s13_s14, 26   ;;  %s1641_s13 = smov %s1643_s15 }
 0x116   :  { %12 = sbr.rel (!%p10_p5) target bundleno = 2 (0x2), region = 76 }

// kernel: alexnet_forward.15
= control target key start
LH: loop header
LB: loop body
LE: loop exit
PB: predicated region body
PF: predicated region fallthrough
CT: control target
= control target key end

     0   :  { %s1219_s6 = smov 0   ;;  %s2062_s0 = inlined_call_operand.vmem [shape: bf16[2,55,55,64], index: 0, kind: input, shape index: {}]   ;;  %s2063_s1 = inlined_call_operand.vmem [shape: bf16[2,27,55,64], index: 1, kind: output, shape index: {}]  }
   0x1 LB: > { %s1182_s7 = sadd.s32 4294967295, %s1207_s6   ;;  %p1186_p0 = scmp.ge.s32.totalorder %s1207_s6, 1  ;;  %s1207_s6 = sphi %s1219_s6, %s11_s6  }
   0x2   : > { %p87_p1 = scmp.lt.s32.totalorder %s1207_s6, 3 }
   0x4   : > { %p88_p2 = pnand %p1186_p0, %p87_p1 }
   0x5   : > { %p107_p3 = scmp.lt.s32.totalorder (!%p88_p2), %s1182_s7, 1 }
   0x6   : > { %91 = sbr.rel (%p88_p2) target bundleno = 218 (0xda), region = 24 }
   0xb   : > { %s2067_s7 = smov (!%p107_p3, %s1182_s7), 1  ;;  %vm880_vm0 = vcmask 519168   ;;  %vm888_vm1 = vsmask.f32 3328 }
   0xc   : > { %s1191_s8 = smul.u32 1540, %s2067_s7  ;;  %vm1236_vm2 = vmand %vm880_vm0, %vm888_vm1 }
   0xd   : > { %s1192_s12 = smul.u32 756, %s2067_s7 }
   0xe   : > { %s1230_s11 = scalar_lea.vmem %s2062_s0, %s1191_s8 }
   0xf   : > { %v117_v0 = vld [vmem:[%s1230_s11] sm:$0xf]  ;;  %v124_v1 = vld [vmem:[%s1230_s11 + $0x1c] sm:$0xf]  ;;  %v131_v2 = vld [vmem:[%s1230_s11 + $0x38] sm:$0xf]  ;;  %s1252_s15 = scalar_lea.vmem %s2063_s1, %s1192_s12 }
  0x10   : > { %v502_v4 = vmax.bf16 %v124_v1, %v117_v0  ;;  %v118_v5 = vld [vmem:[%s1230_s11 + $0x4] sm:$0xf]  ;;  %v125_v6 = vld [vmem:[%s1230_s11 + $0x20] sm:$0xf]  ;;  %v132_v7 = vld [vmem:[%s1230_s11 + $0x3c] sm:$0xf] }
  0x11   : > { %v503_v8 = vmax.bf16 %v125_v6, %v118_v5  ;;  %v119_v9 = vld [vmem:[%s1230_s11 + $0x8] sm:$0xf]  ;;  %v126_v10 = vld [vmem:[%s1230_s11 + $0x24] sm:$0xf]  ;;  %v133_v11 = vld [vmem:[%s1230_s11 + $0x40] sm:$0xf] }
  0x12   : > { %v691_v12 = vmax.bf16 %v502_v4, %v131_v2  ;;  %v504_v13 = vmax.bf16 %v126_v10, %v119_v9  ;;  %v120_v14 = vld [vmem:[%s1230_s11 + $0xc] sm:$0xf]  ;;  %v127_v15 = vld [vmem:[%s1230_s11 + $0x28] sm:$0xf]  ;;  %v134_v16 = vld [vmem:[%s1230_s11 + $0x44] sm:$0xf] }
  0x13   : > { %v692_v17 = vmax.bf16 %v503_v8, %v132_v7  ;;  %v505_v18 = vmax.bf16 %v127_v15, %v120_v14  ;;  %v121_v19 = vld [vmem:[%s1230_s11 + $0x10] sm:$0xf]  ;;  %v128_v20 = vld [vmem:[%s1230_s11 + $0x2c] sm:$0xf]  ;;  %v135_v21 = vld [vmem:[%s1230_s11 + $0x48] sm:$0xf] }
  0x14   : > { %881 = vst.msk [vmem:[%s1252_s15] sm:$0xf] %vm880_vm0, %v691_v12  ;;  %v693_v22 = vmax.bf16 %v504_v13, %v133_v11  ;;  %v506_v23 = vmax.bf16 %v128_v20, %v121_v19  ;;  %v122_v24 = vld [vmem:[%s1230_s11 + $0x14] sm:$0xf]  ;;  %v129_v25 = vld [vmem:[%s1230_s11 + $0x30] sm:$0xf] }
  0x15   : > { %v136_v26 = vld [vmem:[%s1230_s11 + $0x4c] sm:$0xf]  ;;  %882 = vst.msk [vmem:[%s1252_s15 + $0x4] sm:$0xf] %vm880_vm0, %v692_v17  ;;  %v694_v27 = vmax.bf16 %v505_v18, %v134_v16  ;;  %v507_v28 = vmax.bf16 %v129_v25, %v122_v24  ;;  %v123_v29 = vld [vmem:[%s1230_s11 + $0x18] sm:$0xf] }
  0x16   : > { %v130_v30 = vld [vmem:[%s1230_s11 + $0x34] sm:$0xf]  ;;  %v137_v31 = vld [vmem:[%s1230_s11 + $0x50] sm:$0xf]  ;;  %883 = vst.msk [vmem:[%s1252_s15 + $0x8] sm:$0xf] %vm880_vm0, %v693_v22  ;;  %v695_v32 = vmax.bf16 %v506_v23, %v135_v21 }
  0x17   : > { %v508_v33 = vmax.bf16 %v130_v30, %v123_v29  ;;  %v890_v34 = vld [vmem:[%s1252_s15 + $0x18] sm:$0xf]  ;;  %v138_v35 = vld [vmem:[%s1230_s11 + $0x54] sm:$0xf]  ;;  %v145_v36 = vld [vmem:[%s1230_s11 + $0x70] sm:$0xf]  ;;  %v696_v37 = vmax.bf16 %v507_v28, %v136_v26 }
  0x18   : > { %884 = vst.msk [vmem:[%s1252_s15 + $0xc] sm:$0xf] %vm880_vm0, %v694_v27  ;;  %v509_v38 = vmax.bf16 %v138_v35, %v131_v2  ;;  %v139_v39 = vld [vmem:[%s1230_s11 + $0x58] sm:$0xf]  ;;  %v146_v40 = vld [vmem:[%s1230_s11 + $0x74] sm:$0xf] }
  0x19   : > { %v140_v41 = vld [vmem:[%s1230_s11 + $0x5c] sm:$0xf]  ;;  %885 = vst.msk [vmem:[%s1252_s15 + $0x10] sm:$0xf] %vm880_vm0, %v695_v32  ;;  %v697_v42 = vmax.bf16 %v508_v33, %v137_v31  ;;  %v510_v43 = vmax.bf16 %v139_v39, %v132_v7  ;;  %v147_v44 = vld [vmem:[%s1230_s11 + $0x78] sm:$0xf] }
  0x1a   : > { %v511_v45 = vmax.bf16 %v140_v41, %v133_v11  ;;  %v141_v46 = vld [vmem:[%s1230_s11 + $0x60] sm:$0xf]  ;;  %v148_v47 = vld [vmem:[%s1230_s11 + $0x7c] sm:$0xf]  ;;  %886 = vst.msk [vmem:[%s1252_s15 + $0x14] sm:$0xf] %vm880_vm0, %v696_v37  ;;  %v698_v48 = vmax.bf16 %v509_v38, %v145_v36 }
  0x1b   : > { %v512_v49 = vmax.bf16 %v141_v46, %v134_v16  ;;  %v142_v50 = vld [vmem:[%s1230_s11 + $0x64] sm:$0xf]  ;;  %v149_v51 = vld [vmem:[%s1230_s11 + $0x80] sm:$0xf]  ;;  %v143_v52 = vld [vmem:[%s1230_s11 + $0x68] sm:$0xf]  ;;  %v891_v53 = vsel %vm1236_vm2, %v697_v42, %v890_v34  ;;  %v699_v54 = vmax.bf16 %v510_v43, %v146_v40 }
  0x1c   : > { %v700_v55 = vmax.bf16 %v511_v45, %v147_v44  ;;  %v513_v56 = vmax.bf16 %v142_v50, %v135_v21  ;;  %v150_v57 = vld [vmem:[%s1230_s11 + $0x84] sm:$0xf]  ;;  %v144_v58 = vld [vmem:[%s1230_s11 + $0x6c] sm:$0xf]  ;;  %v151_v59 = vld [vmem:[%s1230_s11 + $0x88] sm:$0xf]  ;;  %v514_v61 = vmax.bf16 %v143_v52, %v136_v26 }
  0x1d   : > { %892 = vst [vmem:[%s1252_s15 + $0x18] sm:$0xf] %v891_v53  ;;  %893 = vst.msk [vmem:[%s1252_s15 + $0x1c] sm:$0xf] %vm880_vm0, %v698_v48  ;;  %v701_v60 = vmax.bf16 %v512_v49, %v148_v47  ;;  %v515_v62 = vmax.bf16 %v144_v58, %v137_v31  ;;  %v899_v63 = vld [vmem:[%s1252_s15 + $0x34] sm:$0xf] }
  0x1e   : > { %v152_v0 = vld [vmem:[%s1230_s11 + $0x8c] sm:$0xf]  ;;  %v159_v1 = vld [vmem:[%s1230_s11 + $0xa8] sm:$0xf]  ;;  %894 = vst.msk [vmem:[%s1252_s15 + $0x20] sm:$0xf] %vm880_vm0, %v699_v54  ;;  %v702_v2 = vmax.bf16 %v513_v56, %v149_v51  ;;  %v703_v8 = vmax.bf16 %v514_v61, %v150_v57 }
  0x1f   : > { %895 = vst.msk [vmem:[%s1252_s15 + $0x24] sm:$0xf] %vm880_vm0, %v700_v55  ;;  %v516_v4 = vmax.bf16 %v152_v0, %v145_v36  ;;  %v153_v5 = vld [vmem:[%s1230_s11 + $0x90] sm:$0xf]  ;;  %v160_v6 = vld [vmem:[%s1230_s11 + $0xac] sm:$0xf]  ;;  %v704_v9 = vmax.bf16 %v515_v62, %v151_v59 }
  0x20   : > { %v154_v7 = vld [vmem:[%s1230_s11 + $0x94] sm:$0xf]  ;;  %896 = vst.msk [vmem:[%s1252_s15 + $0x28] sm:$0xf] %vm880_vm0, %v701_v60  ;;  %v517_v10 = vmax.bf16 %v153_v5, %v146_v40  ;;  %v161_v11 = vld [vmem:[%s1230_s11 + $0xb0] sm:$0xf] }
  0x21   : > { %v518_v12 = vmax.bf16 %v154_v7, %v147_v44  ;;  %v155_v13 = vld [vmem:[%s1230_s11 + $0x98] sm:$0xf]  ;;  %v162_v14 = vld [vmem:[%s1230_s11 + $0xb4] sm:$0xf]  ;;  %897 = vst.msk [vmem:[%s1252_s15 + $0x2c] sm:$0xf] %vm880_vm0, %v702_v2  ;;  %v705_v15 = vmax.bf16 %v516_v4, %v159_v1  ;;  %v900_v20 = vsel %vm1236_vm2, %v704_v9, %v899_v63 }
  0x22   : > { %v519_v16 = vmax.bf16 %v155_v13, %v148_v47  ;;  %v156_v17 = vld [vmem:[%s1230_s11 + $0x9c] sm:$0xf]  ;;  %v163_v18 = vld [vmem:[%s1230_s11 + $0xb8] sm:$0xf]  ;;  %v157_v19 = vld [vmem:[%s1230_s11 + $0xa0] sm:$0xf]  ;;  %v706_v21 = vmax.bf16 %v517_v10, %v160_v6 }
  0x23   : > { %898 = vst.msk [vmem:[%s1252_s15 + $0x30] sm:$0xf] %vm880_vm0, %v703_v8  ;;  %v707_v22 = vmax.bf16 %v518_v12, %v161_v11  ;;  %v520_v23 = vmax.bf16 %v156_v17, %v149_v51  ;;  %v164_v24 = vld [vmem:[%s1230_s11 + $0xbc] sm:$0xf]  ;;  %v158_v25 = vld [vmem:[%s1230_s11 + $0xa4] sm:$0xf]  ;;  %v521_v28 = vmax.bf16 %v157_v19, %v150_v57 }
  0x24   : > { %v165_v26 = vld [vmem:[%s1230_s11 + $0xc0] sm:$0xf]  ;;  %901 = vst [vmem:[%s1252_s15 + $0x34] sm:$0xf] %v900_v20  ;;  %902 = vst.msk [vmem:[%s1252_s15 + $0x38] sm:$0xf] %vm880_vm0, %v705_v15  ;;  %v708_v27 = vmax.bf16 %v519_v16, %v162_v14  ;;  %v522_v29 = vmax.bf16 %v158_v25, %v151_v59 }
  0x25   : > { %v908_v30 = vld [vmem:[%s1252_s15 + $0x50] sm:$0xf]  ;;  %v166_v31 = vld [vmem:[%s1230_s11 + $0xc4] sm:$0xf]  ;;  %v173_v32 = vld [vmem:[%s1230_s11 + $0xe0] sm:$0xf]  ;;  %v709_v33 = vmax.bf16 %v520_v23, %v163_v18  ;;  %v710_v38 = vmax.bf16 %v521_v28, %v164_v24 }
  0x26   : > { %903 = vst.msk [vmem:[%s1252_s15 + $0x3c] sm:$0xf] %vm880_vm0, %v706_v21  ;;  %904 = vst.msk [vmem:[%s1252_s15 + $0x40] sm:$0xf] %vm880_vm0, %v707_v22  ;;  %v523_v34 = vmax.bf16 %v166_v31, %v159_v1  ;;  %v167_v35 = vld [vmem:[%s1230_s11 + $0xc8] sm:$0xf]  ;;  %v711_v39 = vmax.bf16 %v522_v29, %v165_v26 }
  0x27   : > { %v174_v36 = vld [vmem:[%s1230_s11 + $0xe4] sm:$0xf]  ;;  %v168_v37 = vld [vmem:[%s1230_s11 + $0xcc] sm:$0xf]  ;;  %905 = vst.msk [vmem:[%s1252_s15 + $0x44] sm:$0xf] %vm880_vm0, %v708_v27  ;;  %v524_v40 = vmax.bf16 %v167_v35, %v160_v6 }
  0x28   : > { %v175_v41 = vld [vmem:[%s1230_s11 + $0xe8] sm:$0xf]  ;;  %v525_v42 = vmax.bf16 %v168_v37, %v161_v11  ;;  %v169_v43 = vld [vmem:[%s1230_s11 + $0xd0] sm:$0xf]  ;;  %v176_v44 = vld [vmem:[%s1230_s11 + $0xec] sm:$0xf]  ;;  %v712_v45 = vmax.bf16 %v523_v34, %v173_v32  ;;  %v909_v50 = vsel %vm1236_vm2, %v711_v39, %v908_v30 }
  0x29   : > { %906 = vst.msk [vmem:[%s1252_s15 + $0x48] sm:$0xf] %vm880_vm0, %v709_v33  ;;  %v526_v46 = vmax.bf16 %v169_v43, %v162_v14  ;;  %v170_v47 = vld [vmem:[%s1230_s11 + $0xd4] sm:$0xf]  ;;  %v177_v48 = vld [vmem:[%s1230_s11 + $0xf0] sm:$0xf]  ;;  %v713_v51 = vmax.bf16 %v524_v40, %v174_v36 }
  0x2a   : > { %v171_v49 = vld [vmem:[%s1230_s11 + $0xd8] sm:$0xf]  ;;  %907 = vst.msk [vmem:[%s1252_s15 + $0x4c] sm:$0xf] %vm880_vm0, %v710_v38  ;;  %v714_v52 = vmax.bf16 %v525_v42, %v175_v41  ;;  %v527_v53 = vmax.bf16 %v170_v47, %v163_v18  ;;  %v178_v54 = vld [vmem:[%s1230_s11 + $0xf4] sm:$0xf] }
  0x2b   : > { %v172_v55 = vld [vmem:[%s1230_s11 + $0xdc] sm:$0xf]  ;;  %v179_v56 = vld [vmem:[%s1230_s11 + $0xf8] sm:$0xf]  ;;  %910 = vst [vmem:[%s1252_s15 + $0x50] sm:$0xf] %v909_v50  ;;  %v715_v57 = vmax.bf16 %v526_v46, %v176_v44  ;;  %v528_v58 = vmax.bf16 %v171_v49, %v164_v24 }
  0x2c   : > { %911 = vst.msk [vmem:[%s1252_s15 + $0x54] sm:$0xf] %vm880_vm0, %v712_v45  ;;  %v529_v59 = vmax.bf16 %v172_v55, %v165_v26  ;;  %v917_v60 = vld [vmem:[%s1252_s15 + $0x6c] sm:$0xf]  ;;  %v180_v61 = vld [vmem:[%s1230_s11 + $0xfc] sm:$0xf]  ;;  %v716_v63 = vmax.bf16 %v527_v53, %v177_v48 }
  0x2d   : > { %v187_v62 = vld [vmem:[%s1230_s11 + $0x118] sm:$0xf]  ;;  %912 = vst.msk [vmem:[%s1252_s15 + $0x58] sm:$0xf] %vm880_vm0, %v713_v51  ;;  %913 = vst.msk [vmem:[%s1252_s15 + $0x5c] sm:$0xf] %vm880_vm0, %v714_v52  ;;  %v530_v0 = vmax.bf16 %v180_v61, %v173_v32  ;;  %v717_v5 = vmax.bf16 %v528_v58, %v178_v54 }
  0x2e   : > { %v181_v1 = vld [vmem:[%s1230_s11 + $0x100] sm:$0xf]  ;;  %v188_v2 = vld [vmem:[%s1230_s11 + $0x11c] sm:$0xf]  ;;  %v182_v4 = vld [vmem:[%s1230_s11 + $0x104] sm:$0xf]  ;;  %v718_v6 = vmax.bf16 %v529_v59, %v179_v56 }
  0x2f   : > { %914 = vst.msk [vmem:[%s1252_s15 + $0x60] sm:$0xf] %vm880_vm0, %v715_v57  ;;  %v531_v7 = vmax.bf16 %v181_v1, %v174_v36  ;;  %v189_v8 = vld [vmem:[%s1230_s11 + $0x120] sm:$0xf]  ;;  %v532_v9 = vmax.bf16 %v182_v4, %v175_v41  ;;  %v183_v10 = vld [vmem:[%s1230_s11 + $0x108] sm:$0xf]  ;;  %v719_v12 = vmax.bf16 %v530_v0, %v187_v62 }
  0x30   : > { %v190_v11 = vld [vmem:[%s1230_s11 + $0x124] sm:$0xf]  ;;  %915 = vst.msk [vmem:[%s1252_s15 + $0x64] sm:$0xf] %vm880_vm0, %v716_v63  ;;  %v533_v13 = vmax.bf16 %v183_v10, %v176_v44  ;;  %v184_v14 = vld [vmem:[%s1230_s11 + $0x10c] sm:$0xf]  ;;  %v918_v17 = vsel %vm1236_vm2, %v718_v6, %v917_v60 }
  0x31   : > { %v191_v15 = vld [vmem:[%s1230_s11 + $0x128] sm:$0xf]  ;;  %v185_v16 = vld [vmem:[%s1230_s11 + $0x110] sm:$0xf]  ;;  %916 = vst.msk [vmem:[%s1252_s15 + $0x68] sm:$0xf] %vm880_vm0, %v717_v5  ;;  %v720_v18 = vmax.bf16 %v531_v7, %v188_v2  ;;  %v721_v19 = vmax.bf16 %v532_v9, %v189_v8  ;;  %v534_v20 = vmax.bf16 %v184_v14, %v177_v48 }
  0x32   : > { %v192_v21 = vld [vmem:[%s1230_s11 + $0x12c] sm:$0xf]  ;;  %v186_v22 = vld [vmem:[%s1230_s11 + $0x114] sm:$0xf]  ;;  %v193_v23 = vld [vmem:[%s1230_s11 + $0x130] sm:$0xf]  ;;  %v722_v24 = vmax.bf16 %v533_v13, %v190_v11  ;;  %v535_v25 = vmax.bf16 %v185_v16, %v178_v54 }
  0x33   : > { %919 = vst [vmem:[%s1252_s15 + $0x6c] sm:$0xf] %v918_v17  ;;  %920 = vst.msk [vmem:[%s1252_s15 + $0x70] sm:$0xf] %vm880_vm0, %v719_v12  ;;  %v536_v26 = vmax.bf16 %v186_v22, %v179_v56  ;;  %v926_v27 = vld [vmem:[%s1252_s15 + $0x88] sm:$0xf]  ;;  %v723_v30 = vmax.bf16 %v534_v20, %v191_v15 }
  0x34   : > { %v194_v28 = vld [vmem:[%s1230_s11 + $0x134] sm:$0xf]  ;;  %v201_v29 = vld [vmem:[%s1230_s11 + $0x150] sm:$0xf]  ;;  %921 = vst.msk [vmem:[%s1252_s15 + $0x74] sm:$0xf] %vm880_vm0, %v720_v18  ;;  %v724_v35 = vmax.bf16 %v535_v25, %v192_v21 }
  0x35   : > { %922 = vst.msk [vmem:[%s1252_s15 + $0x78] sm:$0xf] %vm880_vm0, %v721_v19  ;;  %v537_v31 = vmax.bf16 %v194_v28, %v187_v62  ;;  %v195_v32 = vld [vmem:[%s1230_s11 + $0x138] sm:$0xf]  ;;  %v202_v33 = vld [vmem:[%s1230_s11 + $0x154] sm:$0xf]  ;;  %v725_v36 = vmax.bf16 %v536_v26, %v193_v23 }
  0x36   : > { %v196_v34 = vld [vmem:[%s1230_s11 + $0x13c] sm:$0xf]  ;;  %923 = vst.msk [vmem:[%s1252_s15 + $0x7c] sm:$0xf] %vm880_vm0, %v722_v24  ;;  %v538_v37 = vmax.bf16 %v195_v32, %v188_v2  ;;  %v203_v38 = vld [vmem:[%s1230_s11 + $0x158] sm:$0xf] }
  0x37   : > { %v539_v39 = vmax.bf16 %v196_v34, %v189_v8  ;;  %v197_v40 = vld [vmem:[%s1230_s11 + $0x140] sm:$0xf]  ;;  %v204_v41 = vld [vmem:[%s1230_s11 + $0x15c] sm:$0xf]  ;;  %924 = vst.msk [vmem:[%s1252_s15 + $0x80] sm:$0xf] %vm880_vm0, %v723_v30  ;;  %v726_v42 = vmax.bf16 %v537_v31, %v201_v29  ;;  %v927_v47 = vsel %vm1236_vm2, %v725_v36, %v926_v27 }
  0x38   : > { %v540_v43 = vmax.bf16 %v197_v40, %v190_v11  ;;  %v198_v44 = vld [vmem:[%s1230_s11 + $0x144] sm:$0xf]  ;;  %v205_v45 = vld [vmem:[%s1230_s11 + $0x160] sm:$0xf]  ;;  %v199_v46 = vld [vmem:[%s1230_s11 + $0x148] sm:$0xf]  ;;  %v727_v48 = vmax.bf16 %v538_v37, %v202_v33 }
  0x39   : > { %925 = vst.msk [vmem:[%s1252_s15 + $0x84] sm:$0xf] %vm880_vm0, %v724_v35  ;;  %v728_v49 = vmax.bf16 %v539_v39, %v203_v38  ;;  %v541_v50 = vmax.bf16 %v198_v44, %v191_v15  ;;  %v206_v51 = vld [vmem:[%s1230_s11 + $0x164] sm:$0xf]  ;;  %v200_v52 = vld [vmem:[%s1230_s11 + $0x14c] sm:$0xf]  ;;  %v542_v55 = vmax.bf16 %v199_v46, %v192_v21 }
  0x3a   : > { %v207_v53 = vld [vmem:[%s1230_s11 + $0x168] sm:$0xf]  ;;  %928 = vst [vmem:[%s1252_s15 + $0x88] sm:$0xf] %v927_v47  ;;  %929 = vst.msk [vmem:[%s1252_s15 + $0x8c] sm:$0xf] %vm880_vm0, %v726_v42  ;;  %v729_v54 = vmax.bf16 %v540_v43, %v204_v41  ;;  %v543_v56 = vmax.bf16 %v200_v52, %v193_v23 }
  0x3b   : > { %v935_v57 = vld [vmem:[%s1252_s15 + $0xa4] sm:$0xf]  ;;  %v208_v58 = vld [vmem:[%s1230_s11 + $0x16c] sm:$0xf]  ;;  %v215_v59 = vld [vmem:[%s1230_s11 + $0x188] sm:$0xf]  ;;  %v730_v60 = vmax.bf16 %v541_v50, %v205_v45  ;;  %v731_v1 = vmax.bf16 %v542_v55, %v206_v51 }
  0x3c   : > { %930 = vst.msk [vmem:[%s1252_s15 + $0x90] sm:$0xf] %vm880_vm0, %v727_v48  ;;  %931 = vst.msk [vmem:[%s1252_s15 + $0x94] sm:$0xf] %vm880_vm0, %v728_v49  ;;  %v544_v61 = vmax.bf16 %v208_v58, %v201_v29  ;;  %v209_v62 = vld [vmem:[%s1230_s11 + $0x170] sm:$0xf]  ;;  %v732_v2 = vmax.bf16 %v543_v56, %v207_v53 }
  0x3d   : > { %v216_v63 = vld [vmem:[%s1230_s11 + $0x18c] sm:$0xf]  ;;  %v210_v0 = vld [vmem:[%s1230_s11 + $0x174] sm:$0xf]  ;;  %932 = vst.msk [vmem:[%s1252_s15 + $0x98] sm:$0xf] %vm880_vm0, %v729_v54  ;;  %v545_v4 = vmax.bf16 %v209_v62, %v202_v33 }
  0x3e   : > { %v217_v5 = vld [vmem:[%s1230_s11 + $0x190] sm:$0xf]  ;;  %v546_v6 = vmax.bf16 %v210_v0, %v203_v38  ;;  %v211_v7 = vld [vmem:[%s1230_s11 + $0x178] sm:$0xf]  ;;  %v218_v8 = vld [vmem:[%s1230_s11 + $0x194] sm:$0xf]  ;;  %v733_v9 = vmax.bf16 %v544_v61, %v215_v59  ;;  %v936_v14 = vsel %vm1236_vm2, %v732_v2, %v935_v57 }
  0x3f   : > { %933 = vst.msk [vmem:[%s1252_s15 + $0x9c] sm:$0xf] %vm880_vm0, %v730_v60  ;;  %v547_v10 = vmax.bf16 %v211_v7, %v204_v41  ;;  %v212_v11 = vld [vmem:[%s1230_s11 + $0x17c] sm:$0xf]  ;;  %v219_v12 = vld [vmem:[%s1230_s11 + $0x198] sm:$0xf]  ;;  %v734_v15 = vmax.bf16 %v545_v4, %v216_v63 }
  0x40   : > { %v213_v13 = vld [vmem:[%s1230_s11 + $0x180] sm:$0xf]  ;;  %934 = vst.msk [vmem:[%s1252_s15 + $0xa0] sm:$0xf] %vm880_vm0, %v731_v1  ;;  %v735_v16 = vmax.bf16 %v546_v6, %v217_v5  ;;  %v548_v17 = vmax.bf16 %v212_v11, %v205_v45  ;;  %v220_v18 = vld [vmem:[%s1230_s11 + $0x19c] sm:$0xf] }
  0x41   : > { %v214_v19 = vld [vmem:[%s1230_s11 + $0x184] sm:$0xf]  ;;  %v221_v20 = vld [vmem:[%s1230_s11 + $0x1a0] sm:$0xf]  ;;  %937 = vst [vmem:[%s1252_s15 + $0xa4] sm:$0xf] %v936_v14  ;;  %v736_v21 = vmax.bf16 %v547_v10, %v218_v8  ;;  %v549_v22 = vmax.bf16 %v213_v13, %v206_v51 }
  0x42   : > { %938 = vst.msk [vmem:[%s1252_s15 + $0xa8] sm:$0xf] %vm880_vm0, %v733_v9  ;;  %v550_v23 = vmax.bf16 %v214_v19, %v207_v53  ;;  %v944_v24 = vld [vmem:[%s1252_s15 + $0xc0] sm:$0xf]  ;;  %v222_v25 = vld [vmem:[%s1230_s11 + $0x1a4] sm:$0xf]  ;;  %v737_v27 = vmax.bf16 %v548_v17, %v219_v12 }
  0x43   : > { %v229_v26 = vld [vmem:[%s1230_s11 + $0x1c0] sm:$0xf]  ;;  %939 = vst.msk [vmem:[%s1252_s15 + $0xac] sm:$0xf] %vm880_vm0, %v734_v15  ;;  %940 = vst.msk [vmem:[%s1252_s15 + $0xb0] sm:$0xf] %vm880_vm0, %v735_v16  ;;  %v551_v28 = vmax.bf16 %v222_v25, %v215_v59  ;;  %v738_v32 = vmax.bf16 %v549_v22, %v220_v18 }
  0x44   : > { %v223_v29 = vld [vmem:[%s1230_s11 + $0x1a8] sm:$0xf]  ;;  %v230_v30 = vld [vmem:[%s1230_s11 + $0x1c4] sm:$0xf]  ;;  %v224_v31 = vld [vmem:[%s1230_s11 + $0x1ac] sm:$0xf]  ;;  %v739_v33 = vmax.bf16 %v550_v23, %v221_v20 }
  0x45   : > { %941 = vst.msk [vmem:[%s1252_s15 + $0xb4] sm:$0xf] %vm880_vm0, %v736_v21  ;;  %v552_v34 = vmax.bf16 %v223_v29, %v216_v63  ;;  %v231_v35 = vld [vmem:[%s1230_s11 + $0x1c8] sm:$0xf]  ;;  %v553_v36 = vmax.bf16 %v224_v31, %v217_v5  ;;  %v225_v37 = vld [vmem:[%s1230_s11 + $0x1b0] sm:$0xf]  ;;  %v740_v39 = vmax.bf16 %v551_v28, %v229_v26 }
  0x46   : > { %v232_v38 = vld [vmem:[%s1230_s11 + $0x1cc] sm:$0xf]  ;;  %942 = vst.msk [vmem:[%s1252_s15 + $0xb8] sm:$0xf] %vm880_vm0, %v737_v27  ;;  %v554_v40 = vmax.bf16 %v225_v37, %v218_v8  ;;  %v226_v41 = vld [vmem:[%s1230_s11 + $0x1b4] sm:$0xf]  ;;  %v945_v44 = vsel %vm1236_vm2, %v739_v33, %v944_v24 }
  0x47   : > { %v233_v42 = vld [vmem:[%s1230_s11 + $0x1d0] sm:$0xf]  ;;  %v227_v43 = vld [vmem:[%s1230_s11 + $0x1b8] sm:$0xf]  ;;  %943 = vst.msk [vmem:[%s1252_s15 + $0xbc] sm:$0xf] %vm880_vm0, %v738_v32  ;;  %v741_v45 = vmax.bf16 %v552_v34, %v230_v30  ;;  %v742_v46 = vmax.bf16 %v553_v36, %v231_v35  ;;  %v555_v47 = vmax.bf16 %v226_v41, %v219_v12 }
  0x48   : > { %v234_v48 = vld [vmem:[%s1230_s11 + $0x1d4] sm:$0xf]  ;;  %v228_v49 = vld [vmem:[%s1230_s11 + $0x1bc] sm:$0xf]  ;;  %v235_v50 = vld [vmem:[%s1230_s11 + $0x1d8] sm:$0xf]  ;;  %v743_v51 = vmax.bf16 %v554_v40, %v232_v38  ;;  %v556_v52 = vmax.bf16 %v227_v43, %v220_v18 }
  0x49   : > { %946 = vst [vmem:[%s1252_s15 + $0xc0] sm:$0xf] %v945_v44  ;;  %947 = vst.msk [vmem:[%s1252_s15 + $0xc4] sm:$0xf] %vm880_vm0, %v740_v39  ;;  %v557_v53 = vmax.bf16 %v228_v49, %v221_v20  ;;  %v953_v54 = vld [vmem:[%s1252_s15 + $0xdc] sm:$0xf]  ;;  %v744_v57 = vmax.bf16 %v555_v47, %v233_v42 }
  0x4a   : > { %v236_v55 = vld [vmem:[%s1230_s11 + $0x1dc] sm:$0xf]  ;;  %v243_v56 = vld [vmem:[%s1230_s11 + $0x1f8] sm:$0xf]  ;;  %948 = vst.msk [vmem:[%s1252_s15 + $0xc8] sm:$0xf] %vm880_vm0, %v741_v45  ;;  %v745_v62 = vmax.bf16 %v556_v52, %v234_v48 }
  0x4b   : > { %949 = vst.msk [vmem:[%s1252_s15 + $0xcc] sm:$0xf] %vm880_vm0, %v742_v46  ;;  %v558_v58 = vmax.bf16 %v236_v55, %v229_v26  ;;  %v237_v59 = vld [vmem:[%s1230_s11 + $0x1e0] sm:$0xf]  ;;  %v244_v60 = vld [vmem:[%s1230_s11 + $0x1fc] sm:$0xf]  ;;  %v746_v63 = vmax.bf16 %v557_v53, %v235_v50 }
  0x4c   : > { %v238_v61 = vld [vmem:[%s1230_s11 + $0x1e4] sm:$0xf]  ;;  %950 = vst.msk [vmem:[%s1252_s15 + $0xd0] sm:$0xf] %vm880_vm0, %v743_v51  ;;  %v559_v0 = vmax.bf16 %v237_v59, %v230_v30  ;;  %v245_v1 = vld [vmem:[%s1230_s11 + $0x200] sm:$0xf] }
  0x4d   : > { %v560_v2 = vmax.bf16 %v238_v61, %v231_v35  ;;  %v239_v4 = vld [vmem:[%s1230_s11 + $0x1e8] sm:$0xf]  ;;  %v246_v5 = vld [vmem:[%s1230_s11 + $0x204] sm:$0xf]  ;;  %951 = vst.msk [vmem:[%s1252_s15 + $0xd4] sm:$0xf] %vm880_vm0, %v744_v57  ;;  %v747_v6 = vmax.bf16 %v558_v58, %v243_v56  ;;  %v954_v11 = vsel %vm1236_vm2, %v746_v63, %v953_v54 }
  0x4e   : > { %v561_v7 = vmax.bf16 %v239_v4, %v232_v38  ;;  %v240_v8 = vld [vmem:[%s1230_s11 + $0x1ec] sm:$0xf]  ;;  %v247_v9 = vld [vmem:[%s1230_s11 + $0x208] sm:$0xf]  ;;  %v241_v10 = vld [vmem:[%s1230_s11 + $0x1f0] sm:$0xf]  ;;  %v748_v12 = vmax.bf16 %v559_v0, %v244_v60 }
  0x4f   : > { %952 = vst.msk [vmem:[%s1252_s15 + $0xd8] sm:$0xf] %vm880_vm0, %v745_v62  ;;  %v749_v13 = vmax.bf16 %v560_v2, %v245_v1  ;;  %v562_v14 = vmax.bf16 %v240_v8, %v233_v42  ;;  %v248_v15 = vld [vmem:[%s1230_s11 + $0x20c] sm:$0xf]  ;;  %v242_v16 = vld [vmem:[%s1230_s11 + $0x1f4] sm:$0xf]  ;;  %v563_v19 = vmax.bf16 %v241_v10, %v234_v48 }
  0x50   : > { %v249_v17 = vld [vmem:[%s1230_s11 + $0x210] sm:$0xf]  ;;  %955 = vst [vmem:[%s1252_s15 + $0xdc] sm:$0xf] %v954_v11  ;;  %956 = vst.msk [vmem:[%s1252_s15 + $0xe0] sm:$0xf] %vm880_vm0, %v747_v6  ;;  %v750_v18 = vmax.bf16 %v561_v7, %v246_v5  ;;  %v564_v20 = vmax.bf16 %v242_v16, %v235_v50 }
  0x51   : > { %v962_v21 = vld [vmem:[%s1252_s15 + $0xf8] sm:$0xf]  ;;  %v250_v22 = vld [vmem:[%s1230_s11 + $0x214] sm:$0xf]  ;;  %v257_v23 = vld [vmem:[%s1230_s11 + $0x230] sm:$0xf]  ;;  %v751_v24 = vmax.bf16 %v562_v14, %v247_v9  ;;  %v752_v29 = vmax.bf16 %v563_v19, %v248_v15 }
  0x52   : > { %957 = vst.msk [vmem:[%s1252_s15 + $0xe4] sm:$0xf] %vm880_vm0, %v748_v12  ;;  %958 = vst.msk [vmem:[%s1252_s15 + $0xe8] sm:$0xf] %vm880_vm0, %v749_v13  ;;  %v565_v25 = vmax.bf16 %v250_v22, %v243_v56  ;;  %v251_v26 = vld [vmem:[%s1230_s11 + $0x218] sm:$0xf]  ;;  %v753_v30 = vmax.bf16 %v564_v20, %v249_v17 }
  0x53   : > { %v258_v27 = vld [vmem:[%s1230_s11 + $0x234] sm:$0xf]  ;;  %v252_v28 = vld [vmem:[%s1230_s11 + $0x21c] sm:$0xf]  ;;  %959 = vst.msk [vmem:[%s1252_s15 + $0xec] sm:$0xf] %vm880_vm0, %v750_v18  ;;  %v566_v31 = vmax.bf16 %v251_v26, %v244_v60 }
  0x54   : > { %v259_v32 = vld [vmem:[%s1230_s11 + $0x238] sm:$0xf]  ;;  %v567_v33 = vmax.bf16 %v252_v28, %v245_v1  ;;  %v253_v34 = vld [vmem:[%s1230_s11 + $0x220] sm:$0xf]  ;;  %v260_v35 = vld [vmem:[%s1230_s11 + $0x23c] sm:$0xf]  ;;  %v754_v36 = vmax.bf16 %v565_v25, %v257_v23  ;;  %v963_v41 = vsel %vm1236_vm2, %v753_v30, %v962_v21 }
  0x55   : > { %960 = vst.msk [vmem:[%s1252_s15 + $0xf0] sm:$0xf] %vm880_vm0, %v751_v24  ;;  %v568_v37 = vmax.bf16 %v253_v34, %v246_v5  ;;  %v254_v38 = vld [vmem:[%s1230_s11 + $0x224] sm:$0xf]  ;;  %v261_v39 = vld [vmem:[%s1230_s11 + $0x240] sm:$0xf]  ;;  %v755_v42 = vmax.bf16 %v566_v31, %v258_v27 }
  0x56   : > { %v255_v40 = vld [vmem:[%s1230_s11 + $0x228] sm:$0xf]  ;;  %961 = vst.msk [vmem:[%s1252_s15 + $0xf4] sm:$0xf] %vm880_vm0, %v752_v29  ;;  %v756_v43 = vmax.bf16 %v567_v33, %v259_v32  ;;  %v569_v44 = vmax.bf16 %v254_v38, %v247_v9  ;;  %v262_v45 = vld [vmem:[%s1230_s11 + $0x244] sm:$0xf] }
  0x57   : > { %v256_v46 = vld [vmem:[%s1230_s11 + $0x22c] sm:$0xf]  ;;  %v263_v47 = vld [vmem:[%s1230_s11 + $0x248] sm:$0xf]  ;;  %964 = vst [vmem:[%s1252_s15 + $0xf8] sm:$0xf] %v963_v41  ;;  %v757_v48 = vmax.bf16 %v568_v37, %v260_v35  ;;  %v570_v49 = vmax.bf16 %v255_v40, %v248_v15 }
  0x58   : > { %965 = vst.msk [vmem:[%s1252_s15 + $0xfc] sm:$0xf] %vm880_vm0, %v754_v36  ;;  %v571_v50 = vmax.bf16 %v256_v46, %v249_v17  ;;  %v971_v51 = vld [vmem:[%s1252_s15 + $0x114] sm:$0xf]  ;;  %v264_v52 = vld [vmem:[%s1230_s11 + $0x24c] sm:$0xf]  ;;  %v758_v54 = vmax.bf16 %v569_v44, %v261_v39 }
  0x59   : > { %v271_v53 = vld [vmem:[%s1230_s11 + $0x268] sm:$0xf]  ;;  %966 = vst.msk [vmem:[%s1252_s15 + $0x100] sm:$0xf] %vm880_vm0, %v755_v42  ;;  %967 = vst.msk [vmem:[%s1252_s15 + $0x104] sm:$0xf] %vm880_vm0, %v756_v43  ;;  %v572_v55 = vmax.bf16 %v264_v52, %v257_v23  ;;  %v759_v59 = vmax.bf16 %v570_v49, %v262_v45 }
  0x5a   : > { %v265_v56 = vld [vmem:[%s1230_s11 + $0x250] sm:$0xf]  ;;  %v272_v57 = vld [vmem:[%s1230_s11 + $0x26c] sm:$0xf]  ;;  %v266_v58 = vld [vmem:[%s1230_s11 + $0x254] sm:$0xf]  ;;  %v760_v60 = vmax.bf16 %v571_v50, %v263_v47 }
  0x5b   : > { %968 = vst.msk [vmem:[%s1252_s15 + $0x108] sm:$0xf] %vm880_vm0, %v757_v48  ;;  %v573_v61 = vmax.bf16 %v265_v56, %v258_v27  ;;  %v273_v62 = vld [vmem:[%s1230_s11 + $0x270] sm:$0xf]  ;;  %v574_v63 = vmax.bf16 %v266_v58, %v259_v32  ;;  %v267_v0 = vld [vmem:[%s1230_s11 + $0x258] sm:$0xf]  ;;  %v761_v2 = vmax.bf16 %v572_v55, %v271_v53 }
  0x5c   : > { %v274_v1 = vld [vmem:[%s1230_s11 + $0x274] sm:$0xf]  ;;  %969 = vst.msk [vmem:[%s1252_s15 + $0x10c] sm:$0xf] %vm880_vm0, %v758_v54  ;;  %v575_v4 = vmax.bf16 %v267_v0, %v260_v35  ;;  %v268_v5 = vld [vmem:[%s1230_s11 + $0x25c] sm:$0xf]  ;;  %v972_v8 = vsel %vm1236_vm2, %v760_v60, %v971_v51 }
  0x5d   : > { %v275_v6 = vld [vmem:[%s1230_s11 + $0x278] sm:$0xf]  ;;  %v269_v7 = vld [vmem:[%s1230_s11 + $0x260] sm:$0xf]  ;;  %970 = vst.msk [vmem:[%s1252_s15 + $0x110] sm:$0xf] %vm880_vm0, %v759_v59  ;;  %v762_v9 = vmax.bf16 %v573_v61, %v272_v57  ;;  %v763_v10 = vmax.bf16 %v574_v63, %v273_v62  ;;  %v576_v11 = vmax.bf16 %v268_v5, %v261_v39 }
  0x5e   : > { %v276_v12 = vld [vmem:[%s1230_s11 + $0x27c] sm:$0xf]  ;;  %v270_v13 = vld [vmem:[%s1230_s11 + $0x264] sm:$0xf]  ;;  %v277_v14 = vld [vmem:[%s1230_s11 + $0x280] sm:$0xf]  ;;  %v764_v15 = vmax.bf16 %v575_v4, %v274_v1  ;;  %v577_v16 = vmax.bf16 %v269_v7, %v262_v45 }
  0x5f   : > { %973 = vst [vmem:[%s1252_s15 + $0x114] sm:$0xf] %v972_v8  ;;  %974 = vst.msk [vmem:[%s1252_s15 + $0x118] sm:$0xf] %vm880_vm0, %v761_v2  ;;  %v578_v17 = vmax.bf16 %v270_v13, %v263_v47  ;;  %v980_v18 = vld [vmem:[%s1252_s15 + $0x130] sm:$0xf]  ;;  %v765_v21 = vmax.bf16 %v576_v11, %v275_v6 }
  0x60   : > { %v278_v19 = vld [vmem:[%s1230_s11 + $0x284] sm:$0xf]  ;;  %v285_v20 = vld [vmem:[%s1230_s11 + $0x2a0] sm:$0xf]  ;;  %975 = vst.msk [vmem:[%s1252_s15 + $0x11c] sm:$0xf] %vm880_vm0, %v762_v9  ;;  %v766_v26 = vmax.bf16 %v577_v16, %v276_v12 }
  0x61   : > { %976 = vst.msk [vmem:[%s1252_s15 + $0x120] sm:$0xf] %vm880_vm0, %v763_v10  ;;  %v579_v22 = vmax.bf16 %v278_v19, %v271_v53  ;;  %v279_v23 = vld [vmem:[%s1230_s11 + $0x288] sm:$0xf]  ;;  %v286_v24 = vld [vmem:[%s1230_s11 + $0x2a4] sm:$0xf]  ;;  %v767_v27 = vmax.bf16 %v578_v17, %v277_v14 }
  0x62   : > { %v280_v25 = vld [vmem:[%s1230_s11 + $0x28c] sm:$0xf]  ;;  %977 = vst.msk [vmem:[%s1252_s15 + $0x124] sm:$0xf] %vm880_vm0, %v764_v15  ;;  %v580_v28 = vmax.bf16 %v279_v23, %v272_v57  ;;  %v287_v29 = vld [vmem:[%s1230_s11 + $0x2a8] sm:$0xf] }
  0x63   : > { %v581_v30 = vmax.bf16 %v280_v25, %v273_v62  ;;  %v281_v31 = vld [vmem:[%s1230_s11 + $0x290] sm:$0xf]  ;;  %v288_v32 = vld [vmem:[%s1230_s11 + $0x2ac] sm:$0xf]  ;;  %978 = vst.msk [vmem:[%s1252_s15 + $0x128] sm:$0xf] %vm880_vm0, %v765_v21  ;;  %v768_v33 = vmax.bf16 %v579_v22, %v285_v20  ;;  %v981_v38 = vsel %vm1236_vm2, %v767_v27, %v980_v18 }
  0x64   : > { %v582_v34 = vmax.bf16 %v281_v31, %v274_v1  ;;  %v282_v35 = vld [vmem:[%s1230_s11 + $0x294] sm:$0xf]  ;;  %v289_v36 = vld [vmem:[%s1230_s11 + $0x2b0] sm:$0xf]  ;;  %v283_v37 = vld [vmem:[%s1230_s11 + $0x298] sm:$0xf]  ;;  %v769_v39 = vmax.bf16 %v580_v28, %v286_v24 }
  0x65   : > { %979 = vst.msk [vmem:[%s1252_s15 + $0x12c] sm:$0xf] %vm880_vm0, %v766_v26  ;;  %v770_v40 = vmax.bf16 %v581_v30, %v287_v29  ;;  %v583_v41 = vmax.bf16 %v282_v35, %v275_v6  ;;  %v290_v42 = vld [vmem:[%s1230_s11 + $0x2b4] sm:$0xf]  ;;  %v284_v43 = vld [vmem:[%s1230_s11 + $0x29c] sm:$0xf]  ;;  %v584_v46 = vmax.bf16 %v283_v37, %v276_v12 }
  0x66   : > { %v291_v44 = vld [vmem:[%s1230_s11 + $0x2b8] sm:$0xf]  ;;  %982 = vst [vmem:[%s1252_s15 + $0x130] sm:$0xf] %v981_v38  ;;  %983 = vst.msk [vmem:[%s1252_s15 + $0x134] sm:$0xf] %vm880_vm0, %v768_v33  ;;  %v771_v45 = vmax.bf16 %v582_v34, %v288_v32  ;;  %v585_v47 = vmax.bf16 %v284_v43, %v277_v14 }
  0x67   : > { %v989_v48 = vld [vmem:[%s1252_s15 + $0x14c] sm:$0xf]  ;;  %v292_v49 = vld [vmem:[%s1230_s11 + $0x2bc] sm:$0xf]  ;;  %v299_v50 = vld [vmem:[%s1230_s11 + $0x2d8] sm:$0xf]  ;;  %v772_v51 = vmax.bf16 %v583_v41, %v289_v36  ;;  %v773_v56 = vmax.bf16 %v584_v46, %v290_v42 }
  0x68   : > { %984 = vst.msk [vmem:[%s1252_s15 + $0x138] sm:$0xf] %vm880_vm0, %v769_v39  ;;  %985 = vst.msk [vmem:[%s1252_s15 + $0x13c] sm:$0xf] %vm880_vm0, %v770_v40  ;;  %v586_v52 = vmax.bf16 %v292_v49, %v285_v20  ;;  %v293_v53 = vld [vmem:[%s1230_s11 + $0x2c0] sm:$0xf]  ;;  %v774_v57 = vmax.bf16 %v585_v47, %v291_v44 }
  0x69   : > { %v300_v54 = vld [vmem:[%s1230_s11 + $0x2dc] sm:$0xf]  ;;  %v294_v55 = vld [vmem:[%s1230_s11 + $0x2c4] sm:$0xf]  ;;  %986 = vst.msk [vmem:[%s1252_s15 + $0x140] sm:$0xf] %vm880_vm0, %v771_v45  ;;  %v587_v58 = vmax.bf16 %v293_v53, %v286_v24 }
  0x6a   : > { %v301_v59 = vld [vmem:[%s1230_s11 + $0x2e0] sm:$0xf]  ;;  %v588_v60 = vmax.bf16 %v294_v55, %v287_v29  ;;  %v295_v61 = vld [vmem:[%s1230_s11 + $0x2c8] sm:$0xf]  ;;  %v302_v62 = vld [vmem:[%s1230_s11 + $0x2e4] sm:$0xf]  ;;  %v775_v63 = vmax.bf16 %v586_v52, %v299_v50  ;;  %v990_v5 = vsel %vm1236_vm2, %v774_v57, %v989_v48 }
  0x6b   : > { %987 = vst.msk [vmem:[%s1252_s15 + $0x144] sm:$0xf] %vm880_vm0, %v772_v51  ;;  %v589_v0 = vmax.bf16 %v295_v61, %v288_v32  ;;  %v296_v1 = vld [vmem:[%s1230_s11 + $0x2cc] sm:$0xf]  ;;  %v303_v2 = vld [vmem:[%s1230_s11 + $0x2e8] sm:$0xf]  ;;  %v776_v6 = vmax.bf16 %v587_v58, %v300_v54 }
  0x6c   : > { %v297_v4 = vld [vmem:[%s1230_s11 + $0x2d0] sm:$0xf]  ;;  %988 = vst.msk [vmem:[%s1252_s15 + $0x148] sm:$0xf] %vm880_vm0, %v773_v56  ;;  %v777_v7 = vmax.bf16 %v588_v60, %v301_v59  ;;  %v590_v8 = vmax.bf16 %v296_v1, %v289_v36  ;;  %v304_v9 = vld [vmem:[%s1230_s11 + $0x2ec] sm:$0xf] }
  0x6d   : > { %v298_v10 = vld [vmem:[%s1230_s11 + $0x2d4] sm:$0xf]  ;;  %v305_v11 = vld [vmem:[%s1230_s11 + $0x2f0] sm:$0xf]  ;;  %991 = vst [vmem:[%s1252_s15 + $0x14c] sm:$0xf] %v990_v5  ;;  %v778_v12 = vmax.bf16 %v589_v0, %v302_v62  ;;  %v591_v13 = vmax.bf16 %v297_v4, %v290_v42 }
  0x6e   : > { %992 = vst.msk [vmem:[%s1252_s15 + $0x150] sm:$0xf] %vm880_vm0, %v775_v63  ;;  %v592_v14 = vmax.bf16 %v298_v10, %v291_v44  ;;  %v998_v15 = vld [vmem:[%s1252_s15 + $0x168] sm:$0xf]  ;;  %v306_v16 = vld [vmem:[%s1230_s11 + $0x2f4] sm:$0xf]  ;;  %v779_v18 = vmax.bf16 %v590_v8, %v303_v2 }
  0x6f   : > { %v313_v17 = vld [vmem:[%s1230_s11 + $0x310] sm:$0xf]  ;;  %993 = vst.msk [vmem:[%s1252_s15 + $0x154] sm:$0xf] %vm880_vm0, %v776_v6  ;;  %994 = vst.msk [vmem:[%s1252_s15 + $0x158] sm:$0xf] %vm880_vm0, %v777_v7  ;;  %v593_v19 = vmax.bf16 %v306_v16, %v299_v50  ;;  %v780_v23 = vmax.bf16 %v591_v13, %v304_v9 }
  0x70   : > { %v307_v20 = vld [vmem:[%s1230_s11 + $0x2f8] sm:$0xf]  ;;  %v314_v21 = vld [vmem:[%s1230_s11 + $0x314] sm:$0xf]  ;;  %v308_v22 = vld [vmem:[%s1230_s11 + $0x2fc] sm:$0xf]  ;;  %v781_v24 = vmax.bf16 %v592_v14, %v305_v11 }
  0x71   : > { %995 = vst.msk [vmem:[%s1252_s15 + $0x15c] sm:$0xf] %vm880_vm0, %v778_v12  ;;  %v594_v25 = vmax.bf16 %v307_v20, %v300_v54  ;;  %v315_v26 = vld [vmem:[%s1230_s11 + $0x318] sm:$0xf]  ;;  %v595_v27 = vmax.bf16 %v308_v22, %v301_v59  ;;  %v309_v28 = vld [vmem:[%s1230_s11 + $0x300] sm:$0xf]  ;;  %v782_v30 = vmax.bf16 %v593_v19, %v313_v17 }
  0x72   : > { %v316_v29 = vld [vmem:[%s1230_s11 + $0x31c] sm:$0xf]  ;;  %996 = vst.msk [vmem:[%s1252_s15 + $0x160] sm:$0xf] %vm880_vm0, %v779_v18  ;;  %v596_v31 = vmax.bf16 %v309_v28, %v302_v62  ;;  %v310_v32 = vld [vmem:[%s1230_s11 + $0x304] sm:$0xf]  ;;  %v999_v35 = vsel %vm1236_vm2, %v781_v24, %v998_v15 }
  0x73   : > { %v317_v33 = vld [vmem:[%s1230_s11 + $0x320] sm:$0xf]  ;;  %v311_v34 = vld [vmem:[%s1230_s11 + $0x308] sm:$0xf]  ;;  %997 = vst.msk [vmem:[%s1252_s15 + $0x164] sm:$0xf] %vm880_vm0, %v780_v23  ;;  %v783_v36 = vmax.bf16 %v594_v25, %v314_v21  ;;  %v784_v37 = vmax.bf16 %v595_v27, %v315_v26  ;;  %v597_v38 = vmax.bf16 %v310_v32, %v303_v2 }
  0x74   : > { %v318_v39 = vld [vmem:[%s1230_s11 + $0x324] sm:$0xf]  ;;  %v312_v40 = vld [vmem:[%s1230_s11 + $0x30c] sm:$0xf]  ;;  %v319_v41 = vld [vmem:[%s1230_s11 + $0x328] sm:$0xf]  ;;  %v785_v42 = vmax.bf16 %v596_v31, %v316_v29  ;;  %v598_v43 = vmax.bf16 %v311_v34, %v304_v9 }
  0x75   : > { %1000 = vst [vmem:[%s1252_s15 + $0x168] sm:$0xf] %v999_v35  ;;  %1001 = vst.msk [vmem:[%s1252_s15 + $0x16c] sm:$0xf] %vm880_vm0, %v782_v30  ;;  %v599_v44 = vmax.bf16 %v312_v40, %v305_v11  ;;  %v1007_v45 = vld [vmem:[%s1252_s15 + $0x184] sm:$0xf]  ;;  %v786_v48 = vmax.bf16 %v597_v38, %v317_v33 }
  0x76   : > { %v320_v46 = vld [vmem:[%s1230_s11 + $0x32c] sm:$0xf]  ;;  %v327_v47 = vld [vmem:[%s1230_s11 + $0x348] sm:$0xf]  ;;  %1002 = vst.msk [vmem:[%s1252_s15 + $0x170] sm:$0xf] %vm880_vm0, %v783_v36  ;;  %v787_v53 = vmax.bf16 %v598_v43, %v318_v39 }
  0x77   : > { %1003 = vst.msk [vmem:[%s1252_s15 + $0x174] sm:$0xf] %vm880_vm0, %v784_v37  ;;  %v600_v49 = vmax.bf16 %v320_v46, %v313_v17  ;;  %v321_v50 = vld [vmem:[%s1230_s11 + $0x330] sm:$0xf]  ;;  %v328_v51 = vld [vmem:[%s1230_s11 + $0x34c] sm:$0xf]  ;;  %v788_v54 = vmax.bf16 %v599_v44, %v319_v41 }
  0x78   : > { %v322_v52 = vld [vmem:[%s1230_s11 + $0x334] sm:$0xf]  ;;  %1004 = vst.msk [vmem:[%s1252_s15 + $0x178] sm:$0xf] %vm880_vm0, %v785_v42  ;;  %v601_v55 = vmax.bf16 %v321_v50, %v314_v21  ;;  %v329_v56 = vld [vmem:[%s1230_s11 + $0x350] sm:$0xf] }
  0x79   : > { %v602_v57 = vmax.bf16 %v322_v52, %v315_v26  ;;  %v323_v58 = vld [vmem:[%s1230_s11 + $0x338] sm:$0xf]  ;;  %v330_v59 = vld [vmem:[%s1230_s11 + $0x354] sm:$0xf]  ;;  %1005 = vst.msk [vmem:[%s1252_s15 + $0x17c] sm:$0xf] %vm880_vm0, %v786_v48  ;;  %v789_v60 = vmax.bf16 %v600_v49, %v327_v47  ;;  %v1008_v1 = vsel %vm1236_vm2, %v788_v54, %v1007_v45 }
  0x7a   : > { %v603_v61 = vmax.bf16 %v323_v58, %v316_v29  ;;  %v324_v62 = vld [vmem:[%s1230_s11 + $0x33c] sm:$0xf]  ;;  %v331_v63 = vld [vmem:[%s1230_s11 + $0x358] sm:$0xf]  ;;  %v325_v0 = vld [vmem:[%s1230_s11 + $0x340] sm:$0xf]  ;;  %v790_v2 = vmax.bf16 %v601_v55, %v328_v51 }
  0x7b   : > { %1006 = vst.msk [vmem:[%s1252_s15 + $0x180] sm:$0xf] %vm880_vm0, %v787_v53  ;;  %v791_v4 = vmax.bf16 %v602_v57, %v329_v56  ;;  %v604_v5 = vmax.bf16 %v324_v62, %v317_v33  ;;  %v332_v6 = vld [vmem:[%s1230_s11 + $0x35c] sm:$0xf]  ;;  %v326_v7 = vld [vmem:[%s1230_s11 + $0x344] sm:$0xf]  ;;  %v605_v10 = vmax.bf16 %v325_v0, %v318_v39 }
  0x7c   : > { %v333_v8 = vld [vmem:[%s1230_s11 + $0x360] sm:$0xf]  ;;  %1009 = vst [vmem:[%s1252_s15 + $0x184] sm:$0xf] %v1008_v1  ;;  %1010 = vst.msk [vmem:[%s1252_s15 + $0x188] sm:$0xf] %vm880_vm0, %v789_v60  ;;  %v792_v9 = vmax.bf16 %v603_v61, %v330_v59  ;;  %v606_v11 = vmax.bf16 %v326_v7, %v319_v41 }
  0x7d   : > { %v1016_v12 = vld [vmem:[%s1252_s15 + $0x1a0] sm:$0xf]  ;;  %v334_v13 = vld [vmem:[%s1230_s11 + $0x364] sm:$0xf]  ;;  %1011 = vst.msk [vmem:[%s1252_s15 + $0x18c] sm:$0xf] %vm880_vm0, %v790_v2  ;;  %v793_v15 = vmax.bf16 %v604_v5, %v331_v63  ;;  %v794_v20 = vmax.bf16 %v605_v10, %v332_v6 }
  0x7e   : > { %v341_v14 = vld [vmem:[%s1230_s11 + $0x380] sm:$0xf]  ;;  %1012 = vst.msk [vmem:[%s1252_s15 + $0x190] sm:$0xf] %vm880_vm0, %v791_v4  ;;  %v607_v16 = vmax.bf16 %v334_v13, %v327_v47  ;;  %v335_v17 = vld [vmem:[%s1230_s11 + $0x368] sm:$0xf]  ;;  %v795_v21 = vmax.bf16 %v606_v11, %v333_v8 }
  0x7f   : > { %v342_v18 = vld [vmem:[%s1230_s11 + $0x384] sm:$0xf]  ;;  %v336_v19 = vld [vmem:[%s1230_s11 + $0x36c] sm:$0xf]  ;;  %1013 = vst.msk [vmem:[%s1252_s15 + $0x194] sm:$0xf] %vm880_vm0, %v792_v9  ;;  %v608_v22 = vmax.bf16 %v335_v17, %v328_v51 }
  0x80   : > { %v343_v23 = vld [vmem:[%s1230_s11 + $0x388] sm:$0xf]  ;;  %v609_v24 = vmax.bf16 %v336_v19, %v329_v56  ;;  %v337_v25 = vld [vmem:[%s1230_s11 + $0x370] sm:$0xf]  ;;  %v344_v26 = vld [vmem:[%s1230_s11 + $0x38c] sm:$0xf]  ;;  %v796_v27 = vmax.bf16 %v607_v16, %v341_v14  ;;  %v1017_v32 = vsel %vm1236_vm2, %v795_v21, %v1016_v12 }
  0x81   : > { %1014 = vst.msk [vmem:[%s1252_s15 + $0x198] sm:$0xf] %vm880_vm0, %v793_v15  ;;  %v610_v28 = vmax.bf16 %v337_v25, %v330_v59  ;;  %v338_v29 = vld [vmem:[%s1230_s11 + $0x374] sm:$0xf]  ;;  %v345_v30 = vld [vmem:[%s1230_s11 + $0x390] sm:$0xf]  ;;  %v797_v33 = vmax.bf16 %v608_v22, %v342_v18 }
  0x82   : > { %v339_v31 = vld [vmem:[%s1230_s11 + $0x378] sm:$0xf]  ;;  %1015 = vst.msk [vmem:[%s1252_s15 + $0x19c] sm:$0xf] %vm880_vm0, %v794_v20  ;;  %v798_v34 = vmax.bf16 %v609_v24, %v343_v23  ;;  %v611_v35 = vmax.bf16 %v338_v29, %v331_v63  ;;  %v346_v36 = vld [vmem:[%s1230_s11 + $0x394] sm:$0xf] }
  0x83   : > { %v340_v37 = vld [vmem:[%s1230_s11 + $0x37c] sm:$0xf]  ;;  %v347_v38 = vld [vmem:[%s1230_s11 + $0x398] sm:$0xf]  ;;  %1018 = vst [vmem:[%s1252_s15 + $0x1a0] sm:$0xf] %v1017_v32  ;;  %v799_v39 = vmax.bf16 %v610_v28, %v344_v26  ;;  %v612_v40 = vmax.bf16 %v339_v31, %v332_v6 }
  0x84   : > { %1019 = vst.msk [vmem:[%s1252_s15 + $0x1a4] sm:$0xf] %vm880_vm0, %v796_v27  ;;  %v613_v41 = vmax.bf16 %v340_v37, %v333_v8  ;;  %v1025_v42 = vld [vmem:[%s1252_s15 + $0x1bc] sm:$0xf]  ;;  %v355_v44 = vld [vmem:[%s1230_s11 + $0x3b8] sm:$0xf]  ;;  %v800_v45 = vmax.bf16 %v611_v35, %v345_v30 }
  0x85   : > { %v348_v43 = vld [vmem:[%s1230_s11 + $0x39c] sm:$0xf]  ;;  %1020 = vst.msk [vmem:[%s1252_s15 + $0x1a8] sm:$0xf] %vm880_vm0, %v797_v33  ;;  %1021 = vst.msk [vmem:[%s1252_s15 + $0x1ac] sm:$0xf] %vm880_vm0, %v798_v34  ;;  %v801_v50 = vmax.bf16 %v612_v40, %v346_v36 }
  0x86   : > { %v614_v46 = vmax.bf16 %v348_v43, %v341_v14  ;;  %v349_v47 = vld [vmem:[%s1230_s11 + $0x3a0] sm:$0xf]  ;;  %v356_v48 = vld [vmem:[%s1230_s11 + $0x3bc] sm:$0xf]  ;;  %v350_v49 = vld [vmem:[%s1230_s11 + $0x3a4] sm:$0xf]  ;;  %v802_v51 = vmax.bf16 %v613_v41, %v347_v38 }
  0x87   : > { %1022 = vst.msk [vmem:[%s1252_s15 + $0x1b0] sm:$0xf] %vm880_vm0, %v799_v39  ;;  %v615_v52 = vmax.bf16 %v349_v47, %v342_v18  ;;  %v357_v53 = vld [vmem:[%s1230_s11 + $0x3c0] sm:$0xf]  ;;  %v616_v54 = vmax.bf16 %v350_v49, %v343_v23  ;;  %v351_v55 = vld [vmem:[%s1230_s11 + $0x3a8] sm:$0xf] }
  0x88   : > { %v358_v56 = vld [vmem:[%s1230_s11 + $0x3c4] sm:$0xf]  ;;  %1023 = vst.msk [vmem:[%s1252_s15 + $0x1b4] sm:$0xf] %vm880_vm0, %v800_v45  ;;  %v803_v57 = vmax.bf16 %v614_v46, %v355_v44  ;;  %v617_v58 = vmax.bf16 %v351_v55, %v344_v26  ;;  %v352_v59 = vld [vmem:[%s1230_s11 + $0x3ac] sm:$0xf]  ;;  %v1026_v62 = vsel %vm1236_vm2, %v802_v51, %v1025_v42 }
  0x89   : > { %v359_v60 = vld [vmem:[%s1230_s11 + $0x3c8] sm:$0xf]  ;;  %v353_v61 = vld [vmem:[%s1230_s11 + $0x3b0] sm:$0xf]  ;;  %1024 = vst.msk [vmem:[%s1252_s15 + $0x1b8] sm:$0xf] %vm880_vm0, %v801_v50  ;;  %v804_v63 = vmax.bf16 %v615_v52, %v356_v48  ;;  %v805_v0 = vmax.bf16 %v616_v54, %v357_v53  ;;  %v618_v1 = vmax.bf16 %v352_v59, %v345_v30 }
  0x8a   : > { %v360_v2 = vld [vmem:[%s1230_s11 + $0x3cc] sm:$0xf]  ;;  %v354_v4 = vld [vmem:[%s1230_s11 + $0x3b4] sm:$0xf]  ;;  %v361_v5 = vld [vmem:[%s1230_s11 + $0x3d0] sm:$0xf]  ;;  %v806_v6 = vmax.bf16 %v617_v58, %v358_v56  ;;  %v619_v7 = vmax.bf16 %v353_v61, %v346_v36 }
  0x8b   : > { %1027 = vst [vmem:[%s1252_s15 + $0x1bc] sm:$0xf] %v1026_v62  ;;  %1028 = vst.msk [vmem:[%s1252_s15 + $0x1c0] sm:$0xf] %vm880_vm0, %v803_v57  ;;  %v620_v8 = vmax.bf16 %v354_v4, %v347_v38  ;;  %v1034_v9 = vld [vmem:[%s1252_s15 + $0x1d8] sm:$0xf]  ;;  %v807_v12 = vmax.bf16 %v618_v1, %v359_v60 }
  0x8c   : > { %v362_v10 = vld [vmem:[%s1230_s11 + $0x3d4] sm:$0xf]  ;;  %v369_v11 = vld [vmem:[%s1230_s11 + $0x3f0] sm:$0xf]  ;;  %1029 = vst.msk [vmem:[%s1252_s15 + $0x1c4] sm:$0xf] %vm880_vm0, %v804_v63  ;;  %v808_v17 = vmax.bf16 %v619_v7, %v360_v2 }
  0x8d   : > { %1030 = vst.msk [vmem:[%s1252_s15 + $0x1c8] sm:$0xf] %vm880_vm0, %v805_v0  ;;  %v621_v13 = vmax.bf16 %v362_v10, %v355_v44  ;;  %v363_v14 = vld [vmem:[%s1230_s11 + $0x3d8] sm:$0xf]  ;;  %v370_v15 = vld [vmem:[%s1230_s11 + $0x3f4] sm:$0xf]  ;;  %v809_v18 = vmax.bf16 %v620_v8, %v361_v5 }
  0x8e   : > { %v364_v16 = vld [vmem:[%s1230_s11 + $0x3dc] sm:$0xf]  ;;  %1031 = vst.msk [vmem:[%s1252_s15 + $0x1cc] sm:$0xf] %vm880_vm0, %v806_v6  ;;  %v622_v19 = vmax.bf16 %v363_v14, %v356_v48  ;;  %v371_v20 = vld [vmem:[%s1230_s11 + $0x3f8] sm:$0xf] }
  0x8f   : > { %v623_v21 = vmax.bf16 %v364_v16, %v357_v53  ;;  %v365_v22 = vld [vmem:[%s1230_s11 + $0x3e0] sm:$0xf]  ;;  %v372_v23 = vld [vmem:[%s1230_s11 + $0x3fc] sm:$0xf]  ;;  %1032 = vst.msk [vmem:[%s1252_s15 + $0x1d0] sm:$0xf] %vm880_vm0, %v807_v12  ;;  %v810_v24 = vmax.bf16 %v621_v13, %v369_v11  ;;  %v1035_v29 = vsel %vm1236_vm2, %v809_v18, %v1034_v9 }
  0x90   : > { %v624_v25 = vmax.bf16 %v365_v22, %v358_v56  ;;  %v366_v26 = vld [vmem:[%s1230_s11 + $0x3e4] sm:$0xf]  ;;  %v373_v27 = vld [vmem:[%s1230_s11 + $0x400] sm:$0xf]  ;;  %v367_v28 = vld [vmem:[%s1230_s11 + $0x3e8] sm:$0xf]  ;;  %v811_v30 = vmax.bf16 %v622_v19, %v370_v15 }
  0x91   : > { %1033 = vst.msk [vmem:[%s1252_s15 + $0x1d4] sm:$0xf] %vm880_vm0, %v808_v17  ;;  %v812_v31 = vmax.bf16 %v623_v21, %v371_v20  ;;  %v625_v32 = vmax.bf16 %v366_v26, %v359_v60  ;;  %v374_v33 = vld [vmem:[%s1230_s11 + $0x404] sm:$0xf]  ;;  %v368_v34 = vld [vmem:[%s1230_s11 + $0x3ec] sm:$0xf]  ;;  %v626_v37 = vmax.bf16 %v367_v28, %v360_v2 }
  0x92   : > { %v375_v35 = vld [vmem:[%s1230_s11 + $0x408] sm:$0xf]  ;;  %1036 = vst [vmem:[%s1252_s15 + $0x1d8] sm:$0xf] %v1035_v29  ;;  %1037 = vst.msk [vmem:[%s1252_s15 + $0x1dc] sm:$0xf] %vm880_vm0, %v810_v24  ;;  %v813_v36 = vmax.bf16 %v624_v25, %v372_v23  ;;  %v627_v38 = vmax.bf16 %v368_v34, %v361_v5 }
  0x93   : > { %v1043_v39 = vld [vmem:[%s1252_s15 + $0x1f4] sm:$0xf]  ;;  %v376_v40 = vld [vmem:[%s1230_s11 + $0x40c] sm:$0xf]  ;;  %v383_v41 = vld [vmem:[%s1230_s11 + $0x428] sm:$0xf]  ;;  %v814_v42 = vmax.bf16 %v625_v32, %v373_v27  ;;  %v815_v47 = vmax.bf16 %v626_v37, %v374_v33 }
  0x94   : > { %1038 = vst.msk [vmem:[%s1252_s15 + $0x1e0] sm:$0xf] %vm880_vm0, %v811_v30  ;;  %1039 = vst.msk [vmem:[%s1252_s15 + $0x1e4] sm:$0xf] %vm880_vm0, %v812_v31  ;;  %v628_v43 = vmax.bf16 %v376_v40, %v369_v11  ;;  %v377_v44 = vld [vmem:[%s1230_s11 + $0x410] sm:$0xf]  ;;  %v816_v48 = vmax.bf16 %v627_v38, %v375_v35 }
  0x95   : > { %v384_v45 = vld [vmem:[%s1230_s11 + $0x42c] sm:$0xf]  ;;  %v378_v46 = vld [vmem:[%s1230_s11 + $0x414] sm:$0xf]  ;;  %1040 = vst.msk [vmem:[%s1252_s15 + $0x1e8] sm:$0xf] %vm880_vm0, %v813_v36  ;;  %v629_v49 = vmax.bf16 %v377_v44, %v370_v15 }
  0x96   : > { %v385_v50 = vld [vmem:[%s1230_s11 + $0x430] sm:$0xf]  ;;  %v630_v51 = vmax.bf16 %v378_v46, %v371_v20  ;;  %v379_v52 = vld [vmem:[%s1230_s11 + $0x418] sm:$0xf]  ;;  %v386_v53 = vld [vmem:[%s1230_s11 + $0x434] sm:$0xf]  ;;  %v817_v54 = vmax.bf16 %v628_v43, %v383_v41  ;;  %v1044_v59 = vsel %vm1236_vm2, %v816_v48, %v1043_v39 }
  0x97   : > { %1041 = vst.msk [vmem:[%s1252_s15 + $0x1ec] sm:$0xf] %vm880_vm0, %v814_v42  ;;  %v631_v55 = vmax.bf16 %v379_v52, %v372_v23  ;;  %v380_v56 = vld [vmem:[%s1230_s11 + $0x41c] sm:$0xf]  ;;  %v387_v57 = vld [vmem:[%s1230_s11 + $0x438] sm:$0xf]  ;;  %v818_v60 = vmax.bf16 %v629_v49, %v384_v45 }
  0x98   : > { %v381_v58 = vld [vmem:[%s1230_s11 + $0x420] sm:$0xf]  ;;  %1042 = vst.msk [vmem:[%s1252_s15 + $0x1f0] sm:$0xf] %vm880_vm0, %v815_v47  ;;  %v819_v61 = vmax.bf16 %v630_v51, %v385_v50  ;;  %v632_v62 = vmax.bf16 %v380_v56, %v373_v27  ;;  %v388_v63 = vld [vmem:[%s1230_s11 + $0x43c] sm:$0xf] }
  0x99   : > { %v382_v0 = vld [vmem:[%s1230_s11 + $0x424] sm:$0xf]  ;;  %v389_v1 = vld [vmem:[%s1230_s11 + $0x440] sm:$0xf]  ;;  %1045 = vst [vmem:[%s1252_s15 + $0x1f4] sm:$0xf] %v1044_v59  ;;  %v820_v2 = vmax.bf16 %v631_v55, %v386_v53  ;;  %v633_v4 = vmax.bf16 %v381_v58, %v374_v33 }
  0x9a   : > { %1046 = vst.msk [vmem:[%s1252_s15 + $0x1f8] sm:$0xf] %vm880_vm0, %v817_v54  ;;  %v634_v5 = vmax.bf16 %v382_v0, %v375_v35  ;;  %v1052_v6 = vld [vmem:[%s1252_s15 + $0x210] sm:$0xf]  ;;  %v390_v7 = vld [vmem:[%s1230_s11 + $0x444] sm:$0xf]  ;;  %v821_v9 = vmax.bf16 %v632_v62, %v387_v57 }
  0x9b   : > { %v397_v8 = vld [vmem:[%s1230_s11 + $0x460] sm:$0xf]  ;;  %1047 = vst.msk [vmem:[%s1252_s15 + $0x1fc] sm:$0xf] %vm880_vm0, %v818_v60  ;;  %1048 = vst.msk [vmem:[%s1252_s15 + $0x200] sm:$0xf] %vm880_vm0, %v819_v61  ;;  %v635_v10 = vmax.bf16 %v390_v7, %v383_v41  ;;  %v822_v14 = vmax.bf16 %v633_v4, %v388_v63 }
  0x9c   : > { %v391_v11 = vld [vmem:[%s1230_s11 + $0x448] sm:$0xf]  ;;  %v398_v12 = vld [vmem:[%s1230_s11 + $0x464] sm:$0xf]  ;;  %v392_v13 = vld [vmem:[%s1230_s11 + $0x44c] sm:$0xf]  ;;  %v823_v15 = vmax.bf16 %v634_v5, %v389_v1 }
  0x9d   : > { %1049 = vst.msk [vmem:[%s1252_s15 + $0x204] sm:$0xf] %vm880_vm0, %v820_v2  ;;  %v636_v16 = vmax.bf16 %v391_v11, %v384_v45  ;;  %v399_v17 = vld [vmem:[%s1230_s11 + $0x468] sm:$0xf]  ;;  %v637_v18 = vmax.bf16 %v392_v13, %v385_v50  ;;  %v393_v19 = vld [vmem:[%s1230_s11 + $0x450] sm:$0xf]  ;;  %v824_v21 = vmax.bf16 %v635_v10, %v397_v8 }
  0x9e   : > { %v400_v20 = vld [vmem:[%s1230_s11 + $0x46c] sm:$0xf]  ;;  %1050 = vst.msk [vmem:[%s1252_s15 + $0x208] sm:$0xf] %vm880_vm0, %v821_v9  ;;  %v638_v22 = vmax.bf16 %v393_v19, %v386_v53  ;;  %v394_v23 = vld [vmem:[%s1230_s11 + $0x454] sm:$0xf]  ;;  %v1053_v26 = vsel %vm1236_vm2, %v823_v15, %v1052_v6 }
  0x9f   : > { %v401_v24 = vld [vmem:[%s1230_s11 + $0x470] sm:$0xf]  ;;  %v395_v25 = vld [vmem:[%s1230_s11 + $0x458] sm:$0xf]  ;;  %1051 = vst.msk [vmem:[%s1252_s15 + $0x20c] sm:$0xf] %vm880_vm0, %v822_v14  ;;  %v825_v27 = vmax.bf16 %v636_v16, %v398_v12  ;;  %v826_v28 = vmax.bf16 %v637_v18, %v399_v17  ;;  %v639_v29 = vmax.bf16 %v394_v23, %v387_v57 }
  0xa0   : > { %v402_v30 = vld [vmem:[%s1230_s11 + $0x474] sm:$0xf]  ;;  %v396_v31 = vld [vmem:[%s1230_s11 + $0x45c] sm:$0xf]  ;;  %v403_v32 = vld [vmem:[%s1230_s11 + $0x478] sm:$0xf]  ;;  %v827_v33 = vmax.bf16 %v638_v22, %v400_v20  ;;  %v640_v34 = vmax.bf16 %v395_v25, %v388_v63 }
  0xa1   : > { %1054 = vst [vmem:[%s1252_s15 + $0x210] sm:$0xf] %v1053_v26  ;;  %1055 = vst.msk [vmem:[%s1252_s15 + $0x214] sm:$0xf] %vm880_vm0, %v824_v21  ;;  %v641_v35 = vmax.bf16 %v396_v31, %v389_v1  ;;  %v1061_v36 = vld [vmem:[%s1252_s15 + $0x22c] sm:$0xf]  ;;  %v828_v39 = vmax.bf16 %v639_v29, %v401_v24 }
  0xa2   : > { %v404_v37 = vld [vmem:[%s1230_s11 + $0x47c] sm:$0xf]  ;;  %v411_v38 = vld [vmem:[%s1230_s11 + $0x498] sm:$0xf]  ;;  %1056 = vst.msk [vmem:[%s1252_s15 + $0x218] sm:$0xf] %vm880_vm0, %v825_v27  ;;  %v829_v44 = vmax.bf16 %v640_v34, %v402_v30 }
  0xa3   : > { %1057 = vst.msk [vmem:[%s1252_s15 + $0x21c] sm:$0xf] %vm880_vm0, %v826_v28  ;;  %v642_v40 = vmax.bf16 %v404_v37, %v397_v8  ;;  %v405_v41 = vld [vmem:[%s1230_s11 + $0x480] sm:$0xf]  ;;  %v412_v42 = vld [vmem:[%s1230_s11 + $0x49c] sm:$0xf]  ;;  %v830_v45 = vmax.bf16 %v641_v35, %v403_v32 }
  0xa4   : > { %v406_v43 = vld [vmem:[%s1230_s11 + $0x484] sm:$0xf]  ;;  %1058 = vst.msk [vmem:[%s1252_s15 + $0x220] sm:$0xf] %vm880_vm0, %v827_v33  ;;  %v643_v46 = vmax.bf16 %v405_v41, %v398_v12  ;;  %v413_v47 = vld [vmem:[%s1230_s11 + $0x4a0] sm:$0xf] }
  0xa5   : > { %v644_v48 = vmax.bf16 %v406_v43, %v399_v17  ;;  %v407_v49 = vld [vmem:[%s1230_s11 + $0x488] sm:$0xf]  ;;  %v414_v50 = vld [vmem:[%s1230_s11 + $0x4a4] sm:$0xf]  ;;  %1059 = vst.msk [vmem:[%s1252_s15 + $0x224] sm:$0xf] %vm880_vm0, %v828_v39  ;;  %v831_v51 = vmax.bf16 %v642_v40, %v411_v38  ;;  %v1062_v56 = vsel %vm1236_vm2, %v830_v45, %v1061_v36 }
  0xa6   : > { %v645_v52 = vmax.bf16 %v407_v49, %v400_v20  ;;  %v408_v53 = vld [vmem:[%s1230_s11 + $0x48c] sm:$0xf]  ;;  %v415_v54 = vld [vmem:[%s1230_s11 + $0x4a8] sm:$0xf]  ;;  %v409_v55 = vld [vmem:[%s1230_s11 + $0x490] sm:$0xf]  ;;  %v832_v57 = vmax.bf16 %v643_v46, %v412_v42 }
  0xa7   : > { %1060 = vst.msk [vmem:[%s1252_s15 + $0x228] sm:$0xf] %vm880_vm0, %v829_v44  ;;  %v833_v58 = vmax.bf16 %v644_v48, %v413_v47  ;;  %v646_v59 = vmax.bf16 %v408_v53, %v401_v24  ;;  %v416_v60 = vld [vmem:[%s1230_s11 + $0x4ac] sm:$0xf]  ;;  %v410_v61 = vld [vmem:[%s1230_s11 + $0x494] sm:$0xf]  ;;  %v647_v0 = vmax.bf16 %v409_v55, %v402_v30 }
  0xa8   : > { %v417_v62 = vld [vmem:[%s1230_s11 + $0x4b0] sm:$0xf]  ;;  %1063 = vst [vmem:[%s1252_s15 + $0x22c] sm:$0xf] %v1062_v56  ;;  %1064 = vst.msk [vmem:[%s1252_s15 + $0x230] sm:$0xf] %vm880_vm0, %v831_v51  ;;  %v834_v63 = vmax.bf16 %v645_v52, %v414_v50  ;;  %v648_v1 = vmax.bf16 %v410_v61, %v403_v32 }
  0xa9   : > { %v1070_v2 = vld [vmem:[%s1252_s15 + $0x248] sm:$0xf]  ;;  %v418_v4 = vld [vmem:[%s1230_s11 + $0x4b4] sm:$0xf]  ;;  %v425_v5 = vld [vmem:[%s1230_s11 + $0x4d0] sm:$0xf]  ;;  %v835_v6 = vmax.bf16 %v646_v59, %v415_v54  ;;  %v836_v11 = vmax.bf16 %v647_v0, %v416_v60 }
  0xaa   : > { %1065 = vst.msk [vmem:[%s1252_s15 + $0x234] sm:$0xf] %vm880_vm0, %v832_v57  ;;  %1066 = vst.msk [vmem:[%s1252_s15 + $0x238] sm:$0xf] %vm880_vm0, %v833_v58  ;;  %v649_v7 = vmax.bf16 %v418_v4, %v411_v38  ;;  %v419_v8 = vld [vmem:[%s1230_s11 + $0x4b8] sm:$0xf]  ;;  %v837_v12 = vmax.bf16 %v648_v1, %v417_v62 }
  0xab   : > { %v426_v9 = vld [vmem:[%s1230_s11 + $0x4d4] sm:$0xf]  ;;  %v420_v10 = vld [vmem:[%s1230_s11 + $0x4bc] sm:$0xf]  ;;  %1067 = vst.msk [vmem:[%s1252_s15 + $0x23c] sm:$0xf] %vm880_vm0, %v834_v63  ;;  %v650_v13 = vmax.bf16 %v419_v8, %v412_v42 }
  0xac   : > { %v427_v14 = vld [vmem:[%s1230_s11 + $0x4d8] sm:$0xf]  ;;  %v651_v15 = vmax.bf16 %v420_v10, %v413_v47  ;;  %v421_v16 = vld [vmem:[%s1230_s11 + $0x4c0] sm:$0xf]  ;;  %v428_v17 = vld [vmem:[%s1230_s11 + $0x4dc] sm:$0xf]  ;;  %v838_v18 = vmax.bf16 %v649_v7, %v425_v5  ;;  %v1071_v23 = vsel %vm1236_vm2, %v837_v12, %v1070_v2 }
  0xad   : > { %1068 = vst.msk [vmem:[%s1252_s15 + $0x240] sm:$0xf] %vm880_vm0, %v835_v6  ;;  %v652_v19 = vmax.bf16 %v421_v16, %v414_v50  ;;  %v422_v20 = vld [vmem:[%s1230_s11 + $0x4c4] sm:$0xf]  ;;  %v429_v21 = vld [vmem:[%s1230_s11 + $0x4e0] sm:$0xf]  ;;  %v839_v24 = vmax.bf16 %v650_v13, %v426_v9 }
  0xae   : > { %v423_v22 = vld [vmem:[%s1230_s11 + $0x4c8] sm:$0xf]  ;;  %1069 = vst.msk [vmem:[%s1252_s15 + $0x244] sm:$0xf] %vm880_vm0, %v836_v11  ;;  %v840_v25 = vmax.bf16 %v651_v15, %v427_v14  ;;  %v653_v26 = vmax.bf16 %v422_v20, %v415_v54  ;;  %v430_v27 = vld [vmem:[%s1230_s11 + $0x4e4] sm:$0xf] }
  0xaf   : > { %v424_v28 = vld [vmem:[%s1230_s11 + $0x4cc] sm:$0xf]  ;;  %v431_v29 = vld [vmem:[%s1230_s11 + $0x4e8] sm:$0xf]  ;;  %1072 = vst [vmem:[%s1252_s15 + $0x248] sm:$0xf] %v1071_v23  ;;  %v841_v30 = vmax.bf16 %v652_v19, %v428_v17  ;;  %v654_v31 = vmax.bf16 %v423_v22, %v416_v60 }
  0xb0   : > { %1073 = vst.msk [vmem:[%s1252_s15 + $0x24c] sm:$0xf] %vm880_vm0, %v838_v18  ;;  %v655_v32 = vmax.bf16 %v424_v28, %v417_v62  ;;  %v1079_v33 = vld [vmem:[%s1252_s15 + $0x264] sm:$0xf]  ;;  %v432_v34 = vld [vmem:[%s1230_s11 + $0x4ec] sm:$0xf]  ;;  %v842_v36 = vmax.bf16 %v653_v26, %v429_v21 }
  0xb1   : > { %v439_v35 = vld [vmem:[%s1230_s11 + $0x508] sm:$0xf]  ;;  %1074 = vst.msk [vmem:[%s1252_s15 + $0x250] sm:$0xf] %vm880_vm0, %v839_v24  ;;  %1075 = vst.msk [vmem:[%s1252_s15 + $0x254] sm:$0xf] %vm880_vm0, %v840_v25  ;;  %v656_v37 = vmax.bf16 %v432_v34, %v425_v5  ;;  %v843_v41 = vmax.bf16 %v654_v31, %v430_v27 }
  0xb2   : > { %v433_v38 = vld [vmem:[%s1230_s11 + $0x4f0] sm:$0xf]  ;;  %v440_v39 = vld [vmem:[%s1230_s11 + $0x50c] sm:$0xf]  ;;  %v434_v40 = vld [vmem:[%s1230_s11 + $0x4f4] sm:$0xf]  ;;  %v844_v42 = vmax.bf16 %v655_v32, %v431_v29 }
  0xb3   : > { %1076 = vst.msk [vmem:[%s1252_s15 + $0x258] sm:$0xf] %vm880_vm0, %v841_v30  ;;  %v657_v43 = vmax.bf16 %v433_v38, %v426_v9  ;;  %v441_v44 = vld [vmem:[%s1230_s11 + $0x510] sm:$0xf]  ;;  %v658_v45 = vmax.bf16 %v434_v40, %v427_v14  ;;  %v435_v46 = vld [vmem:[%s1230_s11 + $0x4f8] sm:$0xf]  ;;  %v845_v48 = vmax.bf16 %v656_v37, %v439_v35 }
  0xb4   : > { %v442_v47 = vld [vmem:[%s1230_s11 + $0x514] sm:$0xf]  ;;  %1077 = vst.msk [vmem:[%s1252_s15 + $0x25c] sm:$0xf] %vm880_vm0, %v842_v36  ;;  %v659_v49 = vmax.bf16 %v435_v46, %v428_v17  ;;  %v436_v50 = vld [vmem:[%s1230_s11 + $0x4fc] sm:$0xf]  ;;  %v1080_v53 = vsel %vm1236_vm2, %v844_v42, %v1079_v33 }
  0xb5   : > { %v443_v51 = vld [vmem:[%s1230_s11 + $0x518] sm:$0xf]  ;;  %v437_v52 = vld [vmem:[%s1230_s11 + $0x500] sm:$0xf]  ;;  %1078 = vst.msk [vmem:[%s1252_s15 + $0x260] sm:$0xf] %vm880_vm0, %v843_v41  ;;  %v846_v54 = vmax.bf16 %v657_v43, %v440_v39  ;;  %v847_v55 = vmax.bf16 %v658_v45, %v441_v44  ;;  %v660_v56 = vmax.bf16 %v436_v50, %v429_v21 }
  0xb6   : > { %v444_v57 = vld [vmem:[%s1230_s11 + $0x51c] sm:$0xf]  ;;  %v438_v58 = vld [vmem:[%s1230_s11 + $0x504] sm:$0xf]  ;;  %v445_v59 = vld [vmem:[%s1230_s11 + $0x520] sm:$0xf]  ;;  %v848_v60 = vmax.bf16 %v659_v49, %v442_v47  ;;  %v661_v61 = vmax.bf16 %v437_v52, %v430_v27 }
  0xb7   : > { %1081 = vst [vmem:[%s1252_s15 + $0x264] sm:$0xf] %v1080_v53  ;;  %1082 = vst.msk [vmem:[%s1252_s15 + $0x268] sm:$0xf] %vm880_vm0, %v845_v48  ;;  %v662_v62 = vmax.bf16 %v438_v58, %v431_v29  ;;  %v1088_v63 = vld [vmem:[%s1252_s15 + $0x280] sm:$0xf]  ;;  %v849_v2 = vmax.bf16 %v660_v56, %v443_v51 }
  0xb8   : > { %v446_v0 = vld [vmem:[%s1230_s11 + $0x524] sm:$0xf]  ;;  %v453_v1 = vld [vmem:[%s1230_s11 + $0x540] sm:$0xf]  ;;  %1083 = vst.msk [vmem:[%s1252_s15 + $0x26c] sm:$0xf] %vm880_vm0, %v846_v54  ;;  %v850_v8 = vmax.bf16 %v661_v61, %v444_v57 }
  0xb9   : > { %1084 = vst.msk [vmem:[%s1252_s15 + $0x270] sm:$0xf] %vm880_vm0, %v847_v55  ;;  %v663_v4 = vmax.bf16 %v446_v0, %v439_v35  ;;  %v447_v5 = vld [vmem:[%s1230_s11 + $0x528] sm:$0xf]  ;;  %v454_v6 = vld [vmem:[%s1230_s11 + $0x544] sm:$0xf]  ;;  %v851_v9 = vmax.bf16 %v662_v62, %v445_v59 }
  0xba   : > { %v448_v7 = vld [vmem:[%s1230_s11 + $0x52c] sm:$0xf]  ;;  %1085 = vst.msk [vmem:[%s1252_s15 + $0x274] sm:$0xf] %vm880_vm0, %v848_v60  ;;  %v664_v10 = vmax.bf16 %v447_v5, %v440_v39  ;;  %v455_v11 = vld [vmem:[%s1230_s11 + $0x548] sm:$0xf] }
  0xbb   : > { %v665_v12 = vmax.bf16 %v448_v7, %v441_v44  ;;  %v449_v13 = vld [vmem:[%s1230_s11 + $0x530] sm:$0xf]  ;;  %v456_v14 = vld [vmem:[%s1230_s11 + $0x54c] sm:$0xf]  ;;  %1086 = vst.msk [vmem:[%s1252_s15 + $0x278] sm:$0xf] %vm880_vm0, %v849_v2  ;;  %v852_v15 = vmax.bf16 %v663_v4, %v453_v1  ;;  %v1089_v20 = vsel %vm1236_vm2, %v851_v9, %v1088_v63 }
  0xbc   : > { %v666_v16 = vmax.bf16 %v449_v13, %v442_v47  ;;  %v450_v17 = vld [vmem:[%s1230_s11 + $0x534] sm:$0xf]  ;;  %v457_v18 = vld [vmem:[%s1230_s11 + $0x550] sm:$0xf]  ;;  %v451_v19 = vld [vmem:[%s1230_s11 + $0x538] sm:$0xf]  ;;  %v853_v21 = vmax.bf16 %v664_v10, %v454_v6 }
  0xbd   : > { %1087 = vst.msk [vmem:[%s1252_s15 + $0x27c] sm:$0xf] %vm880_vm0, %v850_v8  ;;  %v854_v22 = vmax.bf16 %v665_v12, %v455_v11  ;;  %v667_v23 = vmax.bf16 %v450_v17, %v443_v51  ;;  %v458_v24 = vld [vmem:[%s1230_s11 + $0x554] sm:$0xf]  ;;  %v452_v25 = vld [vmem:[%s1230_s11 + $0x53c] sm:$0xf]  ;;  %v668_v28 = vmax.bf16 %v451_v19, %v444_v57 }
  0xbe   : > { %v459_v26 = vld [vmem:[%s1230_s11 + $0x558] sm:$0xf]  ;;  %1090 = vst [vmem:[%s1252_s15 + $0x280] sm:$0xf] %v1089_v20  ;;  %1091 = vst.msk [vmem:[%s1252_s15 + $0x284] sm:$0xf] %vm880_vm0, %v852_v15  ;;  %v855_v27 = vmax.bf16 %v666_v16, %v456_v14  ;;  %v669_v29 = vmax.bf16 %v452_v25, %v445_v59 }
  0xbf   : > { %v1097_v30 = vld [vmem:[%s1252_s15 + $0x29c] sm:$0xf]  ;;  %v467_v32 = vld [vmem:[%s1230_s11 + $0x578] sm:$0xf]  ;;  %1092 = vst.msk [vmem:[%s1252_s15 + $0x288] sm:$0xf] %vm880_vm0, %v853_v21  ;;  %v856_v33 = vmax.bf16 %v667_v23, %v457_v18  ;;  %v857_v38 = vmax.bf16 %v668_v28, %v458_v24 }
  0xc0   : > { %v460_v31 = vld [vmem:[%s1230_s11 + $0x55c] sm:$0xf]  ;;  %1093 = vst.msk [vmem:[%s1252_s15 + $0x28c] sm:$0xf] %vm880_vm0, %v854_v22  ;;  %v461_v35 = vld [vmem:[%s1230_s11 + $0x560] sm:$0xf]  ;;  %v858_v39 = vmax.bf16 %v669_v29, %v459_v26 }
  0xc1   : > { %v670_v34 = vmax.bf16 %v460_v31, %v453_v1  ;;  %v468_v36 = vld [vmem:[%s1230_s11 + $0x57c] sm:$0xf]  ;;  %v462_v37 = vld [vmem:[%s1230_s11 + $0x564] sm:$0xf]  ;;  %1094 = vst.msk [vmem:[%s1252_s15 + $0x290] sm:$0xf] %vm880_vm0, %v855_v27  ;;  %v671_v40 = vmax.bf16 %v461_v35, %v454_v6 }
  0xc2   : > { %v469_v41 = vld [vmem:[%s1230_s11 + $0x580] sm:$0xf]  ;;  %v672_v42 = vmax.bf16 %v462_v37, %v455_v11  ;;  %v463_v43 = vld [vmem:[%s1230_s11 + $0x568] sm:$0xf]  ;;  %v470_v44 = vld [vmem:[%s1230_s11 + $0x584] sm:$0xf]  ;;  %v1098_v50 = vsel %vm1236_vm2, %v858_v39, %v1097_v30 }
  0xc3   : > { %1095 = vst.msk [vmem:[%s1252_s15 + $0x294] sm:$0xf] %vm880_vm0, %v856_v33  ;;  %v859_v45 = vmax.bf16 %v670_v34, %v467_v32  ;;  %v673_v46 = vmax.bf16 %v463_v43, %v456_v14  ;;  %v464_v47 = vld [vmem:[%s1230_s11 + $0x56c] sm:$0xf]  ;;  %v471_v48 = vld [vmem:[%s1230_s11 + $0x588] sm:$0xf]  ;;  %v860_v51 = vmax.bf16 %v671_v40, %v468_v36 }
  0xc4   : > { %v465_v49 = vld [vmem:[%s1230_s11 + $0x570] sm:$0xf]  ;;  %1096 = vst.msk [vmem:[%s1252_s15 + $0x298] sm:$0xf] %vm880_vm0, %v857_v38  ;;  %v861_v52 = vmax.bf16 %v672_v42, %v469_v41  ;;  %v674_v53 = vmax.bf16 %v464_v47, %v457_v18  ;;  %v472_v54 = vld [vmem:[%s1230_s11 + $0x58c] sm:$0xf] }
  0xc5   : > { %v466_v55 = vld [vmem:[%s1230_s11 + $0x574] sm:$0xf]  ;;  %v473_v56 = vld [vmem:[%s1230_s11 + $0x590] sm:$0xf]  ;;  %1099 = vst [vmem:[%s1252_s15 + $0x29c] sm:$0xf] %v1098_v50  ;;  %v862_v57 = vmax.bf16 %v673_v46, %v470_v44  ;;  %v675_v58 = vmax.bf16 %v465_v49, %v458_v24 }
  0xc6   : > { %1100 = vst.msk [vmem:[%s1252_s15 + $0x2a0] sm:$0xf] %vm880_vm0, %v859_v45  ;;  %v676_v59 = vmax.bf16 %v466_v55, %v459_v26  ;;  %v1106_v60 = vld [vmem:[%s1252_s15 + $0x2b8] sm:$0xf]  ;;  %v474_v61 = vld [vmem:[%s1230_s11 + $0x594] sm:$0xf]  ;;  %v863_v63 = vmax.bf16 %v674_v53, %v471_v48 }
  0xc7   : > { %v481_v62 = vld [vmem:[%s1230_s11 + $0x5b0] sm:$0xf]  ;;  %1101 = vst.msk [vmem:[%s1252_s15 + $0x2a4] sm:$0xf] %vm880_vm0, %v860_v51  ;;  %1102 = vst.msk [vmem:[%s1252_s15 + $0x2a8] sm:$0xf] %vm880_vm0, %v861_v52  ;;  %v677_v0 = vmax.bf16 %v474_v61, %v467_v32  ;;  %v864_v5 = vmax.bf16 %v675_v58, %v472_v54 }
  0xc8   : > { %v475_v1 = vld [vmem:[%s1230_s11 + $0x598] sm:$0xf]  ;;  %v482_v2 = vld [vmem:[%s1230_s11 + $0x5b4] sm:$0xf]  ;;  %v476_v4 = vld [vmem:[%s1230_s11 + $0x59c] sm:$0xf]  ;;  %v865_v6 = vmax.bf16 %v676_v59, %v473_v56 }
  0xc9   : > { %1103 = vst.msk [vmem:[%s1252_s15 + $0x2ac] sm:$0xf] %vm880_vm0, %v862_v57  ;;  %v678_v7 = vmax.bf16 %v475_v1, %v468_v36  ;;  %v483_v8 = vld [vmem:[%s1230_s11 + $0x5b8] sm:$0xf]  ;;  %v679_v9 = vmax.bf16 %v476_v4, %v469_v41  ;;  %v477_v10 = vld [vmem:[%s1230_s11 + $0x5a0] sm:$0xf]  ;;  %v866_v12 = vmax.bf16 %v677_v0, %v481_v62 }
  0xca   : > { %v484_v11 = vld [vmem:[%s1230_s11 + $0x5bc] sm:$0xf]  ;;  %1104 = vst.msk [vmem:[%s1252_s15 + $0x2b0] sm:$0xf] %vm880_vm0, %v863_v63  ;;  %v680_v13 = vmax.bf16 %v477_v10, %v470_v44  ;;  %v478_v14 = vld [vmem:[%s1230_s11 + $0x5a4] sm:$0xf]  ;;  %v1107_v17 = vsel %vm1236_vm2, %v865_v6, %v1106_v60 }
  0xcb   : > { %v485_v15 = vld [vmem:[%s1230_s11 + $0x5c0] sm:$0xf]  ;;  %v479_v16 = vld [vmem:[%s1230_s11 + $0x5a8] sm:$0xf]  ;;  %1105 = vst.msk [vmem:[%s1252_s15 + $0x2b4] sm:$0xf] %vm880_vm0, %v864_v5  ;;  %v867_v18 = vmax.bf16 %v678_v7, %v482_v2  ;;  %v868_v19 = vmax.bf16 %v679_v9, %v483_v8  ;;  %v681_v20 = vmax.bf16 %v478_v14, %v471_v48 }
  0xcc   : > { %v486_v21 = vld [vmem:[%s1230_s11 + $0x5c4] sm:$0xf]  ;;  %v480_v22 = vld [vmem:[%s1230_s11 + $0x5ac] sm:$0xf]  ;;  %v487_v23 = vld [vmem:[%s1230_s11 + $0x5c8] sm:$0xf]  ;;  %v869_v24 = vmax.bf16 %v680_v13, %v484_v11  ;;  %v682_v25 = vmax.bf16 %v479_v16, %v472_v54 }
  0xcd   : > { %1108 = vst [vmem:[%s1252_s15 + $0x2b8] sm:$0xf] %v1107_v17  ;;  %1109 = vst.msk [vmem:[%s1252_s15 + $0x2bc] sm:$0xf] %vm880_vm0, %v866_v12  ;;  %v683_v26 = vmax.bf16 %v480_v22, %v473_v56  ;;  %v1115_v27 = vld [vmem:[%s1252_s15 + $0x2d4] sm:$0xf]  ;;  %v870_v30 = vmax.bf16 %v681_v20, %v485_v15 }
  0xce   : > { %v488_v28 = vld [vmem:[%s1230_s11 + $0x5cc] sm:$0xf]  ;;  %v495_v29 = vld [vmem:[%s1230_s11 + $0x5e8] sm:$0xf]  ;;  %1110 = vst.msk [vmem:[%s1252_s15 + $0x2c0] sm:$0xf] %vm880_vm0, %v867_v18  ;;  %v871_v35 = vmax.bf16 %v682_v25, %v486_v21 }
  0xcf   : > { %1111 = vst.msk [vmem:[%s1252_s15 + $0x2c4] sm:$0xf] %vm880_vm0, %v868_v19  ;;  %v684_v31 = vmax.bf16 %v488_v28, %v481_v62  ;;  %v489_v32 = vld [vmem:[%s1230_s11 + $0x5d0] sm:$0xf]  ;;  %v496_v33 = vld [vmem:[%s1230_s11 + $0x5ec] sm:$0xf]  ;;  %v872_v36 = vmax.bf16 %v683_v26, %v487_v23 }
  0xd0   : > { %v490_v34 = vld [vmem:[%s1230_s11 + $0x5d4] sm:$0xf]  ;;  %1112 = vst.msk [vmem:[%s1252_s15 + $0x2c8] sm:$0xf] %vm880_vm0, %v869_v24  ;;  %v685_v37 = vmax.bf16 %v489_v32, %v482_v2  ;;  %v497_v38 = vld [vmem:[%s1230_s11 + $0x5f0] sm:$0xf] }
  0xd1   : > { %v686_v39 = vmax.bf16 %v490_v34, %v483_v8  ;;  %v491_v40 = vld [vmem:[%s1230_s11 + $0x5d8] sm:$0xf]  ;;  %v498_v41 = vld [vmem:[%s1230_s11 + $0x5f4] sm:$0xf]  ;;  %1113 = vst.msk [vmem:[%s1252_s15 + $0x2cc] sm:$0xf] %vm880_vm0, %v870_v30  ;;  %v873_v42 = vmax.bf16 %v684_v31, %v495_v29  ;;  %v1116_v47 = vsel %vm1236_vm2, %v872_v36, %v1115_v27 }
  0xd2   : > { %v687_v43 = vmax.bf16 %v491_v40, %v484_v11  ;;  %v492_v44 = vld [vmem:[%s1230_s11 + $0x5dc] sm:$0xf]  ;;  %v499_v45 = vld [vmem:[%s1230_s11 + $0x5f8] sm:$0xf]  ;;  %v493_v46 = vld [vmem:[%s1230_s11 + $0x5e0] sm:$0xf]  ;;  %v874_v48 = vmax.bf16 %v685_v37, %v496_v33 }
  0xd3   : > { %1114 = vst.msk [vmem:[%s1252_s15 + $0x2d0] sm:$0xf] %vm880_vm0, %v871_v35  ;;  %v875_v49 = vmax.bf16 %v686_v39, %v497_v38  ;;  %v688_v50 = vmax.bf16 %v492_v44, %v485_v15  ;;  %v500_v51 = vld [vmem:[%s1230_s11 + $0x5fc] sm:$0xf]  ;;  %v494_v52 = vld [vmem:[%s1230_s11 + $0x5e4] sm:$0xf]  ;;  %v689_v55 = vmax.bf16 %v493_v46, %v486_v21 }
  0xd4   : > { %v501_v53 = vld [vmem:[%s1230_s11 + $0x600] sm:$0xf]  ;;  %1117 = vst [vmem:[%s1252_s15 + $0x2d4] sm:$0xf] %v1116_v47  ;;  %1118 = vst.msk [vmem:[%s1252_s15 + $0x2d8] sm:$0xf] %vm880_vm0, %v873_v42  ;;  %v876_v54 = vmax.bf16 %v687_v43, %v498_v41  ;;  %v690_v56 = vmax.bf16 %v494_v52, %v487_v23 }
  0xd5   : > { %1119 = vst.msk [vmem:[%s1252_s15 + $0x2dc] sm:$0xf] %vm880_vm0, %v874_v48  ;;  %1120 = vst.msk [vmem:[%s1252_s15 + $0x2e0] sm:$0xf] %vm880_vm0, %v875_v49  ;;  %v877_v57 = vmax.bf16 %v688_v50, %v499_v45  ;;  %v1124_v58 = vld [vmem:[%s1252_s15 + $0x2f0] sm:$0xf]  ;;  %v878_v59 = vmax.bf16 %v689_v55, %v500_v51 }
  0xd6   : > { %1121 = vst.msk [vmem:[%s1252_s15 + $0x2e4] sm:$0xf] %vm880_vm0, %v876_v54  ;;  %v879_v60 = vmax.bf16 %v690_v56, %v501_v53 }
  0xd7   : > { %1122 = vst.msk [vmem:[%s1252_s15 + $0x2e8] sm:$0xf] %vm880_vm0, %v877_v57  ;;  %1123 = vst.msk [vmem:[%s1252_s15 + $0x2ec] sm:$0xf] %vm880_vm0, %v878_v59 }
  0xd8   : > { %v1125_v61 = vsel %vm1236_vm2, %v879_v60, %v1124_v58 }
  0xd9   : > { %1126 = vst [vmem:[%s1252_s15 + $0x2f0] sm:$0xf] %v1125_v61 }
  0xda PF: > { %s11_s6 = sadd.s32 1, %s1207_s6  }
  0xdb   : > { %p8_p4 = scmp.ge.s32.totalorder %s11_s6, 4  }
  0xdd   :  { %10 = sbr.rel (!%p8_p4) target bundleno = 1 (0x1), region = 54 }

// kernel: alexnet_forward.16
= control target key start
LH: loop header
LB: loop body
LE: loop exit
PB: predicated region body
PF: predicated region fallthrough
CT: control target
= control target key end

     0   :  { %s811_s6 = smov 0   ;;  %s1326_s0 = inlined_call_operand.vmem [shape: bf16[2,55,27,64], index: 0, kind: input, shape index: {}]   ;;  %s1327_s1 = inlined_call_operand.vmem [shape: bf16[2,27,27,64], index: 1, kind: output, shape index: {}]  }
   0x1 LB: > { %s774_s7 = sadd.s32 4294967295, %s799_s6   ;;  %p778_p0 = scmp.ge.s32.totalorder %s799_s6, 1  ;;  %s799_s6 = sphi %s811_s6, %s11_s6  }
   0x2   : > { %p87_p1 = scmp.lt.s32.totalorder %s799_s6, 3 }
   0x4   : > { %p88_p2 = pnand %p778_p0, %p87_p1 }
   0x5   : > { %p107_p3 = scmp.lt.s32.totalorder (!%p88_p2), %s774_s7, 1 }
   0x6   : > { %91 = sbr.rel (%p88_p2) target bundleno = 137 (0x89), region = 24 }
   0xb   : > { %s1331_s7 = smov (!%p107_p3, %s774_s7), 1  ;;  %vm557_vm0 = vcmask 517120   ;;  %vm558_vm1 = vsmask.f32 1280  ;;  %vm553_vm2 = vcmask 519168  }
   0xc   : > { %s783_s8 = smul.u32 880, %s1331_s7  ;;  %vm824_vm3 = vmand %vm557_vm0, %vm558_vm1 }
   0xd   : > { %s784_s9 = smul.u32 432, %s1331_s7 }
   0xe   : > { %s822_s12 = scalar_lea.vmem %s1326_s0, %s783_s8 }
   0xf   : > { %v117_v1 = vld [vmem:[%s822_s12] sm:$0xf]  ;;  %v121_v2 = vld [vmem:[%s822_s12 + $0x10] sm:$0xf]  ;;  %s834_s15 = scalar_lea.vmem %s1327_s1, %s784_s9  ;;  %v118_v5 = vld [vmem:[%s822_s12 + $0x4] sm:$0xf] }
  0x10   : > { %v125_v3 = vld [vmem:[%s822_s12 + $0x20] sm:$0xf]  ;;  %v337_v4 = vmax.bf16 %v121_v2, %v117_v1  ;;  %v122_v6 = vld [vmem:[%s822_s12 + $0x14] sm:$0xf]  ;;  %v126_v7 = vld [vmem:[%s822_s12 + $0x24] sm:$0xf] }
  0x11   : > { %v338_v8 = vmax.bf16 %v122_v6, %v118_v5  ;;  %v119_v9 = vld [vmem:[%s822_s12 + $0x8] sm:$0xf]  ;;  %v123_v10 = vld [vmem:[%s822_s12 + $0x18] sm:$0xf]  ;;  %v120_v14 = vld [vmem:[%s822_s12 + $0xc] sm:$0x3] }
  0x12   : > { %v127_v11 = vld [vmem:[%s822_s12 + $0x28] sm:$0xf]  ;;  %v445_v12 = vmax.bf16 %v337_v4, %v125_v3  ;;  %v339_v13 = vmax.bf16 %v123_v10, %v119_v9  ;;  %v124_v15 = vld [vmem:[%s822_s12 + $0x1c] sm:$0x3]  ;;  %v128_v16 = vld [vmem:[%s822_s12 + $0x2c] sm:$0x3] }
  0x13   : > { %v446_v17 = vmax.bf16 %v338_v8, %v126_v7  ;;  %v340_v18 = vmax.bf16 %v124_v15, %v120_v14  ;;  %v560_v19 = vld [vmem:[%s834_s15 + $0xc] sm:$0x3]  ;;  %v129_v20 = vld [vmem:[%s822_s12 + $0x30] sm:$0xf]  ;;  %v133_v21 = vld [vmem:[%s822_s12 + $0x40] sm:$0xf] }
  0x14   : > { %554 = vst.msk [vmem:[%s834_s15] sm:$0xf] %vm553_vm2, %v445_v12  ;;  %v447_v22 = vmax.bf16 %v339_v13, %v127_v11  ;;  %v341_v23 = vmax.bf16 %v129_v20, %v125_v3  ;;  %v130_v24 = vld [vmem:[%s822_s12 + $0x34] sm:$0xf]  ;;  %v134_v25 = vld [vmem:[%s822_s12 + $0x44] sm:$0xf] }
  0x15   : > { %v131_v26 = vld [vmem:[%s822_s12 + $0x38] sm:$0xf]  ;;  %555 = vst.msk [vmem:[%s834_s15 + $0x4] sm:$0xf] %vm553_vm2, %v446_v17  ;;  %v448_v27 = vmax.bf16 %v340_v18, %v128_v16  ;;  %v342_v28 = vmax.bf16 %v130_v24, %v126_v7  ;;  %v135_v29 = vld [vmem:[%s822_s12 + $0x48] sm:$0xf] }
  0x16   : > { %v343_v30 = vmax.bf16 %v131_v26, %v127_v11  ;;  %v132_v31 = vld [vmem:[%s822_s12 + $0x3c] sm:$0x3]  ;;  %v136_v32 = vld [vmem:[%s822_s12 + $0x4c] sm:$0x3]  ;;  %556 = vst.msk [vmem:[%s834_s15 + $0x8] sm:$0xf] %vm553_vm2, %v447_v22  ;;  %v449_v33 = vmax.bf16 %v341_v23, %v133_v21 }
  0x17   : > { %v344_v34 = vmax.bf16 %v132_v31, %v128_v16  ;;  %v566_v35 = vld [vmem:[%s834_s15 + $0x1c] sm:$0x3]  ;;  %v137_v36 = vld [vmem:[%s822_s12 + $0x50] sm:$0xf]  ;;  %v141_v37 = vld [vmem:[%s822_s12 + $0x60] sm:$0xf]  ;;  %v561_v38 = vsel %vm824_vm3, %v448_v27, %v560_v19  ;;  %v450_v39 = vmax.bf16 %v342_v28, %v134_v25 }
  0x18   : > { %v451_v40 = vmax.bf16 %v343_v30, %v135_v29  ;;  %v345_v41 = vmax.bf16 %v137_v36, %v133_v21  ;;  %v138_v42 = vld [vmem:[%s822_s12 + $0x54] sm:$0xf]  ;;  %v142_v43 = vld [vmem:[%s822_s12 + $0x64] sm:$0xf]  ;;  %v139_v44 = vld [vmem:[%s822_s12 + $0x58] sm:$0xf] }
  0x19   : > { %562 = vst [vmem:[%s834_s15 + $0xc] sm:$0x3] %v561_v38  ;;  %563 = vst.msk [vmem:[%s834_s15 + $0x10] sm:$0xf] %vm553_vm2, %v449_v33  ;;  %v452_v45 = vmax.bf16 %v344_v34, %v136_v32  ;;  %v346_v46 = vmax.bf16 %v138_v42, %v134_v25  ;;  %v143_v47 = vld [vmem:[%s822_s12 + $0x68] sm:$0xf]  ;;  %v347_v48 = vmax.bf16 %v139_v44, %v135_v29 }
  0x1a   : > { %v140_v49 = vld [vmem:[%s822_s12 + $0x5c] sm:$0x3]  ;;  %v144_v50 = vld [vmem:[%s822_s12 + $0x6c] sm:$0x3]  ;;  %564 = vst.msk [vmem:[%s834_s15 + $0x14] sm:$0xf] %vm553_vm2, %v450_v39  ;;  %v453_v51 = vmax.bf16 %v345_v41, %v141_v37 }
  0x1b   : > { %565 = vst.msk [vmem:[%s834_s15 + $0x18] sm:$0xf] %vm553_vm2, %v451_v40  ;;  %v348_v52 = vmax.bf16 %v140_v49, %v136_v32  ;;  %v572_v53 = vld [vmem:[%s834_s15 + $0x2c] sm:$0x3]  ;;  %v145_v54 = vld [vmem:[%s822_s12 + $0x70] sm:$0xf]  ;;  %v567_v56 = vsel %vm824_vm3, %v452_v45, %v566_v35  ;;  %v454_v57 = vmax.bf16 %v346_v46, %v142_v43  ;;  %v455_v58 = vmax.bf16 %v347_v48, %v143_v47 }
  0x1c   : > { %v149_v55 = vld [vmem:[%s822_s12 + $0x80] sm:$0xf]  ;;  %v349_v59 = vmax.bf16 %v145_v54, %v141_v37  ;;  %v146_v60 = vld [vmem:[%s822_s12 + $0x74] sm:$0xf]  ;;  %v150_v61 = vld [vmem:[%s822_s12 + $0x84] sm:$0xf] }
  0x1d   : > { %v147_v62 = vld [vmem:[%s822_s12 + $0x78] sm:$0xf]  ;;  %568 = vst [vmem:[%s834_s15 + $0x1c] sm:$0x3] %v567_v56  ;;  %569 = vst.msk [vmem:[%s834_s15 + $0x20] sm:$0xf] %vm553_vm2, %v453_v51  ;;  %v456_v63 = vmax.bf16 %v348_v52, %v144_v50  ;;  %v350_v1 = vmax.bf16 %v146_v60, %v142_v43 }
  0x1e   : > { %v151_v2 = vld [vmem:[%s822_s12 + $0x88] sm:$0xf]  ;;  %v351_v3 = vmax.bf16 %v147_v62, %v143_v47  ;;  %v148_v4 = vld [vmem:[%s822_s12 + $0x7c] sm:$0x3]  ;;  %v152_v5 = vld [vmem:[%s822_s12 + $0x8c] sm:$0x3]  ;;  %v457_v6 = vmax.bf16 %v349_v59, %v149_v55 }
  0x1f   : > { %570 = vst.msk [vmem:[%s834_s15 + $0x24] sm:$0xf] %vm553_vm2, %v454_v57  ;;  %571 = vst.msk [vmem:[%s834_s15 + $0x28] sm:$0xf] %vm553_vm2, %v455_v58  ;;  %v352_v7 = vmax.bf16 %v148_v4, %v144_v50  ;;  %v578_v8 = vld [vmem:[%s834_s15 + $0x3c] sm:$0x3]  ;;  %v573_v11 = vsel %vm824_vm3, %v456_v63, %v572_v53  ;;  %v458_v12 = vmax.bf16 %v350_v1, %v150_v61 }
  0x20   : > { %v153_v9 = vld [vmem:[%s822_s12 + $0x90] sm:$0xf]  ;;  %v157_v10 = vld [vmem:[%s822_s12 + $0xa0] sm:$0xf]  ;;  %v459_v13 = vmax.bf16 %v351_v3, %v151_v2  ;;  %v154_v15 = vld [vmem:[%s822_s12 + $0x94] sm:$0xf] }
  0x21   : > { %v353_v14 = vmax.bf16 %v153_v9, %v149_v55  ;;  %v158_v16 = vld [vmem:[%s822_s12 + $0xa4] sm:$0xf]  ;;  %v155_v17 = vld [vmem:[%s822_s12 + $0x98] sm:$0xf]  ;;  %574 = vst [vmem:[%s834_s15 + $0x2c] sm:$0x3] %v573_v11  ;;  %v460_v18 = vmax.bf16 %v352_v7, %v152_v5  ;;  %v354_v19 = vmax.bf16 %v154_v15, %v150_v61 }
  0x22   : > { %575 = vst.msk [vmem:[%s834_s15 + $0x30] sm:$0xf] %vm553_vm2, %v457_v6  ;;  %v159_v20 = vld [vmem:[%s822_s12 + $0xa8] sm:$0xf]  ;;  %v355_v21 = vmax.bf16 %v155_v17, %v151_v2  ;;  %v156_v22 = vld [vmem:[%s822_s12 + $0x9c] sm:$0x3] }
  0x23   : > { %v160_v23 = vld [vmem:[%s822_s12 + $0xac] sm:$0x3]  ;;  %576 = vst.msk [vmem:[%s834_s15 + $0x34] sm:$0xf] %vm553_vm2, %v458_v12  ;;  %577 = vst.msk [vmem:[%s834_s15 + $0x38] sm:$0xf] %vm553_vm2, %v459_v13  ;;  %v461_v24 = vmax.bf16 %v353_v14, %v157_v10  ;;  %v356_v25 = vmax.bf16 %v156_v22, %v152_v5  ;;  %v579_v29 = vsel %vm824_vm3, %v460_v18, %v578_v8 }
  0x24   : > { %v584_v26 = vld [vmem:[%s834_s15 + $0x4c] sm:$0x3]  ;;  %v161_v27 = vld [vmem:[%s822_s12 + $0xb0] sm:$0xf]  ;;  %v165_v28 = vld [vmem:[%s822_s12 + $0xc0] sm:$0xf]  ;;  %v462_v30 = vmax.bf16 %v354_v19, %v158_v16  ;;  %v463_v31 = vmax.bf16 %v355_v21, %v159_v20 }
  0x25   : > { %v357_v32 = vmax.bf16 %v161_v27, %v157_v10  ;;  %v162_v33 = vld [vmem:[%s822_s12 + $0xb4] sm:$0xf]  ;;  %v166_v34 = vld [vmem:[%s822_s12 + $0xc4] sm:$0xf]  ;;  %v163_v35 = vld [vmem:[%s822_s12 + $0xb8] sm:$0xf]  ;;  %v464_v36 = vmax.bf16 %v356_v25, %v160_v23 }
  0x26   : > { %580 = vst [vmem:[%s834_s15 + $0x3c] sm:$0x3] %v579_v29  ;;  %581 = vst.msk [vmem:[%s834_s15 + $0x40] sm:$0xf] %vm553_vm2, %v461_v24  ;;  %v358_v37 = vmax.bf16 %v162_v33, %v158_v16  ;;  %v167_v38 = vld [vmem:[%s822_s12 + $0xc8] sm:$0xf]  ;;  %v359_v39 = vmax.bf16 %v163_v35, %v159_v20 }
  0x27   : > { %v164_v40 = vld [vmem:[%s822_s12 + $0xbc] sm:$0x3]  ;;  %v168_v41 = vld [vmem:[%s822_s12 + $0xcc] sm:$0x3]  ;;  %582 = vst.msk [vmem:[%s834_s15 + $0x44] sm:$0xf] %vm553_vm2, %v462_v30  ;;  %v465_v42 = vmax.bf16 %v357_v32, %v165_v28  ;;  %v585_v47 = vsel %vm824_vm3, %v464_v36, %v584_v26 }
  0x28   : > { %583 = vst.msk [vmem:[%s834_s15 + $0x48] sm:$0xf] %vm553_vm2, %v463_v31  ;;  %v360_v43 = vmax.bf16 %v164_v40, %v160_v23  ;;  %v590_v44 = vld [vmem:[%s834_s15 + $0x5c] sm:$0x3]  ;;  %v169_v45 = vld [vmem:[%s822_s12 + $0xd0] sm:$0xf]  ;;  %v466_v48 = vmax.bf16 %v358_v37, %v166_v34  ;;  %v467_v49 = vmax.bf16 %v359_v39, %v167_v38 }
  0x29   : > { %v173_v46 = vld [vmem:[%s822_s12 + $0xe0] sm:$0xf]  ;;  %v361_v50 = vmax.bf16 %v169_v45, %v165_v28  ;;  %v170_v51 = vld [vmem:[%s822_s12 + $0xd4] sm:$0xf]  ;;  %v174_v52 = vld [vmem:[%s822_s12 + $0xe4] sm:$0xf] }
  0x2a   : > { %v171_v53 = vld [vmem:[%s822_s12 + $0xd8] sm:$0xf]  ;;  %586 = vst [vmem:[%s834_s15 + $0x4c] sm:$0x3] %v585_v47  ;;  %587 = vst.msk [vmem:[%s834_s15 + $0x50] sm:$0xf] %vm553_vm2, %v465_v42  ;;  %v468_v54 = vmax.bf16 %v360_v43, %v168_v41  ;;  %v362_v55 = vmax.bf16 %v170_v51, %v166_v34 }
  0x2b   : > { %v175_v56 = vld [vmem:[%s822_s12 + $0xe8] sm:$0xf]  ;;  %v363_v57 = vmax.bf16 %v171_v53, %v167_v38  ;;  %v172_v58 = vld [vmem:[%s822_s12 + $0xdc] sm:$0x3]  ;;  %v176_v59 = vld [vmem:[%s822_s12 + $0xec] sm:$0x3]  ;;  %v469_v60 = vmax.bf16 %v361_v50, %v173_v46 }
  0x2c   : > { %588 = vst.msk [vmem:[%s834_s15 + $0x54] sm:$0xf] %vm553_vm2, %v466_v48  ;;  %589 = vst.msk [vmem:[%s834_s15 + $0x58] sm:$0xf] %vm553_vm2, %v467_v49  ;;  %v364_v61 = vmax.bf16 %v172_v58, %v168_v41  ;;  %v596_v62 = vld [vmem:[%s834_s15 + $0x6c] sm:$0x3]  ;;  %v591_v2 = vsel %vm824_vm3, %v468_v54, %v590_v44  ;;  %v470_v3 = vmax.bf16 %v362_v55, %v174_v52 }
  0x2d   : > { %v177_v63 = vld [vmem:[%s822_s12 + $0xf0] sm:$0xf]  ;;  %v181_v1 = vld [vmem:[%s822_s12 + $0x100] sm:$0xf]  ;;  %v471_v4 = vmax.bf16 %v363_v57, %v175_v56  ;;  %v178_v6 = vld [vmem:[%s822_s12 + $0xf4] sm:$0xf] }
  0x2e   : > { %v365_v5 = vmax.bf16 %v177_v63, %v173_v46  ;;  %v182_v7 = vld [vmem:[%s822_s12 + $0x104] sm:$0xf]  ;;  %v179_v8 = vld [vmem:[%s822_s12 + $0xf8] sm:$0xf]  ;;  %592 = vst [vmem:[%s834_s15 + $0x5c] sm:$0x3] %v591_v2  ;;  %v472_v9 = vmax.bf16 %v364_v61, %v176_v59  ;;  %v366_v10 = vmax.bf16 %v178_v6, %v174_v52 }
  0x2f   : > { %593 = vst.msk [vmem:[%s834_s15 + $0x60] sm:$0xf] %vm553_vm2, %v469_v60  ;;  %v183_v11 = vld [vmem:[%s822_s12 + $0x108] sm:$0xf]  ;;  %v367_v12 = vmax.bf16 %v179_v8, %v175_v56  ;;  %v180_v13 = vld [vmem:[%s822_s12 + $0xfc] sm:$0x3] }
  0x30   : > { %v184_v14 = vld [vmem:[%s822_s12 + $0x10c] sm:$0x3]  ;;  %594 = vst.msk [vmem:[%s834_s15 + $0x64] sm:$0xf] %vm553_vm2, %v470_v3  ;;  %595 = vst.msk [vmem:[%s834_s15 + $0x68] sm:$0xf] %vm553_vm2, %v471_v4  ;;  %v473_v15 = vmax.bf16 %v365_v5, %v181_v1  ;;  %v368_v16 = vmax.bf16 %v180_v13, %v176_v59  ;;  %v597_v20 = vsel %vm824_vm3, %v472_v9, %v596_v62 }
  0x31   : > { %v602_v17 = vld [vmem:[%s834_s15 + $0x7c] sm:$0x3]  ;;  %v185_v18 = vld [vmem:[%s822_s12 + $0x110] sm:$0xf]  ;;  %v189_v19 = vld [vmem:[%s822_s12 + $0x120] sm:$0xf]  ;;  %v474_v21 = vmax.bf16 %v366_v10, %v182_v7  ;;  %v475_v22 = vmax.bf16 %v367_v12, %v183_v11 }
  0x32   : > { %v369_v23 = vmax.bf16 %v185_v18, %v181_v1  ;;  %v186_v24 = vld [vmem:[%s822_s12 + $0x114] sm:$0xf]  ;;  %v190_v25 = vld [vmem:[%s822_s12 + $0x124] sm:$0xf]  ;;  %v187_v26 = vld [vmem:[%s822_s12 + $0x118] sm:$0xf]  ;;  %v476_v27 = vmax.bf16 %v368_v16, %v184_v14 }
  0x33   : > { %598 = vst [vmem:[%s834_s15 + $0x6c] sm:$0x3] %v597_v20  ;;  %599 = vst.msk [vmem:[%s834_s15 + $0x70] sm:$0xf] %vm553_vm2, %v473_v15  ;;  %v370_v28 = vmax.bf16 %v186_v24, %v182_v7  ;;  %v191_v29 = vld [vmem:[%s822_s12 + $0x128] sm:$0xf]  ;;  %v371_v30 = vmax.bf16 %v187_v26, %v183_v11 }
  0x34   : > { %v188_v31 = vld [vmem:[%s822_s12 + $0x11c] sm:$0x3]  ;;  %v192_v32 = vld [vmem:[%s822_s12 + $0x12c] sm:$0x3]  ;;  %600 = vst.msk [vmem:[%s834_s15 + $0x74] sm:$0xf] %vm553_vm2, %v474_v21  ;;  %v477_v33 = vmax.bf16 %v369_v23, %v189_v19  ;;  %v603_v38 = vsel %vm824_vm3, %v476_v27, %v602_v17 }
  0x35   : > { %601 = vst.msk [vmem:[%s834_s15 + $0x78] sm:$0xf] %vm553_vm2, %v475_v22  ;;  %v372_v34 = vmax.bf16 %v188_v31, %v184_v14  ;;  %v608_v35 = vld [vmem:[%s834_s15 + $0x8c] sm:$0x3]  ;;  %v193_v36 = vld [vmem:[%s822_s12 + $0x130] sm:$0xf]  ;;  %v478_v39 = vmax.bf16 %v370_v28, %v190_v25  ;;  %v479_v40 = vmax.bf16 %v371_v30, %v191_v29 }
  0x36   : > { %v197_v37 = vld [vmem:[%s822_s12 + $0x140] sm:$0xf]  ;;  %v373_v41 = vmax.bf16 %v193_v36, %v189_v19  ;;  %v194_v42 = vld [vmem:[%s822_s12 + $0x134] sm:$0xf]  ;;  %v198_v43 = vld [vmem:[%s822_s12 + $0x144] sm:$0xf] }
  0x37   : > { %v195_v44 = vld [vmem:[%s822_s12 + $0x138] sm:$0xf]  ;;  %604 = vst [vmem:[%s834_s15 + $0x7c] sm:$0x3] %v603_v38  ;;  %605 = vst.msk [vmem:[%s834_s15 + $0x80] sm:$0xf] %vm553_vm2, %v477_v33  ;;  %v480_v45 = vmax.bf16 %v372_v34, %v192_v32  ;;  %v374_v46 = vmax.bf16 %v194_v42, %v190_v25 }
  0x38   : > { %v199_v47 = vld [vmem:[%s822_s12 + $0x148] sm:$0xf]  ;;  %v375_v48 = vmax.bf16 %v195_v44, %v191_v29  ;;  %v196_v49 = vld [vmem:[%s822_s12 + $0x13c] sm:$0x3]  ;;  %v200_v50 = vld [vmem:[%s822_s12 + $0x14c] sm:$0x3]  ;;  %v481_v51 = vmax.bf16 %v373_v41, %v197_v37 }
  0x39   : > { %606 = vst.msk [vmem:[%s834_s15 + $0x84] sm:$0xf] %vm553_vm2, %v478_v39  ;;  %607 = vst.msk [vmem:[%s834_s15 + $0x88] sm:$0xf] %vm553_vm2, %v479_v40  ;;  %v376_v52 = vmax.bf16 %v196_v49, %v192_v32  ;;  %v614_v53 = vld [vmem:[%s834_s15 + $0x9c] sm:$0x3]  ;;  %v609_v56 = vsel %vm824_vm3, %v480_v45, %v608_v35  ;;  %v482_v57 = vmax.bf16 %v374_v46, %v198_v43 }
  0x3a   : > { %v201_v54 = vld [vmem:[%s822_s12 + $0x150] sm:$0xf]  ;;  %v205_v55 = vld [vmem:[%s822_s12 + $0x160] sm:$0xf]  ;;  %v483_v58 = vmax.bf16 %v375_v48, %v199_v47  ;;  %v202_v60 = vld [vmem:[%s822_s12 + $0x154] sm:$0xf] }
  0x3b   : > { %v377_v59 = vmax.bf16 %v201_v54, %v197_v37  ;;  %v206_v61 = vld [vmem:[%s822_s12 + $0x164] sm:$0xf]  ;;  %v203_v62 = vld [vmem:[%s822_s12 + $0x158] sm:$0xf]  ;;  %610 = vst [vmem:[%s834_s15 + $0x8c] sm:$0x3] %v609_v56  ;;  %v484_v63 = vmax.bf16 %v376_v52, %v200_v50  ;;  %v378_v1 = vmax.bf16 %v202_v60, %v198_v43 }
  0x3c   : > { %611 = vst.msk [vmem:[%s834_s15 + $0x90] sm:$0xf] %vm553_vm2, %v481_v51  ;;  %v207_v2 = vld [vmem:[%s822_s12 + $0x168] sm:$0xf]  ;;  %v379_v3 = vmax.bf16 %v203_v62, %v199_v47  ;;  %v204_v4 = vld [vmem:[%s822_s12 + $0x15c] sm:$0x3] }
  0x3d   : > { %v208_v5 = vld [vmem:[%s822_s12 + $0x16c] sm:$0x3]  ;;  %612 = vst.msk [vmem:[%s834_s15 + $0x94] sm:$0xf] %vm553_vm2, %v482_v57  ;;  %613 = vst.msk [vmem:[%s834_s15 + $0x98] sm:$0xf] %vm553_vm2, %v483_v58  ;;  %v485_v6 = vmax.bf16 %v377_v59, %v205_v55  ;;  %v380_v7 = vmax.bf16 %v204_v4, %v200_v50  ;;  %v615_v11 = vsel %vm824_vm3, %v484_v63, %v614_v53 }
  0x3e   : > { %v620_v8 = vld [vmem:[%s834_s15 + $0xac] sm:$0x3]  ;;  %v209_v9 = vld [vmem:[%s822_s12 + $0x170] sm:$0xf]  ;;  %v213_v10 = vld [vmem:[%s822_s12 + $0x180] sm:$0xf]  ;;  %v486_v12 = vmax.bf16 %v378_v1, %v206_v61  ;;  %v487_v13 = vmax.bf16 %v379_v3, %v207_v2 }
  0x3f   : > { %v381_v14 = vmax.bf16 %v209_v9, %v205_v55  ;;  %v210_v15 = vld [vmem:[%s822_s12 + $0x174] sm:$0xf]  ;;  %v214_v16 = vld [vmem:[%s822_s12 + $0x184] sm:$0xf]  ;;  %v211_v17 = vld [vmem:[%s822_s12 + $0x178] sm:$0xf]  ;;  %v488_v18 = vmax.bf16 %v380_v7, %v208_v5 }
  0x40   : > { %616 = vst [vmem:[%s834_s15 + $0x9c] sm:$0x3] %v615_v11  ;;  %617 = vst.msk [vmem:[%s834_s15 + $0xa0] sm:$0xf] %vm553_vm2, %v485_v6  ;;  %v382_v19 = vmax.bf16 %v210_v15, %v206_v61  ;;  %v215_v20 = vld [vmem:[%s822_s12 + $0x188] sm:$0xf]  ;;  %v383_v21 = vmax.bf16 %v211_v17, %v207_v2 }
  0x41   : > { %v212_v22 = vld [vmem:[%s822_s12 + $0x17c] sm:$0x3]  ;;  %v216_v23 = vld [vmem:[%s822_s12 + $0x18c] sm:$0x3]  ;;  %618 = vst.msk [vmem:[%s834_s15 + $0xa4] sm:$0xf] %vm553_vm2, %v486_v12  ;;  %v489_v24 = vmax.bf16 %v381_v14, %v213_v10  ;;  %v621_v29 = vsel %vm824_vm3, %v488_v18, %v620_v8 }
  0x42   : > { %619 = vst.msk [vmem:[%s834_s15 + $0xa8] sm:$0xf] %vm553_vm2, %v487_v13  ;;  %v384_v25 = vmax.bf16 %v212_v22, %v208_v5  ;;  %v626_v26 = vld [vmem:[%s834_s15 + $0xbc] sm:$0x3]  ;;  %v217_v27 = vld [vmem:[%s822_s12 + $0x190] sm:$0xf]  ;;  %v490_v30 = vmax.bf16 %v382_v19, %v214_v16  ;;  %v491_v31 = vmax.bf16 %v383_v21, %v215_v20 }
  0x43   : > { %v221_v28 = vld [vmem:[%s822_s12 + $0x1a0] sm:$0xf]  ;;  %v385_v32 = vmax.bf16 %v217_v27, %v213_v10  ;;  %v218_v33 = vld [vmem:[%s822_s12 + $0x194] sm:$0xf]  ;;  %v222_v34 = vld [vmem:[%s822_s12 + $0x1a4] sm:$0xf] }
  0x44   : > { %v219_v35 = vld [vmem:[%s822_s12 + $0x198] sm:$0xf]  ;;  %622 = vst [vmem:[%s834_s15 + $0xac] sm:$0x3] %v621_v29  ;;  %623 = vst.msk [vmem:[%s834_s15 + $0xb0] sm:$0xf] %vm553_vm2, %v489_v24  ;;  %v492_v36 = vmax.bf16 %v384_v25, %v216_v23  ;;  %v386_v37 = vmax.bf16 %v218_v33, %v214_v16 }
  0x45   : > { %v223_v38 = vld [vmem:[%s822_s12 + $0x1a8] sm:$0xf]  ;;  %v387_v39 = vmax.bf16 %v219_v35, %v215_v20  ;;  %v220_v40 = vld [vmem:[%s822_s12 + $0x19c] sm:$0x3]  ;;  %v224_v41 = vld [vmem:[%s822_s12 + $0x1ac] sm:$0x3]  ;;  %v493_v42 = vmax.bf16 %v385_v32, %v221_v28 }
  0x46   : > { %624 = vst.msk [vmem:[%s834_s15 + $0xb4] sm:$0xf] %vm553_vm2, %v490_v30  ;;  %625 = vst.msk [vmem:[%s834_s15 + $0xb8] sm:$0xf] %vm553_vm2, %v491_v31  ;;  %v388_v43 = vmax.bf16 %v220_v40, %v216_v23  ;;  %v632_v44 = vld [vmem:[%s834_s15 + $0xcc] sm:$0x3]  ;;  %v627_v47 = vsel %vm824_vm3, %v492_v36, %v626_v26  ;;  %v494_v48 = vmax.bf16 %v386_v37, %v222_v34 }
  0x47   : > { %v225_v45 = vld [vmem:[%s822_s12 + $0x1b0] sm:$0xf]  ;;  %v229_v46 = vld [vmem:[%s822_s12 + $0x1c0] sm:$0xf]  ;;  %v495_v49 = vmax.bf16 %v387_v39, %v223_v38  ;;  %v226_v51 = vld [vmem:[%s822_s12 + $0x1b4] sm:$0xf] }
  0x48   : > { %v389_v50 = vmax.bf16 %v225_v45, %v221_v28  ;;  %v230_v52 = vld [vmem:[%s822_s12 + $0x1c4] sm:$0xf]  ;;  %v227_v53 = vld [vmem:[%s822_s12 + $0x1b8] sm:$0xf]  ;;  %628 = vst [vmem:[%s834_s15 + $0xbc] sm:$0x3] %v627_v47  ;;  %v496_v54 = vmax.bf16 %v388_v43, %v224_v41  ;;  %v390_v55 = vmax.bf16 %v226_v51, %v222_v34 }
  0x49   : > { %629 = vst.msk [vmem:[%s834_s15 + $0xc0] sm:$0xf] %vm553_vm2, %v493_v42  ;;  %v231_v56 = vld [vmem:[%s822_s12 + $0x1c8] sm:$0xf]  ;;  %v391_v57 = vmax.bf16 %v227_v53, %v223_v38  ;;  %v228_v58 = vld [vmem:[%s822_s12 + $0x1bc] sm:$0x3] }
  0x4a   : > { %v232_v59 = vld [vmem:[%s822_s12 + $0x1cc] sm:$0x3]  ;;  %630 = vst.msk [vmem:[%s834_s15 + $0xc4] sm:$0xf] %vm553_vm2, %v494_v48  ;;  %631 = vst.msk [vmem:[%s834_s15 + $0xc8] sm:$0xf] %vm553_vm2, %v495_v49  ;;  %v497_v60 = vmax.bf16 %v389_v50, %v229_v46  ;;  %v392_v61 = vmax.bf16 %v228_v58, %v224_v41  ;;  %v633_v2 = vsel %vm824_vm3, %v496_v54, %v632_v44 }
  0x4b   : > { %v638_v62 = vld [vmem:[%s834_s15 + $0xdc] sm:$0x3]  ;;  %v233_v63 = vld [vmem:[%s822_s12 + $0x1d0] sm:$0xf]  ;;  %v237_v1 = vld [vmem:[%s822_s12 + $0x1e0] sm:$0xf]  ;;  %v498_v3 = vmax.bf16 %v390_v55, %v230_v52  ;;  %v499_v4 = vmax.bf16 %v391_v57, %v231_v56 }
  0x4c   : > { %v393_v5 = vmax.bf16 %v233_v63, %v229_v46  ;;  %v234_v6 = vld [vmem:[%s822_s12 + $0x1d4] sm:$0xf]  ;;  %v238_v7 = vld [vmem:[%s822_s12 + $0x1e4] sm:$0xf]  ;;  %v235_v8 = vld [vmem:[%s822_s12 + $0x1d8] sm:$0xf]  ;;  %v500_v9 = vmax.bf16 %v392_v61, %v232_v59 }
  0x4d   : > { %634 = vst [vmem:[%s834_s15 + $0xcc] sm:$0x3] %v633_v2  ;;  %635 = vst.msk [vmem:[%s834_s15 + $0xd0] sm:$0xf] %vm553_vm2, %v497_v60  ;;  %v394_v10 = vmax.bf16 %v234_v6, %v230_v52  ;;  %v239_v11 = vld [vmem:[%s822_s12 + $0x1e8] sm:$0xf]  ;;  %v395_v12 = vmax.bf16 %v235_v8, %v231_v56 }
  0x4e   : > { %v236_v13 = vld [vmem:[%s822_s12 + $0x1dc] sm:$0x3]  ;;  %v240_v14 = vld [vmem:[%s822_s12 + $0x1ec] sm:$0x3]  ;;  %636 = vst.msk [vmem:[%s834_s15 + $0xd4] sm:$0xf] %vm553_vm2, %v498_v3  ;;  %v501_v15 = vmax.bf16 %v393_v5, %v237_v1  ;;  %v639_v20 = vsel %vm824_vm3, %v500_v9, %v638_v62 }
  0x4f   : > { %637 = vst.msk [vmem:[%s834_s15 + $0xd8] sm:$0xf] %vm553_vm2, %v499_v4  ;;  %v396_v16 = vmax.bf16 %v236_v13, %v232_v59  ;;  %v644_v17 = vld [vmem:[%s834_s15 + $0xec] sm:$0x3]  ;;  %v241_v18 = vld [vmem:[%s822_s12 + $0x1f0] sm:$0xf]  ;;  %v502_v21 = vmax.bf16 %v394_v10, %v238_v7  ;;  %v503_v22 = vmax.bf16 %v395_v12, %v239_v11 }
  0x50   : > { %v245_v19 = vld [vmem:[%s822_s12 + $0x200] sm:$0xf]  ;;  %v397_v23 = vmax.bf16 %v241_v18, %v237_v1  ;;  %v242_v24 = vld [vmem:[%s822_s12 + $0x1f4] sm:$0xf]  ;;  %v246_v25 = vld [vmem:[%s822_s12 + $0x204] sm:$0xf] }
  0x51   : > { %v243_v26 = vld [vmem:[%s822_s12 + $0x1f8] sm:$0xf]  ;;  %640 = vst [vmem:[%s834_s15 + $0xdc] sm:$0x3] %v639_v20  ;;  %641 = vst.msk [vmem:[%s834_s15 + $0xe0] sm:$0xf] %vm553_vm2, %v501_v15  ;;  %v504_v27 = vmax.bf16 %v396_v16, %v240_v14  ;;  %v398_v28 = vmax.bf16 %v242_v24, %v238_v7 }
  0x52   : > { %v247_v29 = vld [vmem:[%s822_s12 + $0x208] sm:$0xf]  ;;  %v399_v30 = vmax.bf16 %v243_v26, %v239_v11  ;;  %v244_v31 = vld [vmem:[%s822_s12 + $0x1fc] sm:$0x3]  ;;  %v248_v32 = vld [vmem:[%s822_s12 + $0x20c] sm:$0x3]  ;;  %v505_v33 = vmax.bf16 %v397_v23, %v245_v19 }
  0x53   : > { %642 = vst.msk [vmem:[%s834_s15 + $0xe4] sm:$0xf] %vm553_vm2, %v502_v21  ;;  %643 = vst.msk [vmem:[%s834_s15 + $0xe8] sm:$0xf] %vm553_vm2, %v503_v22  ;;  %v400_v34 = vmax.bf16 %v244_v31, %v240_v14  ;;  %v650_v35 = vld [vmem:[%s834_s15 + $0xfc] sm:$0x3]  ;;  %v645_v38 = vsel %vm824_vm3, %v504_v27, %v644_v17  ;;  %v506_v39 = vmax.bf16 %v398_v28, %v246_v25 }
  0x54   : > { %v249_v36 = vld [vmem:[%s822_s12 + $0x210] sm:$0xf]  ;;  %v253_v37 = vld [vmem:[%s822_s12 + $0x220] sm:$0xf]  ;;  %v507_v40 = vmax.bf16 %v399_v30, %v247_v29  ;;  %v250_v42 = vld [vmem:[%s822_s12 + $0x214] sm:$0xf] }
  0x55   : > { %v401_v41 = vmax.bf16 %v249_v36, %v245_v19  ;;  %v254_v43 = vld [vmem:[%s822_s12 + $0x224] sm:$0xf]  ;;  %v251_v44 = vld [vmem:[%s822_s12 + $0x218] sm:$0xf]  ;;  %646 = vst [vmem:[%s834_s15 + $0xec] sm:$0x3] %v645_v38  ;;  %v508_v45 = vmax.bf16 %v400_v34, %v248_v32  ;;  %v402_v46 = vmax.bf16 %v250_v42, %v246_v25 }
  0x56   : > { %647 = vst.msk [vmem:[%s834_s15 + $0xf0] sm:$0xf] %vm553_vm2, %v505_v33  ;;  %v255_v47 = vld [vmem:[%s822_s12 + $0x228] sm:$0xf]  ;;  %v403_v48 = vmax.bf16 %v251_v44, %v247_v29  ;;  %v252_v49 = vld [vmem:[%s822_s12 + $0x21c] sm:$0x3] }
  0x57   : > { %v256_v50 = vld [vmem:[%s822_s12 + $0x22c] sm:$0x3]  ;;  %648 = vst.msk [vmem:[%s834_s15 + $0xf4] sm:$0xf] %vm553_vm2, %v506_v39  ;;  %649 = vst.msk [vmem:[%s834_s15 + $0xf8] sm:$0xf] %vm553_vm2, %v507_v40  ;;  %v509_v51 = vmax.bf16 %v401_v41, %v253_v37  ;;  %v404_v52 = vmax.bf16 %v252_v49, %v248_v32  ;;  %v651_v56 = vsel %vm824_vm3, %v508_v45, %v650_v35 }
  0x58   : > { %v656_v53 = vld [vmem:[%s834_s15 + $0x10c] sm:$0x3]  ;;  %v257_v54 = vld [vmem:[%s822_s12 + $0x230] sm:$0xf]  ;;  %v261_v55 = vld [vmem:[%s822_s12 + $0x240] sm:$0xf]  ;;  %v510_v57 = vmax.bf16 %v402_v46, %v254_v43  ;;  %v511_v58 = vmax.bf16 %v403_v48, %v255_v47 }
  0x59   : > { %v405_v59 = vmax.bf16 %v257_v54, %v253_v37  ;;  %v258_v60 = vld [vmem:[%s822_s12 + $0x234] sm:$0xf]  ;;  %v262_v61 = vld [vmem:[%s822_s12 + $0x244] sm:$0xf]  ;;  %v259_v62 = vld [vmem:[%s822_s12 + $0x238] sm:$0xf]  ;;  %v512_v63 = vmax.bf16 %v404_v52, %v256_v50 }
  0x5a   : > { %652 = vst [vmem:[%s834_s15 + $0xfc] sm:$0x3] %v651_v56  ;;  %653 = vst.msk [vmem:[%s834_s15 + $0x100] sm:$0xf] %vm553_vm2, %v509_v51  ;;  %v406_v1 = vmax.bf16 %v258_v60, %v254_v43  ;;  %v263_v2 = vld [vmem:[%s822_s12 + $0x248] sm:$0xf]  ;;  %v407_v3 = vmax.bf16 %v259_v62, %v255_v47 }
  0x5b   : > { %v260_v4 = vld [vmem:[%s822_s12 + $0x23c] sm:$0x3]  ;;  %v264_v5 = vld [vmem:[%s822_s12 + $0x24c] sm:$0x3]  ;;  %654 = vst.msk [vmem:[%s834_s15 + $0x104] sm:$0xf] %vm553_vm2, %v510_v57  ;;  %v513_v6 = vmax.bf16 %v405_v59, %v261_v55  ;;  %v657_v11 = vsel %vm824_vm3, %v512_v63, %v656_v53 }
  0x5c   : > { %655 = vst.msk [vmem:[%s834_s15 + $0x108] sm:$0xf] %vm553_vm2, %v511_v58  ;;  %v408_v7 = vmax.bf16 %v260_v4, %v256_v50  ;;  %v662_v8 = vld [vmem:[%s834_s15 + $0x11c] sm:$0x3]  ;;  %v265_v9 = vld [vmem:[%s822_s12 + $0x250] sm:$0xf]  ;;  %v514_v12 = vmax.bf16 %v406_v1, %v262_v61  ;;  %v515_v13 = vmax.bf16 %v407_v3, %v263_v2 }
  0x5d   : > { %v269_v10 = vld [vmem:[%s822_s12 + $0x260] sm:$0xf]  ;;  %v409_v14 = vmax.bf16 %v265_v9, %v261_v55  ;;  %v266_v15 = vld [vmem:[%s822_s12 + $0x254] sm:$0xf]  ;;  %v270_v16 = vld [vmem:[%s822_s12 + $0x264] sm:$0xf] }
  0x5e   : > { %v267_v17 = vld [vmem:[%s822_s12 + $0x258] sm:$0xf]  ;;  %658 = vst [vmem:[%s834_s15 + $0x10c] sm:$0x3] %v657_v11  ;;  %659 = vst.msk [vmem:[%s834_s15 + $0x110] sm:$0xf] %vm553_vm2, %v513_v6  ;;  %v516_v18 = vmax.bf16 %v408_v7, %v264_v5  ;;  %v410_v19 = vmax.bf16 %v266_v15, %v262_v61 }
  0x5f   : > { %v271_v20 = vld [vmem:[%s822_s12 + $0x268] sm:$0xf]  ;;  %v411_v21 = vmax.bf16 %v267_v17, %v263_v2  ;;  %v268_v22 = vld [vmem:[%s822_s12 + $0x25c] sm:$0x3]  ;;  %v272_v23 = vld [vmem:[%s822_s12 + $0x26c] sm:$0x3]  ;;  %v517_v24 = vmax.bf16 %v409_v14, %v269_v10 }
  0x60   : > { %660 = vst.msk [vmem:[%s834_s15 + $0x114] sm:$0xf] %vm553_vm2, %v514_v12  ;;  %661 = vst.msk [vmem:[%s834_s15 + $0x118] sm:$0xf] %vm553_vm2, %v515_v13  ;;  %v412_v25 = vmax.bf16 %v268_v22, %v264_v5  ;;  %v668_v26 = vld [vmem:[%s834_s15 + $0x12c] sm:$0x3]  ;;  %v663_v29 = vsel %vm824_vm3, %v516_v18, %v662_v8  ;;  %v518_v30 = vmax.bf16 %v410_v19, %v270_v16 }
  0x61   : > { %v273_v27 = vld [vmem:[%s822_s12 + $0x270] sm:$0xf]  ;;  %v277_v28 = vld [vmem:[%s822_s12 + $0x280] sm:$0xf]  ;;  %v519_v31 = vmax.bf16 %v411_v21, %v271_v20  ;;  %v274_v33 = vld [vmem:[%s822_s12 + $0x274] sm:$0xf] }
  0x62   : > { %v413_v32 = vmax.bf16 %v273_v27, %v269_v10  ;;  %v278_v34 = vld [vmem:[%s822_s12 + $0x284] sm:$0xf]  ;;  %v275_v35 = vld [vmem:[%s822_s12 + $0x278] sm:$0xf]  ;;  %664 = vst [vmem:[%s834_s15 + $0x11c] sm:$0x3] %v663_v29  ;;  %v520_v36 = vmax.bf16 %v412_v25, %v272_v23  ;;  %v414_v37 = vmax.bf16 %v274_v33, %v270_v16 }
  0x63   : > { %665 = vst.msk [vmem:[%s834_s15 + $0x120] sm:$0xf] %vm553_vm2, %v517_v24  ;;  %v279_v38 = vld [vmem:[%s822_s12 + $0x288] sm:$0xf]  ;;  %v415_v39 = vmax.bf16 %v275_v35, %v271_v20  ;;  %v276_v40 = vld [vmem:[%s822_s12 + $0x27c] sm:$0x3] }
  0x64   : > { %v280_v41 = vld [vmem:[%s822_s12 + $0x28c] sm:$0x3]  ;;  %666 = vst.msk [vmem:[%s834_s15 + $0x124] sm:$0xf] %vm553_vm2, %v518_v30  ;;  %667 = vst.msk [vmem:[%s834_s15 + $0x128] sm:$0xf] %vm553_vm2, %v519_v31  ;;  %v521_v42 = vmax.bf16 %v413_v32, %v277_v28  ;;  %v416_v43 = vmax.bf16 %v276_v40, %v272_v23  ;;  %v669_v47 = vsel %vm824_vm3, %v520_v36, %v668_v26 }
  0x65   : > { %v674_v44 = vld [vmem:[%s834_s15 + $0x13c] sm:$0x3]  ;;  %v281_v45 = vld [vmem:[%s822_s12 + $0x290] sm:$0xf]  ;;  %v285_v46 = vld [vmem:[%s822_s12 + $0x2a0] sm:$0xf]  ;;  %v522_v48 = vmax.bf16 %v414_v37, %v278_v34  ;;  %v523_v49 = vmax.bf16 %v415_v39, %v279_v38 }
  0x66   : > { %v417_v50 = vmax.bf16 %v281_v45, %v277_v28  ;;  %v282_v51 = vld [vmem:[%s822_s12 + $0x294] sm:$0xf]  ;;  %v286_v52 = vld [vmem:[%s822_s12 + $0x2a4] sm:$0xf]  ;;  %v283_v53 = vld [vmem:[%s822_s12 + $0x298] sm:$0xf]  ;;  %v524_v54 = vmax.bf16 %v416_v43, %v280_v41 }
  0x67   : > { %670 = vst [vmem:[%s834_s15 + $0x12c] sm:$0x3] %v669_v47  ;;  %671 = vst.msk [vmem:[%s834_s15 + $0x130] sm:$0xf] %vm553_vm2, %v521_v42  ;;  %v418_v55 = vmax.bf16 %v282_v51, %v278_v34  ;;  %v287_v56 = vld [vmem:[%s822_s12 + $0x2a8] sm:$0xf]  ;;  %v419_v57 = vmax.bf16 %v283_v53, %v279_v38 }
  0x68   : > { %v284_v58 = vld [vmem:[%s822_s12 + $0x29c] sm:$0x3]  ;;  %v288_v59 = vld [vmem:[%s822_s12 + $0x2ac] sm:$0x3]  ;;  %672 = vst.msk [vmem:[%s834_s15 + $0x134] sm:$0xf] %vm553_vm2, %v522_v48  ;;  %v525_v60 = vmax.bf16 %v417_v50, %v285_v46  ;;  %v675_v2 = vsel %vm824_vm3, %v524_v54, %v674_v44 }
  0x69   : > { %673 = vst.msk [vmem:[%s834_s15 + $0x138] sm:$0xf] %vm553_vm2, %v523_v49  ;;  %v420_v61 = vmax.bf16 %v284_v58, %v280_v41  ;;  %v680_v62 = vld [vmem:[%s834_s15 + $0x14c] sm:$0x3]  ;;  %v289_v63 = vld [vmem:[%s822_s12 + $0x2b0] sm:$0xf]  ;;  %v526_v3 = vmax.bf16 %v418_v55, %v286_v52  ;;  %v527_v4 = vmax.bf16 %v419_v57, %v287_v56 }
  0x6a   : > { %v293_v1 = vld [vmem:[%s822_s12 + $0x2c0] sm:$0xf]  ;;  %v421_v5 = vmax.bf16 %v289_v63, %v285_v46  ;;  %v290_v6 = vld [vmem:[%s822_s12 + $0x2b4] sm:$0xf]  ;;  %v294_v7 = vld [vmem:[%s822_s12 + $0x2c4] sm:$0xf] }
  0x6b   : > { %v291_v8 = vld [vmem:[%s822_s12 + $0x2b8] sm:$0xf]  ;;  %676 = vst [vmem:[%s834_s15 + $0x13c] sm:$0x3] %v675_v2  ;;  %677 = vst.msk [vmem:[%s834_s15 + $0x140] sm:$0xf] %vm553_vm2, %v525_v60  ;;  %v528_v9 = vmax.bf16 %v420_v61, %v288_v59  ;;  %v422_v10 = vmax.bf16 %v290_v6, %v286_v52 }
  0x6c   : > { %v295_v11 = vld [vmem:[%s822_s12 + $0x2c8] sm:$0xf]  ;;  %v423_v12 = vmax.bf16 %v291_v8, %v287_v56  ;;  %v292_v13 = vld [vmem:[%s822_s12 + $0x2bc] sm:$0x3]  ;;  %v296_v14 = vld [vmem:[%s822_s12 + $0x2cc] sm:$0x3]  ;;  %v529_v15 = vmax.bf16 %v421_v5, %v293_v1 }
  0x6d   : > { %678 = vst.msk [vmem:[%s834_s15 + $0x144] sm:$0xf] %vm553_vm2, %v526_v3  ;;  %679 = vst.msk [vmem:[%s834_s15 + $0x148] sm:$0xf] %vm553_vm2, %v527_v4  ;;  %v424_v16 = vmax.bf16 %v292_v13, %v288_v59  ;;  %v686_v17 = vld [vmem:[%s834_s15 + $0x15c] sm:$0x3]  ;;  %v681_v20 = vsel %vm824_vm3, %v528_v9, %v680_v62  ;;  %v530_v21 = vmax.bf16 %v422_v10, %v294_v7 }
  0x6e   : > { %v297_v18 = vld [vmem:[%s822_s12 + $0x2d0] sm:$0xf]  ;;  %v301_v19 = vld [vmem:[%s822_s12 + $0x2e0] sm:$0xf]  ;;  %v531_v22 = vmax.bf16 %v423_v12, %v295_v11  ;;  %v298_v24 = vld [vmem:[%s822_s12 + $0x2d4] sm:$0xf] }
  0x6f   : > { %v425_v23 = vmax.bf16 %v297_v18, %v293_v1  ;;  %v302_v25 = vld [vmem:[%s822_s12 + $0x2e4] sm:$0xf]  ;;  %v299_v26 = vld [vmem:[%s822_s12 + $0x2d8] sm:$0xf]  ;;  %682 = vst [vmem:[%s834_s15 + $0x14c] sm:$0x3] %v681_v20  ;;  %v532_v27 = vmax.bf16 %v424_v16, %v296_v14  ;;  %v426_v28 = vmax.bf16 %v298_v24, %v294_v7 }
  0x70   : > { %683 = vst.msk [vmem:[%s834_s15 + $0x150] sm:$0xf] %vm553_vm2, %v529_v15  ;;  %v303_v29 = vld [vmem:[%s822_s12 + $0x2e8] sm:$0xf]  ;;  %v427_v30 = vmax.bf16 %v299_v26, %v295_v11  ;;  %v300_v31 = vld [vmem:[%s822_s12 + $0x2dc] sm:$0x3] }
  0x71   : > { %v304_v32 = vld [vmem:[%s822_s12 + $0x2ec] sm:$0x3]  ;;  %684 = vst.msk [vmem:[%s834_s15 + $0x154] sm:$0xf] %vm553_vm2, %v530_v21  ;;  %685 = vst.msk [vmem:[%s834_s15 + $0x158] sm:$0xf] %vm553_vm2, %v531_v22  ;;  %v533_v33 = vmax.bf16 %v425_v23, %v301_v19  ;;  %v428_v34 = vmax.bf16 %v300_v31, %v296_v14  ;;  %v687_v38 = vsel %vm824_vm3, %v532_v27, %v686_v17 }
  0x72   : > { %v692_v35 = vld [vmem:[%s834_s15 + $0x16c] sm:$0x3]  ;;  %v305_v36 = vld [vmem:[%s822_s12 + $0x2f0] sm:$0xf]  ;;  %v309_v37 = vld [vmem:[%s822_s12 + $0x300] sm:$0xf]  ;;  %v534_v39 = vmax.bf16 %v426_v28, %v302_v25  ;;  %v535_v40 = vmax.bf16 %v427_v30, %v303_v29 }
  0x73   : > { %v429_v41 = vmax.bf16 %v305_v36, %v301_v19  ;;  %v306_v42 = vld [vmem:[%s822_s12 + $0x2f4] sm:$0xf]  ;;  %v310_v43 = vld [vmem:[%s822_s12 + $0x304] sm:$0xf]  ;;  %v307_v44 = vld [vmem:[%s822_s12 + $0x2f8] sm:$0xf]  ;;  %v536_v45 = vmax.bf16 %v428_v34, %v304_v32 }
  0x74   : > { %688 = vst [vmem:[%s834_s15 + $0x15c] sm:$0x3] %v687_v38  ;;  %689 = vst.msk [vmem:[%s834_s15 + $0x160] sm:$0xf] %vm553_vm2, %v533_v33  ;;  %v430_v46 = vmax.bf16 %v306_v42, %v302_v25  ;;  %v311_v47 = vld [vmem:[%s822_s12 + $0x308] sm:$0xf]  ;;  %v431_v48 = vmax.bf16 %v307_v44, %v303_v29 }
  0x75   : > { %v308_v49 = vld [vmem:[%s822_s12 + $0x2fc] sm:$0x3]  ;;  %v312_v50 = vld [vmem:[%s822_s12 + $0x30c] sm:$0x3]  ;;  %690 = vst.msk [vmem:[%s834_s15 + $0x164] sm:$0xf] %vm553_vm2, %v534_v39  ;;  %v537_v51 = vmax.bf16 %v429_v41, %v309_v37  ;;  %v693_v56 = vsel %vm824_vm3, %v536_v45, %v692_v35 }
  0x76   : > { %691 = vst.msk [vmem:[%s834_s15 + $0x168] sm:$0xf] %vm553_vm2, %v535_v40  ;;  %v432_v52 = vmax.bf16 %v308_v49, %v304_v32  ;;  %v698_v53 = vld [vmem:[%s834_s15 + $0x17c] sm:$0x3]  ;;  %v313_v54 = vld [vmem:[%s822_s12 + $0x310] sm:$0xf]  ;;  %v538_v57 = vmax.bf16 %v430_v46, %v310_v43  ;;  %v539_v58 = vmax.bf16 %v431_v48, %v311_v47 }
  0x77   : > { %v317_v55 = vld [vmem:[%s822_s12 + $0x320] sm:$0xf]  ;;  %v433_v59 = vmax.bf16 %v313_v54, %v309_v37  ;;  %v314_v60 = vld [vmem:[%s822_s12 + $0x314] sm:$0xf]  ;;  %v318_v61 = vld [vmem:[%s822_s12 + $0x324] sm:$0xf] }
  0x78   : > { %v315_v62 = vld [vmem:[%s822_s12 + $0x318] sm:$0xf]  ;;  %694 = vst [vmem:[%s834_s15 + $0x16c] sm:$0x3] %v693_v56  ;;  %695 = vst.msk [vmem:[%s834_s15 + $0x170] sm:$0xf] %vm553_vm2, %v537_v51  ;;  %v540_v63 = vmax.bf16 %v432_v52, %v312_v50  ;;  %v434_v1 = vmax.bf16 %v314_v60, %v310_v43 }
  0x79   : > { %v319_v2 = vld [vmem:[%s822_s12 + $0x328] sm:$0xf]  ;;  %v435_v3 = vmax.bf16 %v315_v62, %v311_v47  ;;  %v316_v4 = vld [vmem:[%s822_s12 + $0x31c] sm:$0x3]  ;;  %v320_v5 = vld [vmem:[%s822_s12 + $0x32c] sm:$0x3]  ;;  %v541_v6 = vmax.bf16 %v433_v59, %v317_v55 }
  0x7a   : > { %696 = vst.msk [vmem:[%s834_s15 + $0x174] sm:$0xf] %vm553_vm2, %v538_v57  ;;  %697 = vst.msk [vmem:[%s834_s15 + $0x178] sm:$0xf] %vm553_vm2, %v539_v58  ;;  %v436_v7 = vmax.bf16 %v316_v4, %v312_v50  ;;  %v704_v8 = vld [vmem:[%s834_s15 + $0x18c] sm:$0x3]  ;;  %v699_v11 = vsel %vm824_vm3, %v540_v63, %v698_v53  ;;  %v542_v12 = vmax.bf16 %v434_v1, %v318_v61 }
  0x7b   : > { %v321_v9 = vld [vmem:[%s822_s12 + $0x330] sm:$0xf]  ;;  %v325_v10 = vld [vmem:[%s822_s12 + $0x340] sm:$0xf]  ;;  %v543_v13 = vmax.bf16 %v435_v3, %v319_v2  ;;  %v322_v15 = vld [vmem:[%s822_s12 + $0x334] sm:$0xf] }
  0x7c   : > { %v437_v14 = vmax.bf16 %v321_v9, %v317_v55  ;;  %v326_v16 = vld [vmem:[%s822_s12 + $0x344] sm:$0xf]  ;;  %v323_v17 = vld [vmem:[%s822_s12 + $0x338] sm:$0xf]  ;;  %700 = vst [vmem:[%s834_s15 + $0x17c] sm:$0x3] %v699_v11  ;;  %v544_v18 = vmax.bf16 %v436_v7, %v320_v5  ;;  %v438_v19 = vmax.bf16 %v322_v15, %v318_v61 }
  0x7d   : > { %701 = vst.msk [vmem:[%s834_s15 + $0x180] sm:$0xf] %vm553_vm2, %v541_v6  ;;  %v327_v20 = vld [vmem:[%s822_s12 + $0x348] sm:$0xf]  ;;  %v439_v21 = vmax.bf16 %v323_v17, %v319_v2  ;;  %v324_v22 = vld [vmem:[%s822_s12 + $0x33c] sm:$0x3] }
  0x7e   : > { %v328_v23 = vld [vmem:[%s822_s12 + $0x34c] sm:$0x3]  ;;  %702 = vst.msk [vmem:[%s834_s15 + $0x184] sm:$0xf] %vm553_vm2, %v542_v12  ;;  %703 = vst.msk [vmem:[%s834_s15 + $0x188] sm:$0xf] %vm553_vm2, %v543_v13  ;;  %v545_v24 = vmax.bf16 %v437_v14, %v325_v10  ;;  %v440_v25 = vmax.bf16 %v324_v22, %v320_v5  ;;  %v705_v29 = vsel %vm824_vm3, %v544_v18, %v704_v8 }
  0x7f   : > { %v710_v26 = vld [vmem:[%s834_s15 + $0x19c] sm:$0x3]  ;;  %v329_v27 = vld [vmem:[%s822_s12 + $0x350] sm:$0xf]  ;;  %v333_v28 = vld [vmem:[%s822_s12 + $0x360] sm:$0xf]  ;;  %v546_v30 = vmax.bf16 %v438_v19, %v326_v16  ;;  %v547_v31 = vmax.bf16 %v439_v21, %v327_v20 }
  0x80   : > { %v441_v32 = vmax.bf16 %v329_v27, %v325_v10  ;;  %v330_v33 = vld [vmem:[%s822_s12 + $0x354] sm:$0xf]  ;;  %v334_v34 = vld [vmem:[%s822_s12 + $0x364] sm:$0xf]  ;;  %v331_v35 = vld [vmem:[%s822_s12 + $0x358] sm:$0xf]  ;;  %v548_v36 = vmax.bf16 %v440_v25, %v328_v23 }
  0x81   : > { %706 = vst [vmem:[%s834_s15 + $0x18c] sm:$0x3] %v705_v29  ;;  %707 = vst.msk [vmem:[%s834_s15 + $0x190] sm:$0xf] %vm553_vm2, %v545_v24  ;;  %v442_v37 = vmax.bf16 %v330_v33, %v326_v16  ;;  %v335_v38 = vld [vmem:[%s822_s12 + $0x368] sm:$0xf]  ;;  %v443_v39 = vmax.bf16 %v331_v35, %v327_v20 }
  0x82   : > { %v332_v40 = vld [vmem:[%s822_s12 + $0x35c] sm:$0x3]  ;;  %v336_v41 = vld [vmem:[%s822_s12 + $0x36c] sm:$0x3]  ;;  %708 = vst.msk [vmem:[%s834_s15 + $0x194] sm:$0xf] %vm553_vm2, %v546_v30  ;;  %v549_v42 = vmax.bf16 %v441_v32, %v333_v28  ;;  %v711_v44 = vsel %vm824_vm3, %v548_v36, %v710_v26 }
  0x83   : > { %709 = vst.msk [vmem:[%s834_s15 + $0x198] sm:$0xf] %vm553_vm2, %v547_v31  ;;  %v444_v43 = vmax.bf16 %v332_v40, %v328_v23  ;;  %v550_v45 = vmax.bf16 %v442_v37, %v334_v34  ;;  %v551_v46 = vmax.bf16 %v443_v39, %v335_v38  ;;  %v716_v47 = vld [vmem:[%s834_s15 + $0x1ac] sm:$0x3]  ;;  %712 = vst [vmem:[%s834_s15 + $0x19c] sm:$0x3] %v711_v44 }
  0x84   : > { %713 = vst.msk [vmem:[%s834_s15 + $0x1a0] sm:$0xf] %vm553_vm2, %v549_v42 }
  0x85   : > { %v552_v48 = vmax.bf16 %v444_v43, %v336_v41  ;;  %714 = vst.msk [vmem:[%s834_s15 + $0x1a4] sm:$0xf] %vm553_vm2, %v550_v45  ;;  %715 = vst.msk [vmem:[%s834_s15 + $0x1a8] sm:$0xf] %vm553_vm2, %v551_v46 }
  0x87   : > { %v717_v49 = vsel %vm824_vm3, %v552_v48, %v716_v47 }
  0x88   : > { %718 = vst [vmem:[%s834_s15 + $0x1ac] sm:$0x3] %v717_v49 }
  0x89 PF: > { %s11_s6 = sadd.s32 1, %s799_s6  }
  0x8a   : > { %p8_p4 = scmp.ge.s32.totalorder %s11_s6, 4  }
  0x8c   :  { %10 = sbr.rel (!%p8_p4) target bundleno = 1 (0x1), region = 54 }

// kernel: alexnet_forward.17
= control target key start
LH: loop header
LB: loop body
LE: loop exit
PB: predicated region body
PF: predicated region fallthrough
CT: control target
= control target key end

     0   :  { %s1987_s12 = smov 0   ;;  %s1989_s13 = smov 0   ;;  %s2370_s0 = inlined_call_operand.vmem [shape: bf16[1536,1664], index: 0, kind: input, shape index: {}]   ;;  %s2371_s1 = inlined_call_operand.vmem [shape: bf16[1664,256], index: 1, kind: input, shape index: {}]   ;;  %s2372_s2 = inlined_call_operand.vmem [shape: f32[1,256], index: 2, kind: input, shape index: {}]   ;;  %s2373_s3 = inlined_call_operand.vmem [shape: bf16[1536,256], index: 3, kind: output, shape index: {}]  }
   0x1   :  { %s1991_s14 = smov 0   ;;  %s1993_s15 = smov 0  }
   0x2   :  { %s1995_s16 = smov 0   ;;  %s1997_s17 = smov 0  }
   0x3   :  { %s1999_s18 = smov 0  }
   0x4 LB: > { %s25_s19 = sadd.s32 1, %s1955_s16  ;;  %s32_s20 = sadd.s32 1, %s1959_s17  ;;  %s1963_s18 = sphi %s1999_s18, %s13_s18   ;;  %s1959_s17 = sphi %s1997_s17, %s2379_s17   ;;  %s1955_s16 = sphi %s1995_s16, %s2378_s16   ;;  %s1951_s15 = sphi %s1993_s15, %s2377_s15   ;;  %s1947_s14 = sphi %s1991_s14, %s2376_s14   ;;  %s1943_s13 = sphi %s1989_s13, %s2375_s13   ;;  %s1939_s12 = sphi %s1987_s12, %s2374_s12  }
   0x5   : > { %p26_p0 = scmp.ge.s32.totalorder %s25_s19, 13  ;;  %p48_p1 = scmp.ne.s32.totalorder %s1943_s13, %s1939_s12 }
   0x6   : > { %p49_p2 = scmp.eq.s32.totalorder %s1963_s18, 0  ;;  %s41_s24 = sadd.s32 1, %s1943_s13 }
   0x7   : > { %s2381_s19 = smov (%p26_p0, %s25_s19), 0  ;;  %s2383_s20 = smov (!%p26_p0, %s32_s20), %s1959_s17 }
   0x8   : > { %p50_p3 = por %p49_p2, %p48_p1  ;;  %p34_p4 = scmp.ge.s32.totalorder %s2383_s20, 6 }
   0x9   : > { %s37_s21 = ssub.s32 %s1955_s16, %s2381_s19  ;;  %p1679_p6 = scmp.ge.s32.totalorder %s1963_s18, 78 }
   0xa   : > { %s2385_s20 = smov (%p34_p4, %s2383_s20), 0 }
   0xb   : > { %s36_s22 = ssub.s32 %s1959_s17, %s2385_s20  ;;  %164 = sbr.rel (%p1679_p6) target bundleno = 44 (0x2c), region = 20 }
   0xc   : > { %s38_s23 = sor.u32 %s37_s21, %s36_s22 }
   0xd   : > { %p39_p5 = scmp.eq.s32.totalorder %s38_s23, 0 }
   0xf   : > { %s2038_s25 = scalar_select %p39_p5, %s1943_s13, %s41_s24  }
  0x10   : > { %167 = sbr.rel (!%p50_p3) target bundleno = 44 (0x2c), region = 24  ;;  %s169_s26 = sand.u32 (%p50_p3), 1, %s1943_s13  }
  0x11   : > { %s1810_s27 = smul.u32 (%p50_p3), 416, %s1959_s17  ;;  %s1680_s28 = sshll.u32 (%p50_p3), %s169_s26, 7 }
  0x12   : > { %s2052_s7 = scalar_lea.vmem (%p50_p3), [#allocation3], %s1680_s28 }
  0x13   : > { %s174_s29 = sadd.s32 (%p50_p3), %s1955_s16, %s1810_s27 }
  0x14   : > { %s1683_s30 = sshll.u32 (%p50_p3), %s174_s29, 2 }
  0x15   : > { %s2047_s6 = scalar_lea.vmem %s2370_s0, %s1683_s30 }
  0x16   : > { %v193_v0 = vld [vmem:[%s2047_s6] sm:$0xf]  ;;  %v195_v1 = vld [vmem:[%s2047_s6 + $0x34] sm:$0xf]  ;;  %v197_v2 = vld [vmem:[%s2047_s6 + $0x68] sm:$0xf] }
  0x17   : > { %194 = vst [vmem:[%s2052_s7] sm:$0xf] %v193_v0  ;;  %196 = vst [vmem:[%s2052_s7 + $0x4] sm:$0xf] %v195_v1  ;;  %v199_v3 = vld [vmem:[%s2047_s6 + $0x9c] sm:$0xf] }
  0x18   : > { %198 = vst [vmem:[%s2052_s7 + $0x8] sm:$0xf] %v197_v2  ;;  %v201_v4 = vld [vmem:[%s2047_s6 + $0xd0] sm:$0xf]  ;;  %v203_v5 = vld [vmem:[%s2047_s6 + $0x104] sm:$0xf] }
  0x19   : > { %200 = vst [vmem:[%s2052_s7 + $0xc] sm:$0xf] %v199_v3  ;;  %202 = vst [vmem:[%s2052_s7 + $0x10] sm:$0xf] %v201_v4  ;;  %v205_v6 = vld [vmem:[%s2047_s6 + $0x138] sm:$0xf] }
  0x1a   : > { %204 = vst [vmem:[%s2052_s7 + $0x14] sm:$0xf] %v203_v5  ;;  %v207_v7 = vld [vmem:[%s2047_s6 + $0x16c] sm:$0xf]  ;;  %v209_v8 = vld [vmem:[%s2047_s6 + $0x1a0] sm:$0xf] }
  0x1b   : > { %206 = vst [vmem:[%s2052_s7 + $0x18] sm:$0xf] %v205_v6  ;;  %208 = vst [vmem:[%s2052_s7 + $0x1c] sm:$0xf] %v207_v7  ;;  %v211_v9 = vld [vmem:[%s2047_s6 + $0x1d4] sm:$0xf] }
  0x1c   : > { %210 = vst [vmem:[%s2052_s7 + $0x20] sm:$0xf] %v209_v8  ;;  %v213_v10 = vld [vmem:[%s2047_s6 + $0x208] sm:$0xf]  ;;  %v215_v11 = vld [vmem:[%s2047_s6 + $0x23c] sm:$0xf] }
  0x1d   : > { %212 = vst [vmem:[%s2052_s7 + $0x24] sm:$0xf] %v211_v9  ;;  %214 = vst [vmem:[%s2052_s7 + $0x28] sm:$0xf] %v213_v10  ;;  %v217_v12 = vld [vmem:[%s2047_s6 + $0x270] sm:$0xf] }
  0x1e   : > { %216 = vst [vmem:[%s2052_s7 + $0x2c] sm:$0xf] %v215_v11  ;;  %v219_v13 = vld [vmem:[%s2047_s6 + $0x2a4] sm:$0xf]  ;;  %v221_v14 = vld [vmem:[%s2047_s6 + $0x2d8] sm:$0xf] }
  0x1f   : > { %218 = vst [vmem:[%s2052_s7 + $0x30] sm:$0xf] %v217_v12  ;;  %220 = vst [vmem:[%s2052_s7 + $0x34] sm:$0xf] %v219_v13  ;;  %v223_v15 = vld [vmem:[%s2047_s6 + $0x30c] sm:$0xf] }
  0x20   : > { %222 = vst [vmem:[%s2052_s7 + $0x38] sm:$0xf] %v221_v14  ;;  %v225_v16 = vld [vmem:[%s2047_s6 + $0x340] sm:$0xf]  ;;  %v227_v17 = vld [vmem:[%s2047_s6 + $0x374] sm:$0xf] }
  0x21   : > { %224 = vst [vmem:[%s2052_s7 + $0x3c] sm:$0xf] %v223_v15  ;;  %226 = vst [vmem:[%s2052_s7 + $0x40] sm:$0xf] %v225_v16  ;;  %v229_v18 = vld [vmem:[%s2047_s6 + $0x3a8] sm:$0xf] }
  0x22   : > { %228 = vst [vmem:[%s2052_s7 + $0x44] sm:$0xf] %v227_v17  ;;  %v231_v19 = vld [vmem:[%s2047_s6 + $0x3dc] sm:$0xf]  ;;  %v233_v20 = vld [vmem:[%s2047_s6 + $0x410] sm:$0xf] }
  0x23   : > { %230 = vst [vmem:[%s2052_s7 + $0x48] sm:$0xf] %v229_v18  ;;  %232 = vst [vmem:[%s2052_s7 + $0x4c] sm:$0xf] %v231_v19  ;;  %v235_v21 = vld [vmem:[%s2047_s6 + $0x444] sm:$0xf] }
  0x24   : > { %234 = vst [vmem:[%s2052_s7 + $0x50] sm:$0xf] %v233_v20  ;;  %v237_v22 = vld [vmem:[%s2047_s6 + $0x478] sm:$0xf]  ;;  %v239_v23 = vld [vmem:[%s2047_s6 + $0x4ac] sm:$0xf] }
  0x25   : > { %236 = vst [vmem:[%s2052_s7 + $0x54] sm:$0xf] %v235_v21  ;;  %238 = vst [vmem:[%s2052_s7 + $0x58] sm:$0xf] %v237_v22  ;;  %v241_v24 = vld [vmem:[%s2047_s6 + $0x4e0] sm:$0xf] }
  0x26   : > { %240 = vst [vmem:[%s2052_s7 + $0x5c] sm:$0xf] %v239_v23  ;;  %v243_v25 = vld [vmem:[%s2047_s6 + $0x514] sm:$0xf]  ;;  %v245_v26 = vld [vmem:[%s2047_s6 + $0x548] sm:$0xf] }
  0x27   : > { %242 = vst [vmem:[%s2052_s7 + $0x60] sm:$0xf] %v241_v24  ;;  %244 = vst [vmem:[%s2052_s7 + $0x64] sm:$0xf] %v243_v25  ;;  %v247_v27 = vld [vmem:[%s2047_s6 + $0x57c] sm:$0xf] }
  0x28   : > { %246 = vst [vmem:[%s2052_s7 + $0x68] sm:$0xf] %v245_v26  ;;  %v249_v28 = vld [vmem:[%s2047_s6 + $0x5b0] sm:$0xf]  ;;  %v251_v29 = vld [vmem:[%s2047_s6 + $0x5e4] sm:$0xf] }
  0x29   : > { %248 = vst [vmem:[%s2052_s7 + $0x6c] sm:$0xf] %v247_v27  ;;  %250 = vst [vmem:[%s2052_s7 + $0x70] sm:$0xf] %v249_v28  ;;  %v253_v30 = vld [vmem:[%s2047_s6 + $0x618] sm:$0xf] }
  0x2a   : > { %252 = vst [vmem:[%s2052_s7 + $0x74] sm:$0xf] %v251_v29  ;;  %v255_v31 = vld [vmem:[%s2047_s6 + $0x64c] sm:$0xf]  ;;  %254 = vst [vmem:[%s2052_s7 + $0x78] sm:$0xf] %v253_v30 }
  0x2b   : > { %256 = vst [vmem:[%s2052_s7 + $0x7c] sm:$0xf] %v255_v31 }
  0x2c PF: > { %p1684_p7 = scmp.ge.s32.totalorder %s1963_s18, 1  ;;  %p358_p8 = scmp.lt.s32.totalorder %s1963_s18, 79 }
  0x2e   : > { %p359_p9 = pnand %p1684_p7, %p358_p8 }
  0x2f   : > { %s365_s8 = sand.u32 (!%p359_p9), 1, %s1939_s12   ;;  %s1686_s9 = sshll.u32 (!%p359_p9), %s1947_s14, 4 }
  0x30   : > { %362 = sbr.rel (%p359_p9) target bundleno = 438 (0x1b6), region = 69  ;;  %s1685_s10 = sshll.u32 (!%p359_p9), %s365_s8, 7 }
  0x31   : > { %p410_p10 = scmp.lt.s32.totalorder (!%p359_p9), %s1686_s9, 207  ;;  %s1689_s11 = sshll.u32 (!%p359_p9), %s1951_s15, 5 }
  0x32   : > { %p427_p11 = scmp.lt.s32.totalorder (!%p359_p9), %s1689_s11, 191  ;;  %s2130_s12 = scalar_lea.vmem (!%p359_p9), [#allocation3], %s1685_s10 }
  0x33   : > { %p1692_p12 = scmp.ne.s32.totalorder (!%p359_p9), %s1947_s14, 0 }
  0x35   : > { %s2387_s9 = smov (!%p410_p10, %s1686_s9), 207  ;;  %s2389_s11 = smov (!%p427_p11, %s1689_s11), 191 }
  0x36   : > { %s1760_s21 = sshll.u32 %s2387_s9, 3  ;;  %s1761_s26 = sshll.u32 %s2389_s11, 3 }
  0x37   : > { %s2123_s24 = scalar_lea.vmem %s2371_s1, %s1760_s21  ;;  %s2128_s29 = scalar_lea.vmem %s2373_s3, %s1761_s26 }
  0x38   : > { %441 = sbr.rel (%p1692_p12) target bundleno = 94 (0x5e), region = 77 }
  0x3d   : > { %v1965_v32 = vmov 0.0  }
  0x3e   : > { %442 = vst [vmem:[#allocation2 + $0xb0] sm:$0xff] %v1965_v32  ;;  %443 = vst [vmem:[#allocation2 + $0x1b0] sm:$0xff] %v1965_v32 }
  0x3f   : > { %444 = vst [vmem:[#allocation2 + $0xd8] sm:$0xff] %v1965_v32  ;;  %445 = vst [vmem:[#allocation2 + $0x18] sm:$0xff] %v1965_v32 }
  0x40   : > { %446 = vst [vmem:[#allocation2 + $0x50] sm:$0xff] %v1965_v32  ;;  %447 = vst [vmem:[#allocation2 + $0x168] sm:$0xff] %v1965_v32 }
  0x41   : > { %448 = vst [vmem:[#allocation2 + $0x130] sm:$0xff] %v1965_v32  ;;  %449 = vst [vmem:[#allocation2 + $0x48] sm:$0xff] %v1965_v32 }
  0x42   : > { %450 = vst [vmem:[#allocation2 + $0x180] sm:$0xff] %v1965_v32  ;;  %451 = vst [vmem:[#allocation2 + $0x110] sm:$0xff] %v1965_v32 }
  0x43   : > { %452 = vst [vmem:[#allocation2 + $0x118] sm:$0xff] %v1965_v32  ;;  %453 = vst [vmem:[#allocation2 + $0x98] sm:$0xff] %v1965_v32 }
  0x44   : > { %454 = vst [vmem:[#allocation2 + $0x120] sm:$0xff] %v1965_v32  ;;  %455 = vst [vmem:[#allocation2 + $0x150] sm:$0xff] %v1965_v32 }
  0x45   : > { %456 = vst [vmem:[#allocation2 + $0x108] sm:$0xff] %v1965_v32  ;;  %457 = vst [vmem:[#allocation2 + $0x60] sm:$0xff] %v1965_v32 }
  0x46   : > { %458 = vst [vmem:[#allocation2 + $0xe0] sm:$0xff] %v1965_v32  ;;  %459 = vst [vmem:[#allocation2 + $0x188] sm:$0xff] %v1965_v32 }
  0x47   : > { %460 = vst [vmem:[#allocation2 + $0x138] sm:$0xff] %v1965_v32  ;;  %461 = vst [vmem:[#allocation2 + $0x140] sm:$0xff] %v1965_v32 }
  0x48   : > { %462 = vst [vmem:[#allocation2 + $0x80] sm:$0xff] %v1965_v32  ;;  %463 = vst [vmem:[#allocation2 + $0x1a8] sm:$0xff] %v1965_v32 }
  0x49   : > { %464 = vst [vmem:[#allocation2 + $0x1b8] sm:$0xff] %v1965_v32  ;;  %465 = vst [vmem:[#allocation2 + $0x28] sm:$0xff] %v1965_v32 }
  0x4a   : > { %466 = vst [vmem:[#allocation2 + $0x1e8] sm:$0xff] %v1965_v32  ;;  %467 = vst [vmem:[#allocation2 + $0xf8] sm:$0xff] %v1965_v32 }
  0x4b   : > { %468 = vst [vmem:[#allocation2 + $0x160] sm:$0xff] %v1965_v32  ;;  %469 = vst [vmem:[#allocation2 + $0x30] sm:$0xff] %v1965_v32 }
  0x4c   : > { %470 = vst [vmem:[#allocation2 + $0x1e0] sm:$0xff] %v1965_v32  ;;  %471 = vst [vmem:[#allocation2] sm:$0xff] %v1965_v32 }
  0x4d   : > { %472 = vst [vmem:[#allocation2 + $0xf0] sm:$0xff] %v1965_v32  ;;  %473 = vst [vmem:[#allocation2 + $0x8] sm:$0xff] %v1965_v32 }
  0x4e   : > { %474 = vst [vmem:[#allocation2 + $0x148] sm:$0xff] %v1965_v32  ;;  %475 = vst [vmem:[#allocation2 + $0x1d0] sm:$0xff] %v1965_v32 }
  0x4f   : > { %476 = vst [vmem:[#allocation2 + $0x100] sm:$0xff] %v1965_v32  ;;  %477 = vst [vmem:[#allocation2 + $0xc8] sm:$0xff] %v1965_v32 }
  0x50   : > { %478 = vst [vmem:[#allocation2 + $0x40] sm:$0xff] %v1965_v32  ;;  %479 = vst [vmem:[#allocation2 + $0x1f8] sm:$0xff] %v1965_v32 }
  0x51   : > { %480 = vst [vmem:[#allocation2 + $0x20] sm:$0xff] %v1965_v32  ;;  %481 = vst [vmem:[#allocation2 + $0x128] sm:$0xff] %v1965_v32 }
  0x52   : > { %482 = vst [vmem:[#allocation2 + $0x1a0] sm:$0xff] %v1965_v32  ;;  %483 = vst [vmem:[#allocation2 + $0x1f0] sm:$0xff] %v1965_v32 }
  0x53   : > { %484 = vst [vmem:[#allocation2 + $0xe8] sm:$0xff] %v1965_v32  ;;  %485 = vst [vmem:[#allocation2 + $0x78] sm:$0xff] %v1965_v32 }
  0x54   : > { %486 = vst [vmem:[#allocation2 + $0x70] sm:$0xff] %v1965_v32  ;;  %487 = vst [vmem:[#allocation2 + $0x90] sm:$0xff] %v1965_v32 }
  0x55   : > { %488 = vst [vmem:[#allocation2 + $0x1d8] sm:$0xff] %v1965_v32  ;;  %489 = vst [vmem:[#allocation2 + $0xd0] sm:$0xff] %v1965_v32 }
  0x56   : > { %490 = vst [vmem:[#allocation2 + $0xb8] sm:$0xff] %v1965_v32  ;;  %491 = vst [vmem:[#allocation2 + $0x88] sm:$0xff] %v1965_v32 }
  0x57   : > { %492 = vst [vmem:[#allocation2 + $0xa8] sm:$0xff] %v1965_v32  ;;  %493 = vst [vmem:[#allocation2 + $0x1c8] sm:$0xff] %v1965_v32 }
  0x58   : > { %494 = vst [vmem:[#allocation2 + $0x170] sm:$0xff] %v1965_v32  ;;  %495 = vst [vmem:[#allocation2 + $0x178] sm:$0xff] %v1965_v32 }
  0x59   : > { %496 = vst [vmem:[#allocation2 + $0x68] sm:$0xff] %v1965_v32  ;;  %497 = vst [vmem:[#allocation2 + $0x190] sm:$0xff] %v1965_v32 }
  0x5a   : > { %498 = vst [vmem:[#allocation2 + $0x198] sm:$0xff] %v1965_v32  ;;  %499 = vst [vmem:[#allocation2 + $0x38] sm:$0xff] %v1965_v32 }
  0x5b   : > { %500 = vst [vmem:[#allocation2 + $0xc0] sm:$0xff] %v1965_v32  ;;  %501 = vst [vmem:[#allocation2 + $0x1c0] sm:$0xff] %v1965_v32 }
  0x5c   : > { %502 = vst [vmem:[#allocation2 + $0x158] sm:$0xff] %v1965_v32  ;;  %503 = vst [vmem:[#allocation2 + $0x10] sm:$0xff] %v1965_v32 }
  0x5d   : > { %504 = vst [vmem:[#allocation2 + $0x58] sm:$0xff] %v1965_v32  ;;  %505 = vst [vmem:[#allocation2 + $0xa0] sm:$0xff] %v1965_v32 }
  0x5e PF: > { %v1869_v33 = vld [vmem:[%s2123_s24 + $0x74] ss:$8 sps:$4 sm:$0xff]   ;;  %v1871_v34 = vld [vmem:[%s2123_s24 + $0x70] ss:$8 sps:$4 sm:$0xff]   ;;  %v1966_v35 = vmov 0   ;;  %v1893_v50 = vld [vmem:[%s2130_s12] sm:$0xff]  }
  0x5f   : > { %826 = vmatprep.mubr.bf16.mxu0 %v1966_v35  ;;  %906 = vmatprep.mubr.bf16.mxu1 %v1966_v35  ;;  %v1872_v36 = vld [vmem:[%s2123_s24 + $0x64] ss:$8 sps:$4 sm:$0xff]   ;;  %v1874_v37 = vld [vmem:[%s2123_s24 + $0x60] ss:$8 sps:$4 sm:$0xff]   ;;  %v1875_v38 = vld [vmem:[%s2123_s24 + $0x54] ss:$8 sps:$4 sm:$0xff]  }
  0x60   : > { %794 = vmatprep.subr.bf16.mxu0 %v1869_v33  ;;  %1794 = vmatprep.subr.bf16.mxu1 %v1869_v33  ;;  %v1877_v39 = vld [vmem:[%s2123_s24 + $0x50] ss:$8 sps:$4 sm:$0xff]   ;;  %v1878_v40 = vld [vmem:[%s2123_s24 + $0x44] ss:$8 sps:$4 sm:$0xff]   ;;  %v1880_v41 = vld [vmem:[%s2123_s24 + $0x40] ss:$8 sps:$4 sm:$0xff]  }
  0x61   : > { %795 = vmatpush1.bf16.msra.mxu0 %v1871_v34  ;;  %1802 = vmatpush1.bf16.msra.mxu1 %v1871_v34  ;;  %v1881_v42 = vld [vmem:[%s2123_s24 + $0x34] ss:$8 sps:$4 sm:$0xff]   ;;  %v1883_v43 = vld [vmem:[%s2123_s24 + $0x30] ss:$8 sps:$4 sm:$0xff]   ;;  %v1884_v44 = vld [vmem:[%s2123_s24 + $0x24] ss:$8 sps:$4 sm:$0xff]  }
  0x62   : > { %796 = vmatprep.subr.bf16.mxu0 %v1872_v36  ;;  %1795 = vmatprep.subr.bf16.mxu1 %v1872_v36  ;;  %v1886_v45 = vld [vmem:[%s2123_s24 + $0x20] ss:$8 sps:$4 sm:$0xff]   ;;  %v1887_v46 = vld [vmem:[%s2123_s24 + $0x14] ss:$8 sps:$4 sm:$0xff]   ;;  %v1889_v47 = vld [vmem:[%s2123_s24 + $0x10] ss:$8 sps:$4 sm:$0xff]  }
  0x63   : > { %v1890_v48 = vld [vmem:[%s2123_s24 + $0x4] ss:$8 sps:$4 sm:$0xff]   ;;  %v1892_v49 = vld [vmem:[%s2123_s24] ss:$8 sps:$4 sm:$0xff]   ;;  %v1897_v54 = vld [vmem:[%s2130_s12 + $0x10] sm:$0xff]   ;;  %p1725_p13 = scmp.ne.s32.totalorder %s1947_s14, 12 }
  0x64   : > { %v1894_v51 = vld [vmem:[%s2130_s12 + $0x40] sm:$0xff]   ;;  %v1895_v52 = vld [vmem:[%s2130_s12 + $0x8] sm:$0xff]   ;;  %v1898_v55 = vld [vmem:[%s2130_s12 + $0x50] sm:$0xff]  }
  0x65   : > { %797 = vmatpush1.bf16.msra.mxu0 %v1874_v37  ;;  %1803 = vmatpush1.bf16.msra.mxu1 %v1874_v37  ;;  %v1896_v53 = vld [vmem:[%s2130_s12 + $0x48] sm:$0xff]   ;;  %v1899_v56 = vld [vmem:[%s2130_s12 + $0x18] sm:$0xff]   ;;  %v1901_v58 = vld [vmem:[%s2130_s12 + $0x20] sm:$0xff]  }
  0x66   : > { %798 = vmatprep.subr.bf16.mxu0 %v1875_v38  ;;  %1796 = vmatprep.subr.bf16.mxu1 %v1875_v38  ;;  %v1900_v57 = vld [vmem:[%s2130_s12 + $0x58] sm:$0xff]   ;;  %v1902_v59 = vld [vmem:[%s2130_s12 + $0x60] sm:$0xff]   ;;  %v1903_v60 = vld [vmem:[%s2130_s12 + $0x28] sm:$0xff]  }
  0x67   : > { %v1904_v61 = vld [vmem:[%s2130_s12 + $0x68] sm:$0xff]   ;;  %v1905_v62 = vld [vmem:[%s2130_s12 + $0x30] sm:$0xff]   ;;  %v1907_v0 = vld [vmem:[%s2130_s12 + $0x38] sm:$0xff]  }
  0x68   : > { %v1906_v63 = vld [vmem:[%s2130_s12 + $0x70] sm:$0xff]   ;;  %v1908_v1 = vld [vmem:[%s2130_s12 + $0x78] sm:$0xff]   ;;  %v538_v3 = vld [vmem:[#allocation2 + $0x148] sm:$0xff] }
  0x69   : > { %799 = vmatpush1.bf16.msra.mxu0 %v1877_v39  ;;  %1804 = vmatpush1.bf16.msra.mxu1 %v1877_v39  ;;  %v506_v2 = vld [vmem:[#allocation2 + $0xb0] sm:$0xff]  ;;  %v508_v12 = vld [vmem:[#allocation2 + $0xd8] sm:$0xff]  ;;  %v540_v13 = vld [vmem:[#allocation2 + $0x100] sm:$0xff] }
  0x6a   : > { %800 = vmatprep.subr.bf16.mxu0 %v1878_v40  ;;  %1797 = vmatprep.subr.bf16.mxu1 %v1878_v40  ;;  %v507_v6 = vld [vmem:[#allocation2 + $0x1b0] sm:$0xff]  ;;  %v509_v18 = vld [vmem:[#allocation2 + $0x18] sm:$0xff]  ;;  %v541_v19 = vld [vmem:[#allocation2 + $0xc8] sm:$0xff] }
  0x6b   : > { %v539_v7 = vld [vmem:[#allocation2 + $0x1d0] sm:$0xff]  ;;  %v542_v25 = vld [vmem:[#allocation2 + $0x40] sm:$0xff]  ;;  %v511_v30 = vld [vmem:[#allocation2 + $0x168] sm:$0xff] }
  0x6c   : > { %v510_v24 = vld [vmem:[#allocation2 + $0x50] sm:$0xff]  ;;  %v543_v31 = vld [vmem:[#allocation2 + $0x1f8] sm:$0xff]  ;;  %v544_v37 = vld [vmem:[#allocation2 + $0x20] sm:$0xff] }
  0x6d   : > { %801 = vmatpush1.bf16.msra.mxu0 %v1880_v41  ;;  %1805 = vmatpush1.bf16.msra.mxu1 %v1880_v41  ;;  %v512_v36 = vld [vmem:[#allocation2 + $0x130] sm:$0xff] }
  0x6e   : > { %802 = vmatprep.subr.bf16.mxu0 %v1881_v42  ;;  %1798 = vmatprep.subr.bf16.mxu1 %v1881_v42  ;;  %v513_v42 = vld [vmem:[#allocation2 + $0x48] sm:$0xff] }
  0x71   : > { %803 = vmatpush1.bf16.msra.mxu0 %v1883_v43  ;;  %1806 = vmatpush1.bf16.msra.mxu1 %v1883_v43  ;;  %v545_v43 = vld [vmem:[#allocation2 + $0x128] sm:$0xff] }
  0x72   : > { %804 = vmatprep.subr.bf16.mxu0 %v1884_v44  ;;  %1799 = vmatprep.subr.bf16.mxu1 %v1884_v44 }
  0x75   : > { %805 = vmatpush1.bf16.msra.mxu0 %v1886_v45  ;;  %1807 = vmatpush1.bf16.msra.mxu1 %v1886_v45 }
  0x76   : > { %806 = vmatprep.subr.bf16.mxu0 %v1887_v46  ;;  %1800 = vmatprep.subr.bf16.mxu1 %v1887_v46 }
  0x79   : > { %807 = vmatpush1.bf16.msra.mxu0 %v1889_v47  ;;  %1808 = vmatpush1.bf16.msra.mxu1 %v1889_v47 }
  0x7a   : > { %808 = vmatprep.subr.bf16.mxu0 %v1890_v48  ;;  %1801 = vmatprep.subr.bf16.mxu1 %v1890_v48  ;;  %v514_v48 = vld [vmem:[#allocation2 + $0x180] sm:$0xff] }
  0x7d   : > { %809 = vmatpush1.bf16.msra.mxu0 %v1892_v49  ;;  %1809 = vmatpush1.bf16.msra.mxu1 %v1892_v49  ;;  %v546_v49 = vld [vmem:[#allocation2 + $0x1a0] sm:$0xff] }
  0x80   : > { %827 = vmatmul.mubr.bf16.vlgmr.msra.gmra.mxu0 %v1893_v50  ;;  %907 = vmatmul.mubr.bf16.vlgmr.msra.gmra.mxu1 %v1894_v51 }
  0x81   : > { %836 = vmatprep.mubr.bf16.mxu0 %v1966_v35  ;;  %916 = vmatprep.mubr.bf16.mxu1 %v1966_v35 }
  0x88   : > { %837 = vmatmul.mubr.bf16.gmra.mxu0 %v1895_v52  ;;  %917 = vmatmul.mubr.bf16.gmra.mxu1 %v1896_v53 }
  0x89   : > { %846 = vmatprep.mubr.bf16.mxu0 %v1966_v35  ;;  %926 = vmatprep.mubr.bf16.mxu1 %v1966_v35 }
  0x90   : > { %847 = vmatmul.mubr.bf16.gmra.mxu0 %v1897_v54  ;;  %927 = vmatmul.mubr.bf16.gmra.mxu1 %v1898_v55  ;;  %v515_v54 = vld [vmem:[#allocation2 + $0x110] sm:$0xff] }
  0x91   : > { %856 = vmatprep.mubr.bf16.mxu0 %v1966_v35  ;;  %936 = vmatprep.mubr.bf16.mxu1 %v1966_v35  ;;  %v547_v55 = vld [vmem:[#allocation2 + $0x1f0] sm:$0xff] }
  0x98   : > { %857 = vmatmul.mubr.bf16.gmra.mxu0 %v1899_v56  ;;  %937 = vmatmul.mubr.bf16.gmra.mxu1 %v1900_v57 }
  0x99   : > { %866 = vmatprep.mubr.bf16.mxu0 %v1966_v35  ;;  %946 = vmatprep.mubr.bf16.mxu1 %v1966_v35 }
  0xa0   : > { %867 = vmatmul.mubr.bf16.gmra.mxu0 %v1901_v58  ;;  %947 = vmatmul.mubr.bf16.gmra.mxu1 %v1902_v59 }
  0xa1   : > { %876 = vmatprep.mubr.bf16.mxu0 %v1966_v35  ;;  %956 = vmatprep.mubr.bf16.mxu1 %v1966_v35 }
  0xa8   : > { %877 = vmatmul.mubr.bf16.gmra.mxu0 %v1903_v60  ;;  %957 = vmatmul.mubr.bf16.gmra.mxu1 %v1904_v61  ;;  %v516_v60 = vld [vmem:[#allocation2 + $0x118] sm:$0xff]  ;;  %v548_v61 = vld [vmem:[#allocation2 + $0xe8] sm:$0xff] }
  0xa9   : > { %886 = vmatprep.mubr.bf16.mxu0 %v1966_v35  ;;  %966 = vmatprep.mubr.bf16.mxu1 %v1966_v35 }
  0xb0   : > { %887 = vmatmul.mubr.bf16.gmra.mxu0 %v1905_v62  ;;  %967 = vmatmul.mubr.bf16.gmra.mxu1 %v1906_v63 }
  0xb1   : > { %896 = vmatprep.mubr.bf16.mxu0 %v1966_v35  ;;  %976 = vmatprep.mubr.bf16.mxu1 %v1966_v35 }
  0xb8   : > { %897 = vmatmul.mubr.bf16.gmra.mxu0 %v1907_v0  ;;  %977 = vmatmul.mubr.bf16.gmra.mxu1 %v1908_v1 }
 0x140   : > { %v828_v4 = vpop.f32.mrf.mxu0  ;;  %v908_v5 = vpop.f32.mrf.mxu1 }
 0x141   : > { %v987_v8 = vadd.f32 %v828_v4, %v506_v2  ;;  %v1019_v9 = vadd.f32 %v908_v5, %v538_v3  ;;  %v517_v2 = vld [vmem:[#allocation2 + $0x98] sm:$0xff] }
 0x142   : > { %v830_v10 = vpop.f32.mrf.mxu0  ;;  %v910_v11 = vpop.f32.mrf.mxu1  ;;  %v549_v3 = vld [vmem:[#allocation2 + $0x78] sm:$0xff] }
 0x143   : > { %1051 = vst [vmem:[#allocation2 + $0xb0] sm:$0xff] %v987_v8  ;;  %1083 = vst [vmem:[#allocation2 + $0x148] sm:$0xff] %v1019_v9  ;;  %v988_v14 = vadd.f32 %v830_v10, %v507_v6  ;;  %v1020_v15 = vadd.f32 %v910_v11, %v539_v7  ;;  %v518_v8 = vld [vmem:[#allocation2 + $0x120] sm:$0xff]  ;;  %v550_v9 = vld [vmem:[#allocation2 + $0x70] sm:$0xff] }
 0x144   : > { %v832_v16 = vpop.f32.mrf.mxu0  ;;  %v912_v17 = vpop.f32.mrf.mxu1 }
 0x145   : > { %1052 = vst [vmem:[#allocation2 + $0x1b0] sm:$0xff] %v988_v14  ;;  %1084 = vst [vmem:[#allocation2 + $0x1d0] sm:$0xff] %v1020_v15  ;;  %v989_v20 = vadd.f32 %v832_v16, %v508_v12  ;;  %v1021_v21 = vadd.f32 %v912_v17, %v540_v13  ;;  %v519_v14 = vld [vmem:[#allocation2 + $0x150] sm:$0xff] }
 0x146   : > { %v834_v22 = vpop.f32.mrf.mxu0  ;;  %v914_v23 = vpop.f32.mrf.mxu1  ;;  %v551_v15 = vld [vmem:[#allocation2 + $0x90] sm:$0xff] }
 0x147   : > { %1053 = vst [vmem:[#allocation2 + $0xd8] sm:$0xff] %v989_v20  ;;  %1085 = vst [vmem:[#allocation2 + $0x100] sm:$0xff] %v1021_v21  ;;  %v990_v26 = vadd.f32 %v834_v22, %v509_v18  ;;  %v1022_v27 = vadd.f32 %v914_v23, %v541_v19  ;;  %v520_v20 = vld [vmem:[#allocation2 + $0x108] sm:$0xff]  ;;  %v552_v21 = vld [vmem:[#allocation2 + $0x1d8] sm:$0xff] }
 0x148   : > { %v838_v28 = vpop.f32.mrf.mxu0  ;;  %v918_v29 = vpop.f32.mrf.mxu1 }
 0x149   : > { %1054 = vst [vmem:[#allocation2 + $0x18] sm:$0xff] %v990_v26  ;;  %1086 = vst [vmem:[#allocation2 + $0xc8] sm:$0xff] %v1022_v27  ;;  %v991_v32 = vadd.f32 %v838_v28, %v510_v24  ;;  %v1023_v33 = vadd.f32 %v918_v29, %v542_v25  ;;  %v521_v26 = vld [vmem:[#allocation2 + $0x60] sm:$0xff]  ;;  %v553_v27 = vld [vmem:[#allocation2 + $0xd0] sm:$0xff] }
 0x14a   : > { %v840_v34 = vpop.f32.mrf.mxu0  ;;  %v920_v35 = vpop.f32.mrf.mxu1 }
 0x14b   : > { %1055 = vst [vmem:[#allocation2 + $0x50] sm:$0xff] %v991_v32  ;;  %1087 = vst [vmem:[#allocation2 + $0x40] sm:$0xff] %v1023_v33  ;;  %v992_v38 = vadd.f32 %v840_v34, %v511_v30  ;;  %v1024_v39 = vadd.f32 %v920_v35, %v543_v31  ;;  %v522_v32 = vld [vmem:[#allocation2 + $0xe0] sm:$0xff]  ;;  %v554_v33 = vld [vmem:[#allocation2 + $0xb8] sm:$0xff] }
 0x14c   : > { %v842_v40 = vpop.f32.mrf.mxu0  ;;  %v922_v41 = vpop.f32.mrf.mxu1 }
 0x14d   : > { %1056 = vst [vmem:[#allocation2 + $0x168] sm:$0xff] %v992_v38  ;;  %1088 = vst [vmem:[#allocation2 + $0x1f8] sm:$0xff] %v1024_v39  ;;  %v993_v44 = vadd.f32 %v842_v40, %v512_v36  ;;  %v1025_v45 = vadd.f32 %v922_v41, %v544_v37  ;;  %v523_v38 = vld [vmem:[#allocation2 + $0x188] sm:$0xff] }
 0x14e   : > { %v844_v46 = vpop.f32.mrf.mxu0  ;;  %v924_v47 = vpop.f32.mrf.mxu1  ;;  %v555_v39 = vld [vmem:[#allocation2 + $0x88] sm:$0xff] }
 0x14f   : > { %1057 = vst [vmem:[#allocation2 + $0x130] sm:$0xff] %v993_v44  ;;  %1089 = vst [vmem:[#allocation2 + $0x20] sm:$0xff] %v1025_v45  ;;  %v994_v50 = vadd.f32 %v844_v46, %v513_v42  ;;  %v1026_v51 = vadd.f32 %v924_v47, %v545_v43  ;;  %v524_v44 = vld [vmem:[#allocation2 + $0x138] sm:$0xff]  ;;  %v556_v45 = vld [vmem:[#allocation2 + $0xa8] sm:$0xff] }
 0x150   : > { %v848_v52 = vpop.f32.mrf.mxu0  ;;  %v928_v53 = vpop.f32.mrf.mxu1 }
 0x151   : > { %1058 = vst [vmem:[#allocation2 + $0x48] sm:$0xff] %v994_v50  ;;  %1090 = vst [vmem:[#allocation2 + $0x128] sm:$0xff] %v1026_v51  ;;  %v995_v56 = vadd.f32 %v848_v52, %v514_v48  ;;  %v1027_v57 = vadd.f32 %v928_v53, %v546_v49  ;;  %v525_v50 = vld [vmem:[#allocation2 + $0x140] sm:$0xff]  ;;  %v557_v51 = vld [vmem:[#allocation2 + $0x1c8] sm:$0xff] }
 0x152   : > { %v850_v58 = vpop.f32.mrf.mxu0  ;;  %v930_v59 = vpop.f32.mrf.mxu1 }
 0x153   : > { %1059 = vst [vmem:[#allocation2 + $0x180] sm:$0xff] %v995_v56  ;;  %1091 = vst [vmem:[#allocation2 + $0x1a0] sm:$0xff] %v1027_v57  ;;  %v996_v62 = vadd.f32 %v850_v58, %v515_v54  ;;  %v1028_v63 = vadd.f32 %v930_v59, %v547_v55  ;;  %v526_v56 = vld [vmem:[#allocation2 + $0x80] sm:$0xff]  ;;  %v558_v57 = vld [vmem:[#allocation2 + $0x170] sm:$0xff] }
 0x154   : > { %v852_v0 = vpop.f32.mrf.mxu0  ;;  %v932_v1 = vpop.f32.mrf.mxu1 }
 0x155   : > { %1060 = vst [vmem:[#allocation2 + $0x110] sm:$0xff] %v996_v62  ;;  %1092 = vst [vmem:[#allocation2 + $0x1f0] sm:$0xff] %v1028_v63  ;;  %v997_v4 = vadd.f32 %v852_v0, %v516_v60  ;;  %v1029_v5 = vadd.f32 %v932_v1, %v548_v61  ;;  %v527_v62 = vld [vmem:[#allocation2 + $0x1a8] sm:$0xff]  ;;  %v559_v63 = vld [vmem:[#allocation2 + $0x178] sm:$0xff] }
 0x156   : > { %v854_v6 = vpop.f32.mrf.mxu0  ;;  %v934_v7 = vpop.f32.mrf.mxu1 }
 0x157   : > { %1061 = vst [vmem:[#allocation2 + $0x118] sm:$0xff] %v997_v4  ;;  %1093 = vst [vmem:[#allocation2 + $0xe8] sm:$0xff] %v1029_v5  ;;  %v998_v10 = vadd.f32 %v854_v6, %v517_v2  ;;  %v1030_v11 = vadd.f32 %v934_v7, %v549_v3  ;;  %v528_v4 = vld [vmem:[#allocation2 + $0x1b8] sm:$0xff]  ;;  %v560_v5 = vld [vmem:[#allocation2 + $0x68] sm:$0xff] }
 0x158   : > { %v858_v12 = vpop.f32.mrf.mxu0  ;;  %v938_v13 = vpop.f32.mrf.mxu1 }
 0x159   : > { %1062 = vst [vmem:[#allocation2 + $0x98] sm:$0xff] %v998_v10  ;;  %1094 = vst [vmem:[#allocation2 + $0x78] sm:$0xff] %v1030_v11  ;;  %v999_v16 = vadd.f32 %v858_v12, %v518_v8  ;;  %v1031_v17 = vadd.f32 %v938_v13, %v550_v9  ;;  %v529_v10 = vld [vmem:[#allocation2 + $0x28] sm:$0xff]  ;;  %v561_v11 = vld [vmem:[#allocation2 + $0x190] sm:$0xff] }
 0x15a   : > { %v860_v18 = vpop.f32.mrf.mxu0  ;;  %v940_v19 = vpop.f32.mrf.mxu1 }
 0x15b   : > { %1063 = vst [vmem:[#allocation2 + $0x120] sm:$0xff] %v999_v16  ;;  %1095 = vst [vmem:[#allocation2 + $0x70] sm:$0xff] %v1031_v17  ;;  %v1000_v22 = vadd.f32 %v860_v18, %v519_v14  ;;  %v1032_v23 = vadd.f32 %v940_v19, %v551_v15  ;;  %v530_v16 = vld [vmem:[#allocation2 + $0x1e8] sm:$0xff]  ;;  %v562_v17 = vld [vmem:[#allocation2 + $0x198] sm:$0xff] }
 0x15c   : > { %v862_v24 = vpop.f32.mrf.mxu0  ;;  %v942_v25 = vpop.f32.mrf.mxu1 }
 0x15d   : > { %1064 = vst [vmem:[#allocation2 + $0x150] sm:$0xff] %v1000_v22  ;;  %1096 = vst [vmem:[#allocation2 + $0x90] sm:$0xff] %v1032_v23  ;;  %v1001_v28 = vadd.f32 %v862_v24, %v520_v20  ;;  %v1033_v29 = vadd.f32 %v942_v25, %v552_v21  ;;  %v531_v22 = vld [vmem:[#allocation2 + $0xf8] sm:$0xff] }
 0x15e   : > { %v864_v30 = vpop.f32.mrf.mxu0  ;;  %v944_v31 = vpop.f32.mrf.mxu1  ;;  %v563_v23 = vld [vmem:[#allocation2 + $0x38] sm:$0xff] }
 0x15f   : > { %1065 = vst [vmem:[#allocation2 + $0x108] sm:$0xff] %v1001_v28  ;;  %1097 = vst [vmem:[#allocation2 + $0x1d8] sm:$0xff] %v1033_v29  ;;  %v1002_v34 = vadd.f32 %v864_v30, %v521_v26  ;;  %v1034_v35 = vadd.f32 %v944_v31, %v553_v27  ;;  %v532_v28 = vld [vmem:[#allocation2 + $0x160] sm:$0xff] }
 0x160   : > { %v868_v36 = vpop.f32.mrf.mxu0  ;;  %v948_v37 = vpop.f32.mrf.mxu1  ;;  %v564_v29 = vld [vmem:[#allocation2 + $0xc0] sm:$0xff] }
 0x161   : > { %1066 = vst [vmem:[#allocation2 + $0x60] sm:$0xff] %v1002_v34  ;;  %1098 = vst [vmem:[#allocation2 + $0xd0] sm:$0xff] %v1034_v35  ;;  %v1003_v40 = vadd.f32 %v868_v36, %v522_v32  ;;  %v1035_v41 = vadd.f32 %v948_v37, %v554_v33  ;;  %v533_v34 = vld [vmem:[#allocation2 + $0x30] sm:$0xff]  ;;  %v565_v35 = vld [vmem:[#allocation2 + $0x1c0] sm:$0xff] }
 0x162   : > { %v870_v42 = vpop.f32.mrf.mxu0  ;;  %v950_v43 = vpop.f32.mrf.mxu1 }
 0x163   : > { %1067 = vst [vmem:[#allocation2 + $0xe0] sm:$0xff] %v1003_v40  ;;  %1099 = vst [vmem:[#allocation2 + $0xb8] sm:$0xff] %v1035_v41  ;;  %v1004_v46 = vadd.f32 %v870_v42, %v523_v38  ;;  %v1036_v47 = vadd.f32 %v950_v43, %v555_v39  ;;  %v534_v40 = vld [vmem:[#allocation2 + $0x1e0] sm:$0xff]  ;;  %v566_v41 = vld [vmem:[#allocation2 + $0x158] sm:$0xff] }
 0x164   : > { %v872_v48 = vpop.f32.mrf.mxu0  ;;  %v952_v49 = vpop.f32.mrf.mxu1 }
 0x165   : > { %1068 = vst [vmem:[#allocation2 + $0x188] sm:$0xff] %v1004_v46  ;;  %1100 = vst [vmem:[#allocation2 + $0x88] sm:$0xff] %v1036_v47  ;;  %v1005_v52 = vadd.f32 %v872_v48, %v524_v44  ;;  %v1037_v53 = vadd.f32 %v952_v49, %v556_v45  ;;  %v535_v46 = vld [vmem:[#allocation2] sm:$0xff]  ;;  %v567_v47 = vld [vmem:[#allocation2 + $0x10] sm:$0xff] }
 0x166   : > { %v874_v54 = vpop.f32.mrf.mxu0  ;;  %v954_v55 = vpop.f32.mrf.mxu1 }
 0x167   : > { %1069 = vst [vmem:[#allocation2 + $0x138] sm:$0xff] %v1005_v52  ;;  %1101 = vst [vmem:[#allocation2 + $0xa8] sm:$0xff] %v1037_v53  ;;  %v1006_v58 = vadd.f32 %v874_v54, %v525_v50  ;;  %v1038_v59 = vadd.f32 %v954_v55, %v557_v51  ;;  %v536_v52 = vld [vmem:[#allocation2 + $0xf0] sm:$0xff]  ;;  %v568_v53 = vld [vmem:[#allocation2 + $0x58] sm:$0xff] }
 0x168   : > { %v878_v60 = vpop.f32.mrf.mxu0  ;;  %v958_v61 = vpop.f32.mrf.mxu1 }
 0x169   : > { %1070 = vst [vmem:[#allocation2 + $0x140] sm:$0xff] %v1006_v58  ;;  %1102 = vst [vmem:[#allocation2 + $0x1c8] sm:$0xff] %v1038_v59  ;;  %v1007_v0 = vadd.f32 %v878_v60, %v526_v56  ;;  %v1039_v1 = vadd.f32 %v958_v61, %v558_v57  ;;  %v537_v58 = vld [vmem:[#allocation2 + $0x8] sm:$0xff]  ;;  %v569_v59 = vld [vmem:[#allocation2 + $0xa0] sm:$0xff] }
 0x16a   : > { %v880_v2 = vpop.f32.mrf.mxu0  ;;  %v960_v3 = vpop.f32.mrf.mxu1 }
 0x16b   : > { %1071 = vst [vmem:[#allocation2 + $0x80] sm:$0xff] %v1007_v0  ;;  %1103 = vst [vmem:[#allocation2 + $0x170] sm:$0xff] %v1039_v1  ;;  %v1008_v6 = vadd.f32 %v880_v2, %v527_v62  ;;  %v1040_v7 = vadd.f32 %v960_v3, %v559_v63 }
 0x16c   : > { %v882_v8 = vpop.f32.mrf.mxu0  ;;  %v962_v9 = vpop.f32.mrf.mxu1 }
 0x16d   : > { %1072 = vst [vmem:[#allocation2 + $0x1a8] sm:$0xff] %v1008_v6  ;;  %1104 = vst [vmem:[#allocation2 + $0x178] sm:$0xff] %v1040_v7  ;;  %v1009_v12 = vadd.f32 %v882_v8, %v528_v4  ;;  %v1041_v13 = vadd.f32 %v962_v9, %v560_v5 }
 0x16e   : > { %v884_v14 = vpop.f32.mrf.mxu0  ;;  %v964_v15 = vpop.f32.mrf.mxu1 }
 0x16f   : > { %1073 = vst [vmem:[#allocation2 + $0x1b8] sm:$0xff] %v1009_v12  ;;  %1105 = vst [vmem:[#allocation2 + $0x68] sm:$0xff] %v1041_v13  ;;  %v1010_v18 = vadd.f32 %v884_v14, %v529_v10  ;;  %v1042_v19 = vadd.f32 %v964_v15, %v561_v11 }
 0x170   : > { %v888_v20 = vpop.f32.mrf.mxu0  ;;  %v968_v21 = vpop.f32.mrf.mxu1 }
 0x171   : > { %1074 = vst [vmem:[#allocation2 + $0x28] sm:$0xff] %v1010_v18  ;;  %1106 = vst [vmem:[#allocation2 + $0x190] sm:$0xff] %v1042_v19  ;;  %v1011_v24 = vadd.f32 %v888_v20, %v530_v16  ;;  %v1043_v25 = vadd.f32 %v968_v21, %v562_v17 }
 0x172   : > { %v890_v26 = vpop.f32.mrf.mxu0  ;;  %v970_v27 = vpop.f32.mrf.mxu1 }
 0x173   : > { %1075 = vst [vmem:[#allocation2 + $0x1e8] sm:$0xff] %v1011_v24  ;;  %1107 = vst [vmem:[#allocation2 + $0x198] sm:$0xff] %v1043_v25  ;;  %v1012_v30 = vadd.f32 %v890_v26, %v531_v22  ;;  %v1044_v31 = vadd.f32 %v970_v27, %v563_v23 }
 0x174   : > { %v892_v32 = vpop.f32.mrf.mxu0  ;;  %v972_v33 = vpop.f32.mrf.mxu1 }
 0x175   : > { %1076 = vst [vmem:[#allocation2 + $0xf8] sm:$0xff] %v1012_v30  ;;  %1108 = vst [vmem:[#allocation2 + $0x38] sm:$0xff] %v1044_v31  ;;  %v1013_v36 = vadd.f32 %v892_v32, %v532_v28  ;;  %v1045_v37 = vadd.f32 %v972_v33, %v564_v29 }
 0x176   : > { %v894_v38 = vpop.f32.mrf.mxu0  ;;  %v974_v39 = vpop.f32.mrf.mxu1 }
 0x177   : > { %1077 = vst [vmem:[#allocation2 + $0x160] sm:$0xff] %v1013_v36  ;;  %1109 = vst [vmem:[#allocation2 + $0xc0] sm:$0xff] %v1045_v37  ;;  %v1014_v42 = vadd.f32 %v894_v38, %v533_v34  ;;  %v1046_v43 = vadd.f32 %v974_v39, %v565_v35 }
 0x178   : > { %v898_v44 = vpop.f32.mrf.mxu0  ;;  %v978_v45 = vpop.f32.mrf.mxu1 }
 0x179   : > { %1078 = vst [vmem:[#allocation2 + $0x30] sm:$0xff] %v1014_v42  ;;  %1110 = vst [vmem:[#allocation2 + $0x1c0] sm:$0xff] %v1046_v43  ;;  %v1015_v48 = vadd.f32 %v898_v44, %v534_v40  ;;  %v1047_v49 = vadd.f32 %v978_v45, %v566_v41 }
 0x17a   : > { %v900_v50 = vpop.f32.mrf.mxu0  ;;  %v980_v51 = vpop.f32.mrf.mxu1 }
 0x17b   : > { %1079 = vst [vmem:[#allocation2 + $0x1e0] sm:$0xff] %v1015_v48  ;;  %1111 = vst [vmem:[#allocation2 + $0x158] sm:$0xff] %v1047_v49  ;;  %v1016_v54 = vadd.f32 %v900_v50, %v535_v46  ;;  %v1048_v55 = vadd.f32 %v980_v51, %v567_v47 }
 0x17c   : > { %v902_v56 = vpop.f32.mrf.mxu0  ;;  %v982_v57 = vpop.f32.mrf.mxu1 }
 0x17d   : > { %1080 = vst [vmem:[#allocation2] sm:$0xff] %v1016_v54  ;;  %1112 = vst [vmem:[#allocation2 + $0x10] sm:$0xff] %v1048_v55  ;;  %v1017_v60 = vadd.f32 %v902_v56, %v536_v52  ;;  %v1049_v61 = vadd.f32 %v982_v57, %v568_v53  ;;  %1118 = sbr.rel (%p1725_p13) target bundleno = 438 (0x1b6), region = 81 }
 0x17e   : > { %v904_v62 = vpop.f32.mrf.mxu0  ;;  %v984_v63 = vpop.f32.mrf.mxu1 }
 0x17f   : > { %1081 = vst [vmem:[#allocation2 + $0xf0] sm:$0xff] %v1017_v60  ;;  %1113 = vst [vmem:[#allocation2 + $0x58] sm:$0xff] %v1049_v61  ;;  %v1018_v0 = vadd.f32 %v904_v62, %v537_v58  ;;  %v1050_v1 = vadd.f32 %v984_v63, %v569_v59 }
 0x181   : > { %1082 = vst [vmem:[#allocation2 + $0x8] sm:$0xff] %v1018_v0  ;;  %1114 = vst [vmem:[#allocation2 + $0xa0] sm:$0xff] %v1050_v1 }
 0x182   : > { %v1185_v2 = vlaneseq  ;;  %v1183_v4 = vld [vmem:[%s2372_s2] sm:$0x3]  ;;  %v1119_v5 = vld [vmem:[#allocation2 + $0xb0] sm:$0xff]  ;;  %v1121_v9 = vld [vmem:[#allocation2 + $0xd8] sm:$0xff] }
 0x183   : > { %v1120_v6 = vld [vmem:[#allocation2 + $0x1b0] sm:$0xff]  ;;  %v1122_v10 = vld [vmem:[#allocation2 + $0x18] sm:$0xff]  ;;  %v1124_v14 = vld [vmem:[#allocation2 + $0x168] sm:$0xff] }
 0x184   : > { %v1186_v3 = vshrl.u32 %v1185_v2, 7  ;;  %v1123_v11 = vld [vmem:[#allocation2 + $0x50] sm:$0xff]  ;;  %v1126_v16 = vld [vmem:[#allocation2 + $0x48] sm:$0xff]  ;;  %v1127_v25 = vld [vmem:[#allocation2 + $0x180] sm:$0xff] }
 0x185   : > { %v1125_v15 = vld [vmem:[#allocation2 + $0x130] sm:$0xff]  ;;  %v1129_v31 = vld [vmem:[#allocation2 + $0x118] sm:$0xff]  ;;  %v1131_v37 = vld [vmem:[#allocation2 + $0x120] sm:$0xff] }
 0x186   : > { %v1187_v7 = vsub.s32 0, %v1186_v3  ;;  %v1191_v8 = vsub.s32 1, %v1186_v3  ;;  %v1128_v26 = vld [vmem:[#allocation2 + $0x110] sm:$0xff]  ;;  %v1130_v32 = vld [vmem:[#allocation2 + $0x98] sm:$0xff]  ;;  %v1133_v43 = vld [vmem:[#allocation2 + $0x108] sm:$0xff] }
 0x187   : > { %v1132_v38 = vld [vmem:[#allocation2 + $0x150] sm:$0xff]  ;;  %v1134_v44 = vld [vmem:[#allocation2 + $0x60] sm:$0xff]  ;;  %v1136_v54 = vld [vmem:[#allocation2 + $0x188] sm:$0xff] }
 0x188   : > { %v2249_v12 = vrot.slane %v1183_v4, %v1187_v7  ;;  %v2251_v13 = vrot.slane %v1183_v4, %v1191_v8  ;;  %v1135_v49 = vld [vmem:[#allocation2 + $0xe0] sm:$0xff]  ;;  %v1137_v59 = vld [vmem:[#allocation2 + $0x138] sm:$0xff]  ;;  %v1140_v2 = vld [vmem:[#allocation2 + $0x1a8] sm:$0xff] }
 0x189   : > { %v1138_v60 = vld [vmem:[#allocation2 + $0x140] sm:$0xff]  ;;  %v1141_v7 = vld [vmem:[#allocation2 + $0x1b8] sm:$0xff]  ;;  %v1142_v8 = vld [vmem:[#allocation2 + $0x28] sm:$0xff] }
 0x18a   : > { %v1195_v17 = vadd.f32 %v2249_v12, %v1119_v5  ;;  %v1196_v18 = vadd.f32 %v2251_v13, %v1120_v6  ;;  %v1197_v19 = vadd.f32 %v2249_v12, %v1121_v9  ;;  %v1198_v20 = vadd.f32 %v2251_v13, %v1122_v10  ;;  %v1139_v1 = vld [vmem:[#allocation2 + $0x80] sm:$0xff] }
 0x18b   : > { %v1199_v21 = vadd.f32 %v2249_v12, %v1123_v11  ;;  %v1200_v22 = vadd.f32 %v2251_v13, %v1124_v14  ;;  %v1201_v23 = vadd.f32 %v2249_v12, %v1125_v15  ;;  %v1202_v24 = vadd.f32 %v2251_v13, %v1126_v16  ;;  %v1143_v15 = vld [vmem:[#allocation2 + $0x1e8] sm:$0xff] }
 0x18c   : > { %v1259_v27 = vmax.f32 %v1195_v17, 0.0  ;;  %v1260_v28 = vmax.f32 %v1196_v18, 0.0  ;;  %v1261_v29 = vmax.f32 %v1197_v19, 0.0  ;;  %v1262_v30 = vmax.f32 %v1198_v20, 0.0  ;;  %v1144_v20 = vld [vmem:[#allocation2 + $0xf8] sm:$0xff] }
 0x18d   : > { %v1263_v33 = vmax.f32 %v1199_v21, 0.0  ;;  %v1264_v34 = vmax.f32 %v1200_v22, 0.0  ;;  %v1265_v35 = vmax.f32 %v1201_v23, 0.0  ;;  %v1266_v36 = vmax.f32 %v1202_v24, 0.0 }
 0x18e   : > { %v1762_v39 = vpack.c.bf16 %v1260_v28, %v1259_v27  ;;  %v1763_v40 = vpack.c.bf16 %v1262_v30, %v1261_v29  ;;  %v1203_v41 = vadd.f32 %v2249_v12, %v1127_v25  ;;  %v1204_v42 = vadd.f32 %v2251_v13, %v1128_v26  ;;  %v1145_v25 = vld [vmem:[#allocation2 + $0x160] sm:$0xff]  ;;  %v1146_v26 = vld [vmem:[#allocation2 + $0x30] sm:$0xff] }
 0x18f   : > { %v1764_v45 = vpack.c.bf16 %v1264_v34, %v1263_v33  ;;  %v1765_v46 = vpack.c.bf16 %v1266_v36, %v1265_v35  ;;  %v1205_v47 = vadd.f32 %v2249_v12, %v1129_v31  ;;  %v1206_v48 = vadd.f32 %v2251_v13, %v1130_v32  ;;  %v1147_v31 = vld [vmem:[#allocation2 + $0x1e0] sm:$0xff] }
 0x190   : > { %1515 = vst [vmem:[%s2128_s29] sm:$0xff] %v1762_v39  ;;  %1516 = vst [vmem:[%s2128_s29 + $0x8] sm:$0xff] %v1763_v40  ;;  %v1267_v50 = vmax.f32 %v1203_v41, 0.0  ;;  %v1268_v51 = vmax.f32 %v1204_v42, 0.0  ;;  %v1207_v52 = vadd.f32 %v2249_v12, %v1131_v37  ;;  %v1208_v53 = vadd.f32 %v2251_v13, %v1132_v38  ;;  %v1148_v32 = vld [vmem:[#allocation2] sm:$0xff]  ;;  %v1149_v37 = vld [vmem:[#allocation2 + $0xf0] sm:$0xff] }
 0x191   : > { %1517 = vst [vmem:[%s2128_s29 + $0x10] sm:$0xff] %v1764_v45  ;;  %1518 = vst [vmem:[%s2128_s29 + $0x18] sm:$0xff] %v1765_v46  ;;  %v1269_v55 = vmax.f32 %v1205_v47, 0.0  ;;  %v1270_v56 = vmax.f32 %v1206_v48, 0.0  ;;  %v1209_v57 = vadd.f32 %v2249_v12, %v1133_v43  ;;  %v1210_v58 = vadd.f32 %v2251_v13, %v1134_v44  ;;  %v1150_v38 = vld [vmem:[#allocation2 + $0x8] sm:$0xff]  ;;  %v1152_v48 = vld [vmem:[#allocation2 + $0x1d0] sm:$0xff] }
 0x192   : > { %v1766_v61 = vpack.c.bf16 %v1268_v51, %v1267_v50  ;;  %v1271_v62 = vmax.f32 %v1207_v52, 0.0  ;;  %v1272_v63 = vmax.f32 %v1208_v53, 0.0  ;;  %v1211_v0 = vadd.f32 %v2249_v12, %v1135_v49  ;;  %v1151_v43 = vld [vmem:[#allocation2 + $0x148] sm:$0xff]  ;;  %v1153_v53 = vld [vmem:[#allocation2 + $0x100] sm:$0xff] }
 0x193   : > { %v1767_v3 = vpack.c.bf16 %v1270_v56, %v1269_v55  ;;  %v1273_v4 = vmax.f32 %v1209_v57, 0.0  ;;  %v1274_v5 = vmax.f32 %v1210_v58, 0.0  ;;  %v1212_v6 = vadd.f32 %v2251_v13, %v1136_v54  ;;  %v1154_v54 = vld [vmem:[#allocation2 + $0xc8] sm:$0xff] }
 0x194   : > { %1519 = vst [vmem:[%s2128_s29 + $0x20] sm:$0xff] %v1766_v61  ;;  %v1768_v9 = vpack.c.bf16 %v1272_v63, %v1271_v62  ;;  %v1275_v10 = vmax.f32 %v1211_v0, 0.0  ;;  %v1213_v11 = vadd.f32 %v2249_v12, %v1137_v59  ;;  %v1214_v14 = vadd.f32 %v2251_v13, %v1138_v60  ;;  %v1155_v59 = vld [vmem:[#allocation2 + $0x40] sm:$0xff]  ;;  %v1156_v60 = vld [vmem:[#allocation2 + $0x1f8] sm:$0xff] }
 0x195   : > { %1520 = vst [vmem:[%s2128_s29 + $0x28] sm:$0xff] %v1767_v3  ;;  %v1769_v16 = vpack.c.bf16 %v1274_v5, %v1273_v4  ;;  %v1276_v17 = vmax.f32 %v1212_v6, 0.0  ;;  %v1215_v18 = vadd.f32 %v2249_v12, %v1139_v1  ;;  %v1216_v19 = vadd.f32 %v2251_v13, %v1140_v2  ;;  %v1157_v1 = vld [vmem:[#allocation2 + $0x20] sm:$0xff]  ;;  %v1158_v2 = vld [vmem:[#allocation2 + $0x128] sm:$0xff] }
 0x196   : > { %1521 = vst [vmem:[%s2128_s29 + $0x30] sm:$0xff] %v1768_v9  ;;  %v1277_v21 = vmax.f32 %v1213_v11, 0.0  ;;  %v1278_v22 = vmax.f32 %v1214_v14, 0.0  ;;  %v1217_v23 = vadd.f32 %v2249_v12, %v1141_v7  ;;  %v1218_v24 = vadd.f32 %v2251_v13, %v1142_v8  ;;  %v1159_v7 = vld [vmem:[#allocation2 + $0x1a0] sm:$0xff]  ;;  %v1160_v14 = vld [vmem:[#allocation2 + $0x1f0] sm:$0xff] }
 0x197   : > { %1522 = vst [vmem:[%s2128_s29 + $0x38] sm:$0xff] %v1769_v16  ;;  %v1770_v27 = vpack.c.bf16 %v1276_v17, %v1275_v10  ;;  %v1279_v28 = vmax.f32 %v1215_v18, 0.0  ;;  %v1280_v29 = vmax.f32 %v1216_v19, 0.0  ;;  %v1219_v30 = vadd.f32 %v2249_v12, %v1143_v15  ;;  %v1161_v19 = vld [vmem:[#allocation2 + $0xe8] sm:$0xff] }
 0x198   : > { %v1771_v33 = vpack.c.bf16 %v1278_v22, %v1277_v21  ;;  %v1281_v34 = vmax.f32 %v1217_v23, 0.0  ;;  %v1282_v35 = vmax.f32 %v1218_v24, 0.0  ;;  %v1220_v36 = vadd.f32 %v2251_v13, %v1144_v20  ;;  %v1162_v20 = vld [vmem:[#allocation2 + $0x78] sm:$0xff] }
 0x199   : > { %1523 = vst [vmem:[%s2128_s29 + $0x40] sm:$0xff] %v1770_v27  ;;  %v1772_v39 = vpack.c.bf16 %v1280_v29, %v1279_v28  ;;  %v1283_v40 = vmax.f32 %v1219_v30, 0.0  ;;  %v1221_v41 = vadd.f32 %v2249_v12, %v1145_v25  ;;  %v1222_v42 = vadd.f32 %v2251_v13, %v1146_v26  ;;  %v1163_v25 = vld [vmem:[#allocation2 + $0x70] sm:$0xff] }
 0x19a   : > { %1524 = vst [vmem:[%s2128_s29 + $0x48] sm:$0xff] %v1771_v33  ;;  %v1773_v44 = vpack.c.bf16 %v1282_v35, %v1281_v34  ;;  %v1284_v45 = vmax.f32 %v1220_v36, 0.0  ;;  %v1223_v46 = vadd.f32 %v2249_v12, %v1147_v31  ;;  %v1224_v47 = vadd.f32 %v2251_v13, %v1148_v32  ;;  %v1164_v26 = vld [vmem:[#allocation2 + $0x90] sm:$0xff]  ;;  %v1165_v31 = vld [vmem:[#allocation2 + $0x1d8] sm:$0xff] }
 0x19b   : > { %1525 = vst [vmem:[%s2128_s29 + $0x50] sm:$0xff] %v1772_v39  ;;  %v1285_v49 = vmax.f32 %v1221_v41, 0.0  ;;  %v1286_v50 = vmax.f32 %v1222_v42, 0.0  ;;  %v1225_v51 = vadd.f32 %v2249_v12, %v1149_v37  ;;  %v1226_v52 = vadd.f32 %v2251_v13, %v1150_v38  ;;  %v1166_v32 = vld [vmem:[#allocation2 + $0xd0] sm:$0xff]  ;;  %v1167_v37 = vld [vmem:[#allocation2 + $0xb8] sm:$0xff]  ;;  %v1168_v42 = vld [vmem:[#allocation2 + $0x88] sm:$0xff] }
 0x19c   : > { %1526 = vst [vmem:[%s2128_s29 + $0x58] sm:$0xff] %v1773_v44  ;;  %v1774_v55 = vpack.c.bf16 %v1284_v45, %v1283_v40  ;;  %v1287_v56 = vmax.f32 %v1223_v46, 0.0  ;;  %v1288_v57 = vmax.f32 %v1224_v47, 0.0  ;;  %v1227_v58 = vadd.f32 %v2249_v12, %v1151_v43  ;;  %v1169_v47 = vld [vmem:[#allocation2 + $0xa8] sm:$0xff] }
 0x19d   : > { %v1775_v61 = vpack.c.bf16 %v1286_v50, %v1285_v49  ;;  %v1289_v62 = vmax.f32 %v1225_v51, 0.0  ;;  %v1290_v63 = vmax.f32 %v1226_v52, 0.0  ;;  %v1228_v0 = vadd.f32 %v2251_v13, %v1152_v48  ;;  %v1170_v48 = vld [vmem:[#allocation2 + $0x1c8] sm:$0xff] }
 0x19e   : > { %1527 = vst [vmem:[%s2128_s29 + $0x60] sm:$0xff] %v1774_v55  ;;  %v1776_v3 = vpack.c.bf16 %v1288_v57, %v1287_v56  ;;  %v1291_v4 = vmax.f32 %v1227_v58, 0.0  ;;  %v1229_v5 = vadd.f32 %v2249_v12, %v1153_v53  ;;  %v1230_v6 = vadd.f32 %v2251_v13, %v1154_v54  ;;  %v1171_v53 = vld [vmem:[#allocation2 + $0x170] sm:$0xff]  ;;  %v1172_v54 = vld [vmem:[#allocation2 + $0x178] sm:$0xff] }
 0x19f   : > { %1528 = vst [vmem:[%s2128_s29 + $0x68] sm:$0xff] %v1775_v61  ;;  %v1777_v8 = vpack.c.bf16 %v1290_v63, %v1289_v62  ;;  %v1292_v9 = vmax.f32 %v1228_v0, 0.0  ;;  %v1231_v10 = vadd.f32 %v2249_v12, %v1155_v59  ;;  %v1232_v11 = vadd.f32 %v2251_v13, %v1156_v60  ;;  %v1173_v59 = vld [vmem:[#allocation2 + $0x68] sm:$0xff]  ;;  %v1174_v60 = vld [vmem:[#allocation2 + $0x190] sm:$0xff] }
 0x1a0   : > { %1529 = vst [vmem:[%s2128_s29 + $0x70] sm:$0xff] %v1776_v3  ;;  %v1293_v15 = vmax.f32 %v1229_v5, 0.0  ;;  %v1294_v16 = vmax.f32 %v1230_v6, 0.0  ;;  %v1233_v17 = vadd.f32 %v2249_v12, %v1157_v1  ;;  %v1234_v18 = vadd.f32 %v2251_v13, %v1158_v2  ;;  %v1175_v1 = vld [vmem:[#allocation2 + $0x198] sm:$0xff] }
 0x1a1   : > { %1530 = vst [vmem:[%s2128_s29 + $0x78] sm:$0xff] %v1777_v8  ;;  %v1778_v21 = vpack.c.bf16 %v1292_v9, %v1291_v4  ;;  %v1295_v22 = vmax.f32 %v1231_v10, 0.0  ;;  %v1296_v23 = vmax.f32 %v1232_v11, 0.0  ;;  %v1235_v24 = vadd.f32 %v2249_v12, %v1159_v7  ;;  %v1176_v6 = vld [vmem:[#allocation2 + $0x38] sm:$0xff]  ;;  %v1177_v11 = vld [vmem:[#allocation2 + $0xc0] sm:$0xff] }
 0x1a2   : > { %v1779_v27 = vpack.c.bf16 %v1294_v16, %v1293_v15  ;;  %v1297_v28 = vmax.f32 %v1233_v17, 0.0  ;;  %v1298_v29 = vmax.f32 %v1234_v18, 0.0  ;;  %v1236_v30 = vadd.f32 %v2251_v13, %v1160_v14  ;;  %v1178_v14 = vld [vmem:[#allocation2 + $0x1c0] sm:$0xff] }
 0x1a3   : > { %1531 = vst [vmem:[%s2128_s29 + $0x80] sm:$0xff] %v1778_v21  ;;  %v1780_v33 = vpack.c.bf16 %v1296_v23, %v1295_v22  ;;  %v1299_v34 = vmax.f32 %v1235_v24, 0.0  ;;  %v1237_v35 = vadd.f32 %v2249_v12, %v1161_v19  ;;  %v1238_v36 = vadd.f32 %v2251_v13, %v1162_v20  ;;  %v1179_v19 = vld [vmem:[#allocation2 + $0x158] sm:$0xff]  ;;  %v1180_v20 = vld [vmem:[#allocation2 + $0x10] sm:$0xff] }
 0x1a4   : > { %1532 = vst [vmem:[%s2128_s29 + $0x88] sm:$0xff] %v1779_v27  ;;  %v1781_v38 = vpack.c.bf16 %v1298_v29, %v1297_v28  ;;  %v1300_v39 = vmax.f32 %v1236_v30, 0.0  ;;  %v1239_v40 = vadd.f32 %v2249_v12, %v1163_v25  ;;  %v1240_v41 = vadd.f32 %v2251_v13, %v1164_v26  ;;  %v1181_v25 = vld [vmem:[#allocation2 + $0x58] sm:$0xff]  ;;  %v1182_v26 = vld [vmem:[#allocation2 + $0xa0] sm:$0xff] }
 0x1a5   : > { %1533 = vst [vmem:[%s2128_s29 + $0x90] sm:$0xff] %v1780_v33  ;;  %v1301_v43 = vmax.f32 %v1237_v35, 0.0  ;;  %v1302_v44 = vmax.f32 %v1238_v36, 0.0  ;;  %v1241_v45 = vadd.f32 %v2249_v12, %v1165_v31  ;;  %v1242_v46 = vadd.f32 %v2251_v13, %v1166_v32 }
 0x1a6   : > { %1534 = vst [vmem:[%s2128_s29 + $0x98] sm:$0xff] %v1781_v38  ;;  %v1782_v49 = vpack.c.bf16 %v1300_v39, %v1299_v34  ;;  %v1303_v50 = vmax.f32 %v1239_v40, 0.0  ;;  %v1304_v51 = vmax.f32 %v1240_v41, 0.0  ;;  %v1243_v52 = vadd.f32 %v2249_v12, %v1167_v37 }
 0x1a7   : > { %v1783_v55 = vpack.c.bf16 %v1302_v44, %v1301_v43  ;;  %v1305_v56 = vmax.f32 %v1241_v45, 0.0  ;;  %v1306_v57 = vmax.f32 %v1242_v46, 0.0  ;;  %v1244_v58 = vadd.f32 %v2251_v13, %v1168_v42 }
 0x1a8   : > { %1535 = vst [vmem:[%s2128_s29 + $0xa0] sm:$0xff] %v1782_v49  ;;  %v1784_v61 = vpack.c.bf16 %v1304_v51, %v1303_v50  ;;  %v1307_v62 = vmax.f32 %v1243_v52, 0.0  ;;  %v1245_v63 = vadd.f32 %v2249_v12, %v1169_v47  ;;  %v1246_v0 = vadd.f32 %v2251_v13, %v1170_v48 }
 0x1a9   : > { %1536 = vst [vmem:[%s2128_s29 + $0xa8] sm:$0xff] %v1783_v55  ;;  %v1785_v2 = vpack.c.bf16 %v1306_v57, %v1305_v56  ;;  %v1308_v3 = vmax.f32 %v1244_v58, 0.0  ;;  %v1247_v4 = vadd.f32 %v2249_v12, %v1171_v53  ;;  %v1248_v5 = vadd.f32 %v2251_v13, %v1172_v54 }
 0x1aa   : > { %1537 = vst [vmem:[%s2128_s29 + $0xb0] sm:$0xff] %v1784_v61  ;;  %v1309_v7 = vmax.f32 %v1245_v63, 0.0  ;;  %v1310_v8 = vmax.f32 %v1246_v0, 0.0  ;;  %v1249_v9 = vadd.f32 %v2249_v12, %v1173_v59  ;;  %v1250_v10 = vadd.f32 %v2251_v13, %v1174_v60 }
 0x1ab   : > { %1538 = vst [vmem:[%s2128_s29 + $0xb8] sm:$0xff] %v1785_v2  ;;  %v1786_v15 = vpack.c.bf16 %v1308_v3, %v1307_v62  ;;  %v1311_v16 = vmax.f32 %v1247_v4, 0.0  ;;  %v1312_v17 = vmax.f32 %v1248_v5, 0.0  ;;  %v1251_v18 = vadd.f32 %v2249_v12, %v1175_v1 }
 0x1ac   : > { %v1787_v21 = vpack.c.bf16 %v1310_v8, %v1309_v7  ;;  %v1313_v22 = vmax.f32 %v1249_v9, 0.0  ;;  %v1314_v23 = vmax.f32 %v1250_v10, 0.0  ;;  %v1252_v24 = vadd.f32 %v2251_v13, %v1176_v6 }
 0x1ad   : > { %1539 = vst [vmem:[%s2128_s29 + $0xc0] sm:$0xff] %v1786_v15  ;;  %v1788_v27 = vpack.c.bf16 %v1312_v17, %v1311_v16  ;;  %v1315_v28 = vmax.f32 %v1251_v18, 0.0  ;;  %v1253_v29 = vadd.f32 %v2249_v12, %v1177_v11  ;;  %v1254_v30 = vadd.f32 %v2251_v13, %v1178_v14 }
 0x1ae   : > { %1540 = vst [vmem:[%s2128_s29 + $0xc8] sm:$0xff] %v1787_v21  ;;  %v1789_v31 = vpack.c.bf16 %v1314_v23, %v1313_v22  ;;  %v1316_v32 = vmax.f32 %v1252_v24, 0.0  ;;  %v1255_v33 = vadd.f32 %v2249_v12, %v1179_v19  ;;  %v1256_v34 = vadd.f32 %v2251_v13, %v1180_v20 }
 0x1af   : > { %1541 = vst [vmem:[%s2128_s29 + $0xd0] sm:$0xff] %v1788_v27  ;;  %v1317_v35 = vmax.f32 %v1253_v29, 0.0  ;;  %v1318_v36 = vmax.f32 %v1254_v30, 0.0  ;;  %v1257_v37 = vadd.f32 %v2249_v12, %v1181_v25  ;;  %v1258_v38 = vadd.f32 %v2251_v13, %v1182_v26 }
 0x1b0   : > { %1542 = vst [vmem:[%s2128_s29 + $0xd8] sm:$0xff] %v1789_v31  ;;  %v1790_v39 = vpack.c.bf16 %v1316_v32, %v1315_v28  ;;  %v1319_v40 = vmax.f32 %v1255_v33, 0.0  ;;  %v1320_v41 = vmax.f32 %v1256_v34, 0.0 }
 0x1b1   : > { %v1791_v42 = vpack.c.bf16 %v1318_v36, %v1317_v35  ;;  %v1321_v43 = vmax.f32 %v1257_v37, 0.0  ;;  %v1322_v44 = vmax.f32 %v1258_v38, 0.0 }
 0x1b2   : > { %1543 = vst [vmem:[%s2128_s29 + $0xe0] sm:$0xff] %v1790_v39  ;;  %v1792_v45 = vpack.c.bf16 %v1320_v41, %v1319_v40 }
 0x1b3   : > { %1544 = vst [vmem:[%s2128_s29 + $0xe8] sm:$0xff] %v1791_v42  ;;  %v1793_v46 = vpack.c.bf16 %v1322_v44, %v1321_v43 }
 0x1b4   : > { %1545 = vst [vmem:[%s2128_s29 + $0xf0] sm:$0xff] %v1792_v45 }
 0x1b5   : > { %1546 = vst [vmem:[%s2128_s29 + $0xf8] sm:$0xff] %v1793_v46 }
 0x1b6 PF: > { %s13_s18 = sadd.s32 1, %s1963_s18   ;;  %s2374_s12 = smov %s1943_s13 }
 0x1b7   : > { %p10_p0 = scmp.ge.s32.totalorder %s13_s18, 80   ;;  %s2375_s13 = smov %s2038_s25 }
 0x1b8   : > { %s2376_s14 = smov %s1955_s16  ;;  %s2377_s15 = smov %s1959_s17 }
 0x1b9   : > { %s2378_s16 = smov %s2381_s19  ;;  %s2379_s17 = smov %s2385_s20 }
 0x1ba   :  { %12 = sbr.rel (!%p10_p0) target bundleno = 4 (0x4), region = 122 }

// kernel: alexnet_forward.18
= control target key start
LH: loop header
LB: loop body
LE: loop exit
PB: predicated region body
PF: predicated region fallthrough
CT: control target
= control target key end

     0   :  { %s509_s6 = smov 0   ;;  %s815_s0 = inlined_call_operand.vmem [shape: bf16[2,27,27,192], index: 0, kind: input, shape index: {}]   ;;  %s816_s1 = inlined_call_operand.vmem [shape: bf16[2,13,27,192], index: 1, kind: output, shape index: {}]  }
   0x1 LB: > { %s472_s7 = sadd.s32 4294967295, %s497_s6   ;;  %p476_p0 = scmp.ge.s32.totalorder %s497_s6, 1  ;;  %s497_s6 = sphi %s509_s6, %s11_s6  }
   0x2   : > { %p87_p1 = scmp.lt.s32.totalorder %s497_s6, 3 }
   0x4   : > { %p88_p2 = pnand %p476_p0, %p87_p1 }
   0x5   : > { %p107_p3 = scmp.lt.s32.totalorder (!%p88_p2), %s472_s7, 1 }
   0x6   : > { %91 = sbr.rel (%p88_p2) target bundleno = 66 (0x42), region = 24 }
   0xb   : > { %vm335_vm0 = vcmask 1041408   ;;  %vm336_vm1 = vsmask.f32 1280  ;;  %vm338_vm2 = vcmask 521220   ;;  %vm339_vm3 = vsmask.f32 5376 }
   0xc   : > { %s822_s7 = smov (!%p107_p3, %s472_s7), 1  ;;  %vm329_vm4 = vcmask 1043456   ;;  %vm330_vm5 = vcmask 523268   ;;  %vm337_vm6 = vmand %vm335_vm0, %vm336_vm1 }
   0xd   : > { %vm340_vm7 = vmand %vm338_vm2, %vm339_vm3  ;;  %s481_s8 = smul.u32 864, %s822_s7 }
   0xe   : > { %s482_s9 = smul.u32 416, %s822_s7  ;;  %vm517_vm8 = vmor %vm330_vm5, %vm329_vm4 }
   0xf   : > { %s524_s12 = scalar_lea.vmem %s815_s0, %s481_s8  ;;  %vm526_vm9 = vmor %vm340_vm7, %vm337_vm6 }
  0x10   : > { %v117_v2 = vld [vmem:[%s524_s12] sm:$0xff]  ;;  %s536_s15 = scalar_lea.vmem %s816_s1, %s482_s9  ;;  %v118_v6 = vld [vmem:[%s524_s12 + $0x8] sm:$0xff]  ;;  %v119_v10 = vld [vmem:[%s524_s12 + $0x10] sm:$0xff] }
  0x11   : > { %v121_v3 = vld [vmem:[%s524_s12 + $0x20] sm:$0xff]  ;;  %v122_v7 = vld [vmem:[%s524_s12 + $0x28] sm:$0xff]  ;;  %v123_v11 = vld [vmem:[%s524_s12 + $0x30] sm:$0xff] }
  0x12   : > { %v125_v4 = vld [vmem:[%s524_s12 + $0x40] sm:$0xff]  ;;  %v225_v5 = vmax.bf16 %v121_v3, %v117_v2  ;;  %v126_v8 = vld [vmem:[%s524_s12 + $0x48] sm:$0xff]  ;;  %v226_v9 = vmax.bf16 %v122_v7, %v118_v6  ;;  %v127_v12 = vld [vmem:[%s524_s12 + $0x50] sm:$0xff]  ;;  %v227_v14 = vmax.bf16 %v123_v11, %v119_v10 }
  0x13   : > { %v120_v15 = vld [vmem:[%s524_s12 + $0x18] sm:$0x33]  ;;  %v129_v21 = vld [vmem:[%s524_s12 + $0x60] sm:$0xff]  ;;  %v130_v25 = vld [vmem:[%s524_s12 + $0x68] sm:$0xff] }
  0x14   : > { %v277_v13 = vmax.bf16 %v225_v5, %v125_v4  ;;  %v124_v16 = vld [vmem:[%s524_s12 + $0x38] sm:$0x33]  ;;  %v278_v18 = vmax.bf16 %v226_v9, %v126_v8  ;;  %v133_v22 = vld [vmem:[%s524_s12 + $0x80] sm:$0xff]  ;;  %v279_v23 = vmax.bf16 %v227_v14, %v127_v12  ;;  %v229_v24 = vmax.bf16 %v129_v21, %v125_v4  ;;  %v134_v26 = vld [vmem:[%s524_s12 + $0x88] sm:$0xff] }
  0x15   : > { %v128_v17 = vld [vmem:[%s524_s12 + $0x58] sm:$0x33]  ;;  %v228_v19 = vmax.bf16 %v124_v16, %v120_v15  ;;  %v131_v27 = vld [vmem:[%s524_s12 + $0x70] sm:$0xff]  ;;  %v230_v29 = vmax.bf16 %v130_v25, %v126_v8  ;;  %v137_v37 = vld [vmem:[%s524_s12 + $0xa0] sm:$0xff] }
  0x16   : > { %v342_v20 = vld [vmem:[%s536_s15 + $0x18] sm:$0x33]  ;;  %332 = vst.msk [vmem:[%s536_s15] sm:$0xff] %vm517_vm8, %v277_v13  ;;  %333 = vst.msk [vmem:[%s536_s15 + $0x8] sm:$0xff] %vm517_vm8, %v278_v18  ;;  %v135_v30 = vld [vmem:[%s524_s12 + $0x90] sm:$0xff]  ;;  %v231_v31 = vmax.bf16 %v131_v27, %v127_v12  ;;  %v281_v34 = vmax.bf16 %v229_v24, %v133_v22  ;;  %v233_v42 = vmax.bf16 %v137_v37, %v133_v22 }
  0x17   : > { %v280_v28 = vmax.bf16 %v228_v19, %v128_v17  ;;  %v132_v32 = vld [vmem:[%s524_s12 + $0x78] sm:$0x33]  ;;  %334 = vst.msk [vmem:[%s536_s15 + $0x10] sm:$0xff] %vm517_vm8, %v279_v23  ;;  %v141_v38 = vld [vmem:[%s524_s12 + $0xc0] sm:$0xff]  ;;  %v282_v40 = vmax.bf16 %v230_v29, %v134_v26  ;;  %v138_v43 = vld [vmem:[%s524_s12 + $0xa8] sm:$0xff] }
  0x18   : > { %v136_v33 = vld [vmem:[%s524_s12 + $0x98] sm:$0x33]  ;;  %v232_v35 = vmax.bf16 %v132_v32, %v128_v17  ;;  %v283_v41 = vmax.bf16 %v231_v31, %v135_v30  ;;  %v142_v44 = vld [vmem:[%s524_s12 + $0xc8] sm:$0xff]  ;;  %v139_v45 = vld [vmem:[%s524_s12 + $0xb0] sm:$0xff]  ;;  %345 = vst.msk [vmem:[%s536_s15 + $0x20] sm:$0xff] %vm517_vm8, %v281_v34  ;;  %v234_v47 = vmax.bf16 %v138_v43, %v134_v26  ;;  %v285_v52 = vmax.bf16 %v233_v42, %v141_v38 }
  0x19   : > { %v348_v36 = vld [vmem:[%s536_s15 + $0x38] sm:$0x33]  ;;  %v343_v39 = vsel %vm526_vm9, %v280_v28, %v342_v20  ;;  %v143_v48 = vld [vmem:[%s524_s12 + $0xd0] sm:$0xff]  ;;  %v235_v49 = vmax.bf16 %v139_v45, %v135_v30  ;;  %346 = vst.msk [vmem:[%s536_s15 + $0x28] sm:$0xff] %vm517_vm8, %v282_v40  ;;  %v145_v55 = vld [vmem:[%s524_s12 + $0xe0] sm:$0xff] }
  0x1a   : > { %344 = vst [vmem:[%s536_s15 + $0x18] sm:$0x33] %v343_v39  ;;  %v284_v46 = vmax.bf16 %v232_v35, %v136_v33  ;;  %v140_v50 = vld [vmem:[%s524_s12 + $0xb8] sm:$0x33]  ;;  %347 = vst.msk [vmem:[%s536_s15 + $0x30] sm:$0xff] %vm517_vm8, %v283_v41  ;;  %v149_v56 = vld [vmem:[%s524_s12 + $0x100] sm:$0xff]  ;;  %v286_v58 = vmax.bf16 %v234_v47, %v142_v44  ;;  %v237_v60 = vmax.bf16 %v145_v55, %v141_v38 }
  0x1b   : > { %v144_v51 = vld [vmem:[%s524_s12 + $0xd8] sm:$0x33]  ;;  %v236_v53 = vmax.bf16 %v140_v50, %v136_v33  ;;  %v287_v59 = vmax.bf16 %v235_v49, %v143_v48  ;;  %v146_v61 = vld [vmem:[%s524_s12 + $0xe8] sm:$0xff]  ;;  %v147_v63 = vld [vmem:[%s524_s12 + $0xf0] sm:$0xff]  ;;  %351 = vst.msk [vmem:[%s536_s15 + $0x40] sm:$0xff] %vm517_vm8, %v285_v52 }
  0x1c   : > { %v354_v54 = vld [vmem:[%s536_s15 + $0x58] sm:$0x33]  ;;  %v349_v57 = vsel %vm526_vm9, %v284_v46, %v348_v36  ;;  %v150_v62 = vld [vmem:[%s524_s12 + $0x108] sm:$0xff]  ;;  %v238_v3 = vmax.bf16 %v146_v61, %v142_v44  ;;  %v151_v4 = vld [vmem:[%s524_s12 + $0x110] sm:$0xff]  ;;  %v239_v5 = vmax.bf16 %v147_v63, %v143_v48  ;;  %352 = vst.msk [vmem:[%s536_s15 + $0x48] sm:$0xff] %vm517_vm8, %v286_v58  ;;  %v289_v8 = vmax.bf16 %v237_v60, %v149_v56 }
  0x1d   : > { %350 = vst [vmem:[%s536_s15 + $0x38] sm:$0x33] %v349_v57  ;;  %v288_v2 = vmax.bf16 %v236_v53, %v144_v51  ;;  %v148_v6 = vld [vmem:[%s524_s12 + $0xf8] sm:$0x33]  ;;  %353 = vst.msk [vmem:[%s536_s15 + $0x50] sm:$0xff] %vm517_vm8, %v287_v59  ;;  %v153_v11 = vld [vmem:[%s524_s12 + $0x120] sm:$0xff] }
  0x1e   : > { %v152_v7 = vld [vmem:[%s524_s12 + $0x118] sm:$0x33]  ;;  %v240_v9 = vmax.bf16 %v148_v6, %v144_v51  ;;  %v157_v12 = vld [vmem:[%s524_s12 + $0x140] sm:$0xff]  ;;  %v290_v14 = vmax.bf16 %v238_v3, %v150_v62  ;;  %v291_v15 = vmax.bf16 %v239_v5, %v151_v4  ;;  %v241_v16 = vmax.bf16 %v153_v11, %v149_v56  ;;  %v154_v17 = vld [vmem:[%s524_s12 + $0x128] sm:$0xff]  ;;  %357 = vst.msk [vmem:[%s536_s15 + $0x60] sm:$0xff] %vm517_vm8, %v289_v8 }
  0x1f   : > { %v360_v10 = vld [vmem:[%s536_s15 + $0x78] sm:$0x33]  ;;  %v355_v13 = vsel %vm526_vm9, %v288_v2, %v354_v54  ;;  %v158_v18 = vld [vmem:[%s524_s12 + $0x148] sm:$0xff]  ;;  %v155_v19 = vld [vmem:[%s524_s12 + $0x130] sm:$0xff]  ;;  %v242_v21 = vmax.bf16 %v154_v17, %v150_v62 }
  0x20   : > { %356 = vst [vmem:[%s536_s15 + $0x58] sm:$0x33] %v355_v13  ;;  %v292_v20 = vmax.bf16 %v240_v9, %v152_v7  ;;  %v159_v22 = vld [vmem:[%s524_s12 + $0x150] sm:$0xff]  ;;  %v243_v23 = vmax.bf16 %v155_v19, %v151_v4  ;;  %v156_v24 = vld [vmem:[%s524_s12 + $0x138] sm:$0x33]  ;;  %358 = vst.msk [vmem:[%s536_s15 + $0x68] sm:$0xff] %vm517_vm8, %v290_v14  ;;  %v293_v26 = vmax.bf16 %v241_v16, %v157_v12 }
  0x21   : > { %v160_v25 = vld [vmem:[%s524_s12 + $0x158] sm:$0x33]  ;;  %359 = vst.msk [vmem:[%s536_s15 + $0x70] sm:$0xff] %vm517_vm8, %v291_v15  ;;  %v244_v27 = vmax.bf16 %v156_v24, %v152_v7  ;;  %v161_v29 = vld [vmem:[%s524_s12 + $0x160] sm:$0xff]  ;;  %v294_v32 = vmax.bf16 %v242_v21, %v158_v18  ;;  %v162_v35 = vld [vmem:[%s524_s12 + $0x168] sm:$0xff] }
  0x22   : > { %v366_v28 = vld [vmem:[%s536_s15 + $0x98] sm:$0x33]  ;;  %v165_v30 = vld [vmem:[%s524_s12 + $0x180] sm:$0xff]  ;;  %v361_v31 = vsel %vm526_vm9, %v292_v20, %v360_v10  ;;  %v295_v33 = vmax.bf16 %v243_v23, %v159_v22  ;;  %v245_v34 = vmax.bf16 %v161_v29, %v157_v12  ;;  %v166_v36 = vld [vmem:[%s524_s12 + $0x188] sm:$0xff]  ;;  %363 = vst.msk [vmem:[%s536_s15 + $0x80] sm:$0xff] %vm517_vm8, %v293_v26  ;;  %v246_v39 = vmax.bf16 %v162_v35, %v158_v18 }
  0x23   : > { %v163_v37 = vld [vmem:[%s524_s12 + $0x170] sm:$0xff]  ;;  %362 = vst [vmem:[%s536_s15 + $0x78] sm:$0x33] %v361_v31  ;;  %v296_v38 = vmax.bf16 %v244_v27, %v160_v25  ;;  %v164_v42 = vld [vmem:[%s524_s12 + $0x178] sm:$0x33]  ;;  %364 = vst.msk [vmem:[%s536_s15 + $0x88] sm:$0xff] %vm517_vm8, %v294_v32 }
  0x24   : > { %v167_v40 = vld [vmem:[%s524_s12 + $0x190] sm:$0xff]  ;;  %v247_v41 = vmax.bf16 %v163_v37, %v159_v22  ;;  %v168_v43 = vld [vmem:[%s524_s12 + $0x198] sm:$0x33]  ;;  %365 = vst.msk [vmem:[%s536_s15 + $0x90] sm:$0xff] %vm517_vm8, %v295_v33  ;;  %v297_v44 = vmax.bf16 %v245_v34, %v165_v30  ;;  %v248_v45 = vmax.bf16 %v164_v42, %v160_v25  ;;  %v169_v47 = vld [vmem:[%s524_s12 + $0x1a0] sm:$0xff]  ;;  %v298_v50 = vmax.bf16 %v246_v39, %v166_v36 }
  0x25   : > { %v372_v46 = vld [vmem:[%s536_s15 + $0xb8] sm:$0x33]  ;;  %v173_v48 = vld [vmem:[%s524_s12 + $0x1c0] sm:$0xff]  ;;  %v367_v49 = vsel %vm526_vm9, %v296_v38, %v366_v28  ;;  %v249_v52 = vmax.bf16 %v169_v47, %v165_v30  ;;  %v170_v53 = vld [vmem:[%s524_s12 + $0x1a8] sm:$0xff] }
  0x26   : > { %v299_v51 = vmax.bf16 %v247_v41, %v167_v40  ;;  %v174_v54 = vld [vmem:[%s524_s12 + $0x1c8] sm:$0xff]  ;;  %v171_v55 = vld [vmem:[%s524_s12 + $0x1b0] sm:$0xff]  ;;  %368 = vst [vmem:[%s536_s15 + $0x98] sm:$0x33] %v367_v49  ;;  %369 = vst.msk [vmem:[%s536_s15 + $0xa0] sm:$0xff] %vm517_vm8, %v297_v44  ;;  %v300_v56 = vmax.bf16 %v248_v45, %v168_v43  ;;  %v250_v57 = vmax.bf16 %v170_v53, %v166_v36 }
  0x27   : > { %v175_v58 = vld [vmem:[%s524_s12 + $0x1d0] sm:$0xff]  ;;  %v251_v59 = vmax.bf16 %v171_v55, %v167_v40  ;;  %v172_v60 = vld [vmem:[%s524_s12 + $0x1b8] sm:$0x33]  ;;  %370 = vst.msk [vmem:[%s536_s15 + $0xa8] sm:$0xff] %vm517_vm8, %v298_v50  ;;  %v301_v62 = vmax.bf16 %v249_v52, %v173_v48  ;;  %v177_v3 = vld [vmem:[%s524_s12 + $0x1e0] sm:$0xff] }
  0x28   : > { %v176_v61 = vld [vmem:[%s524_s12 + $0x1d8] sm:$0x33]  ;;  %371 = vst.msk [vmem:[%s536_s15 + $0xb0] sm:$0xff] %vm517_vm8, %v299_v51  ;;  %v252_v63 = vmax.bf16 %v172_v60, %v168_v43  ;;  %v181_v4 = vld [vmem:[%s524_s12 + $0x200] sm:$0xff]  ;;  %v373_v5 = vsel %vm526_vm9, %v300_v56, %v372_v46  ;;  %v302_v6 = vmax.bf16 %v250_v57, %v174_v54  ;;  %v253_v8 = vmax.bf16 %v177_v3, %v173_v48  ;;  %v178_v9 = vld [vmem:[%s524_s12 + $0x1e8] sm:$0xff] }
  0x29   : > { %v378_v2 = vld [vmem:[%s536_s15 + $0xd8] sm:$0x33]  ;;  %v303_v7 = vmax.bf16 %v251_v59, %v175_v58  ;;  %v182_v10 = vld [vmem:[%s524_s12 + $0x208] sm:$0xff]  ;;  %v179_v11 = vld [vmem:[%s524_s12 + $0x1f0] sm:$0xff]  ;;  %374 = vst [vmem:[%s536_s15 + $0xb8] sm:$0x33] %v373_v5  ;;  %v254_v13 = vmax.bf16 %v178_v9, %v174_v54 }
  0x2a   : > { %375 = vst.msk [vmem:[%s536_s15 + $0xc0] sm:$0xff] %vm517_vm8, %v301_v62  ;;  %v304_v12 = vmax.bf16 %v252_v63, %v176_v61  ;;  %v183_v14 = vld [vmem:[%s524_s12 + $0x210] sm:$0xff]  ;;  %v255_v15 = vmax.bf16 %v179_v11, %v175_v58  ;;  %v180_v16 = vld [vmem:[%s524_s12 + $0x1f8] sm:$0x33]  ;;  %376 = vst.msk [vmem:[%s536_s15 + $0xc8] sm:$0xff] %vm517_vm8, %v302_v6  ;;  %v305_v18 = vmax.bf16 %v253_v8, %v181_v4 }
  0x2b   : > { %v184_v17 = vld [vmem:[%s524_s12 + $0x218] sm:$0x33]  ;;  %377 = vst.msk [vmem:[%s536_s15 + $0xd0] sm:$0xff] %vm517_vm8, %v303_v7  ;;  %v256_v19 = vmax.bf16 %v180_v16, %v176_v61  ;;  %v185_v21 = vld [vmem:[%s524_s12 + $0x220] sm:$0xff]  ;;  %v306_v24 = vmax.bf16 %v254_v13, %v182_v10  ;;  %v186_v27 = vld [vmem:[%s524_s12 + $0x228] sm:$0xff] }
  0x2c   : > { %v384_v20 = vld [vmem:[%s536_s15 + $0xf8] sm:$0x33]  ;;  %v189_v22 = vld [vmem:[%s524_s12 + $0x240] sm:$0xff]  ;;  %v379_v23 = vsel %vm526_vm9, %v304_v12, %v378_v2  ;;  %v307_v25 = vmax.bf16 %v255_v15, %v183_v14  ;;  %v257_v26 = vmax.bf16 %v185_v21, %v181_v4  ;;  %v190_v28 = vld [vmem:[%s524_s12 + $0x248] sm:$0xff]  ;;  %381 = vst.msk [vmem:[%s536_s15 + $0xe0] sm:$0xff] %vm517_vm8, %v305_v18  ;;  %v258_v31 = vmax.bf16 %v186_v27, %v182_v10 }
  0x2d   : > { %v187_v29 = vld [vmem:[%s524_s12 + $0x230] sm:$0xff]  ;;  %380 = vst [vmem:[%s536_s15 + $0xd8] sm:$0x33] %v379_v23  ;;  %v308_v30 = vmax.bf16 %v256_v19, %v184_v17  ;;  %v188_v34 = vld [vmem:[%s524_s12 + $0x238] sm:$0x33]  ;;  %382 = vst.msk [vmem:[%s536_s15 + $0xe8] sm:$0xff] %vm517_vm8, %v306_v24 }
  0x2e   : > { %v191_v32 = vld [vmem:[%s524_s12 + $0x250] sm:$0xff]  ;;  %v259_v33 = vmax.bf16 %v187_v29, %v183_v14  ;;  %v192_v35 = vld [vmem:[%s524_s12 + $0x258] sm:$0x33]  ;;  %383 = vst.msk [vmem:[%s536_s15 + $0xf0] sm:$0xff] %vm517_vm8, %v307_v25  ;;  %v309_v36 = vmax.bf16 %v257_v26, %v189_v22  ;;  %v260_v37 = vmax.bf16 %v188_v34, %v184_v17  ;;  %v193_v39 = vld [vmem:[%s524_s12 + $0x260] sm:$0xff]  ;;  %v310_v42 = vmax.bf16 %v258_v31, %v190_v28 }
  0x2f   : > { %v390_v38 = vld [vmem:[%s536_s15 + $0x118] sm:$0x33]  ;;  %v197_v40 = vld [vmem:[%s524_s12 + $0x280] sm:$0xff]  ;;  %v385_v41 = vsel %vm526_vm9, %v308_v30, %v384_v20  ;;  %v261_v44 = vmax.bf16 %v193_v39, %v189_v22  ;;  %v194_v45 = vld [vmem:[%s524_s12 + $0x268] sm:$0xff] }
  0x30   : > { %v311_v43 = vmax.bf16 %v259_v33, %v191_v32  ;;  %v198_v46 = vld [vmem:[%s524_s12 + $0x288] sm:$0xff]  ;;  %v195_v47 = vld [vmem:[%s524_s12 + $0x270] sm:$0xff]  ;;  %386 = vst [vmem:[%s536_s15 + $0xf8] sm:$0x33] %v385_v41  ;;  %387 = vst.msk [vmem:[%s536_s15 + $0x100] sm:$0xff] %vm517_vm8, %v309_v36  ;;  %v312_v48 = vmax.bf16 %v260_v37, %v192_v35  ;;  %v262_v49 = vmax.bf16 %v194_v45, %v190_v28 }
  0x31   : > { %v199_v50 = vld [vmem:[%s524_s12 + $0x290] sm:$0xff]  ;;  %v263_v51 = vmax.bf16 %v195_v47, %v191_v32  ;;  %v196_v52 = vld [vmem:[%s524_s12 + $0x278] sm:$0x33]  ;;  %388 = vst.msk [vmem:[%s536_s15 + $0x108] sm:$0xff] %vm517_vm8, %v310_v42  ;;  %v313_v54 = vmax.bf16 %v261_v44, %v197_v40  ;;  %v201_v57 = vld [vmem:[%s524_s12 + $0x2a0] sm:$0xff] }
  0x32   : > { %v200_v53 = vld [vmem:[%s524_s12 + $0x298] sm:$0x33]  ;;  %389 = vst.msk [vmem:[%s536_s15 + $0x110] sm:$0xff] %vm517_vm8, %v311_v43  ;;  %v264_v55 = vmax.bf16 %v196_v52, %v192_v35  ;;  %v205_v58 = vld [vmem:[%s524_s12 + $0x2c0] sm:$0xff]  ;;  %v391_v59 = vsel %vm526_vm9, %v312_v48, %v390_v38  ;;  %v314_v60 = vmax.bf16 %v262_v49, %v198_v46  ;;  %v265_v62 = vmax.bf16 %v201_v57, %v197_v40  ;;  %v202_v63 = vld [vmem:[%s524_s12 + $0x2a8] sm:$0xff] }
  0x33   : > { %v396_v56 = vld [vmem:[%s536_s15 + $0x138] sm:$0x33]  ;;  %v315_v61 = vmax.bf16 %v263_v51, %v199_v50  ;;  %v206_v2 = vld [vmem:[%s524_s12 + $0x2c8] sm:$0xff]  ;;  %v203_v3 = vld [vmem:[%s524_s12 + $0x2b0] sm:$0xff]  ;;  %392 = vst [vmem:[%s536_s15 + $0x118] sm:$0x33] %v391_v59  ;;  %v266_v5 = vmax.bf16 %v202_v63, %v198_v46 }
  0x34   : > { %393 = vst.msk [vmem:[%s536_s15 + $0x120] sm:$0xff] %vm517_vm8, %v313_v54  ;;  %v316_v4 = vmax.bf16 %v264_v55, %v200_v53  ;;  %v207_v6 = vld [vmem:[%s524_s12 + $0x2d0] sm:$0xff]  ;;  %v267_v7 = vmax.bf16 %v203_v3, %v199_v50  ;;  %v204_v8 = vld [vmem:[%s524_s12 + $0x2b8] sm:$0x33]  ;;  %394 = vst.msk [vmem:[%s536_s15 + $0x128] sm:$0xff] %vm517_vm8, %v314_v60  ;;  %v317_v10 = vmax.bf16 %v265_v62, %v205_v58 }
  0x35   : > { %v208_v9 = vld [vmem:[%s524_s12 + $0x2d8] sm:$0x33]  ;;  %395 = vst.msk [vmem:[%s536_s15 + $0x130] sm:$0xff] %vm517_vm8, %v315_v61  ;;  %v268_v11 = vmax.bf16 %v204_v8, %v200_v53  ;;  %v209_v13 = vld [vmem:[%s524_s12 + $0x2e0] sm:$0xff]  ;;  %v318_v16 = vmax.bf16 %v266_v5, %v206_v2  ;;  %v210_v19 = vld [vmem:[%s524_s12 + $0x2e8] sm:$0xff] }
  0x36   : > { %v402_v12 = vld [vmem:[%s536_s15 + $0x158] sm:$0x33]  ;;  %v213_v14 = vld [vmem:[%s524_s12 + $0x300] sm:$0xff]  ;;  %v397_v15 = vsel %vm526_vm9, %v316_v4, %v396_v56  ;;  %v319_v17 = vmax.bf16 %v267_v7, %v207_v6  ;;  %v269_v18 = vmax.bf16 %v209_v13, %v205_v58  ;;  %v214_v20 = vld [vmem:[%s524_s12 + $0x308] sm:$0xff]  ;;  %399 = vst.msk [vmem:[%s536_s15 + $0x140] sm:$0xff] %vm517_vm8, %v317_v10  ;;  %v270_v23 = vmax.bf16 %v210_v19, %v206_v2 }
  0x37   : > { %v211_v21 = vld [vmem:[%s524_s12 + $0x2f0] sm:$0xff]  ;;  %398 = vst [vmem:[%s536_s15 + $0x138] sm:$0x33] %v397_v15  ;;  %v320_v22 = vmax.bf16 %v268_v11, %v208_v9  ;;  %v212_v26 = vld [vmem:[%s524_s12 + $0x2f8] sm:$0x33]  ;;  %400 = vst.msk [vmem:[%s536_s15 + $0x148] sm:$0xff] %vm517_vm8, %v318_v16 }
  0x38   : > { %v215_v24 = vld [vmem:[%s524_s12 + $0x310] sm:$0xff]  ;;  %v271_v25 = vmax.bf16 %v211_v21, %v207_v6  ;;  %v216_v27 = vld [vmem:[%s524_s12 + $0x318] sm:$0x33]  ;;  %401 = vst.msk [vmem:[%s536_s15 + $0x150] sm:$0xff] %vm517_vm8, %v319_v17  ;;  %v321_v28 = vmax.bf16 %v269_v18, %v213_v14  ;;  %v272_v29 = vmax.bf16 %v212_v26, %v208_v9  ;;  %v217_v31 = vld [vmem:[%s524_s12 + $0x320] sm:$0xff]  ;;  %v322_v34 = vmax.bf16 %v270_v23, %v214_v20 }
  0x39   : > { %v408_v30 = vld [vmem:[%s536_s15 + $0x178] sm:$0x33]  ;;  %v221_v32 = vld [vmem:[%s524_s12 + $0x340] sm:$0xff]  ;;  %v403_v33 = vsel %vm526_vm9, %v320_v22, %v402_v12  ;;  %v273_v36 = vmax.bf16 %v217_v31, %v213_v14  ;;  %v218_v37 = vld [vmem:[%s524_s12 + $0x328] sm:$0xff] }
  0x3a   : > { %v323_v35 = vmax.bf16 %v271_v25, %v215_v24  ;;  %v222_v38 = vld [vmem:[%s524_s12 + $0x348] sm:$0xff]  ;;  %v219_v39 = vld [vmem:[%s524_s12 + $0x330] sm:$0xff]  ;;  %404 = vst [vmem:[%s536_s15 + $0x158] sm:$0x33] %v403_v33  ;;  %405 = vst.msk [vmem:[%s536_s15 + $0x160] sm:$0xff] %vm517_vm8, %v321_v28  ;;  %v324_v40 = vmax.bf16 %v272_v29, %v216_v27  ;;  %v274_v41 = vmax.bf16 %v218_v37, %v214_v20 }
  0x3b   : > { %v223_v42 = vld [vmem:[%s524_s12 + $0x350] sm:$0xff]  ;;  %v275_v43 = vmax.bf16 %v219_v39, %v215_v24  ;;  %v220_v44 = vld [vmem:[%s524_s12 + $0x338] sm:$0x33]  ;;  %406 = vst.msk [vmem:[%s536_s15 + $0x168] sm:$0xff] %vm517_vm8, %v322_v34  ;;  %v325_v46 = vmax.bf16 %v273_v36, %v221_v32 }
  0x3c   : > { %v224_v45 = vld [vmem:[%s524_s12 + $0x358] sm:$0x33]  ;;  %407 = vst.msk [vmem:[%s536_s15 + $0x170] sm:$0xff] %vm517_vm8, %v323_v35  ;;  %v276_v47 = vmax.bf16 %v220_v44, %v216_v27  ;;  %v409_v48 = vsel %vm526_vm9, %v324_v40, %v408_v30  ;;  %v326_v49 = vmax.bf16 %v274_v41, %v222_v38 }
  0x3d   : > { %v327_v50 = vmax.bf16 %v275_v43, %v223_v42  ;;  %v414_v51 = vld [vmem:[%s536_s15 + $0x198] sm:$0x33]  ;;  %410 = vst [vmem:[%s536_s15 + $0x178] sm:$0x33] %v409_v48  ;;  %411 = vst.msk [vmem:[%s536_s15 + $0x180] sm:$0xff] %vm517_vm8, %v325_v46 }
  0x3e   : > { %v328_v52 = vmax.bf16 %v276_v47, %v224_v45  ;;  %412 = vst.msk [vmem:[%s536_s15 + $0x188] sm:$0xff] %vm517_vm8, %v326_v49 }
  0x3f   : > { %413 = vst.msk [vmem:[%s536_s15 + $0x190] sm:$0xff] %vm517_vm8, %v327_v50 }
  0x40   : > { %v415_v53 = vsel %vm526_vm9, %v328_v52, %v414_v51 }
  0x41   : > { %416 = vst [vmem:[%s536_s15 + $0x198] sm:$0x33] %v415_v53 }
  0x42 PF: > { %s11_s6 = sadd.s32 1, %s497_s6  }
  0x43   : > { %p8_p4 = scmp.ge.s32.totalorder %s11_s6, 4  }
  0x45   :  { %10 = sbr.rel (!%p8_p4) target bundleno = 1 (0x1), region = 54 }

// kernel: alexnet_forward.19
= control target key start
LH: loop header
LB: loop body
LE: loop exit
PB: predicated region body
PF: predicated region fallthrough
CT: control target
= control target key end

     0   :  { %s377_s6 = smov 0   ;;  %s551_s0 = inlined_call_operand.vmem [shape: bf16[2,27,13,192], index: 0, kind: input, shape index: {}]   ;;  %s552_s1 = inlined_call_operand.vmem [shape: bf16[2,13,13,192], index: 1, kind: output, shape index: {}]  }
   0x1 LB: > { %s340_s7 = sadd.s32 4294967295, %s365_s6   ;;  %p344_p0 = scmp.ge.s32.totalorder %s365_s6, 1  ;;  %s365_s6 = sphi %s377_s6, %s11_s6  }
   0x2   : > { %p87_p1 = scmp.lt.s32.totalorder %s365_s6, 3 }
   0x4   : > { %p88_p2 = pnand %p344_p0, %p87_p1 }
   0x5   : > { %p107_p3 = scmp.lt.s32.totalorder (!%p88_p2), %s340_s7, 1 }
   0x6   : > { %91 = sbr.rel (%p88_p2) target bundleno = 47 (0x2f), region = 24 }
   0xb   : > { %vm227_vm0 = vcmask 1042432   ;;  %vm228_vm1 = vsmask.f32 2304  ;;  %vm230_vm2 = vcmask 522244   ;;  %vm231_vm3 = vsmask.f32 6400 }
   0xc   : > { %s558_s7 = smov (!%p107_p3, %s340_s7), 1  ;;  %vm223_vm4 = vcmask 1043456   ;;  %vm224_vm5 = vcmask 523268   ;;  %vm229_vm6 = vmand %vm227_vm0, %vm228_vm1 }
   0xd   : > { %vm232_vm7 = vmand %vm230_vm2, %vm231_vm3  ;;  %s349_s8 = smul.u32 432, %s558_s7 }
   0xe   : > { %s350_s9 = smul.u32 208, %s558_s7  ;;  %vm385_vm8 = vmor %vm224_vm5, %vm223_vm4 }
   0xf   : > { %s392_s12 = scalar_lea.vmem %s551_s0, %s349_s8  ;;  %vm394_vm9 = vmor %vm232_vm7, %vm229_vm6 }
  0x10   : > { %s401_s15 = scalar_lea.vmem %s552_s1, %s350_s9  ;;  %v117_v2 = vld [vmem:[%s392_s12] sm:$0xff]  ;;  %v119_v3 = vld [vmem:[%s392_s12 + $0x10] sm:$0xff]  ;;  %v118_v6 = vld [vmem:[%s392_s12 + $0x8] sm:$0x77] }
  0x11   : > { %v121_v4 = vld [vmem:[%s392_s12 + $0x20] sm:$0xff]  ;;  %v171_v5 = vmax.bf16 %v119_v3, %v117_v2  ;;  %v120_v7 = vld [vmem:[%s392_s12 + $0x18] sm:$0x77]  ;;  %v122_v8 = vld [vmem:[%s392_s12 + $0x28] sm:$0x77] }
  0x12   : > { %v172_v9 = vmax.bf16 %v120_v7, %v118_v6  ;;  %v234_v10 = vld [vmem:[%s401_s15 + $0x8] sm:$0x77]  ;;  %v123_v11 = vld [vmem:[%s392_s12 + $0x30] sm:$0xff]  ;;  %v125_v12 = vld [vmem:[%s392_s12 + $0x40] sm:$0xff] }
  0x13   : > { %v197_v13 = vmax.bf16 %v171_v5, %v121_v4  ;;  %v173_v14 = vmax.bf16 %v123_v11, %v121_v4  ;;  %v124_v15 = vld [vmem:[%s392_s12 + $0x38] sm:$0x77]  ;;  %v126_v16 = vld [vmem:[%s392_s12 + $0x48] sm:$0x77]  ;;  %v127_v20 = vld [vmem:[%s392_s12 + $0x50] sm:$0xff] }
  0x14   : > { %v238_v17 = vld [vmem:[%s401_s15 + $0x18] sm:$0x77]  ;;  %v198_v18 = vmax.bf16 %v172_v9, %v122_v8  ;;  %v174_v19 = vmax.bf16 %v124_v15, %v122_v8  ;;  %v129_v21 = vld [vmem:[%s392_s12 + $0x60] sm:$0xff]  ;;  %v175_v24 = vmax.bf16 %v127_v20, %v125_v12  ;;  %v130_v25 = vld [vmem:[%s392_s12 + $0x68] sm:$0x77] }
  0x15   : > { %v128_v22 = vld [vmem:[%s392_s12 + $0x58] sm:$0x77]  ;;  %226 = vst.msk [vmem:[%s401_s15] sm:$0xff] %vm385_vm8, %v197_v13  ;;  %v199_v23 = vmax.bf16 %v173_v14, %v125_v12  ;;  %v242_v27 = vld [vmem:[%s401_s15 + $0x28] sm:$0x77]  ;;  %v131_v28 = vld [vmem:[%s392_s12 + $0x70] sm:$0xff] }
  0x16   : > { %v176_v26 = vmax.bf16 %v128_v22, %v126_v16  ;;  %v235_v29 = vsel %vm394_vm9, %v198_v18, %v234_v10  ;;  %v200_v30 = vmax.bf16 %v174_v19, %v126_v16  ;;  %v133_v31 = vld [vmem:[%s392_s12 + $0x80] sm:$0xff]  ;;  %v177_v32 = vmax.bf16 %v131_v28, %v129_v21  ;;  %v132_v33 = vld [vmem:[%s392_s12 + $0x78] sm:$0x77]  ;;  %v134_v34 = vld [vmem:[%s392_s12 + $0x88] sm:$0x77] }
  0x17   : > { %236 = vst [vmem:[%s401_s15 + $0x8] sm:$0x77] %v235_v29  ;;  %237 = vst.msk [vmem:[%s401_s15 + $0x10] sm:$0xff] %vm385_vm8, %v199_v23  ;;  %v201_v35 = vmax.bf16 %v175_v24, %v129_v21  ;;  %v178_v37 = vmax.bf16 %v132_v33, %v130_v25  ;;  %v246_v38 = vld [vmem:[%s401_s15 + $0x38] sm:$0x77]  ;;  %v135_v39 = vld [vmem:[%s392_s12 + $0x90] sm:$0xff] }
  0x18   : > { %v202_v36 = vmax.bf16 %v176_v26, %v130_v25  ;;  %v137_v40 = vld [vmem:[%s392_s12 + $0xa0] sm:$0xff]  ;;  %v239_v41 = vsel %vm394_vm9, %v200_v30, %v238_v17  ;;  %v203_v42 = vmax.bf16 %v177_v32, %v133_v31  ;;  %v179_v43 = vmax.bf16 %v135_v39, %v133_v31  ;;  %v136_v44 = vld [vmem:[%s392_s12 + $0x98] sm:$0x77]  ;;  %v138_v45 = vld [vmem:[%s392_s12 + $0xa8] sm:$0x77] }
  0x19   : > { %v250_v46 = vld [vmem:[%s401_s15 + $0x48] sm:$0x77]  ;;  %240 = vst [vmem:[%s401_s15 + $0x18] sm:$0x77] %v239_v41  ;;  %241 = vst.msk [vmem:[%s401_s15 + $0x20] sm:$0xff] %vm385_vm8, %v201_v35  ;;  %v204_v48 = vmax.bf16 %v178_v37, %v134_v34  ;;  %v180_v49 = vmax.bf16 %v136_v44, %v134_v34  ;;  %v139_v50 = vld [vmem:[%s392_s12 + $0xb0] sm:$0xff] }
  0x1a   : > { %v243_v47 = vsel %vm394_vm9, %v202_v36, %v242_v27  ;;  %v141_v51 = vld [vmem:[%s392_s12 + $0xc0] sm:$0xff]  ;;  %v140_v52 = vld [vmem:[%s392_s12 + $0xb8] sm:$0x77]  ;;  %245 = vst.msk [vmem:[%s401_s15 + $0x30] sm:$0xff] %vm385_vm8, %v203_v42  ;;  %v205_v53 = vmax.bf16 %v179_v43, %v137_v40  ;;  %v181_v54 = vmax.bf16 %v139_v50, %v137_v40  ;;  %v142_v55 = vld [vmem:[%s392_s12 + $0xc8] sm:$0x77] }
  0x1b   : > { %244 = vst [vmem:[%s401_s15 + $0x28] sm:$0x77] %v243_v47  ;;  %v182_v56 = vmax.bf16 %v140_v52, %v138_v45  ;;  %v254_v57 = vld [vmem:[%s401_s15 + $0x58] sm:$0x77]  ;;  %v143_v58 = vld [vmem:[%s392_s12 + $0xd0] sm:$0xff]  ;;  %v247_v59 = vsel %vm394_vm9, %v204_v48, %v246_v38  ;;  %v206_v60 = vmax.bf16 %v180_v49, %v138_v45  ;;  %v145_v61 = vld [vmem:[%s392_s12 + $0xe0] sm:$0xff] }
  0x1c   : > { %v183_v62 = vmax.bf16 %v143_v58, %v141_v51  ;;  %v144_v63 = vld [vmem:[%s392_s12 + $0xd8] sm:$0x77]  ;;  %v146_v2 = vld [vmem:[%s392_s12 + $0xe8] sm:$0x77]  ;;  %248 = vst [vmem:[%s401_s15 + $0x38] sm:$0x77] %v247_v59  ;;  %v207_v3 = vmax.bf16 %v181_v54, %v141_v51 }
  0x1d   : > { %249 = vst.msk [vmem:[%s401_s15 + $0x40] sm:$0xff] %vm385_vm8, %v205_v53  ;;  %v208_v4 = vmax.bf16 %v182_v56, %v142_v55  ;;  %v184_v5 = vmax.bf16 %v144_v63, %v142_v55  ;;  %v258_v6 = vld [vmem:[%s401_s15 + $0x68] sm:$0x77]  ;;  %v147_v7 = vld [vmem:[%s392_s12 + $0xf0] sm:$0xff]  ;;  %v149_v8 = vld [vmem:[%s392_s12 + $0x100] sm:$0xff]  ;;  %v251_v9 = vsel %vm394_vm9, %v206_v60, %v250_v46 }
  0x1e   : > { %v209_v10 = vmax.bf16 %v183_v62, %v145_v61  ;;  %v185_v11 = vmax.bf16 %v147_v7, %v145_v61  ;;  %v148_v12 = vld [vmem:[%s392_s12 + $0xf8] sm:$0x77]  ;;  %v150_v13 = vld [vmem:[%s392_s12 + $0x108] sm:$0x77]  ;;  %252 = vst [vmem:[%s401_s15 + $0x48] sm:$0x77] %v251_v9 }
  0x1f   : > { %v262_v14 = vld [vmem:[%s401_s15 + $0x78] sm:$0x77]  ;;  %253 = vst.msk [vmem:[%s401_s15 + $0x50] sm:$0xff] %vm385_vm8, %v207_v3  ;;  %v255_v15 = vsel %vm394_vm9, %v208_v4, %v254_v57  ;;  %v210_v16 = vmax.bf16 %v184_v5, %v146_v2  ;;  %v186_v17 = vmax.bf16 %v148_v12, %v146_v2  ;;  %v151_v18 = vld [vmem:[%s392_s12 + $0x110] sm:$0xff]  ;;  %v153_v19 = vld [vmem:[%s392_s12 + $0x120] sm:$0xff] }
  0x20   : > { %v152_v20 = vld [vmem:[%s392_s12 + $0x118] sm:$0x77]  ;;  %256 = vst [vmem:[%s401_s15 + $0x58] sm:$0x77] %v255_v15  ;;  %257 = vst.msk [vmem:[%s401_s15 + $0x60] sm:$0xff] %vm385_vm8, %v209_v10  ;;  %v211_v21 = vmax.bf16 %v185_v11, %v149_v8  ;;  %v187_v22 = vmax.bf16 %v151_v18, %v149_v8  ;;  %v155_v26 = vld [vmem:[%s392_s12 + $0x130] sm:$0xff] }
  0x21   : > { %v154_v23 = vld [vmem:[%s392_s12 + $0x128] sm:$0x77]  ;;  %v188_v24 = vmax.bf16 %v152_v20, %v150_v13  ;;  %v259_v27 = vsel %vm394_vm9, %v210_v16, %v258_v6  ;;  %v212_v28 = vmax.bf16 %v186_v17, %v150_v13  ;;  %v157_v29 = vld [vmem:[%s392_s12 + $0x140] sm:$0xff]  ;;  %v189_v30 = vmax.bf16 %v155_v26, %v153_v19  ;;  %v156_v31 = vld [vmem:[%s392_s12 + $0x138] sm:$0x77] }
  0x22   : > { %v266_v25 = vld [vmem:[%s401_s15 + $0x88] sm:$0x77]  ;;  %260 = vst [vmem:[%s401_s15 + $0x68] sm:$0x77] %v259_v27  ;;  %261 = vst.msk [vmem:[%s401_s15 + $0x70] sm:$0xff] %vm385_vm8, %v211_v21  ;;  %v213_v33 = vmax.bf16 %v187_v22, %v153_v19  ;;  %v190_v35 = vmax.bf16 %v156_v31, %v154_v23  ;;  %v159_v37 = vld [vmem:[%s392_s12 + $0x150] sm:$0xff] }
  0x23   : > { %v158_v32 = vld [vmem:[%s392_s12 + $0x148] sm:$0x77]  ;;  %v214_v34 = vmax.bf16 %v188_v24, %v154_v23  ;;  %v270_v36 = vld [vmem:[%s401_s15 + $0x98] sm:$0x77]  ;;  %v161_v38 = vld [vmem:[%s392_s12 + $0x160] sm:$0xff]  ;;  %v263_v39 = vsel %vm394_vm9, %v212_v28, %v262_v14  ;;  %v215_v40 = vmax.bf16 %v189_v30, %v157_v29  ;;  %v191_v41 = vmax.bf16 %v159_v37, %v157_v29 }
  0x24   : > { %v160_v42 = vld [vmem:[%s392_s12 + $0x158] sm:$0x77]  ;;  %v162_v43 = vld [vmem:[%s392_s12 + $0x168] sm:$0x77]  ;;  %264 = vst [vmem:[%s401_s15 + $0x78] sm:$0x77] %v263_v39  ;;  %v216_v46 = vmax.bf16 %v190_v35, %v158_v32 }
  0x25   : > { %v274_v44 = vld [vmem:[%s401_s15 + $0xa8] sm:$0x77]  ;;  %265 = vst.msk [vmem:[%s401_s15 + $0x80] sm:$0xff] %vm385_vm8, %v213_v33  ;;  %v267_v45 = vsel %vm394_vm9, %v214_v34, %v266_v25  ;;  %v192_v47 = vmax.bf16 %v160_v42, %v158_v32  ;;  %v163_v48 = vld [vmem:[%s392_s12 + $0x170] sm:$0xff]  ;;  %v165_v49 = vld [vmem:[%s392_s12 + $0x180] sm:$0xff]  ;;  %v217_v51 = vmax.bf16 %v191_v41, %v161_v38 }
  0x26   : > { %v164_v50 = vld [vmem:[%s392_s12 + $0x178] sm:$0x77]  ;;  %268 = vst [vmem:[%s401_s15 + $0x88] sm:$0x77] %v267_v45  ;;  %269 = vst.msk [vmem:[%s401_s15 + $0x90] sm:$0xff] %vm385_vm8, %v215_v40  ;;  %v193_v52 = vmax.bf16 %v163_v48, %v161_v38  ;;  %v167_v56 = vld [vmem:[%s392_s12 + $0x190] sm:$0xff]  ;;  %v271_v57 = vsel %vm394_vm9, %v216_v46, %v270_v36 }
  0x27   : > { %v166_v53 = vld [vmem:[%s392_s12 + $0x188] sm:$0x77]  ;;  %v194_v54 = vmax.bf16 %v164_v50, %v162_v43  ;;  %v278_v55 = vld [vmem:[%s401_s15 + $0xb8] sm:$0x77]  ;;  %v218_v58 = vmax.bf16 %v192_v47, %v162_v43  ;;  %v169_v59 = vld [vmem:[%s392_s12 + $0x1a0] sm:$0xff]  ;;  %v195_v60 = vmax.bf16 %v167_v56, %v165_v49  ;;  %273 = vst.msk [vmem:[%s401_s15 + $0xa0] sm:$0xff] %vm385_vm8, %v217_v51 }
  0x28   : > { %v168_v61 = vld [vmem:[%s392_s12 + $0x198] sm:$0x77]  ;;  %v170_v62 = vld [vmem:[%s392_s12 + $0x1a8] sm:$0x77]  ;;  %272 = vst [vmem:[%s401_s15 + $0x98] sm:$0x77] %v271_v57  ;;  %v219_v63 = vmax.bf16 %v193_v52, %v165_v49 }
  0x29   : > { %v220_v2 = vmax.bf16 %v194_v54, %v166_v53  ;;  %v196_v3 = vmax.bf16 %v168_v61, %v166_v53  ;;  %v275_v4 = vsel %vm394_vm9, %v218_v58, %v274_v44  ;;  %v221_v5 = vmax.bf16 %v195_v60, %v169_v59  ;;  %v282_v6 = vld [vmem:[%s401_s15 + $0xc8] sm:$0x77] }
  0x2a   : > { %276 = vst [vmem:[%s401_s15 + $0xa8] sm:$0x77] %v275_v4  ;;  %277 = vst.msk [vmem:[%s401_s15 + $0xb0] sm:$0xff] %vm385_vm8, %v219_v63 }
  0x2b   : > { %v279_v7 = vsel %vm394_vm9, %v220_v2, %v278_v55  ;;  %v222_v8 = vmax.bf16 %v196_v3, %v170_v62  ;;  %281 = vst.msk [vmem:[%s401_s15 + $0xc0] sm:$0xff] %vm385_vm8, %v221_v5 }
  0x2c   : > { %280 = vst [vmem:[%s401_s15 + $0xb8] sm:$0x77] %v279_v7 }
  0x2d   : > { %v283_v9 = vsel %vm394_vm9, %v222_v8, %v282_v6 }
  0x2e   : > { %284 = vst [vmem:[%s401_s15 + $0xc8] sm:$0x77] %v283_v9 }
  0x2f PF: > { %s11_s6 = sadd.s32 1, %s365_s6  }
  0x30   : > { %p8_p4 = scmp.ge.s32.totalorder %s11_s6, 4  }
  0x32   :  { %10 = sbr.rel (!%p8_p4) target bundleno = 1 (0x1), region = 54 }

// kernel: alexnet_forward.20
= control target key start
LH: loop header
LB: loop body
LE: loop exit
PB: predicated region body
PF: predicated region fallthrough
CT: control target
= control target key end

     0   :  { %s2090_s0 = inlined_call_operand.vmem [shape: bf16[384,1792], index: 0, kind: input, shape index: {}]   ;;  %s2091_s1 = inlined_call_operand.vmem [shape: bf16[1792,384], index: 1, kind: input, shape index: {}]   ;;  %s2092_s2 = inlined_call_operand.vmem [shape: f32[1,384], index: 2, kind: input, shape index: {}]   ;;  %s2093_s3 = inlined_call_operand.vmem [shape: bf16[384,384], index: 3, kind: output, shape index: {}]  }
   0x1   :  { %2096 = sst [smem:[#allocation9_spill]] %s2090_s0 }
   0x2   :  { %2097 = sst [smem:[#allocation10_spill]] %s2091_s1 }
   0x3   :  { %2098 = sst [smem:[#allocation11_spill]] %s2093_s3 }
   0x4   :  { %s1737_s12 = smov 0   ;;  %s1739_s13 = smov 0  }
   0x5   :  { %s1741_s14 = smov 0   ;;  %s1743_s15 = smov 0  }
   0x6   :  { %s1745_s16 = smov 0   ;;  %s1747_s17 = smov 0  }
   0x7   :  { %s1749_s18 = smov 0   ;;  %s1751_s19 = smov 0  }
   0x8   :  { %s1753_s20 = smov 0   ;;  %s1755_s21 = smov 0  }
   0x9   :  { %s1757_s22 = smov 0   ;;  %s1759_s23 = smov 0  }
   0xa   :  { %s1761_s24 = smov 0  }
   0xb LB: > { %2099 = sst [smem:[#allocation6_spill]] %s1698_s20  ;;  %s25_s26 = sadd.s32 1, %s1702_s21  ;;  %s1714_s24 = sphi %s1761_s24, %s13_s24   ;;  %s1710_s23 = sphi %s1759_s23, %s2125_s23   ;;  %s1706_s22 = sphi %s1757_s22, %s2124_s22   ;;  %s1702_s21 = sphi %s1755_s21, %s2123_s21   ;;  %s1698_s20 = sphi %s1753_s20, %s2122_s20   ;;  %s1694_s19 = sphi %s1751_s19, %s2121_s19   ;;  %s1690_s18 = sphi %s1749_s18, %s2120_s18   ;;  %s1686_s17 = sphi %s1747_s17, %s2119_s17   ;;  %s1682_s16 = sphi %s1745_s16, %s2118_s16   ;;  %s1678_s15 = sphi %s1743_s15, %s2117_s15   ;;  %s1674_s14 = sphi %s1741_s14, %s2116_s14   ;;  %s1670_s13 = sphi %s1739_s13, %s2115_s13   ;;  %s1666_s12 = sphi %s1737_s12, %s2114_s12  }
   0xc   : > { %p26_p0 = scmp.ge.s32.totalorder %s25_s26, 7  ;;  %s28_s27 = sadd.s32 1, %s1706_s22 }
   0xd   : > { %s32_s28 = sadd.s32 1, %s1710_s23  ;;  %s41_s29 = sadd.s32 1, %s1686_s17 }
   0xe   : > { %s2127_s26 = smov (%p26_p0, %s25_s26), 0  ;;  %s2129_s27 = smov (!%p26_p0, %s28_s27), %s1706_s22 }
   0xf   : > { %2100 = sst [smem:[#allocation7_spill]] %s2127_s26  ;;  %s37_s30 = ssub.s32 %s1702_s21, %s2127_s26 }
  0x10   : > { %p48_p1 = scmp.ne.s32.totalorder %s1686_s17, %s1682_s16  ;;  %p30_p2 = scmp.ge.s32.totalorder %s2129_s27, 3 }
  0x11   : > { %p49_p3 = scmp.eq.s32.totalorder %s1714_s24, 0  ;;  %s69_s4 = sadd.s32 1, %s1678_s15 }
  0x12   : > { %p76_p4 = scmp.ne.s32.totalorder %s1678_s15, %s1674_s14  ;;  %s2131_s27 = smov (%p30_p2, %s2129_s27), 0 }
  0x13   : > { %2101 = sst [smem:[#allocation8_spill]] %s2131_s27  ;;  %s2133_s28 = smov (!%p30_p2, %s32_s28), %s1710_s23 }
  0x14   : > { %p1821_p5 = por %p49_p3, %p48_p1  ;;  %s65_s6 = ssub.s32 %s1706_s22, %s2131_s27 }
  0x15   : > { %p34_p6 = scmp.ge.s32.totalorder %s2133_s28, 3  ;;  %s66_s7 = sor.u32 %s65_s6, %s37_s30 }
  0x16   : > { %p67_p7 = scmp.eq.s32.totalorder %s66_s7, 0  ;;  %p1827_p8 = por %p76_p4, %p49_p3 }
  0x17   : > { %s2135_s28 = smov (%p34_p6, %s2133_s28), 0  ;;  %s123_s11 = sadd.s32 1, %s1670_s13 }
  0x18   : > { %s1834_s9 = scalar_select %p67_p7, %s1678_s15, %s69_s4  }
  0x19   : > { %s36_s10 = ssub.s32 %s1710_s23, %s2135_s28  ;;  %p133_p11 = scmp.ne.s32.totalorder %s1670_s13, %s1666_s12 }
  0x1a   : > { %s38_s25 = sor.u32 %s37_s30, %s36_s10  ;;  %s120_s26 = sor.u32 %s65_s6, %s36_s10 }
  0x1b   : > { %p39_p9 = scmp.eq.s32.totalorder %s38_s25, 0  ;;  %p121_p10 = scmp.eq.s32.totalorder %s120_s26, 0 }
  0x1c   : > { %s2104_s27 = sadd.s32 4294967295, %s1714_s24   ;;  %p1250_p0 = scmp.ge.s32.totalorder %s1714_s24, 63 }
  0x1d   : > { %p134_p12 = scmp.eq.s32.totalorder %s2104_s27, 62 }
  0x1e   : > { %s1844_s3 = scalar_select %p39_p9, %s1686_s17, %s41_s29  }
  0x1f   : > { %s1847_s7 = scalar_select %p121_p10, %s1670_s13, %s123_s11  }
  0x20   : > { %p1849_p13 = por %p134_p12, %p133_p11  ;;  %156 = sbr.rel (%p1250_p0) target bundleno = 86 (0x56), region = 16 }
  0x25   : > { %159 = sbr.rel (!%p1821_p5) target bundleno = 55 (0x37), region = 20  ;;  %s161_s25 = sand.u32 (%p1821_p5), 1, %s1686_s17  }
  0x26   : > { %s1253_s26 = sshll.u32 (%p1821_p5), %s1702_s21, 1  ;;  %s1251_s27 = sshll.u32 (%p1821_p5), %s161_s25, 7 }
  0x27   : > { %s1464_s29 = smul.u32 (%p1821_p5), 224, %s1710_s23  ;;  %s2106_s0 = sld [smem:[#allocation9_spill]] (%p1821_p5) }
  0x28   : > { %s163_s5 = scalar_lea.vmem (%p1821_p5), [#allocation3], %s1251_s27 }
  0x29   : > { %s167_s30 = sadd.s32 (%p1821_p5), %s1464_s29, %s1253_s26 }
  0x2a   : > { %s1255_s4 = sshll.u32 %s167_s30, 2 }
  0x2d   : > { %s1862_s11 = scalar_lea.vmem %s2106_s0, %s1255_s4 }
  0x2e   : > { %v228_v0 = vld [vmem:[%s1862_s11] sm:$0xff]  ;;  %v230_v1 = vld [vmem:[%s1862_s11 + $0x38] sm:$0xff]  ;;  %v232_v2 = vld [vmem:[%s1862_s11 + $0x70] sm:$0xff] }
  0x2f   : > { %229 = vst [vmem:[%s163_s5] sm:$0xff] %v228_v0  ;;  %231 = vst [vmem:[%s163_s5 + $0x8] sm:$0xff] %v230_v1  ;;  %v234_v3 = vld [vmem:[%s1862_s11 + $0xa8] sm:$0xff]  ;;  %v236_v4 = vld [vmem:[%s1862_s11 + $0xe0] sm:$0xff] }
  0x30   : > { %233 = vst [vmem:[%s163_s5 + $0x10] sm:$0xff] %v232_v2  ;;  %v238_v5 = vld [vmem:[%s1862_s11 + $0x118] sm:$0xff]  ;;  %235 = vst [vmem:[%s163_s5 + $0x18] sm:$0xff] %v234_v3  ;;  %v240_v6 = vld [vmem:[%s1862_s11 + $0x150] sm:$0xff] }
  0x31   : > { %237 = vst [vmem:[%s163_s5 + $0x20] sm:$0xff] %v236_v4  ;;  %239 = vst [vmem:[%s163_s5 + $0x28] sm:$0xff] %v238_v5  ;;  %v242_v7 = vld [vmem:[%s1862_s11 + $0x188] sm:$0xff]  ;;  %v244_v8 = vld [vmem:[%s1862_s11 + $0x1c0] sm:$0xff] }
  0x32   : > { %241 = vst [vmem:[%s163_s5 + $0x30] sm:$0xff] %v240_v6  ;;  %243 = vst [vmem:[%s163_s5 + $0x38] sm:$0xff] %v242_v7  ;;  %v246_v9 = vld [vmem:[%s1862_s11 + $0x1f8] sm:$0xff]  ;;  %v248_v10 = vld [vmem:[%s1862_s11 + $0x230] sm:$0xff] }
  0x33   : > { %245 = vst [vmem:[%s163_s5 + $0x40] sm:$0xff] %v244_v8  ;;  %v250_v11 = vld [vmem:[%s1862_s11 + $0x268] sm:$0xff]  ;;  %247 = vst [vmem:[%s163_s5 + $0x48] sm:$0xff] %v246_v9  ;;  %v252_v12 = vld [vmem:[%s1862_s11 + $0x2a0] sm:$0xff] }
  0x34   : > { %249 = vst [vmem:[%s163_s5 + $0x50] sm:$0xff] %v248_v10  ;;  %251 = vst [vmem:[%s163_s5 + $0x58] sm:$0xff] %v250_v11  ;;  %v254_v13 = vld [vmem:[%s1862_s11 + $0x2d8] sm:$0xff]  ;;  %v256_v14 = vld [vmem:[%s1862_s11 + $0x310] sm:$0xff] }
  0x35   : > { %253 = vst [vmem:[%s163_s5 + $0x60] sm:$0xff] %v252_v12  ;;  %255 = vst [vmem:[%s163_s5 + $0x68] sm:$0xff] %v254_v13  ;;  %v258_v15 = vld [vmem:[%s1862_s11 + $0x348] sm:$0xff] }
  0x36   : > { %257 = vst [vmem:[%s163_s5 + $0x70] sm:$0xff] %v256_v14  ;;  %259 = vst [vmem:[%s163_s5 + $0x78] sm:$0xff] %v258_v15 }
  0x37 PF: > { %265 = sbr.rel (!%p1827_p8) target bundleno = 86 (0x56), region = 58  ;;  %s267_s25 = sand.u32 (%p1827_p8), 1, %s1678_s15  }
  0x38   : > { %s1465_s26 = smul.u32 (%p1827_p8), 96, %s1702_s21  ;;  %s1256_s27 = sshll.u32 (%p1827_p8), %s267_s25, 7 }
  0x39   : > { %s2107_s1 = sld [smem:[#allocation10_spill]] (%p1827_p8)  ;;  %s1893_s8 = scalar_lea.vmem (%p1827_p8), [#allocation4], %s1256_s27 }
  0x3a   : > { %s272_s29 = sadd.s32 (%p1827_p8), %s1706_s22, %s1465_s26 }
  0x3b   : > { %s1259_s30 = sshll.u32 (%p1827_p8), %s272_s29, 2 }
  0x3f   : > { %s1888_s10 = scalar_lea.vmem %s2107_s1, %s1259_s30 }
  0x40   : > { %v291_v16 = vld [vmem:[%s1888_s10] sm:$0xf]  ;;  %v293_v17 = vld [vmem:[%s1888_s10 + $0xc] sm:$0xf]  ;;  %v295_v18 = vld [vmem:[%s1888_s10 + $0x18] sm:$0xf] }
  0x41   : > { %292 = vst [vmem:[%s1893_s8] sm:$0xf] %v291_v16  ;;  %294 = vst [vmem:[%s1893_s8 + $0x4] sm:$0xf] %v293_v17  ;;  %v297_v19 = vld [vmem:[%s1888_s10 + $0x24] sm:$0xf] }
  0x42   : > { %296 = vst [vmem:[%s1893_s8 + $0x8] sm:$0xf] %v295_v18  ;;  %v299_v20 = vld [vmem:[%s1888_s10 + $0x30] sm:$0xf]  ;;  %v301_v21 = vld [vmem:[%s1888_s10 + $0x3c] sm:$0xf] }
  0x43   : > { %298 = vst [vmem:[%s1893_s8 + $0xc] sm:$0xf] %v297_v19  ;;  %300 = vst [vmem:[%s1893_s8 + $0x10] sm:$0xf] %v299_v20  ;;  %v303_v22 = vld [vmem:[%s1888_s10 + $0x48] sm:$0xf] }
  0x44   : > { %302 = vst [vmem:[%s1893_s8 + $0x14] sm:$0xf] %v301_v21  ;;  %v305_v23 = vld [vmem:[%s1888_s10 + $0x54] sm:$0xf]  ;;  %v307_v24 = vld [vmem:[%s1888_s10 + $0x60] sm:$0xf] }
  0x45   : > { %304 = vst [vmem:[%s1893_s8 + $0x18] sm:$0xf] %v303_v22  ;;  %306 = vst [vmem:[%s1893_s8 + $0x1c] sm:$0xf] %v305_v23  ;;  %v309_v25 = vld [vmem:[%s1888_s10 + $0x6c] sm:$0xf] }
  0x46   : > { %308 = vst [vmem:[%s1893_s8 + $0x20] sm:$0xf] %v307_v24  ;;  %v311_v26 = vld [vmem:[%s1888_s10 + $0x78] sm:$0xf]  ;;  %v313_v27 = vld [vmem:[%s1888_s10 + $0x84] sm:$0xf] }
  0x47   : > { %310 = vst [vmem:[%s1893_s8 + $0x24] sm:$0xf] %v309_v25  ;;  %312 = vst [vmem:[%s1893_s8 + $0x28] sm:$0xf] %v311_v26  ;;  %v315_v28 = vld [vmem:[%s1888_s10 + $0x90] sm:$0xf] }
  0x48   : > { %314 = vst [vmem:[%s1893_s8 + $0x2c] sm:$0xf] %v313_v27  ;;  %v317_v29 = vld [vmem:[%s1888_s10 + $0x9c] sm:$0xf]  ;;  %v319_v30 = vld [vmem:[%s1888_s10 + $0xa8] sm:$0xf] }
  0x49   : > { %316 = vst [vmem:[%s1893_s8 + $0x30] sm:$0xf] %v315_v28  ;;  %318 = vst [vmem:[%s1893_s8 + $0x34] sm:$0xf] %v317_v29  ;;  %v321_v31 = vld [vmem:[%s1888_s10 + $0xb4] sm:$0xf] }
  0x4a   : > { %320 = vst [vmem:[%s1893_s8 + $0x38] sm:$0xf] %v319_v30  ;;  %v323_v32 = vld [vmem:[%s1888_s10 + $0xc0] sm:$0xf]  ;;  %v325_v33 = vld [vmem:[%s1888_s10 + $0xcc] sm:$0xf] }
  0x4b   : > { %322 = vst [vmem:[%s1893_s8 + $0x3c] sm:$0xf] %v321_v31  ;;  %324 = vst [vmem:[%s1893_s8 + $0x40] sm:$0xf] %v323_v32  ;;  %v327_v34 = vld [vmem:[%s1888_s10 + $0xd8] sm:$0xf] }
  0x4c   : > { %326 = vst [vmem:[%s1893_s8 + $0x44] sm:$0xf] %v325_v33  ;;  %v329_v35 = vld [vmem:[%s1888_s10 + $0xe4] sm:$0xf]  ;;  %v331_v36 = vld [vmem:[%s1888_s10 + $0xf0] sm:$0xf] }
  0x4d   : > { %328 = vst [vmem:[%s1893_s8 + $0x48] sm:$0xf] %v327_v34  ;;  %330 = vst [vmem:[%s1893_s8 + $0x4c] sm:$0xf] %v329_v35  ;;  %v333_v37 = vld [vmem:[%s1888_s10 + $0xfc] sm:$0xf] }
  0x4e   : > { %332 = vst [vmem:[%s1893_s8 + $0x50] sm:$0xf] %v331_v36  ;;  %v335_v38 = vld [vmem:[%s1888_s10 + $0x108] sm:$0xf]  ;;  %v337_v39 = vld [vmem:[%s1888_s10 + $0x114] sm:$0xf] }
  0x4f   : > { %334 = vst [vmem:[%s1893_s8 + $0x54] sm:$0xf] %v333_v37  ;;  %336 = vst [vmem:[%s1893_s8 + $0x58] sm:$0xf] %v335_v38  ;;  %v339_v40 = vld [vmem:[%s1888_s10 + $0x120] sm:$0xf] }
  0x50   : > { %338 = vst [vmem:[%s1893_s8 + $0x5c] sm:$0xf] %v337_v39  ;;  %v341_v41 = vld [vmem:[%s1888_s10 + $0x12c] sm:$0xf]  ;;  %v343_v42 = vld [vmem:[%s1888_s10 + $0x138] sm:$0xf] }
  0x51   : > { %340 = vst [vmem:[%s1893_s8 + $0x60] sm:$0xf] %v339_v40  ;;  %342 = vst [vmem:[%s1893_s8 + $0x64] sm:$0xf] %v341_v41  ;;  %v345_v43 = vld [vmem:[%s1888_s10 + $0x144] sm:$0xf] }
  0x52   : > { %344 = vst [vmem:[%s1893_s8 + $0x68] sm:$0xf] %v343_v42  ;;  %v347_v44 = vld [vmem:[%s1888_s10 + $0x150] sm:$0xf]  ;;  %v349_v45 = vld [vmem:[%s1888_s10 + $0x15c] sm:$0xf] }
  0x53   : > { %346 = vst [vmem:[%s1893_s8 + $0x6c] sm:$0xf] %v345_v43  ;;  %348 = vst [vmem:[%s1893_s8 + $0x70] sm:$0xf] %v347_v44  ;;  %v351_v46 = vld [vmem:[%s1888_s10 + $0x168] sm:$0xf] }
  0x54   : > { %350 = vst [vmem:[%s1893_s8 + $0x74] sm:$0xf] %v349_v45  ;;  %v353_v47 = vld [vmem:[%s1888_s10 + $0x174] sm:$0xf]  ;;  %352 = vst [vmem:[%s1893_s8 + $0x78] sm:$0xf] %v351_v46 }
  0x55   : > { %354 = vst [vmem:[%s1893_s8 + $0x7c] sm:$0xf] %v353_v47 }
  0x56 PF: > { %p1260_p1 = scmp.ge.s32.totalorder %s1714_s24, 1  ;;  %p447_p2 = scmp.lt.s32.totalorder %s1714_s24, 64 }
  0x58   : > { %p448_p3 = pnand %p1260_p1, %p447_p2 }
  0x59   : > { %s454_s11 = sand.u32 (!%p448_p3), 1, %s1682_s16   ;;  %s461_s5 = sand.u32 (!%p448_p3), 1, %s1674_s14  }
  0x5a   : > { %451 = sbr.rel (%p448_p3) target bundleno = 406 (0x196), region = 103  ;;  %s1261_s25 = sshll.u32 (!%p448_p3), %s454_s11, 7 }
  0x5b   : > { %s1262_s26 = sshll.u32 (!%p448_p3), %s461_s5, 7  ;;  %s487_s27 = sand.u32 (!%p448_p3), 1, %s1666_s12  }
  0x5c   : > { %p493_p4 = scmp.lt.s32.totalorder (!%p448_p3), %s1694_s19, 2  ;;  %s1263_s29 = sshll.u32 (!%p448_p3), %s487_s27, 6 }
  0x5d   : > { %s1969_s8 = scalar_lea.vmem (!%p448_p3), [#allocation3], %s1261_s25  ;;  %s1971_s0 = scalar_lea.vmem (!%p448_p3), [#allocation4], %s1262_s26 }
  0x5e   : > { %s1973_s1 = scalar_lea.vmem (!%p448_p3), [#allocation5], %s1263_s29  ;;  %p1264_p5 = scmp.ne.s32.totalorder (!%p448_p3), %s1690_s18, 0 }
  0x5f   : > { %s1963_s30 = scalar_select %p493_p4, %s1694_s19, 2 }
  0x60   : > { %501 = sbr.rel (%p1264_p5) target bundleno = 110 (0x6e), region = 115 }
  0x61   : > { %s495_s10 = scalar_lea.vmem %s2092_s2, %s1963_s30 }
  0x65   : > { %v1716_v48 = vmov 0.0  }
  0x66   : > { %502 = vst [vmem:[#allocation2 + $0x30] sm:$0xff] %v1716_v48  ;;  %503 = vst [vmem:[#allocation2] sm:$0xff] %v1716_v48 }
  0x67   : > { %504 = vst [vmem:[#allocation2 + $0x58] sm:$0xff] %v1716_v48  ;;  %505 = vst [vmem:[#allocation2 + $0x18] sm:$0xff] %v1716_v48 }
  0x68   : > { %506 = vst [vmem:[#allocation2 + $0x50] sm:$0xff] %v1716_v48  ;;  %507 = vst [vmem:[#allocation2 + $0x68] sm:$0xff] %v1716_v48 }
  0x69   : > { %508 = vst [vmem:[#allocation2 + $0x8] sm:$0xff] %v1716_v48  ;;  %509 = vst [vmem:[#allocation2 + $0x48] sm:$0xff] %v1716_v48 }
  0x6a   : > { %510 = vst [vmem:[#allocation2 + $0x40] sm:$0xff] %v1716_v48  ;;  %511 = vst [vmem:[#allocation2 + $0x20] sm:$0xff] %v1716_v48 }
  0x6b   : > { %512 = vst [vmem:[#allocation2 + $0x10] sm:$0xff] %v1716_v48  ;;  %513 = vst [vmem:[#allocation2 + $0x38] sm:$0xff] %v1716_v48 }
  0x6c   : > { %514 = vst [vmem:[#allocation2 + $0x60] sm:$0xff] %v1716_v48  ;;  %515 = vst [vmem:[#allocation2 + $0x70] sm:$0xff] %v1716_v48 }
  0x6d   : > { %516 = vst [vmem:[#allocation2 + $0x78] sm:$0xff] %v1716_v48  ;;  %517 = vst [vmem:[#allocation2 + $0x28] sm:$0xff] %v1716_v48 }
  0x6e PF: > { %v1572_v49 = vld [vmem:[%s1971_s0 + $0x78] sm:$0xff]   ;;  %v1574_v51 = vld [vmem:[%s1971_s0 + $0x70] sm:$0xff]   ;;  %v1576_v53 = vld [vmem:[%s1971_s0 + $0x68] sm:$0xff]   ;;  %p1297_p6 = scmp.ne.s32.totalorder %s1690_s18, 6 }
  0x6f   : > { %v1573_v50 = vld [vmem:[%s1971_s0 + $0x38] sm:$0xff]   ;;  %1384 = vmatprep.subr.bf16.mxu0 %v1572_v49  ;;  %1448 = vmatprep.subr.bf16.mxu1 %v1572_v49  ;;  %v1575_v52 = vld [vmem:[%s1971_s0 + $0x30] sm:$0xff]   ;;  %v1577_v54 = vld [vmem:[%s1971_s0 + $0x28] sm:$0xff]  }
  0x70   : > { %1385 = vmatpush3.bf16.msra.mxu0 %v1573_v50  ;;  %1456 = vmatpush3.bf16.msra.mxu1 %v1573_v50  ;;  %v1578_v55 = vld [vmem:[%s1971_s0 + $0x60] sm:$0xff]   ;;  %v1580_v57 = vld [vmem:[%s1971_s0 + $0x58] sm:$0xff]   ;;  %v1582_v59 = vld [vmem:[%s1971_s0 + $0x50] sm:$0xff]  }
  0x71   : > { %1386 = vmatprep.subr.bf16.mxu0 %v1574_v51  ;;  %1449 = vmatprep.subr.bf16.mxu1 %v1574_v51  ;;  %v1579_v56 = vld [vmem:[%s1971_s0 + $0x20] sm:$0xff]   ;;  %v1581_v58 = vld [vmem:[%s1971_s0 + $0x18] sm:$0xff]   ;;  %v1583_v62 = vld [vmem:[%s1971_s0 + $0x10] sm:$0xff]  }
  0x72   : > { %v1590_v60 = vld [vmem:[%s1969_s8 + $0x4] ss:$8 sps:$4 sm:$0xff]   ;;  %v1588_v3 = vld [vmem:[%s1969_s8] ss:$8 sps:$4 sm:$0xff]   ;;  %v1594_v5 = vld [vmem:[%s1969_s8 + $0x14] ss:$8 sps:$4 sm:$0xff]  }
  0x73   : > { %v1593_v61 = vld [vmem:[%s1969_s8 + $0x44] ss:$8 sps:$4 sm:$0xff]   ;;  %790 = vmatprep.mubr.bf16.mxu0 %v1590_v60  ;;  %v1591_v4 = vld [vmem:[%s1969_s8 + $0x40] ss:$8 sps:$4 sm:$0xff]   ;;  %v1596_v6 = vld [vmem:[%s1969_s8 + $0x54] ss:$8 sps:$4 sm:$0xff]  }
  0x74   : > { %1387 = vmatpush3.bf16.msra.mxu0 %v1575_v52  ;;  %1457 = vmatpush3.bf16.msra.mxu1 %v1575_v52  ;;  %v1584_v63 = vld [vmem:[%s1971_s0 + $0x48] sm:$0xff]   ;;  %v1586_v1 = vld [vmem:[%s1971_s0 + $0x40] sm:$0xff]   ;;  %v1598_v7 = vld [vmem:[%s1969_s8 + $0x10] ss:$8 sps:$4 sm:$0xff]  }
  0x75   : > { %1388 = vmatprep.subr.bf16.mxu0 %v1576_v53  ;;  %1450 = vmatprep.subr.bf16.mxu1 %v1576_v53  ;;  %v1585_v0 = vld [vmem:[%s1971_s0 + $0x8] sm:$0xff]   ;;  %v1587_v2 = vld [vmem:[%s1971_s0] sm:$0xff]   ;;  %v1599_v8 = vld [vmem:[%s1969_s8 + $0x50] ss:$8 sps:$4 sm:$0xff]  }
  0x76   : > { %822 = vmatprep.mubr.bf16.mxu1 %v1593_v61  ;;  %v1600_v9 = vld [vmem:[%s1969_s8 + $0x24] ss:$8 sps:$4 sm:$0xff]   ;;  %v1604_v11 = vld [vmem:[%s1969_s8 + $0x20] ss:$8 sps:$4 sm:$0xff]   ;;  %v1606_v13 = vld [vmem:[%s1969_s8 + $0x34] ss:$8 sps:$4 sm:$0xff]  }
  0x77   : > { %v1602_v10 = vld [vmem:[%s1969_s8 + $0x64] ss:$8 sps:$4 sm:$0xff]   ;;  %v1605_v12 = vld [vmem:[%s1969_s8 + $0x60] ss:$8 sps:$4 sm:$0xff]   ;;  %v1608_v14 = vld [vmem:[%s1969_s8 + $0x74] ss:$8 sps:$4 sm:$0xff]  }
  0x78   : > { %1389 = vmatpush3.bf16.msra.mxu0 %v1577_v54  ;;  %1458 = vmatpush3.bf16.msra.mxu1 %v1577_v54  ;;  %v1610_v15 = vld [vmem:[%s1969_s8 + $0x30] ss:$8 sps:$4 sm:$0xff]   ;;  %v526_v21 = vld [vmem:[#allocation2 + $0x40] sm:$0xff] }
  0x79   : > { %1390 = vmatprep.subr.bf16.mxu0 %v1578_v55  ;;  %1451 = vmatprep.subr.bf16.mxu1 %v1578_v55  ;;  %v1611_v16 = vld [vmem:[%s1969_s8 + $0x70] ss:$8 sps:$4 sm:$0xff]   ;;  %v519_v29 = vld [vmem:[#allocation2] sm:$0xff] }
  0x7a   : > { %v518_v19 = vld [vmem:[#allocation2 + $0x30] sm:$0xff]  ;;  %v527_v31 = vld [vmem:[#allocation2 + $0x20] sm:$0xff]  ;;  %v520_v39 = vld [vmem:[#allocation2 + $0x58] sm:$0xff] }
  0x7b   : > { %v528_v41 = vld [vmem:[#allocation2 + $0x10] sm:$0xff]  ;;  %v521_v49 = vld [vmem:[#allocation2 + $0x18] sm:$0xff]  ;;  %v530_v61 = vld [vmem:[#allocation2 + $0x60] sm:$0xff] }
  0x7c   : > { %1391 = vmatpush3.bf16.msra.mxu0 %v1579_v56  ;;  %1459 = vmatpush3.bf16.msra.mxu1 %v1579_v56  ;;  %v529_v51 = vld [vmem:[#allocation2 + $0x38] sm:$0xff] }
  0x7d   : > { %1392 = vmatprep.subr.bf16.mxu0 %v1580_v57  ;;  %1452 = vmatprep.subr.bf16.mxu1 %v1580_v57 }
  0x80   : > { %1393 = vmatpush3.bf16.msra.mxu0 %v1581_v58  ;;  %1460 = vmatpush3.bf16.msra.mxu1 %v1581_v58 }
  0x81   : > { %1394 = vmatprep.subr.bf16.mxu0 %v1582_v59  ;;  %1453 = vmatprep.subr.bf16.mxu1 %v1582_v59  ;;  %v522_v59 = vld [vmem:[#allocation2 + $0x50] sm:$0xff] }
  0x84   : > { %1395 = vmatpush3.bf16.msra.mxu0 %v1583_v62  ;;  %1461 = vmatpush3.bf16.msra.mxu1 %v1583_v62 }
  0x85   : > { %1396 = vmatprep.subr.bf16.mxu0 %v1584_v63  ;;  %1454 = vmatprep.subr.bf16.mxu1 %v1584_v63 }
  0x88   : > { %1397 = vmatpush3.bf16.msra.mxu0 %v1585_v0  ;;  %1462 = vmatpush3.bf16.msra.mxu1 %v1585_v0 }
  0x89   : > { %1398 = vmatprep.subr.bf16.mxu0 %v1586_v1  ;;  %1455 = vmatprep.subr.bf16.mxu1 %v1586_v1 }
  0x8c   : > { %1399 = vmatpush3.bf16.msra.mxu0 %v1587_v2  ;;  %1463 = vmatpush3.bf16.msra.mxu1 %v1587_v2 }
  0x8f   : > { %791 = vmatmul.mubr.bf16.vlgmr.msra.gmra.mxu0 %v1588_v3  ;;  %823 = vmatmul.mubr.bf16.vlgmr.msra.gmra.mxu1 %v1591_v4 }
  0x90   : > { %798 = vmatprep.mubr.bf16.mxu0 %v1594_v5  ;;  %830 = vmatprep.mubr.bf16.mxu1 %v1596_v6  ;;  %v523_v5 = vld [vmem:[#allocation2 + $0x68] sm:$0xff] }
  0x97   : > { %799 = vmatmul.mubr.bf16.gmra.mxu0 %v1598_v7  ;;  %831 = vmatmul.mubr.bf16.gmra.mxu1 %v1599_v8  ;;  %v531_v7 = vld [vmem:[#allocation2 + $0x70] sm:$0xff] }
  0x98   : > { %806 = vmatprep.mubr.bf16.mxu0 %v1600_v9  ;;  %838 = vmatprep.mubr.bf16.mxu1 %v1602_v10 }
  0x9f   : > { %807 = vmatmul.mubr.bf16.gmra.mxu0 %v1604_v11  ;;  %839 = vmatmul.mubr.bf16.gmra.mxu1 %v1605_v12 }
  0xa0   : > { %814 = vmatprep.mubr.bf16.mxu0 %v1606_v13  ;;  %846 = vmatprep.mubr.bf16.mxu1 %v1608_v14 }
  0xa7   : > { %815 = vmatmul.mubr.bf16.gmra.mxu0 %v1610_v15  ;;  %847 = vmatmul.mubr.bf16.gmra.mxu1 %v1611_v16  ;;  %v524_v15 = vld [vmem:[#allocation2 + $0x8] sm:$0xff] }
 0x14f   : > { %v1400_v17 = vpop.f32.mrf.mxu0  ;;  %v1424_v18 = vpop.f32.mrf.mxu1 }
 0x151   : > { %v1401_v20 = vpop.f32.mrf.mxu0  ;;  %v1425_v22 = vpop.f32.mrf.mxu1 }
 0x152   : > { %v1402_v23 = vadd.f32 %v1401_v20, %v1400_v17  ;;  %v1426_v24 = vadd.f32 %v1425_v22, %v1424_v18  ;;  %v532_v17 = vld [vmem:[#allocation2 + $0x78] sm:$0xff] }
 0x153   : > { %v1403_v25 = vpop.f32.mrf.mxu0  ;;  %v1427_v26 = vpop.f32.mrf.mxu1 }
 0x154   : > { %v855_v27 = vadd.f32 %v1402_v23, %v518_v19  ;;  %v863_v28 = vadd.f32 %v1426_v24, %v526_v21 }
 0x155   : > { %v1404_v30 = vpop.f32.mrf.mxu0  ;;  %v1428_v32 = vpop.f32.mrf.mxu1 }
 0x156   : > { %871 = vst [vmem:[#allocation2 + $0x30] sm:$0xff] %v855_v27  ;;  %879 = vst [vmem:[#allocation2 + $0x40] sm:$0xff] %v863_v28  ;;  %v1405_v33 = vadd.f32 %v1404_v30, %v1403_v25  ;;  %v1429_v34 = vadd.f32 %v1428_v32, %v1427_v26  ;;  %v525_v25 = vld [vmem:[#allocation2 + $0x48] sm:$0xff] }
 0x157   : > { %v1406_v35 = vpop.f32.mrf.mxu0  ;;  %v1430_v36 = vpop.f32.mrf.mxu1  ;;  %v533_v27 = vld [vmem:[#allocation2 + $0x28] sm:$0xff] }
 0x158   : > { %v856_v37 = vadd.f32 %v1405_v33, %v519_v29  ;;  %v864_v38 = vadd.f32 %v1429_v34, %v527_v31 }
 0x159   : > { %v1407_v40 = vpop.f32.mrf.mxu0  ;;  %v1431_v42 = vpop.f32.mrf.mxu1 }
 0x15a   : > { %872 = vst [vmem:[#allocation2] sm:$0xff] %v856_v37  ;;  %880 = vst [vmem:[#allocation2 + $0x20] sm:$0xff] %v864_v38  ;;  %v1408_v43 = vadd.f32 %v1407_v40, %v1406_v35  ;;  %v1432_v44 = vadd.f32 %v1431_v42, %v1430_v36 }
 0x15b   : > { %v1409_v45 = vpop.f32.mrf.mxu0  ;;  %v1433_v46 = vpop.f32.mrf.mxu1 }
 0x15c   : > { %v857_v47 = vadd.f32 %v1408_v43, %v520_v39  ;;  %v865_v48 = vadd.f32 %v1432_v44, %v528_v41 }
 0x15d   : > { %v1410_v50 = vpop.f32.mrf.mxu0  ;;  %v1434_v52 = vpop.f32.mrf.mxu1 }
 0x15e   : > { %873 = vst [vmem:[#allocation2 + $0x58] sm:$0xff] %v857_v47  ;;  %881 = vst [vmem:[#allocation2 + $0x10] sm:$0xff] %v865_v48  ;;  %v1411_v53 = vadd.f32 %v1410_v50, %v1409_v45  ;;  %v1435_v54 = vadd.f32 %v1434_v52, %v1433_v46 }
 0x15f   : > { %v1412_v55 = vpop.f32.mrf.mxu0  ;;  %v1436_v56 = vpop.f32.mrf.mxu1 }
 0x160   : > { %v858_v57 = vadd.f32 %v1411_v53, %v521_v49  ;;  %v866_v58 = vadd.f32 %v1435_v54, %v529_v51 }
 0x161   : > { %v1413_v60 = vpop.f32.mrf.mxu0  ;;  %v1437_v62 = vpop.f32.mrf.mxu1 }
 0x162   : > { %874 = vst [vmem:[#allocation2 + $0x18] sm:$0xff] %v858_v57  ;;  %882 = vst [vmem:[#allocation2 + $0x38] sm:$0xff] %v866_v58  ;;  %v1414_v63 = vadd.f32 %v1413_v60, %v1412_v55  ;;  %v1438_v0 = vadd.f32 %v1437_v62, %v1436_v56 }
 0x163   : > { %v1415_v1 = vpop.f32.mrf.mxu0  ;;  %v1439_v2 = vpop.f32.mrf.mxu1 }
 0x164   : > { %v859_v3 = vadd.f32 %v1414_v63, %v522_v59  ;;  %v867_v4 = vadd.f32 %v1438_v0, %v530_v61 }
 0x165   : > { %v1416_v6 = vpop.f32.mrf.mxu0  ;;  %v1440_v8 = vpop.f32.mrf.mxu1 }
 0x166   : > { %875 = vst [vmem:[#allocation2 + $0x50] sm:$0xff] %v859_v3  ;;  %883 = vst [vmem:[#allocation2 + $0x60] sm:$0xff] %v867_v4  ;;  %v1417_v9 = vadd.f32 %v1416_v6, %v1415_v1  ;;  %v1441_v10 = vadd.f32 %v1440_v8, %v1439_v2 }
 0x167   : > { %v1418_v11 = vpop.f32.mrf.mxu0  ;;  %v1442_v12 = vpop.f32.mrf.mxu1 }
 0x168   : > { %v860_v13 = vadd.f32 %v1417_v9, %v523_v5  ;;  %v868_v14 = vadd.f32 %v1441_v10, %v531_v7 }
 0x169   : > { %v1419_v16 = vpop.f32.mrf.mxu0  ;;  %v1443_v18 = vpop.f32.mrf.mxu1 }
 0x16a   : > { %876 = vst [vmem:[#allocation2 + $0x68] sm:$0xff] %v860_v13  ;;  %884 = vst [vmem:[#allocation2 + $0x70] sm:$0xff] %v868_v14  ;;  %v1420_v19 = vadd.f32 %v1419_v16, %v1418_v11  ;;  %v1444_v20 = vadd.f32 %v1443_v18, %v1442_v12 }
 0x16b   : > { %v1421_v21 = vpop.f32.mrf.mxu0  ;;  %v1445_v22 = vpop.f32.mrf.mxu1 }
 0x16c   : > { %v861_v23 = vadd.f32 %v1420_v19, %v524_v15  ;;  %v869_v24 = vadd.f32 %v1444_v20, %v532_v17 }
 0x16d   : > { %v1422_v26 = vpop.f32.mrf.mxu0  ;;  %v1446_v28 = vpop.f32.mrf.mxu1 }
 0x16e   : > { %877 = vst [vmem:[#allocation2 + $0x8] sm:$0xff] %v861_v23  ;;  %885 = vst [vmem:[#allocation2 + $0x78] sm:$0xff] %v869_v24  ;;  %v1423_v29 = vadd.f32 %v1422_v26, %v1421_v21  ;;  %v1447_v30 = vadd.f32 %v1446_v28, %v1445_v22  ;;  %890 = sbr.rel (%p1297_p6) target bundleno = 387 (0x183), region = 119 }
 0x170   : > { %v862_v31 = vadd.f32 %v1423_v29, %v525_v25  ;;  %v870_v32 = vadd.f32 %v1447_v30, %v533_v27 }
 0x172   : > { %878 = vst [vmem:[#allocation2 + $0x48] sm:$0xff] %v862_v31  ;;  %886 = vst [vmem:[#allocation2 + $0x28] sm:$0xff] %v870_v32 }
 0x173   : > { %v891_v33 = vld [vmem:[#allocation2 + $0x30] sm:$0xff]  ;;  %v892_v34 = vld [vmem:[#allocation2] sm:$0xff]  ;;  %v893_v38 = vld [vmem:[#allocation2 + $0x58] sm:$0xff] }
 0x174   : > { %v1298_v35 = vld [vmem:[%s495_s10] ss:$0 sm:$0xff]  ;;  %v894_v39 = vld [vmem:[#allocation2 + $0x18] sm:$0xff]  ;;  %v895_v40 = vld [vmem:[#allocation2 + $0x50] sm:$0xff] }
 0x175   : > { %v914_v36 = vadd.f32 %v1298_v35, %v891_v33  ;;  %v915_v37 = vadd.f32 %v1298_v35, %v892_v34  ;;  %v916_v41 = vadd.f32 %v1298_v35, %v893_v38  ;;  %v917_v42 = vadd.f32 %v1298_v35, %v894_v39  ;;  %v896_v43 = vld [vmem:[#allocation2 + $0x68] sm:$0xff]  ;;  %v899_v51 = vld [vmem:[#allocation2 + $0x40] sm:$0xff]  ;;  %v901_v53 = vld [vmem:[#allocation2 + $0x10] sm:$0xff] }
 0x176   : > { %v918_v44 = vadd.f32 %v1298_v35, %v895_v40  ;;  %v897_v45 = vld [vmem:[#allocation2 + $0x8] sm:$0xff]  ;;  %v919_v49 = vadd.f32 %v1298_v35, %v896_v43  ;;  %v900_v52 = vld [vmem:[#allocation2 + $0x20] sm:$0xff]  ;;  %v902_v58 = vld [vmem:[#allocation2 + $0x38] sm:$0xff]  ;;  %v922_v63 = vadd.f32 %v1298_v35, %v899_v51  ;;  %v924_v4 = vadd.f32 %v1298_v35, %v901_v53 }
 0x177   : > { %v930_v47 = vmax.f32 %v914_v36, 0.0  ;;  %v931_v48 = vmax.f32 %v915_v37, 0.0  ;;  %v920_v50 = vadd.f32 %v1298_v35, %v897_v45  ;;  %v932_v54 = vmax.f32 %v916_v41, 0.0  ;;  %v903_v59 = vld [vmem:[#allocation2 + $0x60] sm:$0xff]  ;;  %v904_v0 = vld [vmem:[#allocation2 + $0x70] sm:$0xff]  ;;  %v905_v5 = vld [vmem:[#allocation2 + $0x78] sm:$0xff] }
 0x178   : > { %v933_v55 = vmax.f32 %v917_v42, 0.0  ;;  %v934_v56 = vmax.f32 %v918_v44, 0.0  ;;  %v935_v61 = vmax.f32 %v919_v49, 0.0  ;;  %v923_v3 = vadd.f32 %v1298_v35, %v900_v52 }
 0x179   : > { %v898_v46 = vld [vmem:[#allocation2 + $0x48] sm:$0xff]  ;;  %v1340_v60 = vpack.c.bf16 %v931_v48, %v930_v47  ;;  %v936_v62 = vmax.f32 %v920_v50, 0.0  ;;  %v938_v8 = vmax.f32 %v922_v63, 0.0  ;;  %v925_v9 = vadd.f32 %v1298_v35, %v902_v58 }
 0x17a   : > { %v921_v57 = vadd.f32 %v1298_v35, %v898_v46  ;;  %v1345_v1 = vpack.c.bf16 %v933_v55, %v932_v54  ;;  %v906_v6 = vld [vmem:[#allocation2 + $0x28] sm:$0xff]  ;;  %v1350_v7 = vpack.c.bf16 %v935_v61, %v934_v56  ;;  %v926_v10 = vadd.f32 %v1298_v35, %v903_v59 }
 0x17b   : > { %1341 = vst [vmem:[%s1973_s1] sm:$0xff] %v1340_v60   ;;  %v939_v12 = vmax.f32 %v923_v3, 0.0  ;;  %v940_v13 = vmax.f32 %v924_v4, 0.0  ;;  %v927_v14 = vadd.f32 %v1298_v35, %v904_v0  ;;  %v941_v15 = vmax.f32 %v925_v9, 0.0 }
 0x17c   : > { %v937_v2 = vmax.f32 %v921_v57, 0.0  ;;  %1377 = vst [vmem:[%s1973_s1 + $0x8] sm:$0xff] %v1345_v1   ;;  %1378 = vst [vmem:[%s1973_s1 + $0x10] sm:$0xff] %v1350_v7   ;;  %v942_v16 = vmax.f32 %v926_v10, 0.0  ;;  %v928_v17 = vadd.f32 %v1298_v35, %v905_v5  ;;  %v929_v18 = vadd.f32 %v1298_v35, %v906_v6 }
 0x17d   : > { %v1360_v19 = vpack.c.bf16 %v939_v12, %v938_v8  ;;  %v943_v20 = vmax.f32 %v927_v14, 0.0  ;;  %v1365_v21 = vpack.c.bf16 %v941_v15, %v940_v13 }
 0x17e   : > { %v1355_v11 = vpack.c.bf16 %v937_v2, %v936_v62  ;;  %v944_v22 = vmax.f32 %v928_v17, 0.0  ;;  %v945_v23 = vmax.f32 %v929_v18, 0.0 }
 0x17f   : > { %1380 = vst [vmem:[%s1973_s1 + $0x20] sm:$0xff] %v1360_v19   ;;  %v1370_v24 = vpack.c.bf16 %v943_v20, %v942_v16  ;;  %1381 = vst [vmem:[%s1973_s1 + $0x28] sm:$0xff] %v1365_v21  }
 0x180   : > { %1379 = vst [vmem:[%s1973_s1 + $0x18] sm:$0xff] %v1355_v11   ;;  %v1375_v25 = vpack.c.bf16 %v945_v23, %v944_v22 }
 0x181   : > { %1382 = vst [vmem:[%s1973_s1 + $0x30] sm:$0xff] %v1370_v24  }
 0x182   : > { %1383 = vst [vmem:[%s1973_s1 + $0x38] sm:$0xff] %v1375_v25  }
 0x183 PF: > { %1032 = sbr.rel (!%p1849_p13) target bundleno = 406 (0x196), region = 123  ;;  %s2108_s14 = sld [smem:[#allocation6_spill]] (%p1849_p13)  ;;  %v1054_v26 = vld [vmem:[%s1973_s1] sm:$0xf] (%p1849_p13)  ;;  %v1056_v27 = vld [vmem:[%s1973_s1 + $0x4] sm:$0xf] (%p1849_p13) }
 0x184   : > { %v1058_v28 = vld [vmem:[%s1973_s1 + $0x8] sm:$0xf] (%p1849_p13)  ;;  %v1060_v29 = vld [vmem:[%s1973_s1 + $0xc] sm:$0xf] (%p1849_p13)  ;;  %v1062_v30 = vld [vmem:[%s1973_s1 + $0x10] sm:$0xf] (%p1849_p13) }
 0x185   : > { %v1064_v31 = vld [vmem:[%s1973_s1 + $0x14] sm:$0xf] (%p1849_p13)  ;;  %s2109_s25 = sld [smem:[#allocation11_spill]] (%p1849_p13) }
 0x186   : > { %v1070_v34 = vld [vmem:[%s1973_s1 + $0x20] sm:$0xf] (%p1849_p13)  ;;  %v1072_v35 = vld [vmem:[%s1973_s1 + $0x24] sm:$0xf] (%p1849_p13)  ;;  %v1074_v36 = vld [vmem:[%s1973_s1 + $0x28] sm:$0xf] (%p1849_p13) }
 0x187   : > { %v1066_v32 = vld [vmem:[%s1973_s1 + $0x18] sm:$0xf] (%p1849_p13)  ;;  %v1068_v33 = vld [vmem:[%s1973_s1 + $0x1c] sm:$0xf] (%p1849_p13)  ;;  %v1076_v37 = vld [vmem:[%s1973_s1 + $0x2c] sm:$0xf] (%p1849_p13) }
 0x188   : > { %v1078_v38 = vld [vmem:[%s1973_s1 + $0x30] sm:$0xf]  ;;  %v1080_v39 = vld [vmem:[%s1973_s1 + $0x34] sm:$0xf] }
 0x189   : > { %s1466_s16 = smul.u32 48, %s2108_s14  ;;  %v1082_v40 = vld [vmem:[%s1973_s1 + $0x38] sm:$0xf]  ;;  %v1084_v41 = vld [vmem:[%s1973_s1 + $0x3c] sm:$0xf] }
 0x18b   : > { %s1035_s18 = sadd.s32 %s1694_s19, %s1466_s16 }
 0x18c   : > { %s1318_s20 = sshll.u32 %s1035_s18, 2 }
 0x18d   : > { %s1037_s26 = scalar_lea.vmem %s2109_s25, %s1318_s20 }
 0x18e   : > { %1055 = vst [vmem:[%s1037_s26] sm:$0xf] %v1054_v26  ;;  %1057 = vst [vmem:[%s1037_s26 + $0xc] sm:$0xf] %v1056_v27 }
 0x18f   : > { %1059 = vst [vmem:[%s1037_s26 + $0x18] sm:$0xf] %v1058_v28  ;;  %1061 = vst [vmem:[%s1037_s26 + $0x24] sm:$0xf] %v1060_v29 }
 0x190   : > { %1063 = vst [vmem:[%s1037_s26 + $0x30] sm:$0xf] %v1062_v30  ;;  %1065 = vst [vmem:[%s1037_s26 + $0x3c] sm:$0xf] %v1064_v31 }
 0x191   : > { %1067 = vst [vmem:[%s1037_s26 + $0x48] sm:$0xf] %v1066_v32  ;;  %1069 = vst [vmem:[%s1037_s26 + $0x54] sm:$0xf] %v1068_v33 }
 0x192   : > { %1071 = vst [vmem:[%s1037_s26 + $0x60] sm:$0xf] %v1070_v34  ;;  %1073 = vst [vmem:[%s1037_s26 + $0x6c] sm:$0xf] %v1072_v35 }
 0x193   : > { %1075 = vst [vmem:[%s1037_s26 + $0x78] sm:$0xf] %v1074_v36  ;;  %1077 = vst [vmem:[%s1037_s26 + $0x84] sm:$0xf] %v1076_v37 }
 0x194   : > { %1079 = vst [vmem:[%s1037_s26 + $0x90] sm:$0xf] %v1078_v38  ;;  %1081 = vst [vmem:[%s1037_s26 + $0x9c] sm:$0xf] %v1080_v39 }
 0x195   : > { %1083 = vst [vmem:[%s1037_s26 + $0xa8] sm:$0xf] %v1082_v40  ;;  %1085 = vst [vmem:[%s1037_s26 + $0xb4] sm:$0xf] %v1084_v41 }
 0x196 PF: > { %s13_s24 = sadd.s32 1, %s1714_s24   ;;  %s2111_s1 = sld [smem:[#allocation7_spill]] }
 0x197   : > { %p2046_p7 = scmp.ge.s32.totalorder %s13_s24, 65   ;;  %s2112_s27 = sld [smem:[#allocation8_spill]] }
 0x198   : > { %s2114_s12 = smov %s1670_s13  ;;  %s2115_s13 = smov %s1847_s7 }
 0x199   : > { %s2116_s14 = smov %s1678_s15  ;;  %s2117_s15 = smov %s1834_s9 }
 0x19a   : > { %s2118_s16 = smov %s1686_s17  ;;  %s2119_s17 = smov %s1844_s3 }
 0x19b   : > { %s2120_s18 = smov %s1702_s21  ;;  %s2121_s19 = smov %s1706_s22 }
 0x19c   : > { %s2122_s20 = smov %s1710_s23  ;;  %s2123_s21 = smov %s2111_s1 }
 0x19d   : > { %s2124_s22 = smov %s2112_s27  ;;  %s2125_s23 = smov %s2135_s28 }
 0x19e   :  { %12 = sbr.rel (!%p2046_p7) target bundleno = 11 (0xb), region = 206 }

// kernel: alexnet_forward.21
= control target key start
LH: loop header
LB: loop body
LE: loop exit
PB: predicated region body
PF: predicated region fallthrough
CT: control target
= control target key end

     0   :  { %s1395_s12 = smov 0   ;;  %s1397_s13 = smov 0   ;;  %s1600_s0 = inlined_call_operand.vmem [shape: bf16[384,3456], index: 0, kind: input, shape index: {}]   ;;  %s1601_s1 = inlined_call_operand.vmem [shape: bf16[3456,256], index: 1, kind: input, shape index: {}]   ;;  %s1602_s2 = inlined_call_operand.vmem [shape: f32[1,256], index: 2, kind: input, shape index: {}]   ;;  %s1603_s3 = inlined_call_operand.vmem [shape: bf16[384,256], index: 3, kind: output, shape index: {}]  }
   0x1   :  { %s1399_s14 = smov 0   ;;  %s1401_s15 = smov 0  }
   0x2   :  { %s1403_s16 = smov 0   ;;  %s1405_s17 = smov 0  }
   0x3   :  { %s1407_s18 = smov 0  }
   0x4 LB: > { %s25_s19 = sadd.s32 1, %s1363_s16  ;;  %s32_s20 = sadd.s32 1, %s1367_s17  ;;  %s1371_s18 = sphi %s1407_s18, %s13_s18   ;;  %s1367_s17 = sphi %s1405_s17, %s1609_s17   ;;  %s1363_s16 = sphi %s1403_s16, %s1608_s16   ;;  %s1359_s15 = sphi %s1401_s15, %s1607_s15   ;;  %s1355_s14 = sphi %s1399_s14, %s1606_s14   ;;  %s1351_s13 = sphi %s1397_s13, %s1605_s13   ;;  %s1347_s12 = sphi %s1395_s12, %s1604_s12  }
   0x5   : > { %p26_p0 = scmp.ge.s32.totalorder %s25_s19, 27  ;;  %p48_p1 = scmp.ne.s32.totalorder %s1351_s13, %s1347_s12 }
   0x6   : > { %p49_p2 = scmp.eq.s32.totalorder %s1371_s18, 0  ;;  %s41_s24 = sadd.s32 1, %s1351_s13 }
   0x7   : > { %s1611_s19 = smov (%p26_p0, %s25_s19), 0  ;;  %s1613_s20 = smov (!%p26_p0, %s32_s20), %s1367_s17 }
   0x8   : > { %p50_p3 = por %p49_p2, %p48_p1  ;;  %p34_p4 = scmp.ge.s32.totalorder %s1613_s20, 3 }
   0x9   : > { %s37_s21 = ssub.s32 %s1363_s16, %s1611_s19  ;;  %p1135_p6 = scmp.ge.s32.totalorder %s1371_s18, 81 }
   0xa   : > { %s1615_s20 = smov (%p34_p4, %s1613_s20), 0 }
   0xb   : > { %s36_s22 = ssub.s32 %s1367_s17, %s1615_s20  ;;  %164 = sbr.rel (%p1135_p6) target bundleno = 33 (0x21), region = 20 }
   0xc   : > { %s38_s23 = sor.u32 %s37_s21, %s36_s22 }
   0xd   : > { %p39_p5 = scmp.eq.s32.totalorder %s38_s23, 0 }
   0xf   : > { %s1446_s25 = scalar_select %p39_p5, %s1351_s13, %s41_s24  }
  0x10   : > { %167 = sbr.rel (!%p50_p3) target bundleno = 33 (0x21), region = 24  ;;  %s169_s26 = sand.u32 (%p50_p3), 1, %s1351_s13  }
  0x11   : > { %s1226_s27 = smul.u32 (%p50_p3), 432, %s1367_s17  ;;  %s1136_s28 = sshll.u32 (%p50_p3), %s169_s26, 6 }
  0x12   : > { %s171_s7 = scalar_lea.vmem (%p50_p3), [#allocation3], %s1136_s28 }
  0x13   : > { %s174_s29 = sadd.s32 (%p50_p3), %s1363_s16, %s1226_s27 }
  0x14   : > { %s1139_s30 = sshll.u32 (%p50_p3), %s174_s29, 2 }
  0x15   : > { %s1455_s6 = scalar_lea.vmem %s1600_s0, %s1139_s30 }
  0x16   : > { %v193_v0 = vld [vmem:[%s1455_s6] sm:$0xf]  ;;  %v195_v1 = vld [vmem:[%s1455_s6 + $0x6c] sm:$0xf]  ;;  %v197_v2 = vld [vmem:[%s1455_s6 + $0xd8] sm:$0xf] }
  0x17   : > { %194 = vst [vmem:[%s171_s7] sm:$0xf] %v193_v0  ;;  %196 = vst [vmem:[%s171_s7 + $0x4] sm:$0xf] %v195_v1  ;;  %v199_v3 = vld [vmem:[%s1455_s6 + $0x144] sm:$0xf] }
  0x18   : > { %198 = vst [vmem:[%s171_s7 + $0x8] sm:$0xf] %v197_v2  ;;  %v201_v4 = vld [vmem:[%s1455_s6 + $0x1b0] sm:$0xf]  ;;  %v203_v5 = vld [vmem:[%s1455_s6 + $0x21c] sm:$0xf] }
  0x19   : > { %200 = vst [vmem:[%s171_s7 + $0xc] sm:$0xf] %v199_v3  ;;  %202 = vst [vmem:[%s171_s7 + $0x10] sm:$0xf] %v201_v4  ;;  %v205_v6 = vld [vmem:[%s1455_s6 + $0x288] sm:$0xf] }
  0x1a   : > { %204 = vst [vmem:[%s171_s7 + $0x14] sm:$0xf] %v203_v5  ;;  %v207_v7 = vld [vmem:[%s1455_s6 + $0x2f4] sm:$0xf]  ;;  %v209_v8 = vld [vmem:[%s1455_s6 + $0x360] sm:$0xf] }
  0x1b   : > { %206 = vst [vmem:[%s171_s7 + $0x18] sm:$0xf] %v205_v6  ;;  %208 = vst [vmem:[%s171_s7 + $0x1c] sm:$0xf] %v207_v7  ;;  %v211_v9 = vld [vmem:[%s1455_s6 + $0x3cc] sm:$0xf] }
  0x1c   : > { %210 = vst [vmem:[%s171_s7 + $0x20] sm:$0xf] %v209_v8  ;;  %v213_v10 = vld [vmem:[%s1455_s6 + $0x438] sm:$0xf]  ;;  %v215_v11 = vld [vmem:[%s1455_s6 + $0x4a4] sm:$0xf] }
  0x1d   : > { %212 = vst [vmem:[%s171_s7 + $0x24] sm:$0xf] %v211_v9  ;;  %214 = vst [vmem:[%s171_s7 + $0x28] sm:$0xf] %v213_v10  ;;  %v217_v12 = vld [vmem:[%s1455_s6 + $0x510] sm:$0xf] }
  0x1e   : > { %216 = vst [vmem:[%s171_s7 + $0x2c] sm:$0xf] %v215_v11  ;;  %v219_v13 = vld [vmem:[%s1455_s6 + $0x57c] sm:$0xf]  ;;  %v221_v14 = vld [vmem:[%s1455_s6 + $0x5e8] sm:$0xf] }
  0x1f   : > { %218 = vst [vmem:[%s171_s7 + $0x30] sm:$0xf] %v217_v12  ;;  %220 = vst [vmem:[%s171_s7 + $0x34] sm:$0xf] %v219_v13  ;;  %v223_v15 = vld [vmem:[%s1455_s6 + $0x654] sm:$0xf] }
  0x20   : > { %222 = vst [vmem:[%s171_s7 + $0x38] sm:$0xf] %v221_v14  ;;  %224 = vst [vmem:[%s171_s7 + $0x3c] sm:$0xf] %v223_v15 }
  0x21 PF: > { %p1140_p7 = scmp.ge.s32.totalorder %s1371_s18, 1  ;;  %p294_p8 = scmp.lt.s32.totalorder %s1371_s18, 82 }
  0x23   : > { %p295_p9 = pnand %p1140_p7, %p294_p8 }
  0x24   : > { %s301_s8 = sand.u32 (!%p295_p9), 1, %s1347_s12   ;;  %s1142_s9 = sshll.u32 (!%p295_p9), %s1355_s14, 4 }
  0x25   : > { %298 = sbr.rel (%p295_p9) target bundleno = 359 (0x167), region = 69  ;;  %s1141_s10 = sshll.u32 (!%p295_p9), %s301_s8, 6 }
  0x26   : > { %p346_p10 = scmp.lt.s32.totalorder (!%p295_p9), %s1142_s9, 431  ;;  %s1145_s11 = sshll.u32 (!%p295_p9), %s1359_s15, 4 }
  0x27   : > { %p363_p11 = scmp.lt.s32.totalorder (!%p295_p9), %s1145_s11, 47  ;;  %s1488_s12 = scalar_lea.vmem (!%p295_p9), [#allocation3], %s1141_s10 }
  0x28   : > { %p1148_p12 = scmp.ne.s32.totalorder (!%p295_p9), %s1355_s14, 0 }
  0x2a   : > { %s1617_s9 = smov (!%p346_p10, %s1142_s9), 431  ;;  %s1619_s11 = smov (!%p363_p11, %s1145_s11), 47 }
  0x2b   : > { %s1192_s21 = sshll.u32 %s1617_s9, 3  ;;  %s1193_s26 = sshll.u32 %s1619_s11, 3 }
  0x2c   : > { %s1481_s24 = scalar_lea.vmem %s1601_s1, %s1192_s21  ;;  %s1486_s29 = scalar_lea.vmem %s1603_s3, %s1193_s26 }
  0x2d   : > { %377 = sbr.rel (%p1148_p12) target bundleno = 67 (0x43), region = 77 }
  0x32   : > { %v1373_v16 = vmov 0.0  }
  0x33   : > { %378 = vst [vmem:[#allocation2 + $0xb0] sm:$0xff] %v1373_v16  ;;  %379 = vst [vmem:[#allocation2] sm:$0xff] %v1373_v16 }
  0x34   : > { %380 = vst [vmem:[#allocation2 + $0xd8] sm:$0xff] %v1373_v16  ;;  %381 = vst [vmem:[#allocation2 + $0x18] sm:$0xff] %v1373_v16 }
  0x35   : > { %382 = vst [vmem:[#allocation2 + $0x50] sm:$0xff] %v1373_v16  ;;  %383 = vst [vmem:[#allocation2 + $0x68] sm:$0xff] %v1373_v16 }
  0x36   : > { %384 = vst [vmem:[#allocation2 + $0x30] sm:$0xff] %v1373_v16  ;;  %385 = vst [vmem:[#allocation2 + $0x48] sm:$0xff] %v1373_v16 }
  0x37   : > { %386 = vst [vmem:[#allocation2 + $0x80] sm:$0xff] %v1373_v16  ;;  %387 = vst [vmem:[#allocation2 + $0x88] sm:$0xff] %v1373_v16 }
  0x38   : > { %388 = vst [vmem:[#allocation2 + $0xe8] sm:$0xff] %v1373_v16  ;;  %389 = vst [vmem:[#allocation2 + $0xb8] sm:$0xff] %v1373_v16 }
  0x39   : > { %390 = vst [vmem:[#allocation2 + $0x60] sm:$0xff] %v1373_v16  ;;  %391 = vst [vmem:[#allocation2 + $0xf0] sm:$0xff] %v1373_v16 }
  0x3a   : > { %392 = vst [vmem:[#allocation2 + $0x8] sm:$0xff] %v1373_v16  ;;  %393 = vst [vmem:[#allocation2 + $0x78] sm:$0xff] %v1373_v16 }
  0x3b   : > { %394 = vst [vmem:[#allocation2 + $0x38] sm:$0xff] %v1373_v16  ;;  %395 = vst [vmem:[#allocation2 + $0x58] sm:$0xff] %v1373_v16 }
  0x3c   : > { %396 = vst [vmem:[#allocation2 + $0x40] sm:$0xff] %v1373_v16  ;;  %397 = vst [vmem:[#allocation2 + $0xc8] sm:$0xff] %v1373_v16 }
  0x3d   : > { %398 = vst [vmem:[#allocation2 + $0xe0] sm:$0xff] %v1373_v16  ;;  %399 = vst [vmem:[#allocation2 + $0x90] sm:$0xff] %v1373_v16 }
  0x3e   : > { %400 = vst [vmem:[#allocation2 + $0x70] sm:$0xff] %v1373_v16  ;;  %401 = vst [vmem:[#allocation2 + $0xc0] sm:$0xff] %v1373_v16 }
  0x3f   : > { %402 = vst [vmem:[#allocation2 + $0xa8] sm:$0xff] %v1373_v16  ;;  %403 = vst [vmem:[#allocation2 + $0xd0] sm:$0xff] %v1373_v16 }
  0x40   : > { %404 = vst [vmem:[#allocation2 + $0x10] sm:$0xff] %v1373_v16  ;;  %405 = vst [vmem:[#allocation2 + $0x28] sm:$0xff] %v1373_v16 }
  0x41   : > { %406 = vst [vmem:[#allocation2 + $0xa0] sm:$0xff] %v1373_v16  ;;  %407 = vst [vmem:[#allocation2 + $0xf8] sm:$0xff] %v1373_v16 }
  0x42   : > { %408 = vst [vmem:[#allocation2 + $0x20] sm:$0xff] %v1373_v16  ;;  %409 = vst [vmem:[#allocation2 + $0x98] sm:$0xff] %v1373_v16 }
  0x43 PF: > { %v1285_v17 = vld [vmem:[%s1481_s24 + $0x74] ss:$8 sps:$4 sm:$0xff]   ;;  %v1287_v18 = vld [vmem:[%s1481_s24 + $0x70] ss:$8 sps:$4 sm:$0xff]   ;;  %v1374_v19 = vmov 0   ;;  %v1309_v34 = vld [vmem:[%s1488_s12] sm:$0xff]  }
  0x44   : > { %634 = vmatprep.mubr.bf16.mxu0 %v1374_v19  ;;  %674 = vmatprep.mubr.bf16.mxu1 %v1374_v19  ;;  %v1288_v20 = vld [vmem:[%s1481_s24 + $0x64] ss:$8 sps:$4 sm:$0xff]   ;;  %v1290_v21 = vld [vmem:[%s1481_s24 + $0x60] ss:$8 sps:$4 sm:$0xff]   ;;  %v1291_v22 = vld [vmem:[%s1481_s24 + $0x54] ss:$8 sps:$4 sm:$0xff]  }
  0x45   : > { %602 = vmatprep.subr.bf16.mxu0 %v1285_v17  ;;  %1210 = vmatprep.subr.bf16.mxu1 %v1285_v17  ;;  %v1293_v23 = vld [vmem:[%s1481_s24 + $0x50] ss:$8 sps:$4 sm:$0xff]   ;;  %v1294_v24 = vld [vmem:[%s1481_s24 + $0x44] ss:$8 sps:$4 sm:$0xff]   ;;  %v1296_v25 = vld [vmem:[%s1481_s24 + $0x40] ss:$8 sps:$4 sm:$0xff]  }
  0x46   : > { %603 = vmatpush1.bf16.msra.mxu0 %v1287_v18  ;;  %1218 = vmatpush1.bf16.msra.mxu1 %v1287_v18  ;;  %v1297_v26 = vld [vmem:[%s1481_s24 + $0x34] ss:$8 sps:$4 sm:$0xff]   ;;  %v1299_v27 = vld [vmem:[%s1481_s24 + $0x30] ss:$8 sps:$4 sm:$0xff]   ;;  %v1300_v28 = vld [vmem:[%s1481_s24 + $0x24] ss:$8 sps:$4 sm:$0xff]  }
  0x47   : > { %604 = vmatprep.subr.bf16.mxu0 %v1288_v20  ;;  %1211 = vmatprep.subr.bf16.mxu1 %v1288_v20  ;;  %v1302_v29 = vld [vmem:[%s1481_s24 + $0x20] ss:$8 sps:$4 sm:$0xff]   ;;  %v1303_v30 = vld [vmem:[%s1481_s24 + $0x14] ss:$8 sps:$4 sm:$0xff]   ;;  %v1305_v31 = vld [vmem:[%s1481_s24 + $0x10] ss:$8 sps:$4 sm:$0xff]  }
  0x48   : > { %v1306_v32 = vld [vmem:[%s1481_s24 + $0x4] ss:$8 sps:$4 sm:$0xff]   ;;  %v1308_v33 = vld [vmem:[%s1481_s24] ss:$8 sps:$4 sm:$0xff]   ;;  %v1313_v38 = vld [vmem:[%s1488_s12 + $0x10] sm:$0xff]   ;;  %p1173_p13 = scmp.ne.s32.totalorder %s1355_s14, 26 }
  0x49   : > { %v1310_v35 = vld [vmem:[%s1488_s12 + $0x20] sm:$0xff]   ;;  %v1311_v36 = vld [vmem:[%s1488_s12 + $0x8] sm:$0xff]   ;;  %v1314_v39 = vld [vmem:[%s1488_s12 + $0x30] sm:$0xff]  }
  0x4a   : > { %605 = vmatpush1.bf16.msra.mxu0 %v1290_v21  ;;  %1219 = vmatpush1.bf16.msra.mxu1 %v1290_v21  ;;  %v1312_v37 = vld [vmem:[%s1488_s12 + $0x28] sm:$0xff]   ;;  %v1315_v40 = vld [vmem:[%s1488_s12 + $0x18] sm:$0xff]   ;;  %v410_v42 = vld [vmem:[#allocation2 + $0xb0] sm:$0xff] }
  0x4b   : > { %606 = vmatprep.subr.bf16.mxu0 %v1291_v22  ;;  %1212 = vmatprep.subr.bf16.mxu1 %v1291_v22  ;;  %v1316_v41 = vld [vmem:[%s1488_s12 + $0x38] sm:$0xff]   ;;  %v411_v46 = vld [vmem:[#allocation2] sm:$0xff]  ;;  %v429_v59 = vld [vmem:[#allocation2 + $0xc8] sm:$0xff] }
  0x4c   : > { %v426_v43 = vld [vmem:[#allocation2 + $0x38] sm:$0xff]  ;;  %v428_v53 = vld [vmem:[#allocation2 + $0x40] sm:$0xff]  ;;  %v414_v0 = vld [vmem:[#allocation2 + $0x50] sm:$0xff] }
  0x4d   : > { %v427_v47 = vld [vmem:[#allocation2 + $0x58] sm:$0xff]  ;;  %v430_v1 = vld [vmem:[#allocation2 + $0xe0] sm:$0xff]  ;;  %v415_v6 = vld [vmem:[#allocation2 + $0x68] sm:$0xff] }
  0x4e   : > { %607 = vmatpush1.bf16.msra.mxu0 %v1293_v23  ;;  %1220 = vmatpush1.bf16.msra.mxu1 %v1293_v23  ;;  %v412_v52 = vld [vmem:[#allocation2 + $0xd8] sm:$0xff]  ;;  %v431_v7 = vld [vmem:[#allocation2 + $0x90] sm:$0xff]  ;;  %v417_v18 = vld [vmem:[#allocation2 + $0x48] sm:$0xff] }
  0x4f   : > { %608 = vmatprep.subr.bf16.mxu0 %v1294_v24  ;;  %1213 = vmatprep.subr.bf16.mxu1 %v1294_v24  ;;  %v413_v58 = vld [vmem:[#allocation2 + $0x18] sm:$0xff]  ;;  %v416_v12 = vld [vmem:[#allocation2 + $0x30] sm:$0xff]  ;;  %v418_v24 = vld [vmem:[#allocation2 + $0x80] sm:$0xff] }
  0x50   : > { %v432_v13 = vld [vmem:[#allocation2 + $0x70] sm:$0xff] }
  0x52   : > { %609 = vmatpush1.bf16.msra.mxu0 %v1296_v25  ;;  %1221 = vmatpush1.bf16.msra.mxu1 %v1296_v25  ;;  %v434_v25 = vld [vmem:[#allocation2 + $0xa8] sm:$0xff] }
  0x53   : > { %610 = vmatprep.subr.bf16.mxu0 %v1297_v26  ;;  %1214 = vmatprep.subr.bf16.mxu1 %v1297_v26 }
  0x56   : > { %611 = vmatpush1.bf16.msra.mxu0 %v1299_v27  ;;  %1222 = vmatpush1.bf16.msra.mxu1 %v1299_v27 }
  0x57   : > { %612 = vmatprep.subr.bf16.mxu0 %v1300_v28  ;;  %1215 = vmatprep.subr.bf16.mxu1 %v1300_v28 }
  0x5a   : > { %613 = vmatpush1.bf16.msra.mxu0 %v1302_v29  ;;  %1223 = vmatpush1.bf16.msra.mxu1 %v1302_v29 }
  0x5b   : > { %614 = vmatprep.subr.bf16.mxu0 %v1303_v30  ;;  %1216 = vmatprep.subr.bf16.mxu1 %v1303_v30  ;;  %v419_v30 = vld [vmem:[#allocation2 + $0x88] sm:$0xff] }
  0x5e   : > { %615 = vmatpush1.bf16.msra.mxu0 %v1305_v31  ;;  %1224 = vmatpush1.bf16.msra.mxu1 %v1305_v31  ;;  %v435_v31 = vld [vmem:[#allocation2 + $0xd0] sm:$0xff] }
  0x5f   : > { %616 = vmatprep.subr.bf16.mxu0 %v1306_v32  ;;  %1217 = vmatprep.subr.bf16.mxu1 %v1306_v32 }
  0x62   : > { %617 = vmatpush1.bf16.msra.mxu0 %v1308_v33  ;;  %1225 = vmatpush1.bf16.msra.mxu1 %v1308_v33 }
  0x65   : > { %635 = vmatmul.mubr.bf16.vlgmr.msra.gmra.mxu0 %v1309_v34  ;;  %675 = vmatmul.mubr.bf16.vlgmr.msra.gmra.mxu1 %v1310_v35 }
  0x66   : > { %644 = vmatprep.mubr.bf16.mxu0 %v1374_v19  ;;  %684 = vmatprep.mubr.bf16.mxu1 %v1374_v19 }
  0x6d   : > { %645 = vmatmul.mubr.bf16.gmra.mxu0 %v1311_v36  ;;  %685 = vmatmul.mubr.bf16.gmra.mxu1 %v1312_v37  ;;  %v420_v36 = vld [vmem:[#allocation2 + $0xe8] sm:$0xff]  ;;  %v436_v37 = vld [vmem:[#allocation2 + $0x10] sm:$0xff] }
  0x6e   : > { %654 = vmatprep.mubr.bf16.mxu0 %v1374_v19  ;;  %694 = vmatprep.mubr.bf16.mxu1 %v1374_v19 }
  0x75   : > { %655 = vmatmul.mubr.bf16.gmra.mxu0 %v1313_v38  ;;  %695 = vmatmul.mubr.bf16.gmra.mxu1 %v1314_v39 }
  0x76   : > { %664 = vmatprep.mubr.bf16.mxu0 %v1374_v19  ;;  %704 = vmatprep.mubr.bf16.mxu1 %v1374_v19  ;;  %v433_v19 = vld [vmem:[#allocation2 + $0xc0] sm:$0xff] }
  0x7d   : > { %665 = vmatmul.mubr.bf16.gmra.mxu0 %v1315_v40  ;;  %705 = vmatmul.mubr.bf16.gmra.mxu1 %v1316_v41 }
 0x125   : > { %v636_v44 = vpop.f32.mrf.mxu0  ;;  %v676_v45 = vpop.f32.mrf.mxu1 }
 0x126   : > { %v715_v48 = vadd.f32 %v636_v44, %v410_v42  ;;  %v731_v49 = vadd.f32 %v676_v45, %v426_v43  ;;  %v421_v42 = vld [vmem:[#allocation2 + $0xb8] sm:$0xff]  ;;  %v437_v43 = vld [vmem:[#allocation2 + $0x28] sm:$0xff] }
 0x127   : > { %v638_v50 = vpop.f32.mrf.mxu0  ;;  %v678_v51 = vpop.f32.mrf.mxu1 }
 0x128   : > { %747 = vst [vmem:[#allocation2 + $0xb0] sm:$0xff] %v715_v48  ;;  %763 = vst [vmem:[#allocation2 + $0x38] sm:$0xff] %v731_v49  ;;  %v716_v54 = vadd.f32 %v638_v50, %v411_v46  ;;  %v732_v55 = vadd.f32 %v678_v51, %v427_v47  ;;  %v422_v48 = vld [vmem:[#allocation2 + $0x60] sm:$0xff] }
 0x129   : > { %v640_v56 = vpop.f32.mrf.mxu0  ;;  %v680_v57 = vpop.f32.mrf.mxu1  ;;  %v438_v49 = vld [vmem:[#allocation2 + $0xa0] sm:$0xff] }
 0x12a   : > { %748 = vst [vmem:[#allocation2] sm:$0xff] %v716_v54  ;;  %764 = vst [vmem:[#allocation2 + $0x58] sm:$0xff] %v732_v55  ;;  %v717_v60 = vadd.f32 %v640_v56, %v412_v52  ;;  %v733_v61 = vadd.f32 %v680_v57, %v428_v53  ;;  %v423_v54 = vld [vmem:[#allocation2 + $0xf0] sm:$0xff]  ;;  %v439_v55 = vld [vmem:[#allocation2 + $0xf8] sm:$0xff] }
 0x12b   : > { %v642_v62 = vpop.f32.mrf.mxu0  ;;  %v682_v63 = vpop.f32.mrf.mxu1 }
 0x12c   : > { %749 = vst [vmem:[#allocation2 + $0xd8] sm:$0xff] %v717_v60  ;;  %765 = vst [vmem:[#allocation2 + $0x40] sm:$0xff] %v733_v61  ;;  %v718_v2 = vadd.f32 %v642_v62, %v413_v58  ;;  %v734_v3 = vadd.f32 %v682_v63, %v429_v59  ;;  %v424_v60 = vld [vmem:[#allocation2 + $0x8] sm:$0xff]  ;;  %v440_v61 = vld [vmem:[#allocation2 + $0x20] sm:$0xff] }
 0x12d   : > { %v646_v4 = vpop.f32.mrf.mxu0  ;;  %v686_v5 = vpop.f32.mrf.mxu1 }
 0x12e   : > { %750 = vst [vmem:[#allocation2 + $0x18] sm:$0xff] %v718_v2  ;;  %766 = vst [vmem:[#allocation2 + $0xc8] sm:$0xff] %v734_v3  ;;  %v719_v8 = vadd.f32 %v646_v4, %v414_v0  ;;  %v735_v9 = vadd.f32 %v686_v5, %v430_v1  ;;  %v425_v2 = vld [vmem:[#allocation2 + $0x78] sm:$0xff] }
 0x12f   : > { %v648_v10 = vpop.f32.mrf.mxu0  ;;  %v688_v11 = vpop.f32.mrf.mxu1  ;;  %v441_v3 = vld [vmem:[#allocation2 + $0x98] sm:$0xff] }
 0x130   : > { %751 = vst [vmem:[#allocation2 + $0x50] sm:$0xff] %v719_v8  ;;  %767 = vst [vmem:[#allocation2 + $0xe0] sm:$0xff] %v735_v9  ;;  %v720_v14 = vadd.f32 %v648_v10, %v415_v6  ;;  %v736_v15 = vadd.f32 %v688_v11, %v431_v7 }
 0x131   : > { %v650_v16 = vpop.f32.mrf.mxu0  ;;  %v690_v17 = vpop.f32.mrf.mxu1 }
 0x132   : > { %752 = vst [vmem:[#allocation2 + $0x68] sm:$0xff] %v720_v14  ;;  %768 = vst [vmem:[#allocation2 + $0x90] sm:$0xff] %v736_v15  ;;  %v721_v20 = vadd.f32 %v650_v16, %v416_v12  ;;  %v737_v21 = vadd.f32 %v690_v17, %v432_v13 }
 0x133   : > { %v652_v22 = vpop.f32.mrf.mxu0  ;;  %v692_v23 = vpop.f32.mrf.mxu1 }
 0x134   : > { %753 = vst [vmem:[#allocation2 + $0x30] sm:$0xff] %v721_v20  ;;  %769 = vst [vmem:[#allocation2 + $0x70] sm:$0xff] %v737_v21  ;;  %v722_v26 = vadd.f32 %v652_v22, %v417_v18  ;;  %v738_v27 = vadd.f32 %v692_v23, %v433_v19 }
 0x135   : > { %v656_v28 = vpop.f32.mrf.mxu0  ;;  %v696_v29 = vpop.f32.mrf.mxu1 }
 0x136   : > { %754 = vst [vmem:[#allocation2 + $0x48] sm:$0xff] %v722_v26  ;;  %770 = vst [vmem:[#allocation2 + $0xc0] sm:$0xff] %v738_v27  ;;  %v723_v32 = vadd.f32 %v656_v28, %v418_v24  ;;  %v739_v33 = vadd.f32 %v696_v29, %v434_v25 }
 0x137   : > { %v658_v34 = vpop.f32.mrf.mxu0  ;;  %v698_v35 = vpop.f32.mrf.mxu1 }
 0x138   : > { %755 = vst [vmem:[#allocation2 + $0x80] sm:$0xff] %v723_v32  ;;  %771 = vst [vmem:[#allocation2 + $0xa8] sm:$0xff] %v739_v33  ;;  %v724_v38 = vadd.f32 %v658_v34, %v419_v30  ;;  %v740_v39 = vadd.f32 %v698_v35, %v435_v31 }
 0x139   : > { %v660_v40 = vpop.f32.mrf.mxu0  ;;  %v700_v41 = vpop.f32.mrf.mxu1 }
 0x13a   : > { %756 = vst [vmem:[#allocation2 + $0x88] sm:$0xff] %v724_v38  ;;  %772 = vst [vmem:[#allocation2 + $0xd0] sm:$0xff] %v740_v39  ;;  %v725_v44 = vadd.f32 %v660_v40, %v420_v36  ;;  %v741_v45 = vadd.f32 %v700_v41, %v436_v37 }
 0x13b   : > { %v662_v46 = vpop.f32.mrf.mxu0  ;;  %v702_v47 = vpop.f32.mrf.mxu1 }
 0x13c   : > { %757 = vst [vmem:[#allocation2 + $0xe8] sm:$0xff] %v725_v44  ;;  %773 = vst [vmem:[#allocation2 + $0x10] sm:$0xff] %v741_v45  ;;  %v726_v50 = vadd.f32 %v662_v46, %v421_v42  ;;  %v742_v51 = vadd.f32 %v702_v47, %v437_v43 }
 0x13d   : > { %v666_v52 = vpop.f32.mrf.mxu0  ;;  %v706_v53 = vpop.f32.mrf.mxu1 }
 0x13e   : > { %758 = vst [vmem:[#allocation2 + $0xb8] sm:$0xff] %v726_v50  ;;  %774 = vst [vmem:[#allocation2 + $0x28] sm:$0xff] %v742_v51  ;;  %v727_v56 = vadd.f32 %v666_v52, %v422_v48  ;;  %v743_v57 = vadd.f32 %v706_v53, %v438_v49 }
 0x13f   : > { %v668_v58 = vpop.f32.mrf.mxu0  ;;  %v708_v59 = vpop.f32.mrf.mxu1 }
 0x140   : > { %759 = vst [vmem:[#allocation2 + $0x60] sm:$0xff] %v727_v56  ;;  %775 = vst [vmem:[#allocation2 + $0xa0] sm:$0xff] %v743_v57  ;;  %v728_v62 = vadd.f32 %v668_v58, %v423_v54  ;;  %v744_v63 = vadd.f32 %v708_v59, %v439_v55 }
 0x141   : > { %v670_v0 = vpop.f32.mrf.mxu0  ;;  %v710_v1 = vpop.f32.mrf.mxu1 }
 0x142   : > { %760 = vst [vmem:[#allocation2 + $0xf0] sm:$0xff] %v728_v62  ;;  %776 = vst [vmem:[#allocation2 + $0xf8] sm:$0xff] %v744_v63  ;;  %v729_v4 = vadd.f32 %v670_v0, %v424_v60  ;;  %v745_v5 = vadd.f32 %v710_v1, %v440_v61  ;;  %782 = sbr.rel (%p1173_p13) target bundleno = 359 (0x167), region = 81 }
 0x143   : > { %v672_v6 = vpop.f32.mrf.mxu0  ;;  %v712_v7 = vpop.f32.mrf.mxu1 }
 0x144   : > { %761 = vst [vmem:[#allocation2 + $0x8] sm:$0xff] %v729_v4  ;;  %777 = vst [vmem:[#allocation2 + $0x20] sm:$0xff] %v745_v5  ;;  %v730_v8 = vadd.f32 %v672_v6, %v425_v2  ;;  %v746_v9 = vadd.f32 %v712_v7, %v441_v3 }
 0x146   : > { %762 = vst [vmem:[#allocation2 + $0x78] sm:$0xff] %v730_v8  ;;  %778 = vst [vmem:[#allocation2 + $0x98] sm:$0xff] %v746_v9 }
 0x147   : > { %v817_v10 = vlaneseq  ;;  %v815_v12 = vld [vmem:[%s1602_s2] sm:$0x3]  ;;  %v783_v13 = vld [vmem:[#allocation2 + $0xb0] sm:$0xff]  ;;  %v785_v17 = vld [vmem:[#allocation2 + $0xd8] sm:$0xff] }
 0x148   : > { %v784_v14 = vld [vmem:[#allocation2] sm:$0xff]  ;;  %v786_v18 = vld [vmem:[#allocation2 + $0x18] sm:$0xff]  ;;  %v787_v19 = vld [vmem:[#allocation2 + $0x50] sm:$0xff] }
 0x149   : > { %v818_v11 = vshrl.u32 %v817_v10, 7  ;;  %v788_v22 = vld [vmem:[#allocation2 + $0x68] sm:$0xff]  ;;  %v789_v23 = vld [vmem:[#allocation2 + $0x30] sm:$0xff]  ;;  %v791_v33 = vld [vmem:[#allocation2 + $0x80] sm:$0xff] }
 0x14a   : > { %v790_v24 = vld [vmem:[#allocation2 + $0x48] sm:$0xff]  ;;  %v794_v40 = vld [vmem:[#allocation2 + $0xb8] sm:$0xff]  ;;  %v795_v45 = vld [vmem:[#allocation2 + $0x60] sm:$0xff] }
 0x14b   : > { %v819_v15 = vsub.s32 0, %v818_v11  ;;  %v823_v16 = vsub.s32 1, %v818_v11  ;;  %v792_v34 = vld [vmem:[#allocation2 + $0x88] sm:$0xff]  ;;  %v796_v46 = vld [vmem:[#allocation2 + $0xf0] sm:$0xff]  ;;  %v799_v57 = vld [vmem:[#allocation2 + $0x38] sm:$0xff] }
 0x14c   : > { %v793_v39 = vld [vmem:[#allocation2 + $0xe8] sm:$0xff]  ;;  %v800_v62 = vld [vmem:[#allocation2 + $0x58] sm:$0xff]  ;;  %v801_v3 = vld [vmem:[#allocation2 + $0x40] sm:$0xff] }
 0x14d   : > { %v1527_v20 = vrot.slane %v815_v12, %v819_v15  ;;  %v1529_v21 = vrot.slane %v815_v12, %v823_v16  ;;  %v797_v51 = vld [vmem:[#allocation2 + $0x8] sm:$0xff]  ;;  %v798_v52 = vld [vmem:[#allocation2 + $0x78] sm:$0xff]  ;;  %v803_v9 = vld [vmem:[#allocation2 + $0xe0] sm:$0xff] }
 0x14e   : > { %v802_v4 = vld [vmem:[#allocation2 + $0xc8] sm:$0xff]  ;;  %v804_v10 = vld [vmem:[#allocation2 + $0x90] sm:$0xff]  ;;  %v806_v16 = vld [vmem:[#allocation2 + $0xc0] sm:$0xff] }
 0x14f   : > { %v827_v25 = vadd.f32 %v1527_v20, %v783_v13  ;;  %v828_v26 = vadd.f32 %v1529_v21, %v784_v14  ;;  %v829_v27 = vadd.f32 %v1527_v20, %v785_v17  ;;  %v830_v28 = vadd.f32 %v1529_v21, %v786_v18  ;;  %v805_v15 = vld [vmem:[#allocation2 + $0x70] sm:$0xff] }
 0x150   : > { %v831_v29 = vadd.f32 %v1527_v20, %v787_v19  ;;  %v832_v30 = vadd.f32 %v1529_v21, %v788_v22  ;;  %v833_v31 = vadd.f32 %v1527_v20, %v789_v23  ;;  %v834_v32 = vadd.f32 %v1529_v21, %v790_v24  ;;  %v807_v23 = vld [vmem:[#allocation2 + $0xa8] sm:$0xff] }
 0x151   : > { %v859_v35 = vmax.f32 %v827_v25, 0.0  ;;  %v860_v36 = vmax.f32 %v828_v26, 0.0  ;;  %v861_v37 = vmax.f32 %v829_v27, 0.0  ;;  %v862_v38 = vmax.f32 %v830_v28, 0.0  ;;  %v808_v28 = vld [vmem:[#allocation2 + $0xd0] sm:$0xff] }
 0x152   : > { %v863_v41 = vmax.f32 %v831_v29, 0.0  ;;  %v864_v42 = vmax.f32 %v832_v30, 0.0  ;;  %v865_v43 = vmax.f32 %v833_v31, 0.0  ;;  %v866_v44 = vmax.f32 %v834_v32, 0.0 }
 0x153   : > { %v1194_v47 = vpack.c.bf16 %v860_v36, %v859_v35  ;;  %v1195_v48 = vpack.c.bf16 %v862_v38, %v861_v37  ;;  %v835_v49 = vadd.f32 %v1527_v20, %v791_v33  ;;  %v836_v50 = vadd.f32 %v1529_v21, %v792_v34  ;;  %v809_v33 = vld [vmem:[#allocation2 + $0x10] sm:$0xff]  ;;  %v810_v34 = vld [vmem:[#allocation2 + $0x28] sm:$0xff] }
 0x154   : > { %v1196_v53 = vpack.c.bf16 %v864_v42, %v863_v41  ;;  %v1197_v54 = vpack.c.bf16 %v866_v44, %v865_v43  ;;  %v837_v55 = vadd.f32 %v1527_v20, %v793_v39  ;;  %v838_v56 = vadd.f32 %v1529_v21, %v794_v40  ;;  %v811_v39 = vld [vmem:[#allocation2 + $0xa0] sm:$0xff]  ;;  %v812_v40 = vld [vmem:[#allocation2 + $0xf8] sm:$0xff] }
 0x155   : > { %987 = vst [vmem:[%s1486_s29] sm:$0xff] %v1194_v47  ;;  %988 = vst [vmem:[%s1486_s29 + $0x8] sm:$0xff] %v1195_v48  ;;  %v867_v58 = vmax.f32 %v835_v49, 0.0  ;;  %v868_v59 = vmax.f32 %v836_v50, 0.0  ;;  %v839_v60 = vadd.f32 %v1527_v20, %v795_v45  ;;  %v840_v61 = vadd.f32 %v1529_v21, %v796_v46  ;;  %v813_v45 = vld [vmem:[#allocation2 + $0x20] sm:$0xff]  ;;  %v814_v46 = vld [vmem:[#allocation2 + $0x98] sm:$0xff] }
 0x156   : > { %989 = vst [vmem:[%s1486_s29 + $0x10] sm:$0xff] %v1196_v53  ;;  %990 = vst [vmem:[%s1486_s29 + $0x18] sm:$0xff] %v1197_v54  ;;  %v869_v63 = vmax.f32 %v837_v55, 0.0  ;;  %v870_v0 = vmax.f32 %v838_v56, 0.0  ;;  %v841_v1 = vadd.f32 %v1527_v20, %v797_v51  ;;  %v842_v2 = vadd.f32 %v1529_v21, %v798_v52 }
 0x157   : > { %v1198_v5 = vpack.c.bf16 %v868_v59, %v867_v58  ;;  %v871_v6 = vmax.f32 %v839_v60, 0.0  ;;  %v872_v7 = vmax.f32 %v840_v61, 0.0  ;;  %v843_v8 = vadd.f32 %v1527_v20, %v799_v57 }
 0x158   : > { %v1199_v11 = vpack.c.bf16 %v870_v0, %v869_v63  ;;  %v873_v12 = vmax.f32 %v841_v1, 0.0  ;;  %v874_v13 = vmax.f32 %v842_v2, 0.0  ;;  %v844_v14 = vadd.f32 %v1529_v21, %v800_v62 }
 0x159   : > { %991 = vst [vmem:[%s1486_s29 + $0x20] sm:$0xff] %v1198_v5  ;;  %v1200_v17 = vpack.c.bf16 %v872_v7, %v871_v6  ;;  %v875_v18 = vmax.f32 %v843_v8, 0.0  ;;  %v845_v19 = vadd.f32 %v1527_v20, %v801_v3  ;;  %v846_v22 = vadd.f32 %v1529_v21, %v802_v4 }
 0x15a   : > { %992 = vst [vmem:[%s1486_s29 + $0x28] sm:$0xff] %v1199_v11  ;;  %v1201_v24 = vpack.c.bf16 %v874_v13, %v873_v12  ;;  %v876_v25 = vmax.f32 %v844_v14, 0.0  ;;  %v847_v26 = vadd.f32 %v1527_v20, %v803_v9  ;;  %v848_v27 = vadd.f32 %v1529_v21, %v804_v10 }
 0x15b   : > { %993 = vst [vmem:[%s1486_s29 + $0x30] sm:$0xff] %v1200_v17  ;;  %v877_v29 = vmax.f32 %v845_v19, 0.0  ;;  %v878_v30 = vmax.f32 %v846_v22, 0.0  ;;  %v849_v31 = vadd.f32 %v1527_v20, %v805_v15  ;;  %v850_v32 = vadd.f32 %v1529_v21, %v806_v16 }
 0x15c   : > { %994 = vst [vmem:[%s1486_s29 + $0x38] sm:$0xff] %v1201_v24  ;;  %v1202_v35 = vpack.c.bf16 %v876_v25, %v875_v18  ;;  %v879_v36 = vmax.f32 %v847_v26, 0.0  ;;  %v880_v37 = vmax.f32 %v848_v27, 0.0  ;;  %v851_v38 = vadd.f32 %v1527_v20, %v807_v23 }
 0x15d   : > { %v1203_v41 = vpack.c.bf16 %v878_v30, %v877_v29  ;;  %v881_v42 = vmax.f32 %v849_v31, 0.0  ;;  %v882_v43 = vmax.f32 %v850_v32, 0.0  ;;  %v852_v44 = vadd.f32 %v1529_v21, %v808_v28 }
 0x15e   : > { %995 = vst [vmem:[%s1486_s29 + $0x40] sm:$0xff] %v1202_v35  ;;  %v1204_v47 = vpack.c.bf16 %v880_v37, %v879_v36  ;;  %v883_v48 = vmax.f32 %v851_v38, 0.0  ;;  %v853_v49 = vadd.f32 %v1527_v20, %v809_v33  ;;  %v854_v50 = vadd.f32 %v1529_v21, %v810_v34 }
 0x15f   : > { %996 = vst [vmem:[%s1486_s29 + $0x48] sm:$0xff] %v1203_v41  ;;  %v1205_v51 = vpack.c.bf16 %v882_v43, %v881_v42  ;;  %v884_v52 = vmax.f32 %v852_v44, 0.0  ;;  %v855_v53 = vadd.f32 %v1527_v20, %v811_v39  ;;  %v856_v54 = vadd.f32 %v1529_v21, %v812_v40 }
 0x160   : > { %997 = vst [vmem:[%s1486_s29 + $0x50] sm:$0xff] %v1204_v47  ;;  %v885_v55 = vmax.f32 %v853_v49, 0.0  ;;  %v886_v56 = vmax.f32 %v854_v50, 0.0  ;;  %v857_v57 = vadd.f32 %v1527_v20, %v813_v45  ;;  %v858_v58 = vadd.f32 %v1529_v21, %v814_v46 }
 0x161   : > { %998 = vst [vmem:[%s1486_s29 + $0x58] sm:$0xff] %v1205_v51  ;;  %v1206_v59 = vpack.c.bf16 %v884_v52, %v883_v48  ;;  %v887_v60 = vmax.f32 %v855_v53, 0.0  ;;  %v888_v61 = vmax.f32 %v856_v54, 0.0 }
 0x162   : > { %v1207_v62 = vpack.c.bf16 %v886_v56, %v885_v55  ;;  %v889_v63 = vmax.f32 %v857_v57, 0.0  ;;  %v890_v0 = vmax.f32 %v858_v58, 0.0 }
 0x163   : > { %999 = vst [vmem:[%s1486_s29 + $0x60] sm:$0xff] %v1206_v59  ;;  %v1208_v1 = vpack.c.bf16 %v888_v61, %v887_v60 }
 0x164   : > { %1000 = vst [vmem:[%s1486_s29 + $0x68] sm:$0xff] %v1207_v62  ;;  %v1209_v2 = vpack.c.bf16 %v890_v0, %v889_v63 }
 0x165   : > { %1001 = vst [vmem:[%s1486_s29 + $0x70] sm:$0xff] %v1208_v1 }
 0x166   : > { %1002 = vst [vmem:[%s1486_s29 + $0x78] sm:$0xff] %v1209_v2 }
 0x167 PF: > { %s13_s18 = sadd.s32 1, %s1371_s18   ;;  %s1604_s12 = smov %s1351_s13 }
 0x168   : > { %p10_p0 = scmp.ge.s32.totalorder %s13_s18, 83   ;;  %s1605_s13 = smov %s1446_s25 }
 0x169   : > { %s1606_s14 = smov %s1363_s16  ;;  %s1607_s15 = smov %s1367_s17 }
 0x16a   : > { %s1608_s16 = smov %s1611_s19  ;;  %s1609_s17 = smov %s1615_s20 }
 0x16b   :  { %12 = sbr.rel (!%p10_p0) target bundleno = 4 (0x4), region = 122 }

// kernel: alexnet_forward.22
= control target key start
LH: loop header
LB: loop body
LE: loop exit
PB: predicated region body
PF: predicated region fallthrough
CT: control target
= control target key end

     0   :  { %s1596_s12 = smov 0   ;;  %s1598_s13 = smov 0   ;;  %s1817_s0 = inlined_call_operand.vmem [shape: bf16[384,2304], index: 0, kind: input, shape index: {}]   ;;  %s1818_s1 = inlined_call_operand.vmem [shape: bf16[2304,256], index: 1, kind: input, shape index: {}]   ;;  %s1819_s2 = inlined_call_operand.vmem [shape: f32[1,256], index: 2, kind: input, shape index: {}]   ;;  %s1820_s3 = inlined_call_operand.vmem [shape: bf16[384,256], index: 3, kind: output, shape index: {}]  }
   0x1   :  { %s1600_s14 = smov 0   ;;  %s1602_s15 = smov 0  }
   0x2   :  { %s1604_s16 = smov 0   ;;  %s1606_s17 = smov 0  }
   0x3   :  { %s1608_s18 = smov 0  }
   0x4 LB: > { %s25_s19 = sadd.s32 1, %s1565_s16  ;;  %s32_s20 = sadd.s32 1, %s1569_s17  ;;  %s1573_s18 = sphi %s1608_s18, %s13_s18   ;;  %s1569_s17 = sphi %s1606_s17, %s1826_s17   ;;  %s1565_s16 = sphi %s1604_s16, %s1825_s16   ;;  %s1561_s15 = sphi %s1602_s15, %s1824_s15   ;;  %s1557_s14 = sphi %s1600_s14, %s1823_s14   ;;  %s1553_s13 = sphi %s1598_s13, %s1822_s13   ;;  %s1549_s12 = sphi %s1596_s12, %s1821_s12  }
   0x5   : > { %p26_p0 = scmp.ge.s32.totalorder %s25_s19, 9  ;;  %p48_p1 = scmp.ne.s32.totalorder %s1553_s13, %s1549_s12 }
   0x6   : > { %p49_p2 = scmp.eq.s32.totalorder %s1573_s18, 0  ;;  %s41_s24 = sadd.s32 1, %s1553_s13 }
   0x7   : > { %s1828_s19 = smov (%p26_p0, %s25_s19), 0  ;;  %s1830_s20 = smov (!%p26_p0, %s32_s20), %s1569_s17 }
   0x8   : > { %p50_p3 = por %p49_p2, %p48_p1  ;;  %p34_p4 = scmp.ge.s32.totalorder %s1830_s20, 3 }
   0x9   : > { %s37_s21 = ssub.s32 %s1565_s16, %s1828_s19  ;;  %p1257_p6 = scmp.ge.s32.totalorder %s1573_s18, 27 }
   0xa   : > { %s1832_s20 = smov (%p34_p4, %s1830_s20), 0 }
   0xb   : > { %s36_s22 = ssub.s32 %s1569_s17, %s1832_s20  ;;  %164 = sbr.rel (%p1257_p6) target bundleno = 32 (0x20), region = 20 }
   0xc   : > { %s38_s23 = sor.u32 %s37_s21, %s36_s22 }
   0xd   : > { %p39_p5 = scmp.eq.s32.totalorder %s38_s23, 0 }
   0xf   : > { %s1647_s25 = scalar_select %p39_p5, %s1553_s13, %s41_s24  }
  0x10   : > { %167 = sbr.rel (!%p50_p3) target bundleno = 32 (0x20), region = 24  ;;  %s169_s26 = sand.u32 (%p50_p3), 1, %s1553_s13  }
  0x11   : > { %s1260_s27 = sshll.u32 (%p50_p3), %s1565_s16, 1  ;;  %s1258_s28 = sshll.u32 (%p50_p3), %s169_s26, 7 }
  0x12   : > { %s1389_s29 = smul.u32 (%p50_p3), 288, %s1569_s17  ;;  %s171_s8 = scalar_lea.vmem (%p50_p3), [#allocation3], %s1258_s28 }
  0x14   : > { %s175_s30 = sadd.s32 (%p50_p3), %s1389_s29, %s1260_s27 }
  0x15   : > { %s1262_s4 = sshll.u32 %s175_s30, 2 }
  0x16   : > { %s1656_s7 = scalar_lea.vmem %s1817_s0, %s1262_s4 }
  0x17   : > { %v236_v0 = vld [vmem:[%s1656_s7] sm:$0xff]  ;;  %v238_v1 = vld [vmem:[%s1656_s7 + $0x48] sm:$0xff]  ;;  %v240_v2 = vld [vmem:[%s1656_s7 + $0x90] sm:$0xff] }
  0x18   : > { %237 = vst [vmem:[%s171_s8] sm:$0xff] %v236_v0  ;;  %239 = vst [vmem:[%s171_s8 + $0x8] sm:$0xff] %v238_v1  ;;  %v242_v3 = vld [vmem:[%s1656_s7 + $0xd8] sm:$0xff]  ;;  %v244_v4 = vld [vmem:[%s1656_s7 + $0x120] sm:$0xff] }
  0x19   : > { %241 = vst [vmem:[%s171_s8 + $0x10] sm:$0xff] %v240_v2  ;;  %v246_v5 = vld [vmem:[%s1656_s7 + $0x168] sm:$0xff]  ;;  %243 = vst [vmem:[%s171_s8 + $0x18] sm:$0xff] %v242_v3  ;;  %v248_v6 = vld [vmem:[%s1656_s7 + $0x1b0] sm:$0xff] }
  0x1a   : > { %245 = vst [vmem:[%s171_s8 + $0x20] sm:$0xff] %v244_v4  ;;  %247 = vst [vmem:[%s171_s8 + $0x28] sm:$0xff] %v246_v5  ;;  %v250_v7 = vld [vmem:[%s1656_s7 + $0x1f8] sm:$0xff]  ;;  %v252_v8 = vld [vmem:[%s1656_s7 + $0x240] sm:$0xff] }
  0x1b   : > { %249 = vst [vmem:[%s171_s8 + $0x30] sm:$0xff] %v248_v6  ;;  %251 = vst [vmem:[%s171_s8 + $0x38] sm:$0xff] %v250_v7  ;;  %v254_v9 = vld [vmem:[%s1656_s7 + $0x288] sm:$0xff]  ;;  %v256_v10 = vld [vmem:[%s1656_s7 + $0x2d0] sm:$0xff] }
  0x1c   : > { %253 = vst [vmem:[%s171_s8 + $0x40] sm:$0xff] %v252_v8  ;;  %v258_v11 = vld [vmem:[%s1656_s7 + $0x318] sm:$0xff]  ;;  %255 = vst [vmem:[%s171_s8 + $0x48] sm:$0xff] %v254_v9  ;;  %v260_v12 = vld [vmem:[%s1656_s7 + $0x360] sm:$0xff] }
  0x1d   : > { %257 = vst [vmem:[%s171_s8 + $0x50] sm:$0xff] %v256_v10  ;;  %259 = vst [vmem:[%s171_s8 + $0x58] sm:$0xff] %v258_v11  ;;  %v262_v13 = vld [vmem:[%s1656_s7 + $0x3a8] sm:$0xff]  ;;  %v264_v14 = vld [vmem:[%s1656_s7 + $0x3f0] sm:$0xff] }
  0x1e   : > { %261 = vst [vmem:[%s171_s8 + $0x60] sm:$0xff] %v260_v12  ;;  %263 = vst [vmem:[%s171_s8 + $0x68] sm:$0xff] %v262_v13  ;;  %v266_v15 = vld [vmem:[%s1656_s7 + $0x438] sm:$0xff] }
  0x1f   : > { %265 = vst [vmem:[%s171_s8 + $0x70] sm:$0xff] %v264_v14  ;;  %267 = vst [vmem:[%s171_s8 + $0x78] sm:$0xff] %v266_v15 }
  0x20 PF: > { %p1263_p7 = scmp.ge.s32.totalorder %s1573_s18, 1  ;;  %p287_p8 = scmp.lt.s32.totalorder %s1573_s18, 28 }
  0x22   : > { %p288_p9 = pnand %p1263_p7, %p287_p8 }
  0x23   : > { %s294_s9 = sand.u32 (!%p288_p9), 1, %s1549_s12   ;;  %s1265_s10 = sshll.u32 (!%p288_p9), %s1557_s14, 5 }
  0x24   : > { %291 = sbr.rel (%p288_p9) target bundleno = 389 (0x185), region = 66  ;;  %s1264_s11 = sshll.u32 (!%p288_p9), %s294_s9, 7 }
  0x25   : > { %p340_p10 = scmp.lt.s32.totalorder (!%p288_p9), %s1265_s10, 287  ;;  %s1268_s21 = sshll.u32 (!%p288_p9), %s1561_s15, 4 }
  0x26   : > { %p357_p11 = scmp.lt.s32.totalorder (!%p288_p9), %s1268_s21, 47  ;;  %s1689_s12 = scalar_lea.vmem (!%p288_p9), [#allocation3], %s1264_s11 }
  0x27   : > { %p1271_p12 = scmp.ne.s32.totalorder (!%p288_p9), %s1557_s14, 0 }
  0x29   : > { %s1834_s10 = smov (!%p340_p10, %s1265_s10), 287  ;;  %s1836_s21 = smov (!%p357_p11, %s1268_s21), 47 }
  0x2a   : > { %s1339_s22 = sshll.u32 %s1834_s10, 3  ;;  %s1340_s27 = sshll.u32 %s1836_s21, 3 }
  0x2b   : > { %s1682_s26 = scalar_lea.vmem %s1818_s1, %s1339_s22  ;;  %s1687_s30 = scalar_lea.vmem %s1820_s3, %s1340_s27 }
  0x2c   : > { %370 = sbr.rel (%p1271_p12) target bundleno = 66 (0x42), region = 74 }
  0x31   : > { %v1575_v16 = vmov 0.0  }
  0x32   : > { %371 = vst [vmem:[#allocation2 + $0xb0] sm:$0xff] %v1575_v16  ;;  %372 = vst [vmem:[#allocation2] sm:$0xff] %v1575_v16 }
  0x33   : > { %373 = vst [vmem:[#allocation2 + $0xd8] sm:$0xff] %v1575_v16  ;;  %374 = vst [vmem:[#allocation2 + $0x18] sm:$0xff] %v1575_v16 }
  0x34   : > { %375 = vst [vmem:[#allocation2 + $0x50] sm:$0xff] %v1575_v16  ;;  %376 = vst [vmem:[#allocation2 + $0x68] sm:$0xff] %v1575_v16 }
  0x35   : > { %377 = vst [vmem:[#allocation2 + $0x30] sm:$0xff] %v1575_v16  ;;  %378 = vst [vmem:[#allocation2 + $0x48] sm:$0xff] %v1575_v16 }
  0x36   : > { %379 = vst [vmem:[#allocation2 + $0x80] sm:$0xff] %v1575_v16  ;;  %380 = vst [vmem:[#allocation2 + $0x88] sm:$0xff] %v1575_v16 }
  0x37   : > { %381 = vst [vmem:[#allocation2 + $0xe8] sm:$0xff] %v1575_v16  ;;  %382 = vst [vmem:[#allocation2 + $0xb8] sm:$0xff] %v1575_v16 }
  0x38   : > { %383 = vst [vmem:[#allocation2 + $0x60] sm:$0xff] %v1575_v16  ;;  %384 = vst [vmem:[#allocation2 + $0xf0] sm:$0xff] %v1575_v16 }
  0x39   : > { %385 = vst [vmem:[#allocation2 + $0x8] sm:$0xff] %v1575_v16  ;;  %386 = vst [vmem:[#allocation2 + $0x78] sm:$0xff] %v1575_v16 }
  0x3a   : > { %387 = vst [vmem:[#allocation2 + $0x38] sm:$0xff] %v1575_v16  ;;  %388 = vst [vmem:[#allocation2 + $0x58] sm:$0xff] %v1575_v16 }
  0x3b   : > { %389 = vst [vmem:[#allocation2 + $0x40] sm:$0xff] %v1575_v16  ;;  %390 = vst [vmem:[#allocation2 + $0xc8] sm:$0xff] %v1575_v16 }
  0x3c   : > { %391 = vst [vmem:[#allocation2 + $0xe0] sm:$0xff] %v1575_v16  ;;  %392 = vst [vmem:[#allocation2 + $0x90] sm:$0xff] %v1575_v16 }
  0x3d   : > { %393 = vst [vmem:[#allocation2 + $0x70] sm:$0xff] %v1575_v16  ;;  %394 = vst [vmem:[#allocation2 + $0xc0] sm:$0xff] %v1575_v16 }
  0x3e   : > { %395 = vst [vmem:[#allocation2 + $0xa8] sm:$0xff] %v1575_v16  ;;  %396 = vst [vmem:[#allocation2 + $0xd0] sm:$0xff] %v1575_v16 }
  0x3f   : > { %397 = vst [vmem:[#allocation2 + $0x10] sm:$0xff] %v1575_v16  ;;  %398 = vst [vmem:[#allocation2 + $0x28] sm:$0xff] %v1575_v16 }
  0x40   : > { %399 = vst [vmem:[#allocation2 + $0xa0] sm:$0xff] %v1575_v16  ;;  %400 = vst [vmem:[#allocation2 + $0xf8] sm:$0xff] %v1575_v16 }
  0x41   : > { %401 = vst [vmem:[#allocation2 + $0x20] sm:$0xff] %v1575_v16  ;;  %402 = vst [vmem:[#allocation2 + $0x98] sm:$0xff] %v1575_v16 }
  0x42 PF: > { %v1447_v17 = vld [vmem:[%s1682_s26 + $0x74] ss:$8 sps:$4 sm:$0xff]   ;;  %v1449_v18 = vld [vmem:[%s1682_s26 + $0x70] ss:$8 sps:$4 sm:$0xff]   ;;  %v1450_v19 = vld [vmem:[%s1682_s26 + $0x64] ss:$8 sps:$4 sm:$0xff]  }
  0x43   : > { %723 = vmatprep.subr.bf16.mxu0 %v1447_v17  ;;  %1357 = vmatprep.subr.bf16.mxu1 %v1447_v17  ;;  %v1452_v20 = vld [vmem:[%s1682_s26 + $0x60] ss:$8 sps:$4 sm:$0xff]   ;;  %v1453_v21 = vld [vmem:[%s1682_s26 + $0x54] ss:$8 sps:$4 sm:$0xff]   ;;  %v1455_v22 = vld [vmem:[%s1682_s26 + $0x50] ss:$8 sps:$4 sm:$0xff]  }
  0x44   : > { %724 = vmatpush1.bf16.msra.mxu0 %v1449_v18  ;;  %1373 = vmatpush1.bf16.msra.mxu1 %v1449_v18  ;;  %v1456_v23 = vld [vmem:[%s1682_s26 + $0x44] ss:$8 sps:$4 sm:$0xff]   ;;  %v1458_v24 = vld [vmem:[%s1682_s26 + $0x40] ss:$8 sps:$4 sm:$0xff]   ;;  %v1459_v25 = vld [vmem:[%s1682_s26 + $0x34] ss:$8 sps:$4 sm:$0xff]  }
  0x45   : > { %725 = vmatprep.subr.bf16.mxu0 %v1450_v19  ;;  %1358 = vmatprep.subr.bf16.mxu1 %v1450_v19  ;;  %v1461_v26 = vld [vmem:[%s1682_s26 + $0x30] ss:$8 sps:$4 sm:$0xff]   ;;  %v1462_v27 = vld [vmem:[%s1682_s26 + $0x24] ss:$8 sps:$4 sm:$0xff]   ;;  %v1464_v28 = vld [vmem:[%s1682_s26 + $0x20] ss:$8 sps:$4 sm:$0xff]  }
  0x46   : > { %v1465_v29 = vld [vmem:[%s1682_s26 + $0x14] ss:$8 sps:$4 sm:$0xff]   ;;  %v1497_v30 = vld [vmem:[%s1689_s12 + $0x4] ss:$8 sps:$4 sm:$0xff]   ;;  %v1467_v31 = vld [vmem:[%s1682_s26 + $0x10] ss:$8 sps:$4 sm:$0xff]  }
  0x47   : > { %v1500_v32 = vld [vmem:[%s1689_s12 + $0x44] ss:$8 sps:$4 sm:$0xff]   ;;  %755 = vmatprep.mubr.bf16.mxu0 %v1497_v30  ;;  %v1470_v34 = vld [vmem:[%s1682_s26] ss:$8 sps:$4 sm:$0xff]   ;;  %v1471_v35 = vld [vmem:[%s1682_s26 + $0xf4] ss:$8 sps:$4 sm:$0xff]  }
  0x48   : > { %726 = vmatpush1.bf16.msra.mxu0 %v1452_v20  ;;  %1374 = vmatpush1.bf16.msra.mxu1 %v1452_v20  ;;  %v1468_v33 = vld [vmem:[%s1682_s26 + $0x4] ss:$8 sps:$4 sm:$0xff]   ;;  %v1473_v36 = vld [vmem:[%s1682_s26 + $0xf0] ss:$8 sps:$4 sm:$0xff]   ;;  %v1476_v38 = vld [vmem:[%s1682_s26 + $0xe0] ss:$8 sps:$4 sm:$0xff]  }
  0x49   : > { %727 = vmatprep.subr.bf16.mxu0 %v1453_v21  ;;  %1359 = vmatprep.subr.bf16.mxu1 %v1453_v21  ;;  %v1474_v37 = vld [vmem:[%s1682_s26 + $0xe4] ss:$8 sps:$4 sm:$0xff]   ;;  %v1477_v39 = vld [vmem:[%s1682_s26 + $0xd4] ss:$8 sps:$4 sm:$0xff]   ;;  %v1479_v40 = vld [vmem:[%s1682_s26 + $0xd0] ss:$8 sps:$4 sm:$0xff]  }
  0x4a   : > { %795 = vmatprep.mubr.bf16.mxu1 %v1500_v32  ;;  %v1480_v41 = vld [vmem:[%s1682_s26 + $0xc4] ss:$8 sps:$4 sm:$0xff]   ;;  %v1482_v42 = vld [vmem:[%s1682_s26 + $0xc0] ss:$8 sps:$4 sm:$0xff]   ;;  %v1483_v43 = vld [vmem:[%s1682_s26 + $0xb4] ss:$8 sps:$4 sm:$0xff]  }
  0x4b   : > { %v1485_v44 = vld [vmem:[%s1682_s26 + $0xb0] ss:$8 sps:$4 sm:$0xff]   ;;  %v1486_v45 = vld [vmem:[%s1682_s26 + $0xa4] ss:$8 sps:$4 sm:$0xff]   ;;  %v1488_v46 = vld [vmem:[%s1682_s26 + $0xa0] ss:$8 sps:$4 sm:$0xff]  }
  0x4c   : > { %728 = vmatpush1.bf16.msra.mxu0 %v1455_v22  ;;  %1375 = vmatpush1.bf16.msra.mxu1 %v1455_v22  ;;  %v1489_v47 = vld [vmem:[%s1682_s26 + $0x94] ss:$8 sps:$4 sm:$0xff]   ;;  %v1491_v48 = vld [vmem:[%s1682_s26 + $0x90] ss:$8 sps:$4 sm:$0xff]   ;;  %v1492_v49 = vld [vmem:[%s1682_s26 + $0x84] ss:$8 sps:$4 sm:$0xff]  }
  0x4d   : > { %729 = vmatprep.subr.bf16.mxu0 %v1456_v23  ;;  %1360 = vmatprep.subr.bf16.mxu1 %v1456_v23  ;;  %v1494_v50 = vld [vmem:[%s1682_s26 + $0x80] ss:$8 sps:$4 sm:$0xff]   ;;  %v1501_v53 = vld [vmem:[%s1689_s12 + $0x14] ss:$8 sps:$4 sm:$0xff]   ;;  %v1505_v55 = vld [vmem:[%s1689_s12 + $0x10] ss:$8 sps:$4 sm:$0xff]  }
  0x4e   : > { %v1495_v51 = vld [vmem:[%s1689_s12] ss:$8 sps:$4 sm:$0xff]   ;;  %v1503_v54 = vld [vmem:[%s1689_s12 + $0x54] ss:$8 sps:$4 sm:$0xff]   ;;  %v1506_v56 = vld [vmem:[%s1689_s12 + $0x50] ss:$8 sps:$4 sm:$0xff]  }
  0x4f   : > { %v1498_v52 = vld [vmem:[%s1689_s12 + $0x40] ss:$8 sps:$4 sm:$0xff]   ;;  %v1507_v57 = vld [vmem:[%s1689_s12 + $0x24] ss:$8 sps:$4 sm:$0xff]   ;;  %v1513_v61 = vld [vmem:[%s1689_s12 + $0x34] ss:$8 sps:$4 sm:$0xff]  }
  0x50   : > { %730 = vmatpush1.bf16.msra.mxu0 %v1458_v24  ;;  %1376 = vmatpush1.bf16.msra.mxu1 %v1458_v24  ;;  %v1509_v58 = vld [vmem:[%s1689_s12 + $0x64] ss:$8 sps:$4 sm:$0xff]   ;;  %v1511_v59 = vld [vmem:[%s1689_s12 + $0x20] ss:$8 sps:$4 sm:$0xff]   ;;  %v1515_v62 = vld [vmem:[%s1689_s12 + $0x74] ss:$8 sps:$4 sm:$0xff]  }
  0x51   : > { %731 = vmatprep.subr.bf16.mxu0 %v1459_v25  ;;  %1361 = vmatprep.subr.bf16.mxu1 %v1459_v25  ;;  %v1512_v60 = vld [vmem:[%s1689_s12 + $0x60] ss:$8 sps:$4 sm:$0xff]   ;;  %v1517_v63 = vld [vmem:[%s1689_s12 + $0x30] ss:$8 sps:$4 sm:$0xff]   ;;  %p1320_p13 = scmp.ne.s32.totalorder %s1557_s14, 8 }
  0x52   : > { %v1518_v0 = vld [vmem:[%s1689_s12 + $0x70] ss:$8 sps:$4 sm:$0xff]   ;;  %v404_v5 = vld [vmem:[#allocation2] sm:$0xff]  ;;  %v422_v18 = vld [vmem:[#allocation2 + $0xc8] sm:$0xff] }
  0x53   : > { %v403_v1 = vld [vmem:[#allocation2 + $0xb0] sm:$0xff]  ;;  %v419_v2 = vld [vmem:[#allocation2 + $0x38] sm:$0xff]  ;;  %v421_v12 = vld [vmem:[#allocation2 + $0x40] sm:$0xff] }
  0x54   : > { %732 = vmatpush1.bf16.msra.mxu0 %v1461_v26  ;;  %1377 = vmatpush1.bf16.msra.mxu1 %v1461_v26  ;;  %v420_v6 = vld [vmem:[#allocation2 + $0x58] sm:$0xff]  ;;  %v407_v23 = vld [vmem:[#allocation2 + $0x50] sm:$0xff]  ;;  %v423_v24 = vld [vmem:[#allocation2 + $0xe0] sm:$0xff] }
  0x55   : > { %733 = vmatprep.subr.bf16.mxu0 %v1462_v27  ;;  %1362 = vmatprep.subr.bf16.mxu1 %v1462_v27  ;;  %v405_v11 = vld [vmem:[#allocation2 + $0xd8] sm:$0xff]  ;;  %v424_v30 = vld [vmem:[#allocation2 + $0x90] sm:$0xff] }
  0x56   : > { %v406_v17 = vld [vmem:[#allocation2 + $0x18] sm:$0xff] }
  0x58   : > { %734 = vmatpush1.bf16.msra.mxu0 %v1464_v28  ;;  %1378 = vmatpush1.bf16.msra.mxu1 %v1464_v28 }
  0x59   : > { %735 = vmatprep.subr.bf16.mxu0 %v1465_v29  ;;  %1363 = vmatprep.subr.bf16.mxu1 %v1465_v29  ;;  %v408_v29 = vld [vmem:[#allocation2 + $0x68] sm:$0xff] }
  0x5c   : > { %736 = vmatpush1.bf16.msra.mxu0 %v1467_v31  ;;  %1379 = vmatpush1.bf16.msra.mxu1 %v1467_v31 }
  0x5d   : > { %737 = vmatprep.subr.bf16.mxu0 %v1468_v33  ;;  %1364 = vmatprep.subr.bf16.mxu1 %v1468_v33 }
  0x60   : > { %738 = vmatpush1.bf16.msra.mxu0 %v1470_v34  ;;  %1380 = vmatpush1.bf16.msra.mxu1 %v1470_v34 }
  0x61   : > { %739 = vmatprep.subr.bf16.mxu0 %v1471_v35  ;;  %1365 = vmatprep.subr.bf16.mxu1 %v1471_v35  ;;  %v409_v35 = vld [vmem:[#allocation2 + $0x30] sm:$0xff] }
  0x64   : > { %740 = vmatpush2.bf16.msra.mxu0 %v1473_v36  ;;  %1381 = vmatpush2.bf16.msra.mxu1 %v1473_v36  ;;  %v425_v36 = vld [vmem:[#allocation2 + $0x70] sm:$0xff] }
  0x65   : > { %741 = vmatprep.subr.bf16.mxu0 %v1474_v37  ;;  %1366 = vmatprep.subr.bf16.mxu1 %v1474_v37 }
  0x68   : > { %742 = vmatpush2.bf16.msra.mxu0 %v1476_v38  ;;  %1382 = vmatpush2.bf16.msra.mxu1 %v1476_v38 }
  0x69   : > { %743 = vmatprep.subr.bf16.mxu0 %v1477_v39  ;;  %1367 = vmatprep.subr.bf16.mxu1 %v1477_v39 }
  0x6c   : > { %744 = vmatpush2.bf16.msra.mxu0 %v1479_v40  ;;  %1383 = vmatpush2.bf16.msra.mxu1 %v1479_v40 }
  0x6d   : > { %745 = vmatprep.subr.bf16.mxu0 %v1480_v41  ;;  %1368 = vmatprep.subr.bf16.mxu1 %v1480_v41  ;;  %v410_v41 = vld [vmem:[#allocation2 + $0x48] sm:$0xff] }
  0x70   : > { %746 = vmatpush2.bf16.msra.mxu0 %v1482_v42  ;;  %1384 = vmatpush2.bf16.msra.mxu1 %v1482_v42  ;;  %v426_v42 = vld [vmem:[#allocation2 + $0xc0] sm:$0xff] }
  0x71   : > { %747 = vmatprep.subr.bf16.mxu0 %v1483_v43  ;;  %1369 = vmatprep.subr.bf16.mxu1 %v1483_v43 }
  0x74   : > { %748 = vmatpush2.bf16.msra.mxu0 %v1485_v44  ;;  %1385 = vmatpush2.bf16.msra.mxu1 %v1485_v44 }
  0x75   : > { %749 = vmatprep.subr.bf16.mxu0 %v1486_v45  ;;  %1370 = vmatprep.subr.bf16.mxu1 %v1486_v45 }
  0x78   : > { %750 = vmatpush2.bf16.msra.mxu0 %v1488_v46  ;;  %1386 = vmatpush2.bf16.msra.mxu1 %v1488_v46 }
  0x79   : > { %751 = vmatprep.subr.bf16.mxu0 %v1489_v47  ;;  %1371 = vmatprep.subr.bf16.mxu1 %v1489_v47  ;;  %v411_v47 = vld [vmem:[#allocation2 + $0x80] sm:$0xff] }
  0x7c   : > { %752 = vmatpush2.bf16.msra.mxu0 %v1491_v48  ;;  %1387 = vmatpush2.bf16.msra.mxu1 %v1491_v48  ;;  %v427_v48 = vld [vmem:[#allocation2 + $0xa8] sm:$0xff] }
  0x7d   : > { %753 = vmatprep.subr.bf16.mxu0 %v1492_v49  ;;  %1372 = vmatprep.subr.bf16.mxu1 %v1492_v49 }
  0x80   : > { %754 = vmatpush2.bf16.msra.mxu0 %v1494_v50  ;;  %1388 = vmatpush2.bf16.msra.mxu1 %v1494_v50 }
  0x83   : > { %756 = vmatmul.mubr.bf16.vlgmr.msra.gmra.mxu0 %v1495_v51  ;;  %796 = vmatmul.mubr.bf16.vlgmr.msra.gmra.mxu1 %v1498_v52 }
  0x84   : > { %765 = vmatprep.mubr.bf16.mxu0 %v1501_v53  ;;  %805 = vmatprep.mubr.bf16.mxu1 %v1503_v54  ;;  %v412_v53 = vld [vmem:[#allocation2 + $0x88] sm:$0xff]  ;;  %v428_v54 = vld [vmem:[#allocation2 + $0xd0] sm:$0xff] }
  0x8b   : > { %766 = vmatmul.mubr.bf16.gmra.mxu0 %v1505_v55  ;;  %806 = vmatmul.mubr.bf16.gmra.mxu1 %v1506_v56 }
  0x8c   : > { %775 = vmatprep.mubr.bf16.mxu0 %v1507_v57  ;;  %815 = vmatprep.mubr.bf16.mxu1 %v1509_v58 }
  0x93   : > { %776 = vmatmul.mubr.bf16.gmra.mxu0 %v1511_v59  ;;  %816 = vmatmul.mubr.bf16.gmra.mxu1 %v1512_v60  ;;  %v413_v59 = vld [vmem:[#allocation2 + $0xe8] sm:$0xff]  ;;  %v429_v60 = vld [vmem:[#allocation2 + $0x10] sm:$0xff] }
  0x94   : > { %785 = vmatprep.mubr.bf16.mxu0 %v1513_v61  ;;  %825 = vmatprep.mubr.bf16.mxu1 %v1515_v62 }
  0x9b   : > { %786 = vmatmul.mubr.bf16.gmra.mxu0 %v1517_v63  ;;  %826 = vmatmul.mubr.bf16.gmra.mxu1 %v1518_v0 }
 0x143   : > { %v757_v3 = vpop.f32.mrf.mxu0  ;;  %v797_v4 = vpop.f32.mrf.mxu1 }
 0x144   : > { %v836_v7 = vadd.f32 %v757_v3, %v403_v1  ;;  %v852_v8 = vadd.f32 %v797_v4, %v419_v2  ;;  %v414_v1 = vld [vmem:[#allocation2 + $0xb8] sm:$0xff]  ;;  %v430_v2 = vld [vmem:[#allocation2 + $0x28] sm:$0xff] }
 0x145   : > { %v759_v9 = vpop.f32.mrf.mxu0  ;;  %v799_v10 = vpop.f32.mrf.mxu1 }
 0x146   : > { %868 = vst [vmem:[#allocation2 + $0xb0] sm:$0xff] %v836_v7  ;;  %884 = vst [vmem:[#allocation2 + $0x38] sm:$0xff] %v852_v8  ;;  %v837_v13 = vadd.f32 %v759_v9, %v404_v5  ;;  %v853_v14 = vadd.f32 %v799_v10, %v420_v6  ;;  %v415_v7 = vld [vmem:[#allocation2 + $0x60] sm:$0xff] }
 0x147   : > { %v761_v15 = vpop.f32.mrf.mxu0  ;;  %v801_v16 = vpop.f32.mrf.mxu1  ;;  %v431_v8 = vld [vmem:[#allocation2 + $0xa0] sm:$0xff] }
 0x148   : > { %869 = vst [vmem:[#allocation2] sm:$0xff] %v837_v13  ;;  %885 = vst [vmem:[#allocation2 + $0x58] sm:$0xff] %v853_v14  ;;  %v838_v19 = vadd.f32 %v761_v15, %v405_v11  ;;  %v854_v20 = vadd.f32 %v801_v16, %v421_v12  ;;  %v416_v13 = vld [vmem:[#allocation2 + $0xf0] sm:$0xff]  ;;  %v432_v14 = vld [vmem:[#allocation2 + $0xf8] sm:$0xff] }
 0x149   : > { %v763_v21 = vpop.f32.mrf.mxu0  ;;  %v803_v22 = vpop.f32.mrf.mxu1 }
 0x14a   : > { %870 = vst [vmem:[#allocation2 + $0xd8] sm:$0xff] %v838_v19  ;;  %886 = vst [vmem:[#allocation2 + $0x40] sm:$0xff] %v854_v20  ;;  %v839_v25 = vadd.f32 %v763_v21, %v406_v17  ;;  %v855_v26 = vadd.f32 %v803_v22, %v422_v18  ;;  %v417_v19 = vld [vmem:[#allocation2 + $0x8] sm:$0xff]  ;;  %v433_v20 = vld [vmem:[#allocation2 + $0x20] sm:$0xff] }
 0x14b   : > { %v767_v27 = vpop.f32.mrf.mxu0  ;;  %v807_v28 = vpop.f32.mrf.mxu1 }
 0x14c   : > { %871 = vst [vmem:[#allocation2 + $0x18] sm:$0xff] %v839_v25  ;;  %887 = vst [vmem:[#allocation2 + $0xc8] sm:$0xff] %v855_v26  ;;  %v840_v31 = vadd.f32 %v767_v27, %v407_v23  ;;  %v856_v32 = vadd.f32 %v807_v28, %v423_v24  ;;  %v418_v25 = vld [vmem:[#allocation2 + $0x78] sm:$0xff] }
 0x14d   : > { %v769_v33 = vpop.f32.mrf.mxu0  ;;  %v809_v34 = vpop.f32.mrf.mxu1  ;;  %v434_v26 = vld [vmem:[#allocation2 + $0x98] sm:$0xff] }
 0x14e   : > { %872 = vst [vmem:[#allocation2 + $0x50] sm:$0xff] %v840_v31  ;;  %888 = vst [vmem:[#allocation2 + $0xe0] sm:$0xff] %v856_v32  ;;  %v841_v37 = vadd.f32 %v769_v33, %v408_v29  ;;  %v857_v38 = vadd.f32 %v809_v34, %v424_v30 }
 0x14f   : > { %v771_v39 = vpop.f32.mrf.mxu0  ;;  %v811_v40 = vpop.f32.mrf.mxu1 }
 0x150   : > { %873 = vst [vmem:[#allocation2 + $0x68] sm:$0xff] %v841_v37  ;;  %889 = vst [vmem:[#allocation2 + $0x90] sm:$0xff] %v857_v38  ;;  %v842_v43 = vadd.f32 %v771_v39, %v409_v35  ;;  %v858_v44 = vadd.f32 %v811_v40, %v425_v36 }
 0x151   : > { %v773_v45 = vpop.f32.mrf.mxu0  ;;  %v813_v46 = vpop.f32.mrf.mxu1 }
 0x152   : > { %874 = vst [vmem:[#allocation2 + $0x30] sm:$0xff] %v842_v43  ;;  %890 = vst [vmem:[#allocation2 + $0x70] sm:$0xff] %v858_v44  ;;  %v843_v49 = vadd.f32 %v773_v45, %v410_v41  ;;  %v859_v50 = vadd.f32 %v813_v46, %v426_v42 }
 0x153   : > { %v777_v51 = vpop.f32.mrf.mxu0  ;;  %v817_v52 = vpop.f32.mrf.mxu1 }
 0x154   : > { %875 = vst [vmem:[#allocation2 + $0x48] sm:$0xff] %v843_v49  ;;  %891 = vst [vmem:[#allocation2 + $0xc0] sm:$0xff] %v859_v50  ;;  %v844_v55 = vadd.f32 %v777_v51, %v411_v47  ;;  %v860_v56 = vadd.f32 %v817_v52, %v427_v48 }
 0x155   : > { %v779_v57 = vpop.f32.mrf.mxu0  ;;  %v819_v58 = vpop.f32.mrf.mxu1 }
 0x156   : > { %876 = vst [vmem:[#allocation2 + $0x80] sm:$0xff] %v844_v55  ;;  %892 = vst [vmem:[#allocation2 + $0xa8] sm:$0xff] %v860_v56  ;;  %v845_v61 = vadd.f32 %v779_v57, %v412_v53  ;;  %v861_v62 = vadd.f32 %v819_v58, %v428_v54 }
 0x157   : > { %v781_v63 = vpop.f32.mrf.mxu0  ;;  %v821_v0 = vpop.f32.mrf.mxu1 }
 0x158   : > { %877 = vst [vmem:[#allocation2 + $0x88] sm:$0xff] %v845_v61  ;;  %893 = vst [vmem:[#allocation2 + $0xd0] sm:$0xff] %v861_v62  ;;  %v846_v3 = vadd.f32 %v781_v63, %v413_v59  ;;  %v862_v4 = vadd.f32 %v821_v0, %v429_v60 }
 0x159   : > { %v783_v5 = vpop.f32.mrf.mxu0  ;;  %v823_v6 = vpop.f32.mrf.mxu1 }
 0x15a   : > { %878 = vst [vmem:[#allocation2 + $0xe8] sm:$0xff] %v846_v3  ;;  %894 = vst [vmem:[#allocation2 + $0x10] sm:$0xff] %v862_v4  ;;  %v847_v9 = vadd.f32 %v783_v5, %v414_v1  ;;  %v863_v10 = vadd.f32 %v823_v6, %v430_v2 }
 0x15b   : > { %v787_v11 = vpop.f32.mrf.mxu0  ;;  %v827_v12 = vpop.f32.mrf.mxu1 }
 0x15c   : > { %879 = vst [vmem:[#allocation2 + $0xb8] sm:$0xff] %v847_v9  ;;  %895 = vst [vmem:[#allocation2 + $0x28] sm:$0xff] %v863_v10  ;;  %v848_v15 = vadd.f32 %v787_v11, %v415_v7  ;;  %v864_v16 = vadd.f32 %v827_v12, %v431_v8 }
 0x15d   : > { %v789_v17 = vpop.f32.mrf.mxu0  ;;  %v829_v18 = vpop.f32.mrf.mxu1 }
 0x15e   : > { %880 = vst [vmem:[#allocation2 + $0x60] sm:$0xff] %v848_v15  ;;  %896 = vst [vmem:[#allocation2 + $0xa0] sm:$0xff] %v864_v16  ;;  %v849_v21 = vadd.f32 %v789_v17, %v416_v13  ;;  %v865_v22 = vadd.f32 %v829_v18, %v432_v14 }
 0x15f   : > { %v791_v23 = vpop.f32.mrf.mxu0  ;;  %v831_v24 = vpop.f32.mrf.mxu1 }
 0x160   : > { %881 = vst [vmem:[#allocation2 + $0xf0] sm:$0xff] %v849_v21  ;;  %897 = vst [vmem:[#allocation2 + $0xf8] sm:$0xff] %v865_v22  ;;  %v850_v27 = vadd.f32 %v791_v23, %v417_v19  ;;  %v866_v28 = vadd.f32 %v831_v24, %v433_v20  ;;  %903 = sbr.rel (%p1320_p13) target bundleno = 389 (0x185), region = 78 }
 0x161   : > { %v793_v29 = vpop.f32.mrf.mxu0  ;;  %v833_v30 = vpop.f32.mrf.mxu1 }
 0x162   : > { %882 = vst [vmem:[#allocation2 + $0x8] sm:$0xff] %v850_v27  ;;  %898 = vst [vmem:[#allocation2 + $0x20] sm:$0xff] %v866_v28  ;;  %v851_v31 = vadd.f32 %v793_v29, %v418_v25  ;;  %v867_v32 = vadd.f32 %v833_v30, %v434_v26 }
 0x164   : > { %883 = vst [vmem:[#allocation2 + $0x78] sm:$0xff] %v851_v31  ;;  %899 = vst [vmem:[#allocation2 + $0x98] sm:$0xff] %v867_v32 }
 0x165   : > { %v938_v33 = vlaneseq  ;;  %v936_v35 = vld [vmem:[%s1819_s2] sm:$0x3]  ;;  %v904_v36 = vld [vmem:[#allocation2 + $0xb0] sm:$0xff]  ;;  %v906_v40 = vld [vmem:[#allocation2 + $0xd8] sm:$0xff] }
 0x166   : > { %v905_v37 = vld [vmem:[#allocation2] sm:$0xff]  ;;  %v907_v41 = vld [vmem:[#allocation2 + $0x18] sm:$0xff]  ;;  %v908_v42 = vld [vmem:[#allocation2 + $0x50] sm:$0xff] }
 0x167   : > { %v939_v34 = vshrl.u32 %v938_v33, 7  ;;  %v909_v45 = vld [vmem:[#allocation2 + $0x68] sm:$0xff]  ;;  %v910_v46 = vld [vmem:[#allocation2 + $0x30] sm:$0xff]  ;;  %v912_v56 = vld [vmem:[#allocation2 + $0x80] sm:$0xff] }
 0x168   : > { %v911_v47 = vld [vmem:[#allocation2 + $0x48] sm:$0xff]  ;;  %v915_v63 = vld [vmem:[#allocation2 + $0xb8] sm:$0xff]  ;;  %v916_v4 = vld [vmem:[#allocation2 + $0x60] sm:$0xff] }
 0x169   : > { %v940_v38 = vsub.s32 0, %v939_v34  ;;  %v944_v39 = vsub.s32 1, %v939_v34  ;;  %v913_v57 = vld [vmem:[#allocation2 + $0x88] sm:$0xff]  ;;  %v917_v5 = vld [vmem:[#allocation2 + $0xf0] sm:$0xff]  ;;  %v920_v16 = vld [vmem:[#allocation2 + $0x38] sm:$0xff] }
 0x16a   : > { %v914_v62 = vld [vmem:[#allocation2 + $0xe8] sm:$0xff]  ;;  %v921_v21 = vld [vmem:[#allocation2 + $0x58] sm:$0xff]  ;;  %v922_v26 = vld [vmem:[#allocation2 + $0x40] sm:$0xff] }
 0x16b   : > { %v1744_v43 = vrot.slane %v936_v35, %v940_v38  ;;  %v1746_v44 = vrot.slane %v936_v35, %v944_v39  ;;  %v918_v10 = vld [vmem:[#allocation2 + $0x8] sm:$0xff]  ;;  %v919_v11 = vld [vmem:[#allocation2 + $0x78] sm:$0xff]  ;;  %v924_v32 = vld [vmem:[#allocation2 + $0xe0] sm:$0xff] }
 0x16c   : > { %v923_v27 = vld [vmem:[#allocation2 + $0xc8] sm:$0xff]  ;;  %v925_v33 = vld [vmem:[#allocation2 + $0x90] sm:$0xff]  ;;  %v927_v39 = vld [vmem:[#allocation2 + $0xc0] sm:$0xff] }
 0x16d   : > { %v948_v48 = vadd.f32 %v1744_v43, %v904_v36  ;;  %v949_v49 = vadd.f32 %v1746_v44, %v905_v37  ;;  %v950_v50 = vadd.f32 %v1744_v43, %v906_v40  ;;  %v951_v51 = vadd.f32 %v1746_v44, %v907_v41  ;;  %v926_v38 = vld [vmem:[#allocation2 + $0x70] sm:$0xff] }
 0x16e   : > { %v952_v52 = vadd.f32 %v1744_v43, %v908_v42  ;;  %v953_v53 = vadd.f32 %v1746_v44, %v909_v45  ;;  %v954_v54 = vadd.f32 %v1744_v43, %v910_v46  ;;  %v955_v55 = vadd.f32 %v1746_v44, %v911_v47  ;;  %v928_v46 = vld [vmem:[#allocation2 + $0xa8] sm:$0xff] }
 0x16f   : > { %v980_v58 = vmax.f32 %v948_v48, 0.0  ;;  %v981_v59 = vmax.f32 %v949_v49, 0.0  ;;  %v982_v60 = vmax.f32 %v950_v50, 0.0  ;;  %v983_v61 = vmax.f32 %v951_v51, 0.0  ;;  %v929_v51 = vld [vmem:[#allocation2 + $0xd0] sm:$0xff] }
 0x170   : > { %v984_v0 = vmax.f32 %v952_v52, 0.0  ;;  %v985_v1 = vmax.f32 %v953_v53, 0.0  ;;  %v986_v2 = vmax.f32 %v954_v54, 0.0  ;;  %v987_v3 = vmax.f32 %v955_v55, 0.0 }
 0x171   : > { %v1341_v6 = vpack.c.bf16 %v981_v59, %v980_v58  ;;  %v1342_v7 = vpack.c.bf16 %v983_v61, %v982_v60  ;;  %v956_v8 = vadd.f32 %v1744_v43, %v912_v56  ;;  %v957_v9 = vadd.f32 %v1746_v44, %v913_v57  ;;  %v930_v56 = vld [vmem:[#allocation2 + $0x10] sm:$0xff]  ;;  %v931_v57 = vld [vmem:[#allocation2 + $0x28] sm:$0xff] }
 0x172   : > { %v1343_v12 = vpack.c.bf16 %v985_v1, %v984_v0  ;;  %v1344_v13 = vpack.c.bf16 %v987_v3, %v986_v2  ;;  %v958_v14 = vadd.f32 %v1744_v43, %v914_v62  ;;  %v959_v15 = vadd.f32 %v1746_v44, %v915_v63  ;;  %v932_v62 = vld [vmem:[#allocation2 + $0xa0] sm:$0xff]  ;;  %v933_v63 = vld [vmem:[#allocation2 + $0xf8] sm:$0xff] }
 0x173   : > { %1108 = vst [vmem:[%s1687_s30] sm:$0xff] %v1341_v6  ;;  %1109 = vst [vmem:[%s1687_s30 + $0x8] sm:$0xff] %v1342_v7  ;;  %v988_v17 = vmax.f32 %v956_v8, 0.0  ;;  %v989_v18 = vmax.f32 %v957_v9, 0.0  ;;  %v960_v19 = vadd.f32 %v1744_v43, %v916_v4  ;;  %v961_v20 = vadd.f32 %v1746_v44, %v917_v5  ;;  %v934_v4 = vld [vmem:[#allocation2 + $0x20] sm:$0xff]  ;;  %v935_v5 = vld [vmem:[#allocation2 + $0x98] sm:$0xff] }
 0x174   : > { %1110 = vst [vmem:[%s1687_s30 + $0x10] sm:$0xff] %v1343_v12  ;;  %1111 = vst [vmem:[%s1687_s30 + $0x18] sm:$0xff] %v1344_v13  ;;  %v990_v22 = vmax.f32 %v958_v14, 0.0  ;;  %v991_v23 = vmax.f32 %v959_v15, 0.0  ;;  %v962_v24 = vadd.f32 %v1744_v43, %v918_v10  ;;  %v963_v25 = vadd.f32 %v1746_v44, %v919_v11 }
 0x175   : > { %v1345_v28 = vpack.c.bf16 %v989_v18, %v988_v17  ;;  %v992_v29 = vmax.f32 %v960_v19, 0.0  ;;  %v993_v30 = vmax.f32 %v961_v20, 0.0  ;;  %v964_v31 = vadd.f32 %v1744_v43, %v920_v16 }
 0x176   : > { %v1346_v34 = vpack.c.bf16 %v991_v23, %v990_v22  ;;  %v994_v35 = vmax.f32 %v962_v24, 0.0  ;;  %v995_v36 = vmax.f32 %v963_v25, 0.0  ;;  %v965_v37 = vadd.f32 %v1746_v44, %v921_v21 }
 0x177   : > { %1112 = vst [vmem:[%s1687_s30 + $0x20] sm:$0xff] %v1345_v28  ;;  %v1347_v40 = vpack.c.bf16 %v993_v30, %v992_v29  ;;  %v996_v41 = vmax.f32 %v964_v31, 0.0  ;;  %v966_v42 = vadd.f32 %v1744_v43, %v922_v26  ;;  %v967_v45 = vadd.f32 %v1746_v44, %v923_v27 }
 0x178   : > { %1113 = vst [vmem:[%s1687_s30 + $0x28] sm:$0xff] %v1346_v34  ;;  %v1348_v47 = vpack.c.bf16 %v995_v36, %v994_v35  ;;  %v997_v48 = vmax.f32 %v965_v37, 0.0  ;;  %v968_v49 = vadd.f32 %v1744_v43, %v924_v32  ;;  %v969_v50 = vadd.f32 %v1746_v44, %v925_v33 }
 0x179   : > { %1114 = vst [vmem:[%s1687_s30 + $0x30] sm:$0xff] %v1347_v40  ;;  %v998_v52 = vmax.f32 %v966_v42, 0.0  ;;  %v999_v53 = vmax.f32 %v967_v45, 0.0  ;;  %v970_v54 = vadd.f32 %v1744_v43, %v926_v38  ;;  %v971_v55 = vadd.f32 %v1746_v44, %v927_v39 }
 0x17a   : > { %1115 = vst [vmem:[%s1687_s30 + $0x38] sm:$0xff] %v1348_v47  ;;  %v1349_v58 = vpack.c.bf16 %v997_v48, %v996_v41  ;;  %v1000_v59 = vmax.f32 %v968_v49, 0.0  ;;  %v1001_v60 = vmax.f32 %v969_v50, 0.0  ;;  %v972_v61 = vadd.f32 %v1744_v43, %v928_v46 }
 0x17b   : > { %v1350_v0 = vpack.c.bf16 %v999_v53, %v998_v52  ;;  %v1002_v1 = vmax.f32 %v970_v54, 0.0  ;;  %v1003_v2 = vmax.f32 %v971_v55, 0.0  ;;  %v973_v3 = vadd.f32 %v1746_v44, %v929_v51 }
 0x17c   : > { %1116 = vst [vmem:[%s1687_s30 + $0x40] sm:$0xff] %v1349_v58  ;;  %v1351_v6 = vpack.c.bf16 %v1001_v60, %v1000_v59  ;;  %v1004_v7 = vmax.f32 %v972_v61, 0.0  ;;  %v974_v8 = vadd.f32 %v1744_v43, %v930_v56  ;;  %v975_v9 = vadd.f32 %v1746_v44, %v931_v57 }
 0x17d   : > { %1117 = vst [vmem:[%s1687_s30 + $0x48] sm:$0xff] %v1350_v0  ;;  %v1352_v10 = vpack.c.bf16 %v1003_v2, %v1002_v1  ;;  %v1005_v11 = vmax.f32 %v973_v3, 0.0  ;;  %v976_v12 = vadd.f32 %v1744_v43, %v932_v62  ;;  %v977_v13 = vadd.f32 %v1746_v44, %v933_v63 }
 0x17e   : > { %1118 = vst [vmem:[%s1687_s30 + $0x50] sm:$0xff] %v1351_v6  ;;  %v1006_v14 = vmax.f32 %v974_v8, 0.0  ;;  %v1007_v15 = vmax.f32 %v975_v9, 0.0  ;;  %v978_v16 = vadd.f32 %v1744_v43, %v934_v4  ;;  %v979_v17 = vadd.f32 %v1746_v44, %v935_v5 }
 0x17f   : > { %1119 = vst [vmem:[%s1687_s30 + $0x58] sm:$0xff] %v1352_v10  ;;  %v1353_v18 = vpack.c.bf16 %v1005_v11, %v1004_v7  ;;  %v1008_v19 = vmax.f32 %v976_v12, 0.0  ;;  %v1009_v20 = vmax.f32 %v977_v13, 0.0 }
 0x180   : > { %v1354_v21 = vpack.c.bf16 %v1007_v15, %v1006_v14  ;;  %v1010_v22 = vmax.f32 %v978_v16, 0.0  ;;  %v1011_v23 = vmax.f32 %v979_v17, 0.0 }
 0x181   : > { %1120 = vst [vmem:[%s1687_s30 + $0x60] sm:$0xff] %v1353_v18  ;;  %v1355_v24 = vpack.c.bf16 %v1009_v20, %v1008_v19 }
 0x182   : > { %1121 = vst [vmem:[%s1687_s30 + $0x68] sm:$0xff] %v1354_v21  ;;  %v1356_v25 = vpack.c.bf16 %v1011_v23, %v1010_v22 }
 0x183   : > { %1122 = vst [vmem:[%s1687_s30 + $0x70] sm:$0xff] %v1355_v24 }
 0x184   : > { %1123 = vst [vmem:[%s1687_s30 + $0x78] sm:$0xff] %v1356_v25 }
 0x185 PF: > { %s13_s18 = sadd.s32 1, %s1573_s18   ;;  %s1821_s12 = smov %s1553_s13 }
 0x186   : > { %p10_p0 = scmp.ge.s32.totalorder %s13_s18, 29   ;;  %s1822_s13 = smov %s1647_s25 }
 0x187   : > { %s1823_s14 = smov %s1565_s16  ;;  %s1824_s15 = smov %s1569_s17 }
 0x188   : > { %s1825_s16 = smov %s1828_s19  ;;  %s1826_s17 = smov %s1832_s20 }
 0x189   :  { %12 = sbr.rel (!%p10_p0) target bundleno = 4 (0x4), region = 119 }

// kernel: alexnet_forward.23
= control target key start
LH: loop header
LB: loop body
LE: loop exit
PB: predicated region body
PF: predicated region fallthrough
CT: control target
= control target key end

     0   :  { %s290_s6 = smov 0   ;;  %s371_s0 = inlined_call_operand.vmem [shape: bf16[2,13,13,256], index: 0, kind: input, shape index: {}]   ;;  %s372_s1 = inlined_call_operand.vmem [shape: bf16[2,6,13,256], index: 1, kind: output, shape index: {}]  }
   0x1 LB: > { %s253_s7 = sadd.s32 4294967295, %s278_s6   ;;  %p257_p0 = scmp.ge.s32.totalorder %s278_s6, 1  ;;  %s278_s6 = sphi %s290_s6, %s11_s6  }
   0x2   : > { %p87_p1 = scmp.lt.s32.totalorder %s278_s6, 3 }
   0x4   : > { %p88_p2 = pnand %p257_p0, %p87_p1 }
   0x5   : > { %p107_p3 = scmp.lt.s32.totalorder (!%p88_p2), %s253_s7, 1 }
   0x6   : > { %91 = sbr.rel (%p88_p2) target bundleno = 33 (0x21), region = 24 }
   0xb   : > { %vm168_vm0 = vcmask 1042432   ;;  %vm169_vm1 = vsmask.f32 2304  ;;  %vm171_vm2 = vcmask 1046532   ;;  %vm172_vm3 = vsmask.f32 6400 }
   0xc   : > { %s376_s7 = smov (!%p107_p3, %s253_s7), 1  ;;  %vm170_vm4 = vmand %vm168_vm0, %vm169_vm1 }
   0xd   : > { %vm173_vm5 = vmand %vm171_vm2, %vm172_vm3  ;;  %s262_s8 = smul.u32 208, %s376_s7 }
   0xe   : > { %s263_s9 = smul.u32 96, %s376_s7  ;;  %vm303_vm6 = vmor %vm173_vm5, %vm170_vm4 }
   0xf   : > { %s301_s12 = scalar_lea.vmem %s371_s0, %s262_s8 }
  0x10   : > { %s310_s15 = scalar_lea.vmem %s372_s1, %s263_s9  ;;  %v117_v1 = vld [vmem:[%s301_s12] sm:$0xff]  ;;  %v119_v2 = vld [vmem:[%s301_s12 + $0x10] sm:$0xff]  ;;  %v118_v5 = vld [vmem:[%s301_s12 + $0x8] sm:$0x77] }
  0x11   : > { %v121_v3 = vld [vmem:[%s301_s12 + $0x20] sm:$0xff]  ;;  %v143_v4 = vmax.bf16 %v119_v2, %v117_v1  ;;  %v120_v6 = vld [vmem:[%s301_s12 + $0x18] sm:$0x77]  ;;  %v122_v7 = vld [vmem:[%s301_s12 + $0x28] sm:$0x77] }
  0x12   : > { %v144_v8 = vmax.bf16 %v120_v6, %v118_v5  ;;  %v175_v9 = vld [vmem:[%s310_s15 + $0x8] sm:$0x77]  ;;  %v123_v10 = vld [vmem:[%s301_s12 + $0x30] sm:$0xff]  ;;  %v125_v11 = vld [vmem:[%s301_s12 + $0x40] sm:$0xff] }
  0x13   : > { %v155_v12 = vmax.bf16 %v143_v4, %v121_v3  ;;  %v145_v13 = vmax.bf16 %v123_v10, %v121_v3  ;;  %v124_v14 = vld [vmem:[%s301_s12 + $0x38] sm:$0x77]  ;;  %v126_v15 = vld [vmem:[%s301_s12 + $0x48] sm:$0x77]  ;;  %v127_v19 = vld [vmem:[%s301_s12 + $0x50] sm:$0xff] }
  0x14   : > { %v179_v16 = vld [vmem:[%s310_s15 + $0x18] sm:$0x77]  ;;  %v156_v17 = vmax.bf16 %v144_v8, %v122_v7  ;;  %v146_v18 = vmax.bf16 %v124_v14, %v122_v7  ;;  %v129_v20 = vld [vmem:[%s301_s12 + $0x60] sm:$0xff]  ;;  %v147_v23 = vmax.bf16 %v127_v19, %v125_v11  ;;  %v130_v24 = vld [vmem:[%s301_s12 + $0x68] sm:$0x77] }
  0x15   : > { %v128_v21 = vld [vmem:[%s301_s12 + $0x58] sm:$0x77]  ;;  %167 = vst [vmem:[%s310_s15] sm:$0xff] %v155_v12  ;;  %v157_v22 = vmax.bf16 %v145_v13, %v125_v11  ;;  %v183_v26 = vld [vmem:[%s310_s15 + $0x28] sm:$0x77]  ;;  %v131_v27 = vld [vmem:[%s301_s12 + $0x70] sm:$0xff] }
  0x16   : > { %v148_v25 = vmax.bf16 %v128_v21, %v126_v15  ;;  %v176_v28 = vsel %vm303_vm6, %v156_v17, %v175_v9  ;;  %v158_v29 = vmax.bf16 %v146_v18, %v126_v15  ;;  %v133_v30 = vld [vmem:[%s301_s12 + $0x80] sm:$0xff]  ;;  %v149_v31 = vmax.bf16 %v131_v27, %v129_v20  ;;  %v132_v32 = vld [vmem:[%s301_s12 + $0x78] sm:$0x77]  ;;  %v134_v33 = vld [vmem:[%s301_s12 + $0x88] sm:$0x77] }
  0x17   : > { %177 = vst [vmem:[%s310_s15 + $0x8] sm:$0x77] %v176_v28  ;;  %178 = vst [vmem:[%s310_s15 + $0x10] sm:$0xff] %v157_v22  ;;  %v159_v34 = vmax.bf16 %v147_v23, %v129_v20  ;;  %v150_v36 = vmax.bf16 %v132_v32, %v130_v24  ;;  %v135_v37 = vld [vmem:[%s301_s12 + $0x90] sm:$0xff]  ;;  %v137_v38 = vld [vmem:[%s301_s12 + $0xa0] sm:$0xff] }
  0x18   : > { %v160_v35 = vmax.bf16 %v148_v25, %v130_v24  ;;  %v180_v39 = vsel %vm303_vm6, %v158_v29, %v179_v16  ;;  %v161_v40 = vmax.bf16 %v149_v31, %v133_v30  ;;  %v187_v41 = vld [vmem:[%s310_s15 + $0x38] sm:$0x77]  ;;  %v151_v42 = vmax.bf16 %v135_v37, %v133_v30  ;;  %v138_v44 = vld [vmem:[%s301_s12 + $0xa8] sm:$0x77]  ;;  %v139_v48 = vld [vmem:[%s301_s12 + $0xb0] sm:$0xff] }
  0x19   : > { %v136_v43 = vld [vmem:[%s301_s12 + $0x98] sm:$0x77]  ;;  %181 = vst [vmem:[%s310_s15 + $0x18] sm:$0x77] %v180_v39  ;;  %182 = vst [vmem:[%s310_s15 + $0x20] sm:$0xff] %v159_v34  ;;  %v162_v46 = vmax.bf16 %v150_v36, %v134_v33  ;;  %v141_v49 = vld [vmem:[%s301_s12 + $0xc0] sm:$0xff]  ;;  %v153_v53 = vmax.bf16 %v139_v48, %v137_v38 }
  0x1a   : > { %v184_v45 = vsel %vm303_vm6, %v160_v35, %v183_v26  ;;  %v152_v47 = vmax.bf16 %v136_v43, %v134_v33  ;;  %v140_v50 = vld [vmem:[%s301_s12 + $0xb8] sm:$0x77]  ;;  %186 = vst [vmem:[%s310_s15 + $0x30] sm:$0xff] %v161_v40  ;;  %v163_v51 = vmax.bf16 %v151_v42, %v137_v38  ;;  %v191_v52 = vld [vmem:[%s310_s15 + $0x48] sm:$0x77] }
  0x1b   : > { %185 = vst [vmem:[%s310_s15 + $0x28] sm:$0x77] %v184_v45  ;;  %v142_v54 = vld [vmem:[%s301_s12 + $0xc8] sm:$0x77]  ;;  %v154_v55 = vmax.bf16 %v140_v50, %v138_v44  ;;  %v188_v56 = vsel %vm303_vm6, %v162_v46, %v187_v41  ;;  %v195_v58 = vld [vmem:[%s310_s15 + $0x58] sm:$0x77]  ;;  %v165_v59 = vmax.bf16 %v153_v53, %v141_v49 }
  0x1c   : > { %v164_v57 = vmax.bf16 %v152_v47, %v138_v44  ;;  %189 = vst [vmem:[%s310_s15 + $0x38] sm:$0x77] %v188_v56  ;;  %190 = vst [vmem:[%s310_s15 + $0x40] sm:$0xff] %v163_v51 }
  0x1d   : > { %v166_v60 = vmax.bf16 %v154_v55, %v142_v54  ;;  %194 = vst [vmem:[%s310_s15 + $0x50] sm:$0xff] %v165_v59 }
  0x1e   : > { %v192_v61 = vsel %vm303_vm6, %v164_v57, %v191_v52 }
  0x1f   : > { %193 = vst [vmem:[%s310_s15 + $0x48] sm:$0x77] %v192_v61  ;;  %v196_v62 = vsel %vm303_vm6, %v166_v60, %v195_v58 }
  0x20   : > { %197 = vst [vmem:[%s310_s15 + $0x58] sm:$0x77] %v196_v62 }
  0x21 PF: > { %s11_s6 = sadd.s32 1, %s278_s6  }
  0x22   : > { %p8_p4 = scmp.ge.s32.totalorder %s11_s6, 4  }
  0x24   :  { %10 = sbr.rel (!%p8_p4) target bundleno = 1 (0x1), region = 54 }

// kernel: alexnet_forward.24
= control target key start
LH: loop header
LB: loop body
LE: loop exit
PB: predicated region body
PF: predicated region fallthrough
CT: control target
= control target key end

     0   :  { %s240_s6 = smov 0   ;;  %s257_s0 = inlined_call_operand.vmem [shape: bf16[2,13,6,256], index: 0, kind: input, shape index: {}]   ;;  %s258_s1 = inlined_call_operand.vmem [shape: bf16[2,6,6,256], index: 1, kind: output, shape index: {}]  }
   0x1 LB: > { %s203_s7 = sadd.s32 4294967295, %s228_s6   ;;  %p207_p0 = scmp.ge.s32.totalorder %s228_s6, 1  ;;  %s228_s6 = sphi %s240_s6, %s11_s6  }
   0x2   : > { %p87_p1 = scmp.lt.s32.totalorder %s228_s6, 3 }
   0x4   : > { %p88_p2 = pnand %p207_p0, %p87_p1 }
   0x5   : > { %p107_p3 = scmp.lt.s32.totalorder (!%p88_p2), %s203_s7, 1 }
   0x6   : > { %91 = sbr.rel (%p88_p2) target bundleno = 24 (0x18), region = 24 }
   0xb   : > { %s260_s7 = smov (!%p107_p3, %s203_s7), 1 }
   0xc   : > { %s212_s8 = smul.u32 104, %s260_s7 }
   0xd   : > { %s213_s9 = smul.u32 48, %s260_s7 }
   0xe   : > { %s111_s12 = scalar_lea.vmem %s257_s0, %s212_s8 }
   0xf   : > { %v117_v0 = vld [vmem:[%s111_s12] sm:$0x77]  ;;  %v118_v1 = vld [vmem:[%s111_s12 + $0x8] sm:$0x77]  ;;  %v119_v2 = vld [vmem:[%s111_s12 + $0x10] sm:$0x77]  ;;  %s116_s15 = scalar_lea.vmem %s258_s1, %s213_s9 }
  0x10   : > { %v130_v3 = vmax.bf16 %v118_v1, %v117_v0  ;;  %v120_v4 = vld [vmem:[%s111_s12 + $0x18] sm:$0x77]  ;;  %v121_v5 = vld [vmem:[%s111_s12 + $0x20] sm:$0x77]  ;;  %v122_v6 = vld [vmem:[%s111_s12 + $0x28] sm:$0x77] }
  0x11   : > { %v131_v7 = vmax.bf16 %v120_v4, %v119_v2  ;;  %v123_v8 = vld [vmem:[%s111_s12 + $0x30] sm:$0x77]  ;;  %v132_v9 = vmax.bf16 %v122_v6, %v121_v5  ;;  %v124_v10 = vld [vmem:[%s111_s12 + $0x38] sm:$0x77]  ;;  %v125_v11 = vld [vmem:[%s111_s12 + $0x40] sm:$0x77] }
  0x12   : > { %v136_v12 = vmax.bf16 %v130_v3, %v119_v2  ;;  %v133_v13 = vmax.bf16 %v124_v10, %v123_v8  ;;  %v126_v14 = vld [vmem:[%s111_s12 + $0x48] sm:$0x77]  ;;  %v127_v15 = vld [vmem:[%s111_s12 + $0x50] sm:$0x77]  ;;  %v128_v16 = vld [vmem:[%s111_s12 + $0x58] sm:$0x77] }
  0x13   : > { %v137_v17 = vmax.bf16 %v131_v7, %v121_v5  ;;  %v138_v18 = vmax.bf16 %v132_v9, %v123_v8  ;;  %v134_v19 = vmax.bf16 %v126_v14, %v125_v11  ;;  %v129_v20 = vld [vmem:[%s111_s12 + $0x60] sm:$0x77]  ;;  %v135_v21 = vmax.bf16 %v128_v16, %v127_v15 }
  0x14   : > { %142 = vst [vmem:[%s116_s15] sm:$0x77] %v136_v12  ;;  %v139_v22 = vmax.bf16 %v133_v13, %v125_v11 }
  0x15   : > { %143 = vst [vmem:[%s116_s15 + $0x8] sm:$0x77] %v137_v17  ;;  %144 = vst [vmem:[%s116_s15 + $0x10] sm:$0x77] %v138_v18  ;;  %v140_v23 = vmax.bf16 %v134_v19, %v127_v15  ;;  %v141_v24 = vmax.bf16 %v135_v21, %v129_v20 }
  0x16   : > { %145 = vst [vmem:[%s116_s15 + $0x18] sm:$0x77] %v139_v22 }
  0x17   : > { %146 = vst [vmem:[%s116_s15 + $0x20] sm:$0x77] %v140_v23  ;;  %147 = vst [vmem:[%s116_s15 + $0x28] sm:$0x77] %v141_v24 }
  0x18 PF: > { %s11_s6 = sadd.s32 1, %s228_s6  }
  0x19   : > { %p8_p4 = scmp.ge.s32.totalorder %s11_s6, 4  }
  0x1b   :  { %10 = sbr.rel (!%p8_p4) target bundleno = 1 (0x1), region = 54 }

// kernel: alexnet_forward.25
= control target key start
LH: loop header
LB: loop body
LE: loop exit
PB: predicated region body
PF: predicated region fallthrough
CT: control target
= control target key end

     0   :  { %s2171_s12 = smov 0   ;;  %s2173_s13 = smov 0   ;;  %s2687_s0 = inlined_call_operand.vmem [shape: bf16[8,9216], index: 0, kind: input, shape index: {}]   ;;  %s2688_s1 = inlined_call_operand.vmem [shape: bf16[9216,4096], index: 1, kind: input, shape index: {}]   ;;  %s2689_s2 = inlined_call_operand.vmem [shape: f32[1,4096], index: 2, kind: input, shape index: {}]   ;;  %s2690_s3 = inlined_call_operand.vmem [shape: bf16[8,4096], index: 3, kind: output, shape index: {}]  }
   0x1   :  { %s2175_s14 = smov 0   ;;  %s2177_s15 = smov 0  }
   0x2   :  { %s2179_s16 = smov 0   ;;  %s2181_s17 = smov 0  }
   0x3   :  { %s2183_s18 = smov 0  }
   0x4 LB: > { %s25_s19 = sadd.s32 1, %s2140_s16  ;;  %s28_s20 = sadd.s32 1, %s2144_s17  ;;  %s2148_s18 = sphi %s2183_s18, %s13_s18   ;;  %s2144_s17 = sphi %s2181_s17, %s2696_s17   ;;  %s2140_s16 = sphi %s2179_s16, %s2695_s16   ;;  %s2136_s15 = sphi %s2177_s15, %s2694_s15   ;;  %s2132_s14 = sphi %s2175_s14, %s2693_s14   ;;  %s2128_s13 = sphi %s2173_s13, %s2692_s13   ;;  %s2124_s12 = sphi %s2171_s12, %s2691_s12  }
   0x5   : > { %p26_p0 = scmp.ge.s32.totalorder %s25_s19, 18  ;;  %p76_p1 = scmp.ne.s32.totalorder %s2128_s13, %s2124_s12 }
   0x6   : > { %p77_p2 = scmp.eq.s32.totalorder %s2148_s18, 0  ;;  %s69_s24 = sadd.s32 1, %s2128_s13 }
   0x7   : > { %s2698_s19 = smov (%p26_p0, %s25_s19), 0  ;;  %s2700_s20 = smov (!%p26_p0, %s28_s20), %s2144_s17 }
   0x8   : > { %p78_p3 = por %p77_p2, %p76_p1  ;;  %p30_p4 = scmp.ge.s32.totalorder %s2700_s20, 8 }
   0x9   : > { %s64_s21 = ssub.s32 %s2140_s16, %s2698_s19  ;;  %p1687_p6 = scmp.ge.s32.totalorder %s2148_s18, 144 }
   0xa   : > { %s2702_s20 = smov (%p30_p4, %s2700_s20), 0 }
   0xb   : > { %s65_s22 = ssub.s32 %s2144_s17, %s2702_s20  ;;  %156 = sbr.rel (%p1687_p6) target bundleno = 87 (0x57), region = 16 }
   0xc   : > { %s66_s23 = sor.u32 %s65_s22, %s64_s21 }
   0xd   : > { %p67_p5 = scmp.eq.s32.totalorder %s66_s23, 0 }
   0xf   : > { %s2222_s25 = scalar_select %p67_p5, %s2128_s13, %s69_s24  }
  0x10   : > { %172 = sbr.rel (!%p78_p3) target bundleno = 87 (0x57), region = 24  ;;  %s174_s26 = sand.u32 (%p78_p3), 1, %s2128_s13  }
  0x11   : > { %s1690_s27 = sshll.u32 (%p78_p3), %s2144_s17, 2  ;;  %s1688_s28 = sshll.u32 (%p78_p3), %s174_s26, 10 }
  0x12   : > { %s1838_s29 = sshll.u32 (%p78_p3), %s2140_s16, 11  ;;  %s2236_s8 = scalar_lea.vmem (%p78_p3), [#allocation3], %s1688_s28 }
  0x13   : > { %s180_s30 = sadd.s32 (%p78_p3), %s1838_s29, %s1690_s27 }
  0x14   : > { %s1692_s4 = sshll.u32 (%p78_p3), %s180_s30, 2 }
  0x15   : > { %s2231_s7 = scalar_lea.vmem %s2688_s1, %s1692_s4 }
  0x16   : > { %v195_v0 = vld [vmem:[%s2231_s7] sm:$0xff]  ;;  %v197_v1 = vld [vmem:[%s2231_s7 + $0x8] sm:$0xff] }
  0x17   : > { %v199_v2 = vld [vmem:[%s2231_s7 + $0x80] sm:$0xff]  ;;  %196 = vst [vmem:[%s2236_s8] sm:$0xff] %v195_v0  ;;  %198 = vst [vmem:[%s2236_s8 + $0x8] sm:$0xff] %v197_v1  ;;  %v201_v3 = vld [vmem:[%s2231_s7 + $0x88] sm:$0xff] }
  0x18   : > { %200 = vst [vmem:[%s2236_s8 + $0x10] sm:$0xff] %v199_v2  ;;  %v203_v4 = vld [vmem:[%s2231_s7 + $0x100] sm:$0xff]  ;;  %v205_v5 = vld [vmem:[%s2231_s7 + $0x108] sm:$0xff]  ;;  %202 = vst [vmem:[%s2236_s8 + $0x18] sm:$0xff] %v201_v3 }
  0x19   : > { %204 = vst [vmem:[%s2236_s8 + $0x20] sm:$0xff] %v203_v4  ;;  %206 = vst [vmem:[%s2236_s8 + $0x28] sm:$0xff] %v205_v5  ;;  %v207_v6 = vld [vmem:[%s2231_s7 + $0x180] sm:$0xff]  ;;  %v209_v7 = vld [vmem:[%s2231_s7 + $0x188] sm:$0xff] }
  0x1a   : > { %v211_v8 = vld [vmem:[%s2231_s7 + $0x200] sm:$0xff]  ;;  %208 = vst [vmem:[%s2236_s8 + $0x30] sm:$0xff] %v207_v6  ;;  %210 = vst [vmem:[%s2236_s8 + $0x38] sm:$0xff] %v209_v7  ;;  %v213_v9 = vld [vmem:[%s2231_s7 + $0x208] sm:$0xff] }
  0x1b   : > { %212 = vst [vmem:[%s2236_s8 + $0x40] sm:$0xff] %v211_v8  ;;  %v215_v10 = vld [vmem:[%s2231_s7 + $0x280] sm:$0xff]  ;;  %v217_v11 = vld [vmem:[%s2231_s7 + $0x288] sm:$0xff]  ;;  %214 = vst [vmem:[%s2236_s8 + $0x48] sm:$0xff] %v213_v9 }
  0x1c   : > { %216 = vst [vmem:[%s2236_s8 + $0x50] sm:$0xff] %v215_v10  ;;  %218 = vst [vmem:[%s2236_s8 + $0x58] sm:$0xff] %v217_v11  ;;  %v219_v12 = vld [vmem:[%s2231_s7 + $0x300] sm:$0xff]  ;;  %v221_v13 = vld [vmem:[%s2231_s7 + $0x308] sm:$0xff] }
  0x1d   : > { %v223_v14 = vld [vmem:[%s2231_s7 + $0x380] sm:$0xff]  ;;  %220 = vst [vmem:[%s2236_s8 + $0x60] sm:$0xff] %v219_v12  ;;  %222 = vst [vmem:[%s2236_s8 + $0x68] sm:$0xff] %v221_v13  ;;  %v225_v15 = vld [vmem:[%s2231_s7 + $0x388] sm:$0xff] }
  0x1e   : > { %224 = vst [vmem:[%s2236_s8 + $0x70] sm:$0xff] %v223_v14  ;;  %v227_v16 = vld [vmem:[%s2231_s7 + $0x400] sm:$0xff]  ;;  %v229_v17 = vld [vmem:[%s2231_s7 + $0x408] sm:$0xff]  ;;  %226 = vst [vmem:[%s2236_s8 + $0x78] sm:$0xff] %v225_v15 }
  0x1f   : > { %228 = vst [vmem:[%s2236_s8 + $0x80] sm:$0xff] %v227_v16  ;;  %230 = vst [vmem:[%s2236_s8 + $0x88] sm:$0xff] %v229_v17  ;;  %v231_v18 = vld [vmem:[%s2231_s7 + $0x480] sm:$0xff]  ;;  %v233_v19 = vld [vmem:[%s2231_s7 + $0x488] sm:$0xff] }
  0x20   : > { %v235_v20 = vld [vmem:[%s2231_s7 + $0x500] sm:$0xff]  ;;  %232 = vst [vmem:[%s2236_s8 + $0x90] sm:$0xff] %v231_v18  ;;  %234 = vst [vmem:[%s2236_s8 + $0x98] sm:$0xff] %v233_v19  ;;  %v237_v21 = vld [vmem:[%s2231_s7 + $0x508] sm:$0xff] }
  0x21   : > { %236 = vst [vmem:[%s2236_s8 + $0xa0] sm:$0xff] %v235_v20  ;;  %v239_v22 = vld [vmem:[%s2231_s7 + $0x580] sm:$0xff]  ;;  %v241_v23 = vld [vmem:[%s2231_s7 + $0x588] sm:$0xff]  ;;  %238 = vst [vmem:[%s2236_s8 + $0xa8] sm:$0xff] %v237_v21 }
  0x22   : > { %240 = vst [vmem:[%s2236_s8 + $0xb0] sm:$0xff] %v239_v22  ;;  %242 = vst [vmem:[%s2236_s8 + $0xb8] sm:$0xff] %v241_v23  ;;  %v243_v24 = vld [vmem:[%s2231_s7 + $0x600] sm:$0xff]  ;;  %v245_v25 = vld [vmem:[%s2231_s7 + $0x608] sm:$0xff] }
  0x23   : > { %v247_v26 = vld [vmem:[%s2231_s7 + $0x680] sm:$0xff]  ;;  %244 = vst [vmem:[%s2236_s8 + $0xc0] sm:$0xff] %v243_v24  ;;  %246 = vst [vmem:[%s2236_s8 + $0xc8] sm:$0xff] %v245_v25  ;;  %v249_v27 = vld [vmem:[%s2231_s7 + $0x688] sm:$0xff] }
  0x24   : > { %248 = vst [vmem:[%s2236_s8 + $0xd0] sm:$0xff] %v247_v26  ;;  %v251_v28 = vld [vmem:[%s2231_s7 + $0x700] sm:$0xff]  ;;  %v253_v29 = vld [vmem:[%s2231_s7 + $0x708] sm:$0xff]  ;;  %250 = vst [vmem:[%s2236_s8 + $0xd8] sm:$0xff] %v249_v27 }
  0x25   : > { %252 = vst [vmem:[%s2236_s8 + $0xe0] sm:$0xff] %v251_v28  ;;  %254 = vst [vmem:[%s2236_s8 + $0xe8] sm:$0xff] %v253_v29  ;;  %v255_v30 = vld [vmem:[%s2231_s7 + $0x780] sm:$0xff]  ;;  %v257_v31 = vld [vmem:[%s2231_s7 + $0x788] sm:$0xff] }
  0x26   : > { %v259_v32 = vld [vmem:[%s2231_s7 + $0x800] sm:$0xff]  ;;  %256 = vst [vmem:[%s2236_s8 + $0xf0] sm:$0xff] %v255_v30  ;;  %258 = vst [vmem:[%s2236_s8 + $0xf8] sm:$0xff] %v257_v31  ;;  %v261_v33 = vld [vmem:[%s2231_s7 + $0x808] sm:$0xff] }
  0x27   : > { %260 = vst [vmem:[%s2236_s8 + $0x100] sm:$0xff] %v259_v32  ;;  %v263_v34 = vld [vmem:[%s2231_s7 + $0x880] sm:$0xff]  ;;  %v265_v35 = vld [vmem:[%s2231_s7 + $0x888] sm:$0xff]  ;;  %262 = vst [vmem:[%s2236_s8 + $0x108] sm:$0xff] %v261_v33 }
  0x28   : > { %264 = vst [vmem:[%s2236_s8 + $0x110] sm:$0xff] %v263_v34  ;;  %266 = vst [vmem:[%s2236_s8 + $0x118] sm:$0xff] %v265_v35  ;;  %v267_v36 = vld [vmem:[%s2231_s7 + $0x900] sm:$0xff]  ;;  %v269_v37 = vld [vmem:[%s2231_s7 + $0x908] sm:$0xff] }
  0x29   : > { %v271_v38 = vld [vmem:[%s2231_s7 + $0x980] sm:$0xff]  ;;  %268 = vst [vmem:[%s2236_s8 + $0x120] sm:$0xff] %v267_v36  ;;  %270 = vst [vmem:[%s2236_s8 + $0x128] sm:$0xff] %v269_v37  ;;  %v273_v39 = vld [vmem:[%s2231_s7 + $0x988] sm:$0xff] }
  0x2a   : > { %272 = vst [vmem:[%s2236_s8 + $0x130] sm:$0xff] %v271_v38  ;;  %v275_v40 = vld [vmem:[%s2231_s7 + $0xa00] sm:$0xff]  ;;  %v277_v41 = vld [vmem:[%s2231_s7 + $0xa08] sm:$0xff]  ;;  %274 = vst [vmem:[%s2236_s8 + $0x138] sm:$0xff] %v273_v39 }
  0x2b   : > { %276 = vst [vmem:[%s2236_s8 + $0x140] sm:$0xff] %v275_v40  ;;  %278 = vst [vmem:[%s2236_s8 + $0x148] sm:$0xff] %v277_v41  ;;  %v279_v42 = vld [vmem:[%s2231_s7 + $0xa80] sm:$0xff]  ;;  %v281_v43 = vld [vmem:[%s2231_s7 + $0xa88] sm:$0xff] }
  0x2c   : > { %v283_v44 = vld [vmem:[%s2231_s7 + $0xb00] sm:$0xff]  ;;  %280 = vst [vmem:[%s2236_s8 + $0x150] sm:$0xff] %v279_v42  ;;  %282 = vst [vmem:[%s2236_s8 + $0x158] sm:$0xff] %v281_v43  ;;  %v285_v45 = vld [vmem:[%s2231_s7 + $0xb08] sm:$0xff] }
  0x2d   : > { %284 = vst [vmem:[%s2236_s8 + $0x160] sm:$0xff] %v283_v44  ;;  %v287_v46 = vld [vmem:[%s2231_s7 + $0xb80] sm:$0xff]  ;;  %v289_v47 = vld [vmem:[%s2231_s7 + $0xb88] sm:$0xff]  ;;  %286 = vst [vmem:[%s2236_s8 + $0x168] sm:$0xff] %v285_v45 }
  0x2e   : > { %288 = vst [vmem:[%s2236_s8 + $0x170] sm:$0xff] %v287_v46  ;;  %290 = vst [vmem:[%s2236_s8 + $0x178] sm:$0xff] %v289_v47  ;;  %v291_v48 = vld [vmem:[%s2231_s7 + $0xc00] sm:$0xff]  ;;  %v293_v49 = vld [vmem:[%s2231_s7 + $0xc08] sm:$0xff] }
  0x2f   : > { %v295_v50 = vld [vmem:[%s2231_s7 + $0xc80] sm:$0xff]  ;;  %292 = vst [vmem:[%s2236_s8 + $0x180] sm:$0xff] %v291_v48  ;;  %294 = vst [vmem:[%s2236_s8 + $0x188] sm:$0xff] %v293_v49  ;;  %v297_v51 = vld [vmem:[%s2231_s7 + $0xc88] sm:$0xff] }
  0x30   : > { %296 = vst [vmem:[%s2236_s8 + $0x190] sm:$0xff] %v295_v50  ;;  %v299_v52 = vld [vmem:[%s2231_s7 + $0xd00] sm:$0xff]  ;;  %v301_v53 = vld [vmem:[%s2231_s7 + $0xd08] sm:$0xff]  ;;  %298 = vst [vmem:[%s2236_s8 + $0x198] sm:$0xff] %v297_v51 }
  0x31   : > { %300 = vst [vmem:[%s2236_s8 + $0x1a0] sm:$0xff] %v299_v52  ;;  %302 = vst [vmem:[%s2236_s8 + $0x1a8] sm:$0xff] %v301_v53  ;;  %v303_v54 = vld [vmem:[%s2231_s7 + $0xd80] sm:$0xff]  ;;  %v305_v55 = vld [vmem:[%s2231_s7 + $0xd88] sm:$0xff] }
  0x32   : > { %v307_v56 = vld [vmem:[%s2231_s7 + $0xe00] sm:$0xff]  ;;  %304 = vst [vmem:[%s2236_s8 + $0x1b0] sm:$0xff] %v303_v54  ;;  %306 = vst [vmem:[%s2236_s8 + $0x1b8] sm:$0xff] %v305_v55  ;;  %v309_v57 = vld [vmem:[%s2231_s7 + $0xe08] sm:$0xff] }
  0x33   : > { %308 = vst [vmem:[%s2236_s8 + $0x1c0] sm:$0xff] %v307_v56  ;;  %v311_v58 = vld [vmem:[%s2231_s7 + $0xe80] sm:$0xff]  ;;  %v313_v59 = vld [vmem:[%s2231_s7 + $0xe88] sm:$0xff]  ;;  %310 = vst [vmem:[%s2236_s8 + $0x1c8] sm:$0xff] %v309_v57 }
  0x34   : > { %312 = vst [vmem:[%s2236_s8 + $0x1d0] sm:$0xff] %v311_v58  ;;  %314 = vst [vmem:[%s2236_s8 + $0x1d8] sm:$0xff] %v313_v59  ;;  %v315_v60 = vld [vmem:[%s2231_s7 + $0xf00] sm:$0xff]  ;;  %v317_v61 = vld [vmem:[%s2231_s7 + $0xf08] sm:$0xff] }
  0x35   : > { %v319_v62 = vld [vmem:[%s2231_s7 + $0xf80] sm:$0xff]  ;;  %316 = vst [vmem:[%s2236_s8 + $0x1e0] sm:$0xff] %v315_v60  ;;  %318 = vst [vmem:[%s2236_s8 + $0x1e8] sm:$0xff] %v317_v61  ;;  %v321_v63 = vld [vmem:[%s2231_s7 + $0xf88] sm:$0xff] }
  0x36   : > { %320 = vst [vmem:[%s2236_s8 + $0x1f0] sm:$0xff] %v319_v62  ;;  %v323_v0 = vld [vmem:[%s2231_s7 + $0x1000] sm:$0xff]  ;;  %v325_v1 = vld [vmem:[%s2231_s7 + $0x1008] sm:$0xff]  ;;  %322 = vst [vmem:[%s2236_s8 + $0x1f8] sm:$0xff] %v321_v63 }
  0x37   : > { %324 = vst [vmem:[%s2236_s8 + $0x200] sm:$0xff] %v323_v0  ;;  %326 = vst [vmem:[%s2236_s8 + $0x208] sm:$0xff] %v325_v1  ;;  %v327_v2 = vld [vmem:[%s2231_s7 + $0x1080] sm:$0xff]  ;;  %v329_v3 = vld [vmem:[%s2231_s7 + $0x1088] sm:$0xff] }
  0x38   : > { %v331_v4 = vld [vmem:[%s2231_s7 + $0x1100] sm:$0xff]  ;;  %328 = vst [vmem:[%s2236_s8 + $0x210] sm:$0xff] %v327_v2  ;;  %330 = vst [vmem:[%s2236_s8 + $0x218] sm:$0xff] %v329_v3  ;;  %v333_v5 = vld [vmem:[%s2231_s7 + $0x1108] sm:$0xff] }
  0x39   : > { %332 = vst [vmem:[%s2236_s8 + $0x220] sm:$0xff] %v331_v4  ;;  %v335_v6 = vld [vmem:[%s2231_s7 + $0x1180] sm:$0xff]  ;;  %v337_v7 = vld [vmem:[%s2231_s7 + $0x1188] sm:$0xff]  ;;  %334 = vst [vmem:[%s2236_s8 + $0x228] sm:$0xff] %v333_v5 }
  0x3a   : > { %336 = vst [vmem:[%s2236_s8 + $0x230] sm:$0xff] %v335_v6  ;;  %338 = vst [vmem:[%s2236_s8 + $0x238] sm:$0xff] %v337_v7  ;;  %v339_v8 = vld [vmem:[%s2231_s7 + $0x1200] sm:$0xff]  ;;  %v341_v9 = vld [vmem:[%s2231_s7 + $0x1208] sm:$0xff] }
  0x3b   : > { %v343_v10 = vld [vmem:[%s2231_s7 + $0x1280] sm:$0xff]  ;;  %340 = vst [vmem:[%s2236_s8 + $0x240] sm:$0xff] %v339_v8  ;;  %342 = vst [vmem:[%s2236_s8 + $0x248] sm:$0xff] %v341_v9  ;;  %v345_v11 = vld [vmem:[%s2231_s7 + $0x1288] sm:$0xff] }
  0x3c   : > { %344 = vst [vmem:[%s2236_s8 + $0x250] sm:$0xff] %v343_v10  ;;  %v347_v12 = vld [vmem:[%s2231_s7 + $0x1300] sm:$0xff]  ;;  %v349_v13 = vld [vmem:[%s2231_s7 + $0x1308] sm:$0xff]  ;;  %346 = vst [vmem:[%s2236_s8 + $0x258] sm:$0xff] %v345_v11 }
  0x3d   : > { %348 = vst [vmem:[%s2236_s8 + $0x260] sm:$0xff] %v347_v12  ;;  %350 = vst [vmem:[%s2236_s8 + $0x268] sm:$0xff] %v349_v13  ;;  %v351_v14 = vld [vmem:[%s2231_s7 + $0x1380] sm:$0xff]  ;;  %v353_v15 = vld [vmem:[%s2231_s7 + $0x1388] sm:$0xff] }
  0x3e   : > { %v355_v16 = vld [vmem:[%s2231_s7 + $0x1400] sm:$0xff]  ;;  %352 = vst [vmem:[%s2236_s8 + $0x270] sm:$0xff] %v351_v14  ;;  %354 = vst [vmem:[%s2236_s8 + $0x278] sm:$0xff] %v353_v15  ;;  %v357_v17 = vld [vmem:[%s2231_s7 + $0x1408] sm:$0xff] }
  0x3f   : > { %356 = vst [vmem:[%s2236_s8 + $0x280] sm:$0xff] %v355_v16  ;;  %v359_v18 = vld [vmem:[%s2231_s7 + $0x1480] sm:$0xff]  ;;  %v361_v19 = vld [vmem:[%s2231_s7 + $0x1488] sm:$0xff]  ;;  %358 = vst [vmem:[%s2236_s8 + $0x288] sm:$0xff] %v357_v17 }
  0x40   : > { %360 = vst [vmem:[%s2236_s8 + $0x290] sm:$0xff] %v359_v18  ;;  %362 = vst [vmem:[%s2236_s8 + $0x298] sm:$0xff] %v361_v19  ;;  %v363_v20 = vld [vmem:[%s2231_s7 + $0x1500] sm:$0xff]  ;;  %v365_v21 = vld [vmem:[%s2231_s7 + $0x1508] sm:$0xff] }
  0x41   : > { %v367_v22 = vld [vmem:[%s2231_s7 + $0x1580] sm:$0xff]  ;;  %364 = vst [vmem:[%s2236_s8 + $0x2a0] sm:$0xff] %v363_v20  ;;  %366 = vst [vmem:[%s2236_s8 + $0x2a8] sm:$0xff] %v365_v21  ;;  %v369_v23 = vld [vmem:[%s2231_s7 + $0x1588] sm:$0xff] }
  0x42   : > { %368 = vst [vmem:[%s2236_s8 + $0x2b0] sm:$0xff] %v367_v22  ;;  %v371_v24 = vld [vmem:[%s2231_s7 + $0x1600] sm:$0xff]  ;;  %v373_v25 = vld [vmem:[%s2231_s7 + $0x1608] sm:$0xff]  ;;  %370 = vst [vmem:[%s2236_s8 + $0x2b8] sm:$0xff] %v369_v23 }
  0x43   : > { %372 = vst [vmem:[%s2236_s8 + $0x2c0] sm:$0xff] %v371_v24  ;;  %374 = vst [vmem:[%s2236_s8 + $0x2c8] sm:$0xff] %v373_v25  ;;  %v375_v26 = vld [vmem:[%s2231_s7 + $0x1680] sm:$0xff]  ;;  %v377_v27 = vld [vmem:[%s2231_s7 + $0x1688] sm:$0xff] }
  0x44   : > { %v379_v28 = vld [vmem:[%s2231_s7 + $0x1700] sm:$0xff]  ;;  %376 = vst [vmem:[%s2236_s8 + $0x2d0] sm:$0xff] %v375_v26  ;;  %378 = vst [vmem:[%s2236_s8 + $0x2d8] sm:$0xff] %v377_v27  ;;  %v381_v29 = vld [vmem:[%s2231_s7 + $0x1708] sm:$0xff] }
  0x45   : > { %380 = vst [vmem:[%s2236_s8 + $0x2e0] sm:$0xff] %v379_v28  ;;  %v383_v30 = vld [vmem:[%s2231_s7 + $0x1780] sm:$0xff]  ;;  %v385_v31 = vld [vmem:[%s2231_s7 + $0x1788] sm:$0xff]  ;;  %382 = vst [vmem:[%s2236_s8 + $0x2e8] sm:$0xff] %v381_v29 }
  0x46   : > { %384 = vst [vmem:[%s2236_s8 + $0x2f0] sm:$0xff] %v383_v30  ;;  %386 = vst [vmem:[%s2236_s8 + $0x2f8] sm:$0xff] %v385_v31  ;;  %v387_v32 = vld [vmem:[%s2231_s7 + $0x1800] sm:$0xff]  ;;  %v389_v33 = vld [vmem:[%s2231_s7 + $0x1808] sm:$0xff] }
  0x47   : > { %v391_v34 = vld [vmem:[%s2231_s7 + $0x1880] sm:$0xff]  ;;  %388 = vst [vmem:[%s2236_s8 + $0x300] sm:$0xff] %v387_v32  ;;  %390 = vst [vmem:[%s2236_s8 + $0x308] sm:$0xff] %v389_v33  ;;  %v393_v35 = vld [vmem:[%s2231_s7 + $0x1888] sm:$0xff] }
  0x48   : > { %392 = vst [vmem:[%s2236_s8 + $0x310] sm:$0xff] %v391_v34  ;;  %v395_v36 = vld [vmem:[%s2231_s7 + $0x1900] sm:$0xff]  ;;  %v397_v37 = vld [vmem:[%s2231_s7 + $0x1908] sm:$0xff]  ;;  %394 = vst [vmem:[%s2236_s8 + $0x318] sm:$0xff] %v393_v35 }
  0x49   : > { %396 = vst [vmem:[%s2236_s8 + $0x320] sm:$0xff] %v395_v36  ;;  %398 = vst [vmem:[%s2236_s8 + $0x328] sm:$0xff] %v397_v37  ;;  %v399_v38 = vld [vmem:[%s2231_s7 + $0x1980] sm:$0xff]  ;;  %v401_v39 = vld [vmem:[%s2231_s7 + $0x1988] sm:$0xff] }
  0x4a   : > { %v403_v40 = vld [vmem:[%s2231_s7 + $0x1a00] sm:$0xff]  ;;  %400 = vst [vmem:[%s2236_s8 + $0x330] sm:$0xff] %v399_v38  ;;  %402 = vst [vmem:[%s2236_s8 + $0x338] sm:$0xff] %v401_v39  ;;  %v405_v41 = vld [vmem:[%s2231_s7 + $0x1a08] sm:$0xff] }
  0x4b   : > { %404 = vst [vmem:[%s2236_s8 + $0x340] sm:$0xff] %v403_v40  ;;  %v407_v42 = vld [vmem:[%s2231_s7 + $0x1a80] sm:$0xff]  ;;  %v409_v43 = vld [vmem:[%s2231_s7 + $0x1a88] sm:$0xff]  ;;  %406 = vst [vmem:[%s2236_s8 + $0x348] sm:$0xff] %v405_v41 }
  0x4c   : > { %408 = vst [vmem:[%s2236_s8 + $0x350] sm:$0xff] %v407_v42  ;;  %410 = vst [vmem:[%s2236_s8 + $0x358] sm:$0xff] %v409_v43  ;;  %v411_v44 = vld [vmem:[%s2231_s7 + $0x1b00] sm:$0xff]  ;;  %v413_v45 = vld [vmem:[%s2231_s7 + $0x1b08] sm:$0xff] }
  0x4d   : > { %v415_v46 = vld [vmem:[%s2231_s7 + $0x1b80] sm:$0xff]  ;;  %412 = vst [vmem:[%s2236_s8 + $0x360] sm:$0xff] %v411_v44  ;;  %414 = vst [vmem:[%s2236_s8 + $0x368] sm:$0xff] %v413_v45  ;;  %v417_v47 = vld [vmem:[%s2231_s7 + $0x1b88] sm:$0xff] }
  0x4e   : > { %416 = vst [vmem:[%s2236_s8 + $0x370] sm:$0xff] %v415_v46  ;;  %v419_v48 = vld [vmem:[%s2231_s7 + $0x1c00] sm:$0xff]  ;;  %v421_v49 = vld [vmem:[%s2231_s7 + $0x1c08] sm:$0xff]  ;;  %418 = vst [vmem:[%s2236_s8 + $0x378] sm:$0xff] %v417_v47 }
  0x4f   : > { %420 = vst [vmem:[%s2236_s8 + $0x380] sm:$0xff] %v419_v48  ;;  %422 = vst [vmem:[%s2236_s8 + $0x388] sm:$0xff] %v421_v49  ;;  %v423_v50 = vld [vmem:[%s2231_s7 + $0x1c80] sm:$0xff]  ;;  %v425_v51 = vld [vmem:[%s2231_s7 + $0x1c88] sm:$0xff] }
  0x50   : > { %v427_v52 = vld [vmem:[%s2231_s7 + $0x1d00] sm:$0xff]  ;;  %424 = vst [vmem:[%s2236_s8 + $0x390] sm:$0xff] %v423_v50  ;;  %426 = vst [vmem:[%s2236_s8 + $0x398] sm:$0xff] %v425_v51  ;;  %v429_v53 = vld [vmem:[%s2231_s7 + $0x1d08] sm:$0xff] }
  0x51   : > { %428 = vst [vmem:[%s2236_s8 + $0x3a0] sm:$0xff] %v427_v52  ;;  %v431_v54 = vld [vmem:[%s2231_s7 + $0x1d80] sm:$0xff]  ;;  %v433_v55 = vld [vmem:[%s2231_s7 + $0x1d88] sm:$0xff]  ;;  %430 = vst [vmem:[%s2236_s8 + $0x3a8] sm:$0xff] %v429_v53 }
  0x52   : > { %432 = vst [vmem:[%s2236_s8 + $0x3b0] sm:$0xff] %v431_v54  ;;  %434 = vst [vmem:[%s2236_s8 + $0x3b8] sm:$0xff] %v433_v55  ;;  %v435_v56 = vld [vmem:[%s2231_s7 + $0x1e00] sm:$0xff]  ;;  %v437_v57 = vld [vmem:[%s2231_s7 + $0x1e08] sm:$0xff] }
  0x53   : > { %v439_v58 = vld [vmem:[%s2231_s7 + $0x1e80] sm:$0xff]  ;;  %436 = vst [vmem:[%s2236_s8 + $0x3c0] sm:$0xff] %v435_v56  ;;  %438 = vst [vmem:[%s2236_s8 + $0x3c8] sm:$0xff] %v437_v57  ;;  %v441_v59 = vld [vmem:[%s2231_s7 + $0x1e88] sm:$0xff] }
  0x54   : > { %440 = vst [vmem:[%s2236_s8 + $0x3d0] sm:$0xff] %v439_v58  ;;  %v443_v60 = vld [vmem:[%s2231_s7 + $0x1f00] sm:$0xff]  ;;  %v445_v61 = vld [vmem:[%s2231_s7 + $0x1f08] sm:$0xff]  ;;  %442 = vst [vmem:[%s2236_s8 + $0x3d8] sm:$0xff] %v441_v59 }
  0x55   : > { %444 = vst [vmem:[%s2236_s8 + $0x3e0] sm:$0xff] %v443_v60  ;;  %446 = vst [vmem:[%s2236_s8 + $0x3e8] sm:$0xff] %v445_v61  ;;  %v447_v62 = vld [vmem:[%s2231_s7 + $0x1f80] sm:$0xff]  ;;  %v449_v63 = vld [vmem:[%s2231_s7 + $0x1f88] sm:$0xff] }
  0x56   : > { %448 = vst [vmem:[%s2236_s8 + $0x3f0] sm:$0xff] %v447_v62  ;;  %450 = vst [vmem:[%s2236_s8 + $0x3f8] sm:$0xff] %v449_v63 }
  0x57 PF: > { %p1693_p7 = scmp.ge.s32.totalorder %s2148_s18, 1  ;;  %p463_p8 = scmp.lt.s32.totalorder %s2148_s18, 145 }
  0x59   : > { %p464_p9 = pnand %p1693_p7, %p463_p8 }
  0x5a   : > { %s470_s9 = sand.u32 (!%p464_p9), 1, %s2124_s12   ;;  %s1695_s10 = sshll.u32 (!%p464_p9), %s2132_s14, 2 }
  0x5b   : > { %467 = sbr.rel (%p464_p9) target bundleno = 452 (0x1c4), region = 51  ;;  %s1694_s11 = sshll.u32 (!%p464_p9), %s470_s9, 10 }
  0x5c   : > { %p513_p10 = scmp.lt.s32.totalorder (!%p464_p9), %s1695_s10, 71  ;;  %s1697_s21 = sshll.u32 (!%p464_p9), %s2136_s15, 2 }
  0x5d   : > { %p523_p11 = scmp.lt.s32.totalorder (!%p464_p9), %s1697_s21, 31  ;;  %s2513_s5 = scalar_lea.vmem (!%p464_p9), [#allocation3], %s1694_s11 }
  0x5e   : > { %p1700_p12 = scmp.ne.s32.totalorder (!%p464_p9), %s2132_s14, 0 }
  0x60   : > { %s2704_s10 = smov (!%p513_p10, %s1695_s10), 71  ;;  %s2706_s21 = smov (!%p523_p11, %s1697_s21), 31 }
  0x61   : > { %s1696_s22 = sshll.u32 %s2704_s10, 2  ;;  %s525_s12 = scalar_lea.vmem %s2689_s2, %s2706_s21 }
  0x62   : > { %s2499_s26 = scalar_lea.vmem %s2687_s0, %s1696_s22  ;;  %s1699_s29 = sshll.u32 %s2706_s21, 2 }
  0x63   : > { %s2511_s15 = scalar_lea.vmem %s2690_s3, %s1699_s29  ;;  %540 = sbr.rel (%p1700_p12) target bundleno = 107 (0x6b), region = 59 }
  0x68   : > { %v2150_v0 = vmov 0.0  }
  0x69   : > { %541 = vst [vmem:[#allocation2 + $0x10] sm:$0xff] %v2150_v0  ;;  %542 = vst [vmem:[#allocation2] sm:$0xff] %v2150_v0 }
  0x6a   : > { %543 = vst [vmem:[#allocation2 + $0x18] sm:$0xff] %v2150_v0  ;;  %544 = vst [vmem:[#allocation2 + $0x8] sm:$0xff] %v2150_v0 }
  0x6b PF: > { %v1898_v1 = vld [vmem:[%s2513_s5 + $0xe4] ss:$16 sps:$4 sm:$0xff]   ;;  %v1902_v3 = vld [vmem:[%s2513_s5 + $0xe0] ss:$16 sps:$4 sm:$0xff]   ;;  %v550_v49 = vld [vmem:[%s2499_s26 + $0x8] sm:$0xff]  ;;  %p1833_p13 = scmp.ne.s32.totalorder %s2132_s14, 17 }
  0x6c   : > { %v1900_v2 = vld [vmem:[%s2513_s5 + $0x2e4] ss:$16 sps:$4 sm:$0xff]   ;;  %1333 = vmatprep.subr.bf16.mxu0 %v1898_v1  ;;  %v1903_v4 = vld [vmem:[%s2513_s5 + $0x2e0] ss:$16 sps:$4 sm:$0xff]   ;;  %v1704_v52 = vcombine.high %v550_v49, %v550_v49 }
  0x6d   : > { %1374 = vmatprep.subr.bf16.mxu1 %v1900_v2  ;;  %v1904_v5 = vld [vmem:[%s2513_s5 + $0xc4] ss:$16 sps:$4 sm:$0xff]   ;;  %1334 = vmatpush1.bf16.msra.mxu0 %v1902_v3  ;;  %v1908_v7 = vld [vmem:[%s2513_s5 + $0xc0] ss:$16 sps:$4 sm:$0xff]  }
  0x6e   : > { %1375 = vmatpush1.bf16.msra.mxu1 %v1903_v4  ;;  %v1906_v6 = vld [vmem:[%s2513_s5 + $0x2c4] ss:$16 sps:$4 sm:$0xff]   ;;  %1335 = vmatprep.subr.bf16.mxu0 %v1904_v5  ;;  %v1909_v8 = vld [vmem:[%s2513_s5 + $0x2c0] ss:$16 sps:$4 sm:$0xff]   ;;  %v2000_v5 = vld [vmem:[%s2513_s5 + $0xec] ss:$16 sps:$4 sm:$0xff]  }
  0x6f   : > { %1376 = vmatprep.subr.bf16.mxu1 %v1906_v6  ;;  %v1910_v9 = vld [vmem:[%s2513_s5 + $0xa4] ss:$16 sps:$4 sm:$0xff]   ;;  %v1914_v11 = vld [vmem:[%s2513_s5 + $0xa0] ss:$16 sps:$4 sm:$0xff]   ;;  %1406 = vmatprep.mubr.bf16.mxu1 %v1704_v52  ;;  %v2003_v6 = vld [vmem:[%s2513_s5 + $0x2ec] ss:$16 sps:$4 sm:$0xff]  }
  0x70   : > { %v1912_v10 = vld [vmem:[%s2513_s5 + $0x2a4] ss:$16 sps:$4 sm:$0xff]   ;;  %v1915_v12 = vld [vmem:[%s2513_s5 + $0x2a0] ss:$16 sps:$4 sm:$0xff]  }
  0x71   : > { %1336 = vmatpush1.bf16.msra.mxu0 %v1908_v7  ;;  %v1916_v13 = vld [vmem:[%s2513_s5 + $0x84] ss:$16 sps:$4 sm:$0xff]   ;;  %v1920_v15 = vld [vmem:[%s2513_s5 + $0x80] ss:$16 sps:$4 sm:$0xff]  }
  0x72   : > { %1377 = vmatpush1.bf16.msra.mxu1 %v1909_v8  ;;  %1337 = vmatprep.subr.bf16.mxu0 %v1910_v9  ;;  %v1918_v14 = vld [vmem:[%s2513_s5 + $0x284] ss:$16 sps:$4 sm:$0xff]   ;;  %v1921_v16 = vld [vmem:[%s2513_s5 + $0x280] ss:$16 sps:$4 sm:$0xff]   ;;  %v2589_v8 = vcombine.low %v550_v49, %v550_v49  ;;  %v1998_v9 = vld [vmem:[%s2513_s5 + $0xe8] ss:$16 sps:$4 sm:$0xff]  }
  0x73   : > { %1378 = vmatprep.subr.bf16.mxu1 %v1912_v10  ;;  %v1922_v17 = vld [vmem:[%s2513_s5 + $0x64] ss:$16 sps:$4 sm:$0xff]   ;;  %v1926_v19 = vld [vmem:[%s2513_s5 + $0x60] ss:$16 sps:$4 sm:$0xff]   ;;  %v2001_v10 = vld [vmem:[%s2513_s5 + $0x2e8] ss:$16 sps:$4 sm:$0xff]  }
  0x74   : > { %v1924_v18 = vld [vmem:[%s2513_s5 + $0x264] ss:$16 sps:$4 sm:$0xff]   ;;  %v1927_v20 = vld [vmem:[%s2513_s5 + $0x260] ss:$16 sps:$4 sm:$0xff]   ;;  %v2058_v49 = vld [vmem:[%s2513_s5 + $0x1a8] ss:$16 sps:$4 sm:$0xff]  }
  0x75   : > { %1338 = vmatpush1.bf16.msra.mxu0 %v1914_v11  ;;  %v1928_v21 = vld [vmem:[%s2513_s5 + $0x44] ss:$16 sps:$4 sm:$0xff]   ;;  %v1932_v23 = vld [vmem:[%s2513_s5 + $0x40] ss:$16 sps:$4 sm:$0xff]   ;;  %v2006_v11 = vld [vmem:[%s2513_s5 + $0xcc] ss:$16 sps:$4 sm:$0xff]  }
  0x76   : > { %1379 = vmatpush1.bf16.msra.mxu1 %v1915_v12  ;;  %1339 = vmatprep.subr.bf16.mxu0 %v1916_v13  ;;  %v1930_v22 = vld [vmem:[%s2513_s5 + $0x244] ss:$16 sps:$4 sm:$0xff]   ;;  %v1933_v24 = vld [vmem:[%s2513_s5 + $0x240] ss:$16 sps:$4 sm:$0xff]   ;;  %v2009_v12 = vld [vmem:[%s2513_s5 + $0x2cc] ss:$16 sps:$4 sm:$0xff]  }
  0x77   : > { %1380 = vmatprep.subr.bf16.mxu1 %v1918_v14  ;;  %v1934_v25 = vld [vmem:[%s2513_s5 + $0x24] ss:$16 sps:$4 sm:$0xff]   ;;  %v1938_v27 = vld [vmem:[%s2513_s5 + $0x20] ss:$16 sps:$4 sm:$0xff]   ;;  %v2004_v13 = vld [vmem:[%s2513_s5 + $0xc8] ss:$16 sps:$4 sm:$0xff]  }
  0x78   : > { %v1936_v26 = vld [vmem:[%s2513_s5 + $0x224] ss:$16 sps:$4 sm:$0xff]   ;;  %v1939_v28 = vld [vmem:[%s2513_s5 + $0x220] ss:$16 sps:$4 sm:$0xff]   ;;  %v2007_v14 = vld [vmem:[%s2513_s5 + $0x2c8] ss:$16 sps:$4 sm:$0xff]  }
  0x79   : > { %1340 = vmatpush1.bf16.msra.mxu0 %v1920_v15  ;;  %v1940_v29 = vld [vmem:[%s2513_s5 + $0x4] ss:$16 sps:$4 sm:$0xff]   ;;  %v1944_v31 = vld [vmem:[%s2513_s5] ss:$16 sps:$4 sm:$0xff]   ;;  %v2012_v15 = vld [vmem:[%s2513_s5 + $0xac] ss:$16 sps:$4 sm:$0xff]  }
  0x7a   : > { %1381 = vmatpush1.bf16.msra.mxu1 %v1921_v16  ;;  %1341 = vmatprep.subr.bf16.mxu0 %v1922_v17  ;;  %v1942_v30 = vld [vmem:[%s2513_s5 + $0x204] ss:$16 sps:$4 sm:$0xff]   ;;  %v1945_v32 = vld [vmem:[%s2513_s5 + $0x200] ss:$16 sps:$4 sm:$0xff]   ;;  %v2015_v16 = vld [vmem:[%s2513_s5 + $0x2ac] ss:$16 sps:$4 sm:$0xff]  }
  0x7b   : > { %1382 = vmatprep.subr.bf16.mxu1 %v1924_v18  ;;  %v1946_v33 = vld [vmem:[%s2513_s5 + $0x1e4] ss:$16 sps:$4 sm:$0xff]   ;;  %v1950_v35 = vld [vmem:[%s2513_s5 + $0x1e0] ss:$16 sps:$4 sm:$0xff]   ;;  %v2010_v17 = vld [vmem:[%s2513_s5 + $0xa8] ss:$16 sps:$4 sm:$0xff]  }
  0x7c   : > { %v1948_v34 = vld [vmem:[%s2513_s5 + $0x3e4] ss:$16 sps:$4 sm:$0xff]   ;;  %v1951_v36 = vld [vmem:[%s2513_s5 + $0x3e0] ss:$16 sps:$4 sm:$0xff]   ;;  %v2013_v18 = vld [vmem:[%s2513_s5 + $0x2a8] ss:$16 sps:$4 sm:$0xff]  }
  0x7d   : > { %1342 = vmatpush1.bf16.msra.mxu0 %v1926_v19  ;;  %v1952_v37 = vld [vmem:[%s2513_s5 + $0x1c4] ss:$16 sps:$4 sm:$0xff]   ;;  %v1956_v39 = vld [vmem:[%s2513_s5 + $0x1c0] ss:$16 sps:$4 sm:$0xff]   ;;  %v2018_v19 = vld [vmem:[%s2513_s5 + $0x8c] ss:$16 sps:$4 sm:$0xff]  }
  0x7e   : > { %1383 = vmatpush1.bf16.msra.mxu1 %v1927_v20  ;;  %1343 = vmatprep.subr.bf16.mxu0 %v1928_v21  ;;  %v1954_v38 = vld [vmem:[%s2513_s5 + $0x3c4] ss:$16 sps:$4 sm:$0xff]   ;;  %v1957_v40 = vld [vmem:[%s2513_s5 + $0x3c0] ss:$16 sps:$4 sm:$0xff]   ;;  %v2021_v20 = vld [vmem:[%s2513_s5 + $0x28c] ss:$16 sps:$4 sm:$0xff]  }
  0x7f   : > { %1384 = vmatprep.subr.bf16.mxu1 %v1930_v22  ;;  %v1958_v41 = vld [vmem:[%s2513_s5 + $0x1a4] ss:$16 sps:$4 sm:$0xff]   ;;  %v1962_v43 = vld [vmem:[%s2513_s5 + $0x1a0] ss:$16 sps:$4 sm:$0xff]   ;;  %v2016_v21 = vld [vmem:[%s2513_s5 + $0x88] ss:$16 sps:$4 sm:$0xff]  }
  0x80   : > { %v1960_v42 = vld [vmem:[%s2513_s5 + $0x3a4] ss:$16 sps:$4 sm:$0xff]   ;;  %v1963_v44 = vld [vmem:[%s2513_s5 + $0x3a0] ss:$16 sps:$4 sm:$0xff]   ;;  %v2019_v22 = vld [vmem:[%s2513_s5 + $0x288] ss:$16 sps:$4 sm:$0xff]  }
  0x81   : > { %1344 = vmatpush1.bf16.msra.mxu0 %v1932_v23  ;;  %v1964_v45 = vld [vmem:[%s2513_s5 + $0x184] ss:$16 sps:$4 sm:$0xff]   ;;  %v1968_v50 = vld [vmem:[%s2513_s5 + $0x180] ss:$16 sps:$4 sm:$0xff]   ;;  %v2024_v23 = vld [vmem:[%s2513_s5 + $0x6c] ss:$16 sps:$4 sm:$0xff]  }
  0x82   : > { %1385 = vmatpush1.bf16.msra.mxu1 %v1933_v24  ;;  %1345 = vmatprep.subr.bf16.mxu0 %v1934_v25  ;;  %v1966_v46 = vld [vmem:[%s2513_s5 + $0x384] ss:$16 sps:$4 sm:$0xff]   ;;  %v1969_v51 = vld [vmem:[%s2513_s5 + $0x380] ss:$16 sps:$4 sm:$0xff]   ;;  %v2027_v24 = vld [vmem:[%s2513_s5 + $0x26c] ss:$16 sps:$4 sm:$0xff]  }
  0x83   : > { %1386 = vmatprep.subr.bf16.mxu1 %v1936_v26  ;;  %v549_v47 = vld [vmem:[%s2499_s26] sm:$0xff]  ;;  %v2022_v25 = vld [vmem:[%s2513_s5 + $0x68] ss:$16 sps:$4 sm:$0xff]  }
  0x84   : > { %v2563_v48 = vcombine.high %v549_v47, %v549_v47  ;;  %v1970_v53 = vld [vmem:[%s2513_s5 + $0x164] ss:$16 sps:$4 sm:$0xff]   ;;  %v1974_v55 = vld [vmem:[%s2513_s5 + $0x160] ss:$16 sps:$4 sm:$0xff]   ;;  %v2587_v7 = vcombine.low %v549_v47, %v549_v47  ;;  %v2025_v26 = vld [vmem:[%s2513_s5 + $0x268] ss:$16 sps:$4 sm:$0xff]  }
  0x85   : > { %1346 = vmatpush1.bf16.msra.mxu0 %v1938_v27  ;;  %v1972_v54 = vld [vmem:[%s2513_s5 + $0x364] ss:$16 sps:$4 sm:$0xff]   ;;  %v1975_v56 = vld [vmem:[%s2513_s5 + $0x360] ss:$16 sps:$4 sm:$0xff]   ;;  %v2030_v27 = vld [vmem:[%s2513_s5 + $0x4c] ss:$16 sps:$4 sm:$0xff]  }
  0x86   : > { %1387 = vmatpush1.bf16.msra.mxu1 %v1939_v28  ;;  %1347 = vmatprep.subr.bf16.mxu0 %v1940_v29  ;;  %v1976_v57 = vld [vmem:[%s2513_s5 + $0x144] ss:$16 sps:$4 sm:$0xff]   ;;  %v1980_v59 = vld [vmem:[%s2513_s5 + $0x140] ss:$16 sps:$4 sm:$0xff]   ;;  %v2033_v28 = vld [vmem:[%s2513_s5 + $0x24c] ss:$16 sps:$4 sm:$0xff]  }
  0x87   : > { %1388 = vmatprep.subr.bf16.mxu1 %v1942_v30  ;;  %1365 = vmatprep.mubr.bf16.mxu0 %v2563_v48  ;;  %v1978_v58 = vld [vmem:[%s2513_s5 + $0x344] ss:$16 sps:$4 sm:$0xff]   ;;  %v1981_v60 = vld [vmem:[%s2513_s5 + $0x340] ss:$16 sps:$4 sm:$0xff]   ;;  %v2028_v29 = vld [vmem:[%s2513_s5 + $0x48] ss:$16 sps:$4 sm:$0xff]  }
  0x88   : > { %v1982_v61 = vld [vmem:[%s2513_s5 + $0x124] ss:$16 sps:$4 sm:$0xff]   ;;  %v1986_v63 = vld [vmem:[%s2513_s5 + $0x120] ss:$16 sps:$4 sm:$0xff]   ;;  %v2031_v30 = vld [vmem:[%s2513_s5 + $0x248] ss:$16 sps:$4 sm:$0xff]  }
  0x89   : > { %1348 = vmatpush1.bf16.msra.mxu0 %v1944_v31  ;;  %v1984_v62 = vld [vmem:[%s2513_s5 + $0x324] ss:$16 sps:$4 sm:$0xff]   ;;  %v1987_v0 = vld [vmem:[%s2513_s5 + $0x320] ss:$16 sps:$4 sm:$0xff]   ;;  %v2036_v31 = vld [vmem:[%s2513_s5 + $0x2c] ss:$16 sps:$4 sm:$0xff]  }
  0x8a   : > { %1389 = vmatpush1.bf16.msra.mxu1 %v1945_v32  ;;  %1349 = vmatprep.subr.bf16.mxu0 %v1946_v33  ;;  %v1988_v1 = vld [vmem:[%s2513_s5 + $0x104] ss:$16 sps:$4 sm:$0xff]   ;;  %v1992_v3 = vld [vmem:[%s2513_s5 + $0x100] ss:$16 sps:$4 sm:$0xff]   ;;  %v2039_v32 = vld [vmem:[%s2513_s5 + $0x22c] ss:$16 sps:$4 sm:$0xff]  }
  0x8b   : > { %1390 = vmatprep.subr.bf16.mxu1 %v1948_v34  ;;  %v1990_v2 = vld [vmem:[%s2513_s5 + $0x304] ss:$16 sps:$4 sm:$0xff]   ;;  %v1993_v4 = vld [vmem:[%s2513_s5 + $0x300] ss:$16 sps:$4 sm:$0xff]   ;;  %v2034_v33 = vld [vmem:[%s2513_s5 + $0x28] ss:$16 sps:$4 sm:$0xff]  }
  0x8c   : > { %v2037_v34 = vld [vmem:[%s2513_s5 + $0x228] ss:$16 sps:$4 sm:$0xff]   ;;  %v2060_v47 = vld [vmem:[%s2513_s5 + $0x1ac] ss:$16 sps:$4 sm:$0xff]  }
  0x8d   : > { %1350 = vmatpush2.bf16.msra.mxu0 %v1950_v35  ;;  %v2042_v35 = vld [vmem:[%s2513_s5 + $0xc] ss:$16 sps:$4 sm:$0xff]  }
  0x8e   : > { %1391 = vmatpush2.bf16.msra.mxu1 %v1951_v36  ;;  %1351 = vmatprep.subr.bf16.mxu0 %v1952_v37  ;;  %v2045_v36 = vld [vmem:[%s2513_s5 + $0x20c] ss:$16 sps:$4 sm:$0xff]   ;;  %v2040_v37 = vld [vmem:[%s2513_s5 + $0x8] ss:$16 sps:$4 sm:$0xff]  }
  0x8f   : > { %1392 = vmatprep.subr.bf16.mxu1 %v1954_v38  ;;  %v2043_v38 = vld [vmem:[%s2513_s5 + $0x208] ss:$16 sps:$4 sm:$0xff]  }
  0x91   : > { %1352 = vmatpush2.bf16.msra.mxu0 %v1956_v39  ;;  %v2048_v39 = vld [vmem:[%s2513_s5 + $0x1ec] ss:$16 sps:$4 sm:$0xff]  }
  0x92   : > { %1393 = vmatpush2.bf16.msra.mxu1 %v1957_v40  ;;  %1353 = vmatprep.subr.bf16.mxu0 %v1958_v41  ;;  %v2051_v40 = vld [vmem:[%s2513_s5 + $0x3ec] ss:$16 sps:$4 sm:$0xff]   ;;  %v2046_v41 = vld [vmem:[%s2513_s5 + $0x1e8] ss:$16 sps:$4 sm:$0xff]  }
  0x93   : > { %1394 = vmatprep.subr.bf16.mxu1 %v1960_v42  ;;  %v2049_v42 = vld [vmem:[%s2513_s5 + $0x3e8] ss:$16 sps:$4 sm:$0xff]  }
  0x95   : > { %1354 = vmatpush2.bf16.msra.mxu0 %v1962_v43  ;;  %v2054_v43 = vld [vmem:[%s2513_s5 + $0x1cc] ss:$16 sps:$4 sm:$0xff]  }
  0x96   : > { %1395 = vmatpush2.bf16.msra.mxu1 %v1963_v44  ;;  %1355 = vmatprep.subr.bf16.mxu0 %v1964_v45  ;;  %v2057_v44 = vld [vmem:[%s2513_s5 + $0x3cc] ss:$16 sps:$4 sm:$0xff]   ;;  %v2052_v45 = vld [vmem:[%s2513_s5 + $0x1c8] ss:$16 sps:$4 sm:$0xff]  }
  0x97   : > { %1396 = vmatprep.subr.bf16.mxu1 %v1966_v46  ;;  %v2055_v46 = vld [vmem:[%s2513_s5 + $0x3c8] ss:$16 sps:$4 sm:$0xff]  }
  0x99   : > { %1356 = vmatpush2.bf16.msra.mxu0 %v1968_v50  ;;  %v2061_v50 = vld [vmem:[%s2513_s5 + $0x3a8] ss:$16 sps:$4 sm:$0xff]  }
  0x9a   : > { %1397 = vmatpush2.bf16.msra.mxu1 %v1969_v51  ;;  %1357 = vmatprep.subr.bf16.mxu0 %v1970_v53  ;;  %v2066_v51 = vld [vmem:[%s2513_s5 + $0x18c] ss:$16 sps:$4 sm:$0xff]   ;;  %v2064_v53 = vld [vmem:[%s2513_s5 + $0x188] ss:$16 sps:$4 sm:$0xff]  }
  0x9b   : > { %1398 = vmatprep.subr.bf16.mxu1 %v1972_v54  ;;  %v2067_v54 = vld [vmem:[%s2513_s5 + $0x388] ss:$16 sps:$4 sm:$0xff]  }
  0x9d   : > { %1358 = vmatpush2.bf16.msra.mxu0 %v1974_v55  ;;  %v2072_v55 = vld [vmem:[%s2513_s5 + $0x16c] ss:$16 sps:$4 sm:$0xff]  }
  0x9e   : > { %1399 = vmatpush2.bf16.msra.mxu1 %v1975_v56  ;;  %1359 = vmatprep.subr.bf16.mxu0 %v1976_v57  ;;  %v2075_v56 = vld [vmem:[%s2513_s5 + $0x36c] ss:$16 sps:$4 sm:$0xff]   ;;  %v2070_v57 = vld [vmem:[%s2513_s5 + $0x168] ss:$16 sps:$4 sm:$0xff]  }
  0x9f   : > { %1400 = vmatprep.subr.bf16.mxu1 %v1978_v58  ;;  %v2073_v58 = vld [vmem:[%s2513_s5 + $0x368] ss:$16 sps:$4 sm:$0xff]  }
  0xa1   : > { %1360 = vmatpush2.bf16.msra.mxu0 %v1980_v59  ;;  %v2078_v59 = vld [vmem:[%s2513_s5 + $0x14c] ss:$16 sps:$4 sm:$0xff]  }
  0xa2   : > { %1401 = vmatpush2.bf16.msra.mxu1 %v1981_v60  ;;  %1361 = vmatprep.subr.bf16.mxu0 %v1982_v61  ;;  %v2081_v60 = vld [vmem:[%s2513_s5 + $0x34c] ss:$16 sps:$4 sm:$0xff]   ;;  %v2076_v61 = vld [vmem:[%s2513_s5 + $0x148] ss:$16 sps:$4 sm:$0xff]  }
  0xa3   : > { %1402 = vmatprep.subr.bf16.mxu1 %v1984_v62  ;;  %v2079_v62 = vld [vmem:[%s2513_s5 + $0x348] ss:$16 sps:$4 sm:$0xff]  }
  0xa5   : > { %1362 = vmatpush2.bf16.msra.mxu0 %v1986_v63  ;;  %v2084_v63 = vld [vmem:[%s2513_s5 + $0x12c] ss:$16 sps:$4 sm:$0xff]  }
  0xa6   : > { %1403 = vmatpush2.bf16.msra.mxu1 %v1987_v0  ;;  %1363 = vmatprep.subr.bf16.mxu0 %v1988_v1  ;;  %v2087_v0 = vld [vmem:[%s2513_s5 + $0x32c] ss:$16 sps:$4 sm:$0xff]   ;;  %v2082_v1 = vld [vmem:[%s2513_s5 + $0x128] ss:$16 sps:$4 sm:$0xff]  }
  0xa7   : > { %1404 = vmatprep.subr.bf16.mxu1 %v1990_v2  ;;  %v2085_v2 = vld [vmem:[%s2513_s5 + $0x328] ss:$16 sps:$4 sm:$0xff]  }
  0xa9   : > { %1364 = vmatpush2.bf16.msra.mxu0 %v1992_v3  ;;  %v2090_v3 = vld [vmem:[%s2513_s5 + $0x10c] ss:$16 sps:$4 sm:$0xff]  }
  0xaa   : > { %1405 = vmatpush2.bf16.msra.mxu1 %v1993_v4  ;;  %1415 = vmatprep.subr.bf16.mxu0 %v2000_v5  ;;  %v2093_v4 = vld [vmem:[%s2513_s5 + $0x30c] ss:$16 sps:$4 sm:$0xff]   ;;  %v2088_v5 = vld [vmem:[%s2513_s5 + $0x108] ss:$16 sps:$4 sm:$0xff]  }
  0xab   : > { %1456 = vmatprep.subr.bf16.mxu1 %v2003_v6  ;;  %v2091_v6 = vld [vmem:[%s2513_s5 + $0x308] ss:$16 sps:$4 sm:$0xff]  }
  0xac   : > { %1366 = vmatmul.mubr.bf16.vlgmr.msra.gmra.mxu0 %v2587_v7 }
  0xad   : > { %1407 = vmatmul.mubr.bf16.vlgmr.msra.gmra.mxu1 %v2589_v8  ;;  %1416 = vmatpush1.bf16.msra.mxu0 %v1998_v9 }
  0xae   : > { %1457 = vmatpush1.bf16.msra.mxu1 %v2001_v10  ;;  %1417 = vmatprep.subr.bf16.mxu0 %v2006_v11  ;;  %v545_v10 = vld [vmem:[#allocation2 + $0x10] sm:$0xff] }
  0xaf   : > { %1458 = vmatprep.subr.bf16.mxu1 %v2009_v12  ;;  %1447 = vmatprep.mubr.bf16.mxu0 %v2563_v48  ;;  %v2063_v48 = vld [vmem:[%s2513_s5 + $0x3ac] ss:$16 sps:$4 sm:$0xff]  }
  0xb0   : > { %1488 = vmatprep.mubr.bf16.mxu1 %v1704_v52  ;;  %v2069_v52 = vld [vmem:[%s2513_s5 + $0x38c] ss:$16 sps:$4 sm:$0xff]  }
  0xb1   : > { %1418 = vmatpush1.bf16.msra.mxu0 %v2004_v13 }
  0xb2   : > { %1459 = vmatpush1.bf16.msra.mxu1 %v2007_v14  ;;  %1419 = vmatprep.subr.bf16.mxu0 %v2012_v15  ;;  %v546_v14 = vld [vmem:[#allocation2] sm:$0xff] }
  0xb3   : > { %1460 = vmatprep.subr.bf16.mxu1 %v2015_v16 }
  0xb5   : > { %1420 = vmatpush1.bf16.msra.mxu0 %v2010_v17 }
  0xb6   : > { %1461 = vmatpush1.bf16.msra.mxu1 %v2013_v18  ;;  %1421 = vmatprep.subr.bf16.mxu0 %v2018_v19 }
  0xb7   : > { %1462 = vmatprep.subr.bf16.mxu1 %v2021_v20 }
  0xb9   : > { %1422 = vmatpush1.bf16.msra.mxu0 %v2016_v21 }
  0xba   : > { %1463 = vmatpush1.bf16.msra.mxu1 %v2019_v22  ;;  %1423 = vmatprep.subr.bf16.mxu0 %v2024_v23 }
  0xbb   : > { %1464 = vmatprep.subr.bf16.mxu1 %v2027_v24 }
  0xbd   : > { %1424 = vmatpush1.bf16.msra.mxu0 %v2022_v25 }
  0xbe   : > { %1465 = vmatpush1.bf16.msra.mxu1 %v2025_v26  ;;  %1425 = vmatprep.subr.bf16.mxu0 %v2030_v27  ;;  %v548_v26 = vld [vmem:[#allocation2 + $0x8] sm:$0xff] }
  0xbf   : > { %1466 = vmatprep.subr.bf16.mxu1 %v2033_v28 }
  0xc1   : > { %1426 = vmatpush1.bf16.msra.mxu0 %v2028_v29 }
  0xc2   : > { %1467 = vmatpush1.bf16.msra.mxu1 %v2031_v30  ;;  %1427 = vmatprep.subr.bf16.mxu0 %v2036_v31 }
  0xc3   : > { %1468 = vmatprep.subr.bf16.mxu1 %v2039_v32 }
  0xc5   : > { %1428 = vmatpush1.bf16.msra.mxu0 %v2034_v33 }
  0xc6   : > { %1469 = vmatpush1.bf16.msra.mxu1 %v2037_v34  ;;  %1429 = vmatprep.subr.bf16.mxu0 %v2042_v35 }
  0xc7   : > { %1470 = vmatprep.subr.bf16.mxu1 %v2045_v36 }
  0xc9   : > { %1430 = vmatpush1.bf16.msra.mxu0 %v2040_v37 }
  0xca   : > { %1471 = vmatpush1.bf16.msra.mxu1 %v2043_v38  ;;  %1431 = vmatprep.subr.bf16.mxu0 %v2048_v39 }
  0xcb   : > { %1472 = vmatprep.subr.bf16.mxu1 %v2051_v40 }
  0xcd   : > { %1432 = vmatpush2.bf16.msra.mxu0 %v2046_v41 }
  0xce   : > { %1473 = vmatpush2.bf16.msra.mxu1 %v2049_v42  ;;  %1433 = vmatprep.subr.bf16.mxu0 %v2054_v43 }
  0xcf   : > { %1474 = vmatprep.subr.bf16.mxu1 %v2057_v44 }
  0xd1   : > { %1434 = vmatpush2.bf16.msra.mxu0 %v2052_v45 }
  0xd2   : > { %1475 = vmatpush2.bf16.msra.mxu1 %v2055_v46  ;;  %1435 = vmatprep.subr.bf16.mxu0 %v2060_v47 }
  0xd3   : > { %1476 = vmatprep.subr.bf16.mxu1 %v2063_v48 }
  0xd5   : > { %1436 = vmatpush2.bf16.msra.mxu0 %v2058_v49 }
  0xd6   : > { %1477 = vmatpush2.bf16.msra.mxu1 %v2061_v50  ;;  %1437 = vmatprep.subr.bf16.mxu0 %v2066_v51 }
  0xd7   : > { %1478 = vmatprep.subr.bf16.mxu1 %v2069_v52 }
  0xd9   : > { %1438 = vmatpush2.bf16.msra.mxu0 %v2064_v53 }
  0xda   : > { %1479 = vmatpush2.bf16.msra.mxu1 %v2067_v54  ;;  %1439 = vmatprep.subr.bf16.mxu0 %v2072_v55 }
  0xdb   : > { %1480 = vmatprep.subr.bf16.mxu1 %v2075_v56 }
  0xdd   : > { %1440 = vmatpush2.bf16.msra.mxu0 %v2070_v57 }
  0xde   : > { %1481 = vmatpush2.bf16.msra.mxu1 %v2073_v58  ;;  %1441 = vmatprep.subr.bf16.mxu0 %v2078_v59 }
  0xdf   : > { %1482 = vmatprep.subr.bf16.mxu1 %v2081_v60 }
  0xe1   : > { %1442 = vmatpush2.bf16.msra.mxu0 %v2076_v61 }
  0xe2   : > { %1483 = vmatpush2.bf16.msra.mxu1 %v2079_v62  ;;  %1443 = vmatprep.subr.bf16.mxu0 %v2084_v63 }
  0xe3   : > { %1484 = vmatprep.subr.bf16.mxu1 %v2087_v0 }
  0xe5   : > { %1444 = vmatpush2.bf16.msra.mxu0 %v2082_v1 }
  0xe6   : > { %1485 = vmatpush2.bf16.msra.mxu1 %v2085_v2  ;;  %1445 = vmatprep.subr.bf16.mxu0 %v2090_v3 }
  0xe7   : > { %1486 = vmatprep.subr.bf16.mxu1 %v2093_v4 }
  0xe9   : > { %1446 = vmatpush2.bf16.msra.mxu0 %v2088_v5 }
  0xea   : > { %1487 = vmatpush2.bf16.msra.mxu1 %v2091_v6 }
  0xec   : > { %1448 = vmatmul.mubr.bf16.vlgmr.msra.gmra.mxu0 %v2587_v7  ;;  %v547_v7 = vld [vmem:[#allocation2 + $0x18] sm:$0xff] }
  0xed   : > { %1489 = vmatmul.mubr.bf16.vlgmr.msra.gmra.mxu1 %v2589_v8 }
 0x16c   : > { %v1367_v9 = vpop.f32.mrf.mxu0 }
 0x16d   : > { %v1408_v11 = vpop.f32.mrf.mxu1 }
 0x16e   : > { %v1409_v12 = vadd.f32 %v1408_v11, %v1367_v9  ;;  %v1369_v13 = vpop.f32.mrf.mxu0 }
 0x16f   : > { %v1410_v15 = vpop.f32.mrf.mxu1 }
 0x170   : > { %v1497_v16 = vadd.f32 %v1409_v12, %v545_v10  ;;  %v1411_v17 = vadd.f32 %v1410_v15, %v1369_v13  ;;  %v1371_v18 = vpop.f32.mrf.mxu0 }
 0x171   : > { %v1412_v19 = vpop.f32.mrf.mxu1 }
 0x172   : > { %1501 = vst [vmem:[#allocation2 + $0x10] sm:$0xff] %v1497_v16  ;;  %v1498_v20 = vadd.f32 %v1411_v17, %v546_v14  ;;  %v1372_v21 = vpop.f32.mrf.mxu0 }
 0x173   : > { %v1413_v22 = vpop.f32.mrf.mxu1 }
 0x174   : > { %1502 = vst [vmem:[#allocation2] sm:$0xff] %v1498_v20 }
 0x1ac   : > { %v1449_v23 = vpop.f32.mrf.mxu0 }
 0x1ad   : > { %v1490_v24 = vpop.f32.mrf.mxu1 }
 0x1ae   : > { %v1491_v8 = vadd.f32 %v1490_v24, %v1449_v23  ;;  %v1451_v25 = vpop.f32.mrf.mxu0 }
 0x1af   : > { %v1492_v27 = vpop.f32.mrf.mxu1 }
 0x1b0   : > { %v1499_v28 = vadd.f32 %v1491_v8, %v547_v7  ;;  %v1493_v29 = vadd.f32 %v1492_v27, %v1451_v25  ;;  %v1453_v30 = vpop.f32.mrf.mxu0  ;;  %1508 = sbr.rel (%p1833_p13) target bundleno = 452 (0x1c4), region = 63 }
 0x1b1   : > { %v1494_v31 = vpop.f32.mrf.mxu1 }
 0x1b2   : > { %1503 = vst [vmem:[#allocation2 + $0x18] sm:$0xff] %v1499_v28  ;;  %v1500_v32 = vadd.f32 %v1493_v29, %v548_v26  ;;  %v1454_v33 = vpop.f32.mrf.mxu0 }
 0x1b3   : > { %v1495_v34 = vpop.f32.mrf.mxu1 }
 0x1b4   : > { %1504 = vst [vmem:[#allocation2 + $0x8] sm:$0xff] %v1500_v32 }
 0x1b5   : > { %v1515_v35 = vlaneseq  ;;  %v1513_v37 = vld [vmem:[%s525_s12] sm:$0xf]  ;;  %v1509_v38 = vld [vmem:[#allocation2 + $0x10] sm:$0xff] }
 0x1b6   : > { %v1510_v43 = vld [vmem:[#allocation2] sm:$0xff] }
 0x1b7   : > { %v1516_v36 = vshrl.u32 %v1515_v35, 7 }
 0x1b9   : > { %v1517_v39 = vsub.s32 0, %v1516_v36  ;;  %v1521_v40 = vsub.s32 1, %v1516_v36  ;;  %v1525_v41 = vsub.s32 2, %v1516_v36  ;;  %v1529_v42 = vsub.s32 3, %v1516_v36  ;;  %v1511_v44 = vld [vmem:[#allocation2 + $0x18] sm:$0xff] }
 0x1bb   : > { %v1512_v45 = vld [vmem:[#allocation2 + $0x8] sm:$0xff]  ;;  %v1518_v46 = vrot.slane %v1513_v37, %v1517_v39  ;;  %v1522_v47 = vrot.slane %v1513_v37, %v1521_v40  ;;  %v1526_v48 = vrot.slane %v1513_v37, %v1525_v41  ;;  %v1530_v49 = vrot.slane %v1513_v37, %v1529_v42 }
 0x1bd   : > { %v1535_v50 = vadd.f32 %v1518_v46, %v1509_v38  ;;  %v1536_v51 = vadd.f32 %v1522_v47, %v1510_v43  ;;  %v1537_v52 = vadd.f32 %v1526_v48, %v1511_v44  ;;  %v1538_v53 = vadd.f32 %v1530_v49, %v1512_v45 }
 0x1bf   : > { %v1539_v54 = vmax.f32 %v1535_v50, 0.0  ;;  %v1540_v55 = vmax.f32 %v1536_v51, 0.0  ;;  %v1541_v56 = vmax.f32 %v1537_v52, 0.0  ;;  %v1542_v57 = vmax.f32 %v1538_v53, 0.0 }
 0x1c1   : > { %v1839_v58 = vpack.c.bf16 %v1540_v55, %v1539_v54  ;;  %v1840_v59 = vpack.c.bf16 %v1542_v57, %v1541_v56 }
 0x1c3   : > { %1559 = vst [vmem:[%s2511_s15] sm:$0xff] %v1839_v58  ;;  %1560 = vst [vmem:[%s2511_s15 + $0x8] sm:$0xff] %v1840_v59 }
 0x1c4 PF: > { %s13_s18 = sadd.s32 1, %s2148_s18   ;;  %s2691_s12 = smov %s2128_s13 }
 0x1c5   : > { %p10_p0 = scmp.ge.s32.totalorder %s13_s18, 146   ;;  %s2692_s13 = smov %s2222_s25 }
 0x1c6   : > { %s2693_s14 = smov %s2140_s16  ;;  %s2694_s15 = smov %s2144_s17 }
 0x1c7   : > { %s2695_s16 = smov %s2698_s19  ;;  %s2696_s17 = smov %s2702_s20 }
 0x1c8   :  { %12 = sbr.rel (!%p10_p0) target bundleno = 4 (0x4), region = 104 }

// kernel: alexnet_forward.26
= control target key start
LH: loop header
LB: loop body
LE: loop exit
PB: predicated region body
PF: predicated region fallthrough
CT: control target
= control target key end

     0   :  { %s2171_s12 = smov 0   ;;  %s2173_s13 = smov 0   ;;  %s2687_s0 = inlined_call_operand.vmem [shape: bf16[8,4096], index: 0, kind: input, shape index: {}]   ;;  %s2688_s1 = inlined_call_operand.vmem [shape: bf16[4096,4096], index: 1, kind: input, shape index: {}]   ;;  %s2689_s2 = inlined_call_operand.vmem [shape: f32[1,4096], index: 2, kind: input, shape index: {}]   ;;  %s2690_s3 = inlined_call_operand.vmem [shape: bf16[8,4096], index: 3, kind: output, shape index: {}]  }
   0x1   :  { %s2175_s14 = smov 0   ;;  %s2177_s15 = smov 0  }
   0x2   :  { %s2179_s16 = smov 0   ;;  %s2181_s17 = smov 0  }
   0x3   :  { %s2183_s18 = smov 0  }
   0x4 LB: > { %s25_s19 = sadd.s32 1, %s2140_s16  ;;  %s28_s20 = sadd.s32 1, %s2144_s17  ;;  %s2148_s18 = sphi %s2183_s18, %s13_s18   ;;  %s2144_s17 = sphi %s2181_s17, %s2696_s17   ;;  %s2140_s16 = sphi %s2179_s16, %s2695_s16   ;;  %s2136_s15 = sphi %s2177_s15, %s2694_s15   ;;  %s2132_s14 = sphi %s2175_s14, %s2693_s14   ;;  %s2128_s13 = sphi %s2173_s13, %s2692_s13   ;;  %s2124_s12 = sphi %s2171_s12, %s2691_s12  }
   0x5   : > { %p26_p0 = scmp.ge.s32.totalorder %s25_s19, 8  ;;  %p76_p1 = scmp.ne.s32.totalorder %s2128_s13, %s2124_s12 }
   0x6   : > { %p77_p2 = scmp.eq.s32.totalorder %s2148_s18, 0  ;;  %s69_s24 = sadd.s32 1, %s2128_s13 }
   0x7   : > { %s2698_s19 = smov (%p26_p0, %s25_s19), 0  ;;  %s2700_s20 = smov (!%p26_p0, %s28_s20), %s2144_s17 }
   0x8   : > { %p78_p3 = por %p77_p2, %p76_p1  ;;  %p30_p4 = scmp.ge.s32.totalorder %s2700_s20, 8 }
   0x9   : > { %s64_s21 = ssub.s32 %s2140_s16, %s2698_s19  ;;  %p1687_p6 = scmp.ge.s32.totalorder %s2148_s18, 64 }
   0xa   : > { %s2702_s20 = smov (%p30_p4, %s2700_s20), 0 }
   0xb   : > { %s65_s22 = ssub.s32 %s2144_s17, %s2702_s20  ;;  %156 = sbr.rel (%p1687_p6) target bundleno = 87 (0x57), region = 16 }
   0xc   : > { %s66_s23 = sor.u32 %s65_s22, %s64_s21 }
   0xd   : > { %p67_p5 = scmp.eq.s32.totalorder %s66_s23, 0 }
   0xf   : > { %s2222_s25 = scalar_select %p67_p5, %s2128_s13, %s69_s24  }
  0x10   : > { %172 = sbr.rel (!%p78_p3) target bundleno = 87 (0x57), region = 24  ;;  %s174_s26 = sand.u32 (%p78_p3), 1, %s2128_s13  }
  0x11   : > { %s1690_s27 = sshll.u32 (%p78_p3), %s2144_s17, 2  ;;  %s1688_s28 = sshll.u32 (%p78_p3), %s174_s26, 10 }
  0x12   : > { %s1838_s29 = sshll.u32 (%p78_p3), %s2140_s16, 11  ;;  %s2236_s8 = scalar_lea.vmem (%p78_p3), [#allocation3], %s1688_s28 }
  0x13   : > { %s180_s30 = sadd.s32 (%p78_p3), %s1838_s29, %s1690_s27 }
  0x14   : > { %s1692_s4 = sshll.u32 (%p78_p3), %s180_s30, 2 }
  0x15   : > { %s2231_s7 = scalar_lea.vmem %s2688_s1, %s1692_s4 }
  0x16   : > { %v195_v0 = vld [vmem:[%s2231_s7] sm:$0xff]  ;;  %v197_v1 = vld [vmem:[%s2231_s7 + $0x8] sm:$0xff] }
  0x17   : > { %v199_v2 = vld [vmem:[%s2231_s7 + $0x80] sm:$0xff]  ;;  %196 = vst [vmem:[%s2236_s8] sm:$0xff] %v195_v0  ;;  %198 = vst [vmem:[%s2236_s8 + $0x8] sm:$0xff] %v197_v1  ;;  %v201_v3 = vld [vmem:[%s2231_s7 + $0x88] sm:$0xff] }
  0x18   : > { %200 = vst [vmem:[%s2236_s8 + $0x10] sm:$0xff] %v199_v2  ;;  %v203_v4 = vld [vmem:[%s2231_s7 + $0x100] sm:$0xff]  ;;  %v205_v5 = vld [vmem:[%s2231_s7 + $0x108] sm:$0xff]  ;;  %202 = vst [vmem:[%s2236_s8 + $0x18] sm:$0xff] %v201_v3 }
  0x19   : > { %204 = vst [vmem:[%s2236_s8 + $0x20] sm:$0xff] %v203_v4  ;;  %206 = vst [vmem:[%s2236_s8 + $0x28] sm:$0xff] %v205_v5  ;;  %v207_v6 = vld [vmem:[%s2231_s7 + $0x180] sm:$0xff]  ;;  %v209_v7 = vld [vmem:[%s2231_s7 + $0x188] sm:$0xff] }
  0x1a   : > { %v211_v8 = vld [vmem:[%s2231_s7 + $0x200] sm:$0xff]  ;;  %208 = vst [vmem:[%s2236_s8 + $0x30] sm:$0xff] %v207_v6  ;;  %210 = vst [vmem:[%s2236_s8 + $0x38] sm:$0xff] %v209_v7  ;;  %v213_v9 = vld [vmem:[%s2231_s7 + $0x208] sm:$0xff] }
  0x1b   : > { %212 = vst [vmem:[%s2236_s8 + $0x40] sm:$0xff] %v211_v8  ;;  %v215_v10 = vld [vmem:[%s2231_s7 + $0x280] sm:$0xff]  ;;  %v217_v11 = vld [vmem:[%s2231_s7 + $0x288] sm:$0xff]  ;;  %214 = vst [vmem:[%s2236_s8 + $0x48] sm:$0xff] %v213_v9 }
  0x1c   : > { %216 = vst [vmem:[%s2236_s8 + $0x50] sm:$0xff] %v215_v10  ;;  %218 = vst [vmem:[%s2236_s8 + $0x58] sm:$0xff] %v217_v11  ;;  %v219_v12 = vld [vmem:[%s2231_s7 + $0x300] sm:$0xff]  ;;  %v221_v13 = vld [vmem:[%s2231_s7 + $0x308] sm:$0xff] }
  0x1d   : > { %v223_v14 = vld [vmem:[%s2231_s7 + $0x380] sm:$0xff]  ;;  %220 = vst [vmem:[%s2236_s8 + $0x60] sm:$0xff] %v219_v12  ;;  %222 = vst [vmem:[%s2236_s8 + $0x68] sm:$0xff] %v221_v13  ;;  %v225_v15 = vld [vmem:[%s2231_s7 + $0x388] sm:$0xff] }
  0x1e   : > { %224 = vst [vmem:[%s2236_s8 + $0x70] sm:$0xff] %v223_v14  ;;  %v227_v16 = vld [vmem:[%s2231_s7 + $0x400] sm:$0xff]  ;;  %v229_v17 = vld [vmem:[%s2231_s7 + $0x408] sm:$0xff]  ;;  %226 = vst [vmem:[%s2236_s8 + $0x78] sm:$0xff] %v225_v15 }
  0x1f   : > { %228 = vst [vmem:[%s2236_s8 + $0x80] sm:$0xff] %v227_v16  ;;  %230 = vst [vmem:[%s2236_s8 + $0x88] sm:$0xff] %v229_v17  ;;  %v231_v18 = vld [vmem:[%s2231_s7 + $0x480] sm:$0xff]  ;;  %v233_v19 = vld [vmem:[%s2231_s7 + $0x488] sm:$0xff] }
  0x20   : > { %v235_v20 = vld [vmem:[%s2231_s7 + $0x500] sm:$0xff]  ;;  %232 = vst [vmem:[%s2236_s8 + $0x90] sm:$0xff] %v231_v18  ;;  %234 = vst [vmem:[%s2236_s8 + $0x98] sm:$0xff] %v233_v19  ;;  %v237_v21 = vld [vmem:[%s2231_s7 + $0x508] sm:$0xff] }
  0x21   : > { %236 = vst [vmem:[%s2236_s8 + $0xa0] sm:$0xff] %v235_v20  ;;  %v239_v22 = vld [vmem:[%s2231_s7 + $0x580] sm:$0xff]  ;;  %v241_v23 = vld [vmem:[%s2231_s7 + $0x588] sm:$0xff]  ;;  %238 = vst [vmem:[%s2236_s8 + $0xa8] sm:$0xff] %v237_v21 }
  0x22   : > { %240 = vst [vmem:[%s2236_s8 + $0xb0] sm:$0xff] %v239_v22  ;;  %242 = vst [vmem:[%s2236_s8 + $0xb8] sm:$0xff] %v241_v23  ;;  %v243_v24 = vld [vmem:[%s2231_s7 + $0x600] sm:$0xff]  ;;  %v245_v25 = vld [vmem:[%s2231_s7 + $0x608] sm:$0xff] }
  0x23   : > { %v247_v26 = vld [vmem:[%s2231_s7 + $0x680] sm:$0xff]  ;;  %244 = vst [vmem:[%s2236_s8 + $0xc0] sm:$0xff] %v243_v24  ;;  %246 = vst [vmem:[%s2236_s8 + $0xc8] sm:$0xff] %v245_v25  ;;  %v249_v27 = vld [vmem:[%s2231_s7 + $0x688] sm:$0xff] }
  0x24   : > { %248 = vst [vmem:[%s2236_s8 + $0xd0] sm:$0xff] %v247_v26  ;;  %v251_v28 = vld [vmem:[%s2231_s7 + $0x700] sm:$0xff]  ;;  %v253_v29 = vld [vmem:[%s2231_s7 + $0x708] sm:$0xff]  ;;  %250 = vst [vmem:[%s2236_s8 + $0xd8] sm:$0xff] %v249_v27 }
  0x25   : > { %252 = vst [vmem:[%s2236_s8 + $0xe0] sm:$0xff] %v251_v28  ;;  %254 = vst [vmem:[%s2236_s8 + $0xe8] sm:$0xff] %v253_v29  ;;  %v255_v30 = vld [vmem:[%s2231_s7 + $0x780] sm:$0xff]  ;;  %v257_v31 = vld [vmem:[%s2231_s7 + $0x788] sm:$0xff] }
  0x26   : > { %v259_v32 = vld [vmem:[%s2231_s7 + $0x800] sm:$0xff]  ;;  %256 = vst [vmem:[%s2236_s8 + $0xf0] sm:$0xff] %v255_v30  ;;  %258 = vst [vmem:[%s2236_s8 + $0xf8] sm:$0xff] %v257_v31  ;;  %v261_v33 = vld [vmem:[%s2231_s7 + $0x808] sm:$0xff] }
  0x27   : > { %260 = vst [vmem:[%s2236_s8 + $0x100] sm:$0xff] %v259_v32  ;;  %v263_v34 = vld [vmem:[%s2231_s7 + $0x880] sm:$0xff]  ;;  %v265_v35 = vld [vmem:[%s2231_s7 + $0x888] sm:$0xff]  ;;  %262 = vst [vmem:[%s2236_s8 + $0x108] sm:$0xff] %v261_v33 }
  0x28   : > { %264 = vst [vmem:[%s2236_s8 + $0x110] sm:$0xff] %v263_v34  ;;  %266 = vst [vmem:[%s2236_s8 + $0x118] sm:$0xff] %v265_v35  ;;  %v267_v36 = vld [vmem:[%s2231_s7 + $0x900] sm:$0xff]  ;;  %v269_v37 = vld [vmem:[%s2231_s7 + $0x908] sm:$0xff] }
  0x29   : > { %v271_v38 = vld [vmem:[%s2231_s7 + $0x980] sm:$0xff]  ;;  %268 = vst [vmem:[%s2236_s8 + $0x120] sm:$0xff] %v267_v36  ;;  %270 = vst [vmem:[%s2236_s8 + $0x128] sm:$0xff] %v269_v37  ;;  %v273_v39 = vld [vmem:[%s2231_s7 + $0x988] sm:$0xff] }
  0x2a   : > { %272 = vst [vmem:[%s2236_s8 + $0x130] sm:$0xff] %v271_v38  ;;  %v275_v40 = vld [vmem:[%s2231_s7 + $0xa00] sm:$0xff]  ;;  %v277_v41 = vld [vmem:[%s2231_s7 + $0xa08] sm:$0xff]  ;;  %274 = vst [vmem:[%s2236_s8 + $0x138] sm:$0xff] %v273_v39 }
  0x2b   : > { %276 = vst [vmem:[%s2236_s8 + $0x140] sm:$0xff] %v275_v40  ;;  %278 = vst [vmem:[%s2236_s8 + $0x148] sm:$0xff] %v277_v41  ;;  %v279_v42 = vld [vmem:[%s2231_s7 + $0xa80] sm:$0xff]  ;;  %v281_v43 = vld [vmem:[%s2231_s7 + $0xa88] sm:$0xff] }
  0x2c   : > { %v283_v44 = vld [vmem:[%s2231_s7 + $0xb00] sm:$0xff]  ;;  %280 = vst [vmem:[%s2236_s8 + $0x150] sm:$0xff] %v279_v42  ;;  %282 = vst [vmem:[%s2236_s8 + $0x158] sm:$0xff] %v281_v43  ;;  %v285_v45 = vld [vmem:[%s2231_s7 + $0xb08] sm:$0xff] }
  0x2d   : > { %284 = vst [vmem:[%s2236_s8 + $0x160] sm:$0xff] %v283_v44  ;;  %v287_v46 = vld [vmem:[%s2231_s7 + $0xb80] sm:$0xff]  ;;  %v289_v47 = vld [vmem:[%s2231_s7 + $0xb88] sm:$0xff]  ;;  %286 = vst [vmem:[%s2236_s8 + $0x168] sm:$0xff] %v285_v45 }
  0x2e   : > { %288 = vst [vmem:[%s2236_s8 + $0x170] sm:$0xff] %v287_v46  ;;  %290 = vst [vmem:[%s2236_s8 + $0x178] sm:$0xff] %v289_v47  ;;  %v291_v48 = vld [vmem:[%s2231_s7 + $0xc00] sm:$0xff]  ;;  %v293_v49 = vld [vmem:[%s2231_s7 + $0xc08] sm:$0xff] }
  0x2f   : > { %v295_v50 = vld [vmem:[%s2231_s7 + $0xc80] sm:$0xff]  ;;  %292 = vst [vmem:[%s2236_s8 + $0x180] sm:$0xff] %v291_v48  ;;  %294 = vst [vmem:[%s2236_s8 + $0x188] sm:$0xff] %v293_v49  ;;  %v297_v51 = vld [vmem:[%s2231_s7 + $0xc88] sm:$0xff] }
  0x30   : > { %296 = vst [vmem:[%s2236_s8 + $0x190] sm:$0xff] %v295_v50  ;;  %v299_v52 = vld [vmem:[%s2231_s7 + $0xd00] sm:$0xff]  ;;  %v301_v53 = vld [vmem:[%s2231_s7 + $0xd08] sm:$0xff]  ;;  %298 = vst [vmem:[%s2236_s8 + $0x198] sm:$0xff] %v297_v51 }
  0x31   : > { %300 = vst [vmem:[%s2236_s8 + $0x1a0] sm:$0xff] %v299_v52  ;;  %302 = vst [vmem:[%s2236_s8 + $0x1a8] sm:$0xff] %v301_v53  ;;  %v303_v54 = vld [vmem:[%s2231_s7 + $0xd80] sm:$0xff]  ;;  %v305_v55 = vld [vmem:[%s2231_s7 + $0xd88] sm:$0xff] }
  0x32   : > { %v307_v56 = vld [vmem:[%s2231_s7 + $0xe00] sm:$0xff]  ;;  %304 = vst [vmem:[%s2236_s8 + $0x1b0] sm:$0xff] %v303_v54  ;;  %306 = vst [vmem:[%s2236_s8 + $0x1b8] sm:$0xff] %v305_v55  ;;  %v309_v57 = vld [vmem:[%s2231_s7 + $0xe08] sm:$0xff] }
  0x33   : > { %308 = vst [vmem:[%s2236_s8 + $0x1c0] sm:$0xff] %v307_v56  ;;  %v311_v58 = vld [vmem:[%s2231_s7 + $0xe80] sm:$0xff]  ;;  %v313_v59 = vld [vmem:[%s2231_s7 + $0xe88] sm:$0xff]  ;;  %310 = vst [vmem:[%s2236_s8 + $0x1c8] sm:$0xff] %v309_v57 }
  0x34   : > { %312 = vst [vmem:[%s2236_s8 + $0x1d0] sm:$0xff] %v311_v58  ;;  %314 = vst [vmem:[%s2236_s8 + $0x1d8] sm:$0xff] %v313_v59  ;;  %v315_v60 = vld [vmem:[%s2231_s7 + $0xf00] sm:$0xff]  ;;  %v317_v61 = vld [vmem:[%s2231_s7 + $0xf08] sm:$0xff] }
  0x35   : > { %v319_v62 = vld [vmem:[%s2231_s7 + $0xf80] sm:$0xff]  ;;  %316 = vst [vmem:[%s2236_s8 + $0x1e0] sm:$0xff] %v315_v60  ;;  %318 = vst [vmem:[%s2236_s8 + $0x1e8] sm:$0xff] %v317_v61  ;;  %v321_v63 = vld [vmem:[%s2231_s7 + $0xf88] sm:$0xff] }
  0x36   : > { %320 = vst [vmem:[%s2236_s8 + $0x1f0] sm:$0xff] %v319_v62  ;;  %v323_v0 = vld [vmem:[%s2231_s7 + $0x1000] sm:$0xff]  ;;  %v325_v1 = vld [vmem:[%s2231_s7 + $0x1008] sm:$0xff]  ;;  %322 = vst [vmem:[%s2236_s8 + $0x1f8] sm:$0xff] %v321_v63 }
  0x37   : > { %324 = vst [vmem:[%s2236_s8 + $0x200] sm:$0xff] %v323_v0  ;;  %326 = vst [vmem:[%s2236_s8 + $0x208] sm:$0xff] %v325_v1  ;;  %v327_v2 = vld [vmem:[%s2231_s7 + $0x1080] sm:$0xff]  ;;  %v329_v3 = vld [vmem:[%s2231_s7 + $0x1088] sm:$0xff] }
  0x38   : > { %v331_v4 = vld [vmem:[%s2231_s7 + $0x1100] sm:$0xff]  ;;  %328 = vst [vmem:[%s2236_s8 + $0x210] sm:$0xff] %v327_v2  ;;  %330 = vst [vmem:[%s2236_s8 + $0x218] sm:$0xff] %v329_v3  ;;  %v333_v5 = vld [vmem:[%s2231_s7 + $0x1108] sm:$0xff] }
  0x39   : > { %332 = vst [vmem:[%s2236_s8 + $0x220] sm:$0xff] %v331_v4  ;;  %v335_v6 = vld [vmem:[%s2231_s7 + $0x1180] sm:$0xff]  ;;  %v337_v7 = vld [vmem:[%s2231_s7 + $0x1188] sm:$0xff]  ;;  %334 = vst [vmem:[%s2236_s8 + $0x228] sm:$0xff] %v333_v5 }
  0x3a   : > { %336 = vst [vmem:[%s2236_s8 + $0x230] sm:$0xff] %v335_v6  ;;  %338 = vst [vmem:[%s2236_s8 + $0x238] sm:$0xff] %v337_v7  ;;  %v339_v8 = vld [vmem:[%s2231_s7 + $0x1200] sm:$0xff]  ;;  %v341_v9 = vld [vmem:[%s2231_s7 + $0x1208] sm:$0xff] }
  0x3b   : > { %v343_v10 = vld [vmem:[%s2231_s7 + $0x1280] sm:$0xff]  ;;  %340 = vst [vmem:[%s2236_s8 + $0x240] sm:$0xff] %v339_v8  ;;  %342 = vst [vmem:[%s2236_s8 + $0x248] sm:$0xff] %v341_v9  ;;  %v345_v11 = vld [vmem:[%s2231_s7 + $0x1288] sm:$0xff] }
  0x3c   : > { %344 = vst [vmem:[%s2236_s8 + $0x250] sm:$0xff] %v343_v10  ;;  %v347_v12 = vld [vmem:[%s2231_s7 + $0x1300] sm:$0xff]  ;;  %v349_v13 = vld [vmem:[%s2231_s7 + $0x1308] sm:$0xff]  ;;  %346 = vst [vmem:[%s2236_s8 + $0x258] sm:$0xff] %v345_v11 }
  0x3d   : > { %348 = vst [vmem:[%s2236_s8 + $0x260] sm:$0xff] %v347_v12  ;;  %350 = vst [vmem:[%s2236_s8 + $0x268] sm:$0xff] %v349_v13  ;;  %v351_v14 = vld [vmem:[%s2231_s7 + $0x1380] sm:$0xff]  ;;  %v353_v15 = vld [vmem:[%s2231_s7 + $0x1388] sm:$0xff] }
  0x3e   : > { %v355_v16 = vld [vmem:[%s2231_s7 + $0x1400] sm:$0xff]  ;;  %352 = vst [vmem:[%s2236_s8 + $0x270] sm:$0xff] %v351_v14  ;;  %354 = vst [vmem:[%s2236_s8 + $0x278] sm:$0xff] %v353_v15  ;;  %v357_v17 = vld [vmem:[%s2231_s7 + $0x1408] sm:$0xff] }
  0x3f   : > { %356 = vst [vmem:[%s2236_s8 + $0x280] sm:$0xff] %v355_v16  ;;  %v359_v18 = vld [vmem:[%s2231_s7 + $0x1480] sm:$0xff]  ;;  %v361_v19 = vld [vmem:[%s2231_s7 + $0x1488] sm:$0xff]  ;;  %358 = vst [vmem:[%s2236_s8 + $0x288] sm:$0xff] %v357_v17 }
  0x40   : > { %360 = vst [vmem:[%s2236_s8 + $0x290] sm:$0xff] %v359_v18  ;;  %362 = vst [vmem:[%s2236_s8 + $0x298] sm:$0xff] %v361_v19  ;;  %v363_v20 = vld [vmem:[%s2231_s7 + $0x1500] sm:$0xff]  ;;  %v365_v21 = vld [vmem:[%s2231_s7 + $0x1508] sm:$0xff] }
  0x41   : > { %v367_v22 = vld [vmem:[%s2231_s7 + $0x1580] sm:$0xff]  ;;  %364 = vst [vmem:[%s2236_s8 + $0x2a0] sm:$0xff] %v363_v20  ;;  %366 = vst [vmem:[%s2236_s8 + $0x2a8] sm:$0xff] %v365_v21  ;;  %v369_v23 = vld [vmem:[%s2231_s7 + $0x1588] sm:$0xff] }
  0x42   : > { %368 = vst [vmem:[%s2236_s8 + $0x2b0] sm:$0xff] %v367_v22  ;;  %v371_v24 = vld [vmem:[%s2231_s7 + $0x1600] sm:$0xff]  ;;  %v373_v25 = vld [vmem:[%s2231_s7 + $0x1608] sm:$0xff]  ;;  %370 = vst [vmem:[%s2236_s8 + $0x2b8] sm:$0xff] %v369_v23 }
  0x43   : > { %372 = vst [vmem:[%s2236_s8 + $0x2c0] sm:$0xff] %v371_v24  ;;  %374 = vst [vmem:[%s2236_s8 + $0x2c8] sm:$0xff] %v373_v25  ;;  %v375_v26 = vld [vmem:[%s2231_s7 + $0x1680] sm:$0xff]  ;;  %v377_v27 = vld [vmem:[%s2231_s7 + $0x1688] sm:$0xff] }
  0x44   : > { %v379_v28 = vld [vmem:[%s2231_s7 + $0x1700] sm:$0xff]  ;;  %376 = vst [vmem:[%s2236_s8 + $0x2d0] sm:$0xff] %v375_v26  ;;  %378 = vst [vmem:[%s2236_s8 + $0x2d8] sm:$0xff] %v377_v27  ;;  %v381_v29 = vld [vmem:[%s2231_s7 + $0x1708] sm:$0xff] }
  0x45   : > { %380 = vst [vmem:[%s2236_s8 + $0x2e0] sm:$0xff] %v379_v28  ;;  %v383_v30 = vld [vmem:[%s2231_s7 + $0x1780] sm:$0xff]  ;;  %v385_v31 = vld [vmem:[%s2231_s7 + $0x1788] sm:$0xff]  ;;  %382 = vst [vmem:[%s2236_s8 + $0x2e8] sm:$0xff] %v381_v29 }
  0x46   : > { %384 = vst [vmem:[%s2236_s8 + $0x2f0] sm:$0xff] %v383_v30  ;;  %386 = vst [vmem:[%s2236_s8 + $0x2f8] sm:$0xff] %v385_v31  ;;  %v387_v32 = vld [vmem:[%s2231_s7 + $0x1800] sm:$0xff]  ;;  %v389_v33 = vld [vmem:[%s2231_s7 + $0x1808] sm:$0xff] }
  0x47   : > { %v391_v34 = vld [vmem:[%s2231_s7 + $0x1880] sm:$0xff]  ;;  %388 = vst [vmem:[%s2236_s8 + $0x300] sm:$0xff] %v387_v32  ;;  %390 = vst [vmem:[%s2236_s8 + $0x308] sm:$0xff] %v389_v33  ;;  %v393_v35 = vld [vmem:[%s2231_s7 + $0x1888] sm:$0xff] }
  0x48   : > { %392 = vst [vmem:[%s2236_s8 + $0x310] sm:$0xff] %v391_v34  ;;  %v395_v36 = vld [vmem:[%s2231_s7 + $0x1900] sm:$0xff]  ;;  %v397_v37 = vld [vmem:[%s2231_s7 + $0x1908] sm:$0xff]  ;;  %394 = vst [vmem:[%s2236_s8 + $0x318] sm:$0xff] %v393_v35 }
  0x49   : > { %396 = vst [vmem:[%s2236_s8 + $0x320] sm:$0xff] %v395_v36  ;;  %398 = vst [vmem:[%s2236_s8 + $0x328] sm:$0xff] %v397_v37  ;;  %v399_v38 = vld [vmem:[%s2231_s7 + $0x1980] sm:$0xff]  ;;  %v401_v39 = vld [vmem:[%s2231_s7 + $0x1988] sm:$0xff] }
  0x4a   : > { %v403_v40 = vld [vmem:[%s2231_s7 + $0x1a00] sm:$0xff]  ;;  %400 = vst [vmem:[%s2236_s8 + $0x330] sm:$0xff] %v399_v38  ;;  %402 = vst [vmem:[%s2236_s8 + $0x338] sm:$0xff] %v401_v39  ;;  %v405_v41 = vld [vmem:[%s2231_s7 + $0x1a08] sm:$0xff] }
  0x4b   : > { %404 = vst [vmem:[%s2236_s8 + $0x340] sm:$0xff] %v403_v40  ;;  %v407_v42 = vld [vmem:[%s2231_s7 + $0x1a80] sm:$0xff]  ;;  %v409_v43 = vld [vmem:[%s2231_s7 + $0x1a88] sm:$0xff]  ;;  %406 = vst [vmem:[%s2236_s8 + $0x348] sm:$0xff] %v405_v41 }
  0x4c   : > { %408 = vst [vmem:[%s2236_s8 + $0x350] sm:$0xff] %v407_v42  ;;  %410 = vst [vmem:[%s2236_s8 + $0x358] sm:$0xff] %v409_v43  ;;  %v411_v44 = vld [vmem:[%s2231_s7 + $0x1b00] sm:$0xff]  ;;  %v413_v45 = vld [vmem:[%s2231_s7 + $0x1b08] sm:$0xff] }
  0x4d   : > { %v415_v46 = vld [vmem:[%s2231_s7 + $0x1b80] sm:$0xff]  ;;  %412 = vst [vmem:[%s2236_s8 + $0x360] sm:$0xff] %v411_v44  ;;  %414 = vst [vmem:[%s2236_s8 + $0x368] sm:$0xff] %v413_v45  ;;  %v417_v47 = vld [vmem:[%s2231_s7 + $0x1b88] sm:$0xff] }
  0x4e   : > { %416 = vst [vmem:[%s2236_s8 + $0x370] sm:$0xff] %v415_v46  ;;  %v419_v48 = vld [vmem:[%s2231_s7 + $0x1c00] sm:$0xff]  ;;  %v421_v49 = vld [vmem:[%s2231_s7 + $0x1c08] sm:$0xff]  ;;  %418 = vst [vmem:[%s2236_s8 + $0x378] sm:$0xff] %v417_v47 }
  0x4f   : > { %420 = vst [vmem:[%s2236_s8 + $0x380] sm:$0xff] %v419_v48  ;;  %422 = vst [vmem:[%s2236_s8 + $0x388] sm:$0xff] %v421_v49  ;;  %v423_v50 = vld [vmem:[%s2231_s7 + $0x1c80] sm:$0xff]  ;;  %v425_v51 = vld [vmem:[%s2231_s7 + $0x1c88] sm:$0xff] }
  0x50   : > { %v427_v52 = vld [vmem:[%s2231_s7 + $0x1d00] sm:$0xff]  ;;  %424 = vst [vmem:[%s2236_s8 + $0x390] sm:$0xff] %v423_v50  ;;  %426 = vst [vmem:[%s2236_s8 + $0x398] sm:$0xff] %v425_v51  ;;  %v429_v53 = vld [vmem:[%s2231_s7 + $0x1d08] sm:$0xff] }
  0x51   : > { %428 = vst [vmem:[%s2236_s8 + $0x3a0] sm:$0xff] %v427_v52  ;;  %v431_v54 = vld [vmem:[%s2231_s7 + $0x1d80] sm:$0xff]  ;;  %v433_v55 = vld [vmem:[%s2231_s7 + $0x1d88] sm:$0xff]  ;;  %430 = vst [vmem:[%s2236_s8 + $0x3a8] sm:$0xff] %v429_v53 }
  0x52   : > { %432 = vst [vmem:[%s2236_s8 + $0x3b0] sm:$0xff] %v431_v54  ;;  %434 = vst [vmem:[%s2236_s8 + $0x3b8] sm:$0xff] %v433_v55  ;;  %v435_v56 = vld [vmem:[%s2231_s7 + $0x1e00] sm:$0xff]  ;;  %v437_v57 = vld [vmem:[%s2231_s7 + $0x1e08] sm:$0xff] }
  0x53   : > { %v439_v58 = vld [vmem:[%s2231_s7 + $0x1e80] sm:$0xff]  ;;  %436 = vst [vmem:[%s2236_s8 + $0x3c0] sm:$0xff] %v435_v56  ;;  %438 = vst [vmem:[%s2236_s8 + $0x3c8] sm:$0xff] %v437_v57  ;;  %v441_v59 = vld [vmem:[%s2231_s7 + $0x1e88] sm:$0xff] }
  0x54   : > { %440 = vst [vmem:[%s2236_s8 + $0x3d0] sm:$0xff] %v439_v58  ;;  %v443_v60 = vld [vmem:[%s2231_s7 + $0x1f00] sm:$0xff]  ;;  %v445_v61 = vld [vmem:[%s2231_s7 + $0x1f08] sm:$0xff]  ;;  %442 = vst [vmem:[%s2236_s8 + $0x3d8] sm:$0xff] %v441_v59 }
  0x55   : > { %444 = vst [vmem:[%s2236_s8 + $0x3e0] sm:$0xff] %v443_v60  ;;  %446 = vst [vmem:[%s2236_s8 + $0x3e8] sm:$0xff] %v445_v61  ;;  %v447_v62 = vld [vmem:[%s2231_s7 + $0x1f80] sm:$0xff]  ;;  %v449_v63 = vld [vmem:[%s2231_s7 + $0x1f88] sm:$0xff] }
  0x56   : > { %448 = vst [vmem:[%s2236_s8 + $0x3f0] sm:$0xff] %v447_v62  ;;  %450 = vst [vmem:[%s2236_s8 + $0x3f8] sm:$0xff] %v449_v63 }
  0x57 PF: > { %p1693_p7 = scmp.ge.s32.totalorder %s2148_s18, 1  ;;  %p463_p8 = scmp.lt.s32.totalorder %s2148_s18, 65 }
  0x59   : > { %p464_p9 = pnand %p1693_p7, %p463_p8 }
  0x5a   : > { %s470_s9 = sand.u32 (!%p464_p9), 1, %s2124_s12   ;;  %s1695_s10 = sshll.u32 (!%p464_p9), %s2132_s14, 2 }
  0x5b   : > { %467 = sbr.rel (%p464_p9) target bundleno = 452 (0x1c4), region = 51  ;;  %s1694_s11 = sshll.u32 (!%p464_p9), %s470_s9, 10 }
  0x5c   : > { %p513_p10 = scmp.lt.s32.totalorder (!%p464_p9), %s1695_s10, 31  ;;  %s1697_s21 = sshll.u32 (!%p464_p9), %s2136_s15, 2 }
  0x5d   : > { %p523_p11 = scmp.lt.s32.totalorder (!%p464_p9), %s1697_s21, 31  ;;  %s2513_s5 = scalar_lea.vmem (!%p464_p9), [#allocation3], %s1694_s11 }
  0x5e   : > { %p1700_p12 = scmp.ne.s32.totalorder (!%p464_p9), %s2132_s14, 0 }
  0x60   : > { %s2704_s10 = smov (!%p513_p10, %s1695_s10), 31  ;;  %s2706_s21 = smov (!%p523_p11, %s1697_s21), 31 }
  0x61   : > { %s1696_s22 = sshll.u32 %s2704_s10, 2  ;;  %s525_s12 = scalar_lea.vmem %s2689_s2, %s2706_s21 }
  0x62   : > { %s2499_s26 = scalar_lea.vmem %s2687_s0, %s1696_s22  ;;  %s1699_s29 = sshll.u32 %s2706_s21, 2 }
  0x63   : > { %s2511_s15 = scalar_lea.vmem %s2690_s3, %s1699_s29  ;;  %540 = sbr.rel (%p1700_p12) target bundleno = 107 (0x6b), region = 59 }
  0x68   : > { %v2150_v0 = vmov 0.0  }
  0x69   : > { %541 = vst [vmem:[#allocation2 + $0x10] sm:$0xff] %v2150_v0  ;;  %542 = vst [vmem:[#allocation2] sm:$0xff] %v2150_v0 }
  0x6a   : > { %543 = vst [vmem:[#allocation2 + $0x18] sm:$0xff] %v2150_v0  ;;  %544 = vst [vmem:[#allocation2 + $0x8] sm:$0xff] %v2150_v0 }
  0x6b PF: > { %v1898_v1 = vld [vmem:[%s2513_s5 + $0xe4] ss:$16 sps:$4 sm:$0xff]   ;;  %v1902_v3 = vld [vmem:[%s2513_s5 + $0xe0] ss:$16 sps:$4 sm:$0xff]   ;;  %v550_v49 = vld [vmem:[%s2499_s26 + $0x8] sm:$0xff]  ;;  %p1833_p13 = scmp.ne.s32.totalorder %s2132_s14, 7 }
  0x6c   : > { %v1900_v2 = vld [vmem:[%s2513_s5 + $0x2e4] ss:$16 sps:$4 sm:$0xff]   ;;  %1333 = vmatprep.subr.bf16.mxu0 %v1898_v1  ;;  %v1903_v4 = vld [vmem:[%s2513_s5 + $0x2e0] ss:$16 sps:$4 sm:$0xff]   ;;  %v1704_v52 = vcombine.high %v550_v49, %v550_v49 }
  0x6d   : > { %1374 = vmatprep.subr.bf16.mxu1 %v1900_v2  ;;  %v1904_v5 = vld [vmem:[%s2513_s5 + $0xc4] ss:$16 sps:$4 sm:$0xff]   ;;  %1334 = vmatpush1.bf16.msra.mxu0 %v1902_v3  ;;  %v1908_v7 = vld [vmem:[%s2513_s5 + $0xc0] ss:$16 sps:$4 sm:$0xff]  }
  0x6e   : > { %1375 = vmatpush1.bf16.msra.mxu1 %v1903_v4  ;;  %v1906_v6 = vld [vmem:[%s2513_s5 + $0x2c4] ss:$16 sps:$4 sm:$0xff]   ;;  %1335 = vmatprep.subr.bf16.mxu0 %v1904_v5  ;;  %v1909_v8 = vld [vmem:[%s2513_s5 + $0x2c0] ss:$16 sps:$4 sm:$0xff]   ;;  %v2000_v5 = vld [vmem:[%s2513_s5 + $0xec] ss:$16 sps:$4 sm:$0xff]  }
  0x6f   : > { %1376 = vmatprep.subr.bf16.mxu1 %v1906_v6  ;;  %v1910_v9 = vld [vmem:[%s2513_s5 + $0xa4] ss:$16 sps:$4 sm:$0xff]   ;;  %v1914_v11 = vld [vmem:[%s2513_s5 + $0xa0] ss:$16 sps:$4 sm:$0xff]   ;;  %1406 = vmatprep.mubr.bf16.mxu1 %v1704_v52  ;;  %v2003_v6 = vld [vmem:[%s2513_s5 + $0x2ec] ss:$16 sps:$4 sm:$0xff]  }
  0x70   : > { %v1912_v10 = vld [vmem:[%s2513_s5 + $0x2a4] ss:$16 sps:$4 sm:$0xff]   ;;  %v1915_v12 = vld [vmem:[%s2513_s5 + $0x2a0] ss:$16 sps:$4 sm:$0xff]  }
  0x71   : > { %1336 = vmatpush1.bf16.msra.mxu0 %v1908_v7  ;;  %v1916_v13 = vld [vmem:[%s2513_s5 + $0x84] ss:$16 sps:$4 sm:$0xff]   ;;  %v1920_v15 = vld [vmem:[%s2513_s5 + $0x80] ss:$16 sps:$4 sm:$0xff]  }
  0x72   : > { %1377 = vmatpush1.bf16.msra.mxu1 %v1909_v8  ;;  %1337 = vmatprep.subr.bf16.mxu0 %v1910_v9  ;;  %v1918_v14 = vld [vmem:[%s2513_s5 + $0x284] ss:$16 sps:$4 sm:$0xff]   ;;  %v1921_v16 = vld [vmem:[%s2513_s5 + $0x280] ss:$16 sps:$4 sm:$0xff]   ;;  %v2589_v8 = vcombine.low %v550_v49, %v550_v49  ;;  %v1998_v9 = vld [vmem:[%s2513_s5 + $0xe8] ss:$16 sps:$4 sm:$0xff]  }
  0x73   : > { %1378 = vmatprep.subr.bf16.mxu1 %v1912_v10  ;;  %v1922_v17 = vld [vmem:[%s2513_s5 + $0x64] ss:$16 sps:$4 sm:$0xff]   ;;  %v1926_v19 = vld [vmem:[%s2513_s5 + $0x60] ss:$16 sps:$4 sm:$0xff]   ;;  %v2001_v10 = vld [vmem:[%s2513_s5 + $0x2e8] ss:$16 sps:$4 sm:$0xff]  }
  0x74   : > { %v1924_v18 = vld [vmem:[%s2513_s5 + $0x264] ss:$16 sps:$4 sm:$0xff]   ;;  %v1927_v20 = vld [vmem:[%s2513_s5 + $0x260] ss:$16 sps:$4 sm:$0xff]   ;;  %v2058_v49 = vld [vmem:[%s2513_s5 + $0x1a8] ss:$16 sps:$4 sm:$0xff]  }
  0x75   : > { %1338 = vmatpush1.bf16.msra.mxu0 %v1914_v11  ;;  %v1928_v21 = vld [vmem:[%s2513_s5 + $0x44] ss:$16 sps:$4 sm:$0xff]   ;;  %v1932_v23 = vld [vmem:[%s2513_s5 + $0x40] ss:$16 sps:$4 sm:$0xff]   ;;  %v2006_v11 = vld [vmem:[%s2513_s5 + $0xcc] ss:$16 sps:$4 sm:$0xff]  }
  0x76   : > { %1379 = vmatpush1.bf16.msra.mxu1 %v1915_v12  ;;  %1339 = vmatprep.subr.bf16.mxu0 %v1916_v13  ;;  %v1930_v22 = vld [vmem:[%s2513_s5 + $0x244] ss:$16 sps:$4 sm:$0xff]   ;;  %v1933_v24 = vld [vmem:[%s2513_s5 + $0x240] ss:$16 sps:$4 sm:$0xff]   ;;  %v2009_v12 = vld [vmem:[%s2513_s5 + $0x2cc] ss:$16 sps:$4 sm:$0xff]  }
  0x77   : > { %1380 = vmatprep.subr.bf16.mxu1 %v1918_v14  ;;  %v1934_v25 = vld [vmem:[%s2513_s5 + $0x24] ss:$16 sps:$4 sm:$0xff]   ;;  %v1938_v27 = vld [vmem:[%s2513_s5 + $0x20] ss:$16 sps:$4 sm:$0xff]   ;;  %v2004_v13 = vld [vmem:[%s2513_s5 + $0xc8] ss:$16 sps:$4 sm:$0xff]  }
  0x78   : > { %v1936_v26 = vld [vmem:[%s2513_s5 + $0x224] ss:$16 sps:$4 sm:$0xff]   ;;  %v1939_v28 = vld [vmem:[%s2513_s5 + $0x220] ss:$16 sps:$4 sm:$0xff]   ;;  %v2007_v14 = vld [vmem:[%s2513_s5 + $0x2c8] ss:$16 sps:$4 sm:$0xff]  }
  0x79   : > { %1340 = vmatpush1.bf16.msra.mxu0 %v1920_v15  ;;  %v1940_v29 = vld [vmem:[%s2513_s5 + $0x4] ss:$16 sps:$4 sm:$0xff]   ;;  %v1944_v31 = vld [vmem:[%s2513_s5] ss:$16 sps:$4 sm:$0xff]   ;;  %v2012_v15 = vld [vmem:[%s2513_s5 + $0xac] ss:$16 sps:$4 sm:$0xff]  }
  0x7a   : > { %1381 = vmatpush1.bf16.msra.mxu1 %v1921_v16  ;;  %1341 = vmatprep.subr.bf16.mxu0 %v1922_v17  ;;  %v1942_v30 = vld [vmem:[%s2513_s5 + $0x204] ss:$16 sps:$4 sm:$0xff]   ;;  %v1945_v32 = vld [vmem:[%s2513_s5 + $0x200] ss:$16 sps:$4 sm:$0xff]   ;;  %v2015_v16 = vld [vmem:[%s2513_s5 + $0x2ac] ss:$16 sps:$4 sm:$0xff]  }
  0x7b   : > { %1382 = vmatprep.subr.bf16.mxu1 %v1924_v18  ;;  %v1946_v33 = vld [vmem:[%s2513_s5 + $0x1e4] ss:$16 sps:$4 sm:$0xff]   ;;  %v1950_v35 = vld [vmem:[%s2513_s5 + $0x1e0] ss:$16 sps:$4 sm:$0xff]   ;;  %v2010_v17 = vld [vmem:[%s2513_s5 + $0xa8] ss:$16 sps:$4 sm:$0xff]  }
  0x7c   : > { %v1948_v34 = vld [vmem:[%s2513_s5 + $0x3e4] ss:$16 sps:$4 sm:$0xff]   ;;  %v1951_v36 = vld [vmem:[%s2513_s5 + $0x3e0] ss:$16 sps:$4 sm:$0xff]   ;;  %v2013_v18 = vld [vmem:[%s2513_s5 + $0x2a8] ss:$16 sps:$4 sm:$0xff]  }
  0x7d   : > { %1342 = vmatpush1.bf16.msra.mxu0 %v1926_v19  ;;  %v1952_v37 = vld [vmem:[%s2513_s5 + $0x1c4] ss:$16 sps:$4 sm:$0xff]   ;;  %v1956_v39 = vld [vmem:[%s2513_s5 + $0x1c0] ss:$16 sps:$4 sm:$0xff]   ;;  %v2018_v19 = vld [vmem:[%s2513_s5 + $0x8c] ss:$16 sps:$4 sm:$0xff]  }
  0x7e   : > { %1383 = vmatpush1.bf16.msra.mxu1 %v1927_v20  ;;  %1343 = vmatprep.subr.bf16.mxu0 %v1928_v21  ;;  %v1954_v38 = vld [vmem:[%s2513_s5 + $0x3c4] ss:$16 sps:$4 sm:$0xff]   ;;  %v1957_v40 = vld [vmem:[%s2513_s5 + $0x3c0] ss:$16 sps:$4 sm:$0xff]   ;;  %v2021_v20 = vld [vmem:[%s2513_s5 + $0x28c] ss:$16 sps:$4 sm:$0xff]  }
  0x7f   : > { %1384 = vmatprep.subr.bf16.mxu1 %v1930_v22  ;;  %v1958_v41 = vld [vmem:[%s2513_s5 + $0x1a4] ss:$16 sps:$4 sm:$0xff]   ;;  %v1962_v43 = vld [vmem:[%s2513_s5 + $0x1a0] ss:$16 sps:$4 sm:$0xff]   ;;  %v2016_v21 = vld [vmem:[%s2513_s5 + $0x88] ss:$16 sps:$4 sm:$0xff]  }
  0x80   : > { %v1960_v42 = vld [vmem:[%s2513_s5 + $0x3a4] ss:$16 sps:$4 sm:$0xff]   ;;  %v1963_v44 = vld [vmem:[%s2513_s5 + $0x3a0] ss:$16 sps:$4 sm:$0xff]   ;;  %v2019_v22 = vld [vmem:[%s2513_s5 + $0x288] ss:$16 sps:$4 sm:$0xff]  }
  0x81   : > { %1344 = vmatpush1.bf16.msra.mxu0 %v1932_v23  ;;  %v1964_v45 = vld [vmem:[%s2513_s5 + $0x184] ss:$16 sps:$4 sm:$0xff]   ;;  %v1968_v50 = vld [vmem:[%s2513_s5 + $0x180] ss:$16 sps:$4 sm:$0xff]   ;;  %v2024_v23 = vld [vmem:[%s2513_s5 + $0x6c] ss:$16 sps:$4 sm:$0xff]  }
  0x82   : > { %1385 = vmatpush1.bf16.msra.mxu1 %v1933_v24  ;;  %1345 = vmatprep.subr.bf16.mxu0 %v1934_v25  ;;  %v1966_v46 = vld [vmem:[%s2513_s5 + $0x384] ss:$16 sps:$4 sm:$0xff]   ;;  %v1969_v51 = vld [vmem:[%s2513_s5 + $0x380] ss:$16 sps:$4 sm:$0xff]   ;;  %v2027_v24 = vld [vmem:[%s2513_s5 + $0x26c] ss:$16 sps:$4 sm:$0xff]  }
  0x83   : > { %1386 = vmatprep.subr.bf16.mxu1 %v1936_v26  ;;  %v549_v47 = vld [vmem:[%s2499_s26] sm:$0xff]  ;;  %v2022_v25 = vld [vmem:[%s2513_s5 + $0x68] ss:$16 sps:$4 sm:$0xff]  }
  0x84   : > { %v2563_v48 = vcombine.high %v549_v47, %v549_v47  ;;  %v1970_v53 = vld [vmem:[%s2513_s5 + $0x164] ss:$16 sps:$4 sm:$0xff]   ;;  %v1974_v55 = vld [vmem:[%s2513_s5 + $0x160] ss:$16 sps:$4 sm:$0xff]   ;;  %v2587_v7 = vcombine.low %v549_v47, %v549_v47  ;;  %v2025_v26 = vld [vmem:[%s2513_s5 + $0x268] ss:$16 sps:$4 sm:$0xff]  }
  0x85   : > { %1346 = vmatpush1.bf16.msra.mxu0 %v1938_v27  ;;  %v1972_v54 = vld [vmem:[%s2513_s5 + $0x364] ss:$16 sps:$4 sm:$0xff]   ;;  %v1975_v56 = vld [vmem:[%s2513_s5 + $0x360] ss:$16 sps:$4 sm:$0xff]   ;;  %v2030_v27 = vld [vmem:[%s2513_s5 + $0x4c] ss:$16 sps:$4 sm:$0xff]  }
  0x86   : > { %1387 = vmatpush1.bf16.msra.mxu1 %v1939_v28  ;;  %1347 = vmatprep.subr.bf16.mxu0 %v1940_v29  ;;  %v1976_v57 = vld [vmem:[%s2513_s5 + $0x144] ss:$16 sps:$4 sm:$0xff]   ;;  %v1980_v59 = vld [vmem:[%s2513_s5 + $0x140] ss:$16 sps:$4 sm:$0xff]   ;;  %v2033_v28 = vld [vmem:[%s2513_s5 + $0x24c] ss:$16 sps:$4 sm:$0xff]  }
  0x87   : > { %1388 = vmatprep.subr.bf16.mxu1 %v1942_v30  ;;  %1365 = vmatprep.mubr.bf16.mxu0 %v2563_v48  ;;  %v1978_v58 = vld [vmem:[%s2513_s5 + $0x344] ss:$16 sps:$4 sm:$0xff]   ;;  %v1981_v60 = vld [vmem:[%s2513_s5 + $0x340] ss:$16 sps:$4 sm:$0xff]   ;;  %v2028_v29 = vld [vmem:[%s2513_s5 + $0x48] ss:$16 sps:$4 sm:$0xff]  }
  0x88   : > { %v1982_v61 = vld [vmem:[%s2513_s5 + $0x124] ss:$16 sps:$4 sm:$0xff]   ;;  %v1986_v63 = vld [vmem:[%s2513_s5 + $0x120] ss:$16 sps:$4 sm:$0xff]   ;;  %v2031_v30 = vld [vmem:[%s2513_s5 + $0x248] ss:$16 sps:$4 sm:$0xff]  }
  0x89   : > { %1348 = vmatpush1.bf16.msra.mxu0 %v1944_v31  ;;  %v1984_v62 = vld [vmem:[%s2513_s5 + $0x324] ss:$16 sps:$4 sm:$0xff]   ;;  %v1987_v0 = vld [vmem:[%s2513_s5 + $0x320] ss:$16 sps:$4 sm:$0xff]   ;;  %v2036_v31 = vld [vmem:[%s2513_s5 + $0x2c] ss:$16 sps:$4 sm:$0xff]  }
  0x8a   : > { %1389 = vmatpush1.bf16.msra.mxu1 %v1945_v32  ;;  %1349 = vmatprep.subr.bf16.mxu0 %v1946_v33  ;;  %v1988_v1 = vld [vmem:[%s2513_s5 + $0x104] ss:$16 sps:$4 sm:$0xff]   ;;  %v1992_v3 = vld [vmem:[%s2513_s5 + $0x100] ss:$16 sps:$4 sm:$0xff]   ;;  %v2039_v32 = vld [vmem:[%s2513_s5 + $0x22c] ss:$16 sps:$4 sm:$0xff]  }
  0x8b   : > { %1390 = vmatprep.subr.bf16.mxu1 %v1948_v34  ;;  %v1990_v2 = vld [vmem:[%s2513_s5 + $0x304] ss:$16 sps:$4 sm:$0xff]   ;;  %v1993_v4 = vld [vmem:[%s2513_s5 + $0x300] ss:$16 sps:$4 sm:$0xff]   ;;  %v2034_v33 = vld [vmem:[%s2513_s5 + $0x28] ss:$16 sps:$4 sm:$0xff]  }
  0x8c   : > { %v2037_v34 = vld [vmem:[%s2513_s5 + $0x228] ss:$16 sps:$4 sm:$0xff]   ;;  %v2060_v47 = vld [vmem:[%s2513_s5 + $0x1ac] ss:$16 sps:$4 sm:$0xff]  }
  0x8d   : > { %1350 = vmatpush2.bf16.msra.mxu0 %v1950_v35  ;;  %v2042_v35 = vld [vmem:[%s2513_s5 + $0xc] ss:$16 sps:$4 sm:$0xff]  }
  0x8e   : > { %1391 = vmatpush2.bf16.msra.mxu1 %v1951_v36  ;;  %1351 = vmatprep.subr.bf16.mxu0 %v1952_v37  ;;  %v2045_v36 = vld [vmem:[%s2513_s5 + $0x20c] ss:$16 sps:$4 sm:$0xff]   ;;  %v2040_v37 = vld [vmem:[%s2513_s5 + $0x8] ss:$16 sps:$4 sm:$0xff]  }
  0x8f   : > { %1392 = vmatprep.subr.bf16.mxu1 %v1954_v38  ;;  %v2043_v38 = vld [vmem:[%s2513_s5 + $0x208] ss:$16 sps:$4 sm:$0xff]  }
  0x91   : > { %1352 = vmatpush2.bf16.msra.mxu0 %v1956_v39  ;;  %v2048_v39 = vld [vmem:[%s2513_s5 + $0x1ec] ss:$16 sps:$4 sm:$0xff]  }
  0x92   : > { %1393 = vmatpush2.bf16.msra.mxu1 %v1957_v40  ;;  %1353 = vmatprep.subr.bf16.mxu0 %v1958_v41  ;;  %v2051_v40 = vld [vmem:[%s2513_s5 + $0x3ec] ss:$16 sps:$4 sm:$0xff]   ;;  %v2046_v41 = vld [vmem:[%s2513_s5 + $0x1e8] ss:$16 sps:$4 sm:$0xff]  }
  0x93   : > { %1394 = vmatprep.subr.bf16.mxu1 %v1960_v42  ;;  %v2049_v42 = vld [vmem:[%s2513_s5 + $0x3e8] ss:$16 sps:$4 sm:$0xff]  }
  0x95   : > { %1354 = vmatpush2.bf16.msra.mxu0 %v1962_v43  ;;  %v2054_v43 = vld [vmem:[%s2513_s5 + $0x1cc] ss:$16 sps:$4 sm:$0xff]  }
  0x96   : > { %1395 = vmatpush2.bf16.msra.mxu1 %v1963_v44  ;;  %1355 = vmatprep.subr.bf16.mxu0 %v1964_v45  ;;  %v2057_v44 = vld [vmem:[%s2513_s5 + $0x3cc] ss:$16 sps:$4 sm:$0xff]   ;;  %v2052_v45 = vld [vmem:[%s2513_s5 + $0x1c8] ss:$16 sps:$4 sm:$0xff]  }
  0x97   : > { %1396 = vmatprep.subr.bf16.mxu1 %v1966_v46  ;;  %v2055_v46 = vld [vmem:[%s2513_s5 + $0x3c8] ss:$16 sps:$4 sm:$0xff]  }
  0x99   : > { %1356 = vmatpush2.bf16.msra.mxu0 %v1968_v50  ;;  %v2061_v50 = vld [vmem:[%s2513_s5 + $0x3a8] ss:$16 sps:$4 sm:$0xff]  }
  0x9a   : > { %1397 = vmatpush2.bf16.msra.mxu1 %v1969_v51  ;;  %1357 = vmatprep.subr.bf16.mxu0 %v1970_v53  ;;  %v2066_v51 = vld [vmem:[%s2513_s5 + $0x18c] ss:$16 sps:$4 sm:$0xff]   ;;  %v2064_v53 = vld [vmem:[%s2513_s5 + $0x188] ss:$16 sps:$4 sm:$0xff]  }
  0x9b   : > { %1398 = vmatprep.subr.bf16.mxu1 %v1972_v54  ;;  %v2067_v54 = vld [vmem:[%s2513_s5 + $0x388] ss:$16 sps:$4 sm:$0xff]  }
  0x9d   : > { %1358 = vmatpush2.bf16.msra.mxu0 %v1974_v55  ;;  %v2072_v55 = vld [vmem:[%s2513_s5 + $0x16c] ss:$16 sps:$4 sm:$0xff]  }
  0x9e   : > { %1399 = vmatpush2.bf16.msra.mxu1 %v1975_v56  ;;  %1359 = vmatprep.subr.bf16.mxu0 %v1976_v57  ;;  %v2075_v56 = vld [vmem:[%s2513_s5 + $0x36c] ss:$16 sps:$4 sm:$0xff]   ;;  %v2070_v57 = vld [vmem:[%s2513_s5 + $0x168] ss:$16 sps:$4 sm:$0xff]  }
  0x9f   : > { %1400 = vmatprep.subr.bf16.mxu1 %v1978_v58  ;;  %v2073_v58 = vld [vmem:[%s2513_s5 + $0x368] ss:$16 sps:$4 sm:$0xff]  }
  0xa1   : > { %1360 = vmatpush2.bf16.msra.mxu0 %v1980_v59  ;;  %v2078_v59 = vld [vmem:[%s2513_s5 + $0x14c] ss:$16 sps:$4 sm:$0xff]  }
  0xa2   : > { %1401 = vmatpush2.bf16.msra.mxu1 %v1981_v60  ;;  %1361 = vmatprep.subr.bf16.mxu0 %v1982_v61  ;;  %v2081_v60 = vld [vmem:[%s2513_s5 + $0x34c] ss:$16 sps:$4 sm:$0xff]   ;;  %v2076_v61 = vld [vmem:[%s2513_s5 + $0x148] ss:$16 sps:$4 sm:$0xff]  }
  0xa3   : > { %1402 = vmatprep.subr.bf16.mxu1 %v1984_v62  ;;  %v2079_v62 = vld [vmem:[%s2513_s5 + $0x348] ss:$16 sps:$4 sm:$0xff]  }
  0xa5   : > { %1362 = vmatpush2.bf16.msra.mxu0 %v1986_v63  ;;  %v2084_v63 = vld [vmem:[%s2513_s5 + $0x12c] ss:$16 sps:$4 sm:$0xff]  }
  0xa6   : > { %1403 = vmatpush2.bf16.msra.mxu1 %v1987_v0  ;;  %1363 = vmatprep.subr.bf16.mxu0 %v1988_v1  ;;  %v2087_v0 = vld [vmem:[%s2513_s5 + $0x32c] ss:$16 sps:$4 sm:$0xff]   ;;  %v2082_v1 = vld [vmem:[%s2513_s5 + $0x128] ss:$16 sps:$4 sm:$0xff]  }
  0xa7   : > { %1404 = vmatprep.subr.bf16.mxu1 %v1990_v2  ;;  %v2085_v2 = vld [vmem:[%s2513_s5 + $0x328] ss:$16 sps:$4 sm:$0xff]  }
  0xa9   : > { %1364 = vmatpush2.bf16.msra.mxu0 %v1992_v3  ;;  %v2090_v3 = vld [vmem:[%s2513_s5 + $0x10c] ss:$16 sps:$4 sm:$0xff]  }
  0xaa   : > { %1405 = vmatpush2.bf16.msra.mxu1 %v1993_v4  ;;  %1415 = vmatprep.subr.bf16.mxu0 %v2000_v5  ;;  %v2093_v4 = vld [vmem:[%s2513_s5 + $0x30c] ss:$16 sps:$4 sm:$0xff]   ;;  %v2088_v5 = vld [vmem:[%s2513_s5 + $0x108] ss:$16 sps:$4 sm:$0xff]  }
  0xab   : > { %1456 = vmatprep.subr.bf16.mxu1 %v2003_v6  ;;  %v2091_v6 = vld [vmem:[%s2513_s5 + $0x308] ss:$16 sps:$4 sm:$0xff]  }
  0xac   : > { %1366 = vmatmul.mubr.bf16.vlgmr.msra.gmra.mxu0 %v2587_v7 }
  0xad   : > { %1407 = vmatmul.mubr.bf16.vlgmr.msra.gmra.mxu1 %v2589_v8  ;;  %1416 = vmatpush1.bf16.msra.mxu0 %v1998_v9 }
  0xae   : > { %1457 = vmatpush1.bf16.msra.mxu1 %v2001_v10  ;;  %1417 = vmatprep.subr.bf16.mxu0 %v2006_v11  ;;  %v545_v10 = vld [vmem:[#allocation2 + $0x10] sm:$0xff] }
  0xaf   : > { %1458 = vmatprep.subr.bf16.mxu1 %v2009_v12  ;;  %1447 = vmatprep.mubr.bf16.mxu0 %v2563_v48  ;;  %v2063_v48 = vld [vmem:[%s2513_s5 + $0x3ac] ss:$16 sps:$4 sm:$0xff]  }
  0xb0   : > { %1488 = vmatprep.mubr.bf16.mxu1 %v1704_v52  ;;  %v2069_v52 = vld [vmem:[%s2513_s5 + $0x38c] ss:$16 sps:$4 sm:$0xff]  }
  0xb1   : > { %1418 = vmatpush1.bf16.msra.mxu0 %v2004_v13 }
  0xb2   : > { %1459 = vmatpush1.bf16.msra.mxu1 %v2007_v14  ;;  %1419 = vmatprep.subr.bf16.mxu0 %v2012_v15  ;;  %v546_v14 = vld [vmem:[#allocation2] sm:$0xff] }
  0xb3   : > { %1460 = vmatprep.subr.bf16.mxu1 %v2015_v16 }
  0xb5   : > { %1420 = vmatpush1.bf16.msra.mxu0 %v2010_v17 }
  0xb6   : > { %1461 = vmatpush1.bf16.msra.mxu1 %v2013_v18  ;;  %1421 = vmatprep.subr.bf16.mxu0 %v2018_v19 }
  0xb7   : > { %1462 = vmatprep.subr.bf16.mxu1 %v2021_v20 }
  0xb9   : > { %1422 = vmatpush1.bf16.msra.mxu0 %v2016_v21 }
  0xba   : > { %1463 = vmatpush1.bf16.msra.mxu1 %v2019_v22  ;;  %1423 = vmatprep.subr.bf16.mxu0 %v2024_v23 }
  0xbb   : > { %1464 = vmatprep.subr.bf16.mxu1 %v2027_v24 }
  0xbd   : > { %1424 = vmatpush1.bf16.msra.mxu0 %v2022_v25 }
  0xbe   : > { %1465 = vmatpush1.bf16.msra.mxu1 %v2025_v26  ;;  %1425 = vmatprep.subr.bf16.mxu0 %v2030_v27  ;;  %v548_v26 = vld [vmem:[#allocation2 + $0x8] sm:$0xff] }
  0xbf   : > { %1466 = vmatprep.subr.bf16.mxu1 %v2033_v28 }
  0xc1   : > { %1426 = vmatpush1.bf16.msra.mxu0 %v2028_v29 }
  0xc2   : > { %1467 = vmatpush1.bf16.msra.mxu1 %v2031_v30  ;;  %1427 = vmatprep.subr.bf16.mxu0 %v2036_v31 }
  0xc3   : > { %1468 = vmatprep.subr.bf16.mxu1 %v2039_v32 }
  0xc5   : > { %1428 = vmatpush1.bf16.msra.mxu0 %v2034_v33 }
  0xc6   : > { %1469 = vmatpush1.bf16.msra.mxu1 %v2037_v34  ;;  %1429 = vmatprep.subr.bf16.mxu0 %v2042_v35 }
  0xc7   : > { %1470 = vmatprep.subr.bf16.mxu1 %v2045_v36 }
  0xc9   : > { %1430 = vmatpush1.bf16.msra.mxu0 %v2040_v37 }
  0xca   : > { %1471 = vmatpush1.bf16.msra.mxu1 %v2043_v38  ;;  %1431 = vmatprep.subr.bf16.mxu0 %v2048_v39 }
  0xcb   : > { %1472 = vmatprep.subr.bf16.mxu1 %v2051_v40 }
  0xcd   : > { %1432 = vmatpush2.bf16.msra.mxu0 %v2046_v41 }
  0xce   : > { %1473 = vmatpush2.bf16.msra.mxu1 %v2049_v42  ;;  %1433 = vmatprep.subr.bf16.mxu0 %v2054_v43 }
  0xcf   : > { %1474 = vmatprep.subr.bf16.mxu1 %v2057_v44 }
  0xd1   : > { %1434 = vmatpush2.bf16.msra.mxu0 %v2052_v45 }
  0xd2   : > { %1475 = vmatpush2.bf16.msra.mxu1 %v2055_v46  ;;  %1435 = vmatprep.subr.bf16.mxu0 %v2060_v47 }
  0xd3   : > { %1476 = vmatprep.subr.bf16.mxu1 %v2063_v48 }
  0xd5   : > { %1436 = vmatpush2.bf16.msra.mxu0 %v2058_v49 }
  0xd6   : > { %1477 = vmatpush2.bf16.msra.mxu1 %v2061_v50  ;;  %1437 = vmatprep.subr.bf16.mxu0 %v2066_v51 }
  0xd7   : > { %1478 = vmatprep.subr.bf16.mxu1 %v2069_v52 }
  0xd9   : > { %1438 = vmatpush2.bf16.msra.mxu0 %v2064_v53 }
  0xda   : > { %1479 = vmatpush2.bf16.msra.mxu1 %v2067_v54  ;;  %1439 = vmatprep.subr.bf16.mxu0 %v2072_v55 }
  0xdb   : > { %1480 = vmatprep.subr.bf16.mxu1 %v2075_v56 }
  0xdd   : > { %1440 = vmatpush2.bf16.msra.mxu0 %v2070_v57 }
  0xde   : > { %1481 = vmatpush2.bf16.msra.mxu1 %v2073_v58  ;;  %1441 = vmatprep.subr.bf16.mxu0 %v2078_v59 }
  0xdf   : > { %1482 = vmatprep.subr.bf16.mxu1 %v2081_v60 }
  0xe1   : > { %1442 = vmatpush2.bf16.msra.mxu0 %v2076_v61 }
  0xe2   : > { %1483 = vmatpush2.bf16.msra.mxu1 %v2079_v62  ;;  %1443 = vmatprep.subr.bf16.mxu0 %v2084_v63 }
  0xe3   : > { %1484 = vmatprep.subr.bf16.mxu1 %v2087_v0 }
  0xe5   : > { %1444 = vmatpush2.bf16.msra.mxu0 %v2082_v1 }
  0xe6   : > { %1485 = vmatpush2.bf16.msra.mxu1 %v2085_v2  ;;  %1445 = vmatprep.subr.bf16.mxu0 %v2090_v3 }
  0xe7   : > { %1486 = vmatprep.subr.bf16.mxu1 %v2093_v4 }
  0xe9   : > { %1446 = vmatpush2.bf16.msra.mxu0 %v2088_v5 }
  0xea   : > { %1487 = vmatpush2.bf16.msra.mxu1 %v2091_v6 }
  0xec   : > { %1448 = vmatmul.mubr.bf16.vlgmr.msra.gmra.mxu0 %v2587_v7  ;;  %v547_v7 = vld [vmem:[#allocation2 + $0x18] sm:$0xff] }
  0xed   : > { %1489 = vmatmul.mubr.bf16.vlgmr.msra.gmra.mxu1 %v2589_v8 }
 0x16c   : > { %v1367_v9 = vpop.f32.mrf.mxu0 }
 0x16d   : > { %v1408_v11 = vpop.f32.mrf.mxu1 }
 0x16e   : > { %v1409_v12 = vadd.f32 %v1408_v11, %v1367_v9  ;;  %v1369_v13 = vpop.f32.mrf.mxu0 }
 0x16f   : > { %v1410_v15 = vpop.f32.mrf.mxu1 }
 0x170   : > { %v1497_v16 = vadd.f32 %v1409_v12, %v545_v10  ;;  %v1411_v17 = vadd.f32 %v1410_v15, %v1369_v13  ;;  %v1371_v18 = vpop.f32.mrf.mxu0 }
 0x171   : > { %v1412_v19 = vpop.f32.mrf.mxu1 }
 0x172   : > { %1501 = vst [vmem:[#allocation2 + $0x10] sm:$0xff] %v1497_v16  ;;  %v1498_v20 = vadd.f32 %v1411_v17, %v546_v14  ;;  %v1372_v21 = vpop.f32.mrf.mxu0 }
 0x173   : > { %v1413_v22 = vpop.f32.mrf.mxu1 }
 0x174   : > { %1502 = vst [vmem:[#allocation2] sm:$0xff] %v1498_v20 }
 0x1ac   : > { %v1449_v23 = vpop.f32.mrf.mxu0 }
 0x1ad   : > { %v1490_v24 = vpop.f32.mrf.mxu1 }
 0x1ae   : > { %v1491_v8 = vadd.f32 %v1490_v24, %v1449_v23  ;;  %v1451_v25 = vpop.f32.mrf.mxu0 }
 0x1af   : > { %v1492_v27 = vpop.f32.mrf.mxu1 }
 0x1b0   : > { %v1499_v28 = vadd.f32 %v1491_v8, %v547_v7  ;;  %v1493_v29 = vadd.f32 %v1492_v27, %v1451_v25  ;;  %v1453_v30 = vpop.f32.mrf.mxu0  ;;  %1508 = sbr.rel (%p1833_p13) target bundleno = 452 (0x1c4), region = 63 }
 0x1b1   : > { %v1494_v31 = vpop.f32.mrf.mxu1 }
 0x1b2   : > { %1503 = vst [vmem:[#allocation2 + $0x18] sm:$0xff] %v1499_v28  ;;  %v1500_v32 = vadd.f32 %v1493_v29, %v548_v26  ;;  %v1454_v33 = vpop.f32.mrf.mxu0 }
 0x1b3   : > { %v1495_v34 = vpop.f32.mrf.mxu1 }
 0x1b4   : > { %1504 = vst [vmem:[#allocation2 + $0x8] sm:$0xff] %v1500_v32 }
 0x1b5   : > { %v1515_v35 = vlaneseq  ;;  %v1513_v37 = vld [vmem:[%s525_s12] sm:$0xf]  ;;  %v1509_v38 = vld [vmem:[#allocation2 + $0x10] sm:$0xff] }
 0x1b6   : > { %v1510_v43 = vld [vmem:[#allocation2] sm:$0xff] }
 0x1b7   : > { %v1516_v36 = vshrl.u32 %v1515_v35, 7 }
 0x1b9   : > { %v1517_v39 = vsub.s32 0, %v1516_v36  ;;  %v1521_v40 = vsub.s32 1, %v1516_v36  ;;  %v1525_v41 = vsub.s32 2, %v1516_v36  ;;  %v1529_v42 = vsub.s32 3, %v1516_v36  ;;  %v1511_v44 = vld [vmem:[#allocation2 + $0x18] sm:$0xff] }
 0x1bb   : > { %v1512_v45 = vld [vmem:[#allocation2 + $0x8] sm:$0xff]  ;;  %v1518_v46 = vrot.slane %v1513_v37, %v1517_v39  ;;  %v1522_v47 = vrot.slane %v1513_v37, %v1521_v40  ;;  %v1526_v48 = vrot.slane %v1513_v37, %v1525_v41  ;;  %v1530_v49 = vrot.slane %v1513_v37, %v1529_v42 }
 0x1bd   : > { %v1535_v50 = vadd.f32 %v1518_v46, %v1509_v38  ;;  %v1536_v51 = vadd.f32 %v1522_v47, %v1510_v43  ;;  %v1537_v52 = vadd.f32 %v1526_v48, %v1511_v44  ;;  %v1538_v53 = vadd.f32 %v1530_v49, %v1512_v45 }
 0x1bf   : > { %v1539_v54 = vmax.f32 %v1535_v50, 0.0  ;;  %v1540_v55 = vmax.f32 %v1536_v51, 0.0  ;;  %v1541_v56 = vmax.f32 %v1537_v52, 0.0  ;;  %v1542_v57 = vmax.f32 %v1538_v53, 0.0 }
 0x1c1   : > { %v1839_v58 = vpack.c.bf16 %v1540_v55, %v1539_v54  ;;  %v1840_v59 = vpack.c.bf16 %v1542_v57, %v1541_v56 }
 0x1c3   : > { %1559 = vst [vmem:[%s2511_s15] sm:$0xff] %v1839_v58  ;;  %1560 = vst [vmem:[%s2511_s15 + $0x8] sm:$0xff] %v1840_v59 }
 0x1c4 PF: > { %s13_s18 = sadd.s32 1, %s2148_s18   ;;  %s2691_s12 = smov %s2128_s13 }
 0x1c5   : > { %p10_p0 = scmp.ge.s32.totalorder %s13_s18, 66   ;;  %s2692_s13 = smov %s2222_s25 }
 0x1c6   : > { %s2693_s14 = smov %s2140_s16  ;;  %s2694_s15 = smov %s2144_s17 }
 0x1c7   : > { %s2695_s16 = smov %s2698_s19  ;;  %s2696_s17 = smov %s2702_s20 }
 0x1c8   :  { %12 = sbr.rel (!%p10_p0) target bundleno = 4 (0x4), region = 104 }

// kernel: alexnet_forward.27
= control target key start
LH: loop header
LB: loop body
LE: loop exit
PB: predicated region body
PF: predicated region fallthrough
CT: control target
= control target key end

     0   :  { %s940_s12 = smov 0   ;;  %s942_s13 = smov 0   ;;  %s1023_s0 = inlined_call_operand.vmem [shape: bf16[8,4096], index: 0, kind: input, shape index: {}]   ;;  %s1024_s1 = inlined_call_operand.vmem [shape: bf16[4096,128], index: 1, kind: input, shape index: {}]   ;;  %s1025_s2 = inlined_call_operand.vmem [shape: f32[1,128], index: 2, kind: input, shape index: {}]   ;;  %s1026_s3 = inlined_call_operand.vmem [shape: f32[8,128], index: 3, kind: output, shape index: {}]  }
   0x1   :  { %s944_s14 = smov 0  }
   0x2 LB: > { %s25_s15 = sadd.s32 1, %s913_s13  ;;  %p743_p0 = scmp.ge.s32.totalorder %s917_s14, 1  ;;  %s917_s14 = sphi %s944_s14, %s13_s14   ;;  %s913_s13 = sphi %s942_s13, %s1028_s13   ;;  %s909_s12 = sphi %s940_s12, %s1027_s12  }
   0x3   : > { %p26_p1 = scmp.ge.s32.totalorder %s25_s15, 8  ;;  %p189_p2 = scmp.lt.s32.totalorder %s917_s14, 9 }
   0x5   : > { %s1030_s15 = smov (%p26_p1, %s25_s15), 0  ;;  %p190_p3 = pnand %p743_p0, %p189_p2 }
   0x6   : > { %s744_s16 = sshll.u32 (!%p190_p3), %s909_s12, 2  ;;  %s746_s17 = sshll.u32 (!%p190_p3), %s909_s12, 6 }
   0x7   : > { %193 = sbr.rel (%p190_p3) target bundleno = 269 (0x10d), region = 32  ;;  %p233_p4 = scmp.lt.s32.totalorder (!%p190_p3), %s744_s16, 31 }
   0x8   : > { %p241_p5 = scmp.lt.s32.totalorder (!%p190_p3), %s746_s17, 511  ;;  %p748_p6 = scmp.ne.s32.totalorder (!%p190_p3), %s909_s12, 0 }
   0xc   : > { %s1032_s16 = smov (!%p233_p4, %s744_s16), 31  ;;  %s1034_s17 = smov (!%p241_p5, %s746_s17), 511 }
   0xd   : > { %s745_s18 = sshll.u32 %s1032_s16, 2  ;;  %s747_s22 = sshll.u32 %s1034_s17, 2 }
   0xe   : > { %s965_s21 = scalar_lea.vmem %s1023_s0, %s745_s18  ;;  %s970_s25 = scalar_lea.vmem %s1024_s1, %s747_s22 }
   0xf   : > { %263 = sbr.rel (%p748_p6) target bundleno = 22 (0x16), region = 36 }
  0x14   : > { %v919_v0 = vmov 0.0  }
  0x15   : > { %264 = vst [vmem:[#allocation2] sm:$0xff] %v919_v0 }
  0x16 PF: > { %v859_v1 = vld [vmem:[%s970_s25 + $0x78] sm:$0xff]   ;;  %v863_v5 = vld [vmem:[%s970_s25 + $0x70] sm:$0xff]   ;;  %v867_v9 = vld [vmem:[%s970_s25 + $0x68] sm:$0xff]   ;;  %p785_p7 = scmp.ne.s32.totalorder %s909_s12, 7 }
  0x17   : > { %v860_v2 = vld [vmem:[%s970_s25 + $0xf8] sm:$0xff]   ;;  %790 = vmatprep.subr.bf16.mxu0 %v859_v1  ;;  %v864_v6 = vld [vmem:[%s970_s25 + $0xf0] sm:$0xff]   ;;  %v868_v10 = vld [vmem:[%s970_s25 + $0xe8] sm:$0xff]  }
  0x18   : > { %v861_v3 = vld [vmem:[%s970_s25 + $0x38] sm:$0xff]   ;;  %812 = vmatprep.subr.bf16.mxu1 %v860_v2  ;;  %v865_v7 = vld [vmem:[%s970_s25 + $0x30] sm:$0xff]   ;;  %v869_v11 = vld [vmem:[%s970_s25 + $0x28] sm:$0xff]  }
  0x19   : > { %v862_v4 = vld [vmem:[%s970_s25 + $0xb8] sm:$0xff]   ;;  %791 = vmatpush3.bf16.msra.mxu0 %v861_v3  ;;  %v866_v8 = vld [vmem:[%s970_s25 + $0xb0] sm:$0xff]   ;;  %v870_v12 = vld [vmem:[%s970_s25 + $0xa8] sm:$0xff]  }
  0x1a   : > { %813 = vmatpush3.bf16.msra.mxu1 %v862_v4  ;;  %792 = vmatprep.subr.bf16.mxu0 %v863_v5  ;;  %v871_v13 = vld [vmem:[%s970_s25 + $0x60] sm:$0xff]   ;;  %v875_v17 = vld [vmem:[%s970_s25 + $0x58] sm:$0xff]   ;;  %v879_v21 = vld [vmem:[%s970_s25 + $0x50] sm:$0xff]  }
  0x1b   : > { %814 = vmatprep.subr.bf16.mxu1 %v864_v6  ;;  %v872_v14 = vld [vmem:[%s970_s25 + $0xe0] sm:$0xff]   ;;  %v876_v18 = vld [vmem:[%s970_s25 + $0xd8] sm:$0xff]   ;;  %v880_v22 = vld [vmem:[%s970_s25 + $0xd0] sm:$0xff]  }
  0x1c   : > { %v873_v15 = vld [vmem:[%s970_s25 + $0x20] sm:$0xff]   ;;  %v877_v19 = vld [vmem:[%s970_s25 + $0x18] sm:$0xff]   ;;  %v881_v23 = vld [vmem:[%s970_s25 + $0x10] sm:$0xff]  }
  0x1d   : > { %793 = vmatpush3.bf16.msra.mxu0 %v865_v7  ;;  %v874_v16 = vld [vmem:[%s970_s25 + $0xa0] sm:$0xff]   ;;  %v878_v20 = vld [vmem:[%s970_s25 + $0x98] sm:$0xff]   ;;  %v882_v24 = vld [vmem:[%s970_s25 + $0x90] sm:$0xff]  }
  0x1e   : > { %815 = vmatpush3.bf16.msra.mxu1 %v866_v8  ;;  %794 = vmatprep.subr.bf16.mxu0 %v867_v9  ;;  %v883_v25 = vld [vmem:[%s970_s25 + $0x48] sm:$0xff]   ;;  %v887_v29 = vld [vmem:[%s970_s25 + $0x40] sm:$0xff]  }
  0x1f   : > { %816 = vmatprep.subr.bf16.mxu1 %v868_v10  ;;  %v884_v26 = vld [vmem:[%s970_s25 + $0xc8] sm:$0xff]   ;;  %v888_v30 = vld [vmem:[%s970_s25 + $0xc0] sm:$0xff]  }
  0x20   : > { %v885_v27 = vld [vmem:[%s970_s25 + $0x8] sm:$0xff]   ;;  %v889_v31 = vld [vmem:[%s970_s25] sm:$0xff]  }
  0x21   : > { %795 = vmatpush3.bf16.msra.mxu0 %v869_v11  ;;  %v886_v28 = vld [vmem:[%s970_s25 + $0x88] sm:$0xff]   ;;  %v890_v32 = vld [vmem:[%s970_s25 + $0x80] sm:$0xff]  }
  0x22   : > { %817 = vmatpush3.bf16.msra.mxu1 %v870_v12  ;;  %796 = vmatprep.subr.bf16.mxu0 %v871_v13  ;;  %v266_v33 = vld [vmem:[%s965_s21] sm:$0xff]  ;;  %v267_v34 = vld [vmem:[%s965_s21 + $0x8] sm:$0xff] }
  0x23   : > { %818 = vmatprep.subr.bf16.mxu1 %v872_v14  ;;  %v749_v35 = vcombine.low %v266_v33, %v266_v33  ;;  %v750_v36 = vcombine.high %v266_v33, %v266_v33  ;;  %v751_v37 = vcombine.low %v267_v34, %v267_v34  ;;  %v752_v38 = vcombine.high %v267_v34, %v267_v34  ;;  %v265_v45 = vld [vmem:[#allocation2] sm:$0xff] }
  0x25   : > { %797 = vmatpush3.bf16.msra.mxu0 %v873_v15  ;;  %570 = vmatprep.mubr.bf16.mxu0 %v750_v36 }
  0x26   : > { %819 = vmatpush3.bf16.msra.mxu1 %v874_v16  ;;  %798 = vmatprep.subr.bf16.mxu0 %v875_v17 }
  0x27   : > { %820 = vmatprep.subr.bf16.mxu1 %v876_v18  ;;  %610 = vmatprep.mubr.bf16.mxu1 %v752_v38 }
  0x29   : > { %799 = vmatpush3.bf16.msra.mxu0 %v877_v19 }
  0x2a   : > { %821 = vmatpush3.bf16.msra.mxu1 %v878_v20  ;;  %800 = vmatprep.subr.bf16.mxu0 %v879_v21 }
  0x2b   : > { %822 = vmatprep.subr.bf16.mxu1 %v880_v22 }
  0x2d   : > { %801 = vmatpush3.bf16.msra.mxu0 %v881_v23 }
  0x2e   : > { %823 = vmatpush3.bf16.msra.mxu1 %v882_v24  ;;  %802 = vmatprep.subr.bf16.mxu0 %v883_v25 }
  0x2f   : > { %824 = vmatprep.subr.bf16.mxu1 %v884_v26 }
  0x31   : > { %803 = vmatpush3.bf16.msra.mxu0 %v885_v27 }
  0x32   : > { %825 = vmatpush3.bf16.msra.mxu1 %v886_v28  ;;  %804 = vmatprep.subr.bf16.mxu0 %v887_v29 }
  0x33   : > { %826 = vmatprep.subr.bf16.mxu1 %v888_v30 }
  0x35   : > { %805 = vmatpush3.bf16.msra.mxu0 %v889_v31 }
  0x36   : > { %827 = vmatpush3.bf16.msra.mxu1 %v890_v32 }
  0x38   : > { %571 = vmatmul.mubr.bf16.vlgmr.msra.gmra.mxu0 %v749_v35 }
  0x39   : > { %611 = vmatmul.mubr.bf16.vlgmr.msra.gmra.mxu1 %v751_v37 }
  0xf8   : > { %v806_v39 = vpop.f32.mrf.mxu0 }
  0xf9   : > { %v828_v40 = vpop.f32.mrf.mxu1 }
  0xfa   : > { %v807_v41 = vpop.f32.mrf.mxu0 }
  0xfb   : > { %v829_v42 = vpop.f32.mrf.mxu1  ;;  %v808_v43 = vadd.f32 %v807_v41, %v806_v39 }
  0xfc   : > { %v830_v44 = vadd.f32 %v829_v42, %v828_v40  ;;  %v809_v46 = vpop.f32.mrf.mxu0 }
  0xfd   : > { %v831_v47 = vpop.f32.mrf.mxu1 }
  0xfe   : > { %v613_v48 = vadd.f32 %v830_v44, %v808_v43  ;;  %v810_v49 = vpop.f32.mrf.mxu0  ;;  %623 = sbr.rel (%p785_p7) target bundleno = 269 (0x10d), region = 40 }
  0xff   : > { %v832_v50 = vpop.f32.mrf.mxu1 }
 0x100   : > { %v618_v51 = vadd.f32 %v613_v48, %v265_v45 }
 0x102   : > { %619 = vst [vmem:[#allocation2] sm:$0xff] %v618_v51 }
 0x103   : > { %v786_v53 = vld [vmem:[%s1025_s2] ss:$0 sm:$0xff] }
 0x109   : > { %v624_v52 = vld [vmem:[#allocation2] sm:$0xff] }
 0x10a   : > { %v632_v54 = vadd.f32 %v786_v53, %v624_v52 }
 0x10c   : > { %633 = vst [vmem:[%s1026_s3] sm:$0xff] %v632_v54 }
 0x10d PF: > { %s13_s14 = sadd.s32 1, %s917_s14   ;;  %s1027_s12 = smov %s913_s13 }
 0x10e   : > { %p10_p8 = scmp.ge.s32.totalorder %s13_s14, 10   ;;  %s1028_s13 = smov %s1030_s15 }
 0x110   :  { %12 = sbr.rel (!%p10_p8) target bundleno = 2 (0x2), region = 76 }

</bundles_post_ra>
